<compile_context>
chip_gen: v5e
topology: v5e:2x2
jax: 0.10.0
libtpu: 0.0.40
codegen_flags: <defaults>
</compile_context>

<pallas_src>
import functools

import jax
import jax.numpy as jnp
from jax.experimental import pallas as pl
from jax.experimental.pallas import tpu as pltpu

_BN_EPS = 0.001


# ---------------------------------------------------------------------------
# Kernel 1: fused conv2_1 (1x1) + BN + ReLU  ->  conv2_2 (3x3, pad 1) + BN + ReLU
# One grid step per batch element; the C1 intermediate stays in VMEM scratch.
# ---------------------------------------------------------------------------
def _conv1x1_conv3x3_kernel(x_ref, w1_ref, b1_ref, w2_ref, b2_ref, o_ref, t_ref):
    # x_ref : (1, H, W, Cin) f32      w1_ref: (Cin, C1) bf16   b1_ref: (1, C1) f32
    # w2_ref: (9, C1, C2)   bf16      b2_ref: (1, C2)  f32
    # o_ref : (1, H, W, C2) f32       t_ref : (H+2, W+2, C1) bf16 VMEM scratch
    _, h, w, cin = x_ref.shape
    c1 = w1_ref.shape[1]
    c2 = w2_ref.shape[2]

    # conv2_1: a 1x1 conv is a plain channel matmul (no im2col needed).
    x = x_ref[0].reshape(h * w, cin).astype(jnp.bfloat16)
    t = jnp.dot(x, w1_ref[...], preferred_element_type=jnp.float32)
    t = jnp.maximum(t + b1_ref[...], 0.0)

    # Stage the ReLU'd intermediate into a zero-padded VMEM scratch so the
    # 3x3 / pad-1 taps below become contiguous static slices (fused im2col).
    t_ref[...] = jnp.zeros(t_ref.shape, t_ref.dtype)
    t_ref[1:h + 1, 1:w + 1, :] = t.reshape(h, w, c1).astype(t_ref.dtype)

    # conv2_2: 3x3 stride-1 pad-1 conv as 9 tap matmuls, accumulated in f32.
    acc = jnp.zeros((h * w, c2), jnp.float32)
    for i in range(3):
        for j in range(3):
            a = t_ref[i:i + h, j:j + w, :].reshape(h * w, c1)
            acc = acc + jnp.dot(a, w2_ref[i * 3 + j],
                                preferred_element_type=jnp.float32)
    y = jnp.maximum(acc + b2_ref[...], 0.0)
    o_ref[0] = y.reshape(h, w, c2).astype(o_ref.dtype)


# ---------------------------------------------------------------------------
# Kernel 2: fused conv1_1 (3x3 / stride 2) + BN + ReLU  and  MaxPool2d(3, 2).
# Both branches consume the same parity-split x, read exactly once.
# ---------------------------------------------------------------------------
def _s2_conv_pool_kernel(xc_ref, xf_ref, w_ref, b_ref, conv_ref, pool_ref,
                         *, hh, wh, c):
    # xc_ref : (1, 4, hh*wh, c) f32  parity planes, rows flattened (matmul view)
    # xf_ref : (1, 4, hh, wh*c) f32  parity planes, lanes = wh*c   (pool view)
    # w_ref  : (9, c, cout) bf16     b_ref: (1, cout) f32
    # conv_ref: (1, ho, wo, cout) f32   pool_ref: (1, ho, wo*c) f32
    ho, wo = hh - 1, wh - 1
    cout = w_ref.shape[-1]

    acc = jnp.zeros((ho, wo, cout), jnp.float32)
    pmax = None
    for i in range(3):
        for j in range(3):
            p = (i % 2) * 2 + (j % 2)      # parity plane used by this tap
            dh, dw = i // 2, j // 2        # shift inside that parity plane
            # Conv tap: matmul the whole parity plane once, then add the
            # shifted (ho, wo) window of the product (conv is linear).
            plane = xc_ref[0, p].astype(jnp.bfloat16)            # (hh*wh, c)
            m = jnp.dot(plane, w_ref[i * 3 + j],
                        preferred_element_type=jnp.float32)
            m = m.reshape(hh, wh, cout)
            acc = acc + m[dh:dh + ho, dw:dw + wo, :]
            # Pool tap: contiguous (ho, wo*c) window of the lane-flat view.
            tap = xf_ref[0, p, dh:dh + ho, dw * c:(dw + wo) * c]
            pmax = tap if pmax is None else jnp.maximum(pmax, tap)

    bias = b_ref[...].reshape(1, 1, cout)
    conv_ref[0] = jnp.maximum(acc + bias, 0.0).astype(conv_ref.dtype)
    pool_ref[0] = pmax.astype(pool_ref.dtype)


# ---------------------------------------------------------------------------
# Kernel 3: conv2_3 (3x3 / stride 2) + BN + ReLU over parity-split input.
# ---------------------------------------------------------------------------
def _s2_conv_kernel(xc_ref, w_ref, b_ref, o_ref, *, hh, wh):
    ho, wo = hh - 1, wh - 1
    cout = w_ref.shape[-1]
    acc = jnp.zeros((ho, wo, cout), jnp.float32)
    for i in range(3):
        for j in range(3):
            p = (i % 2) * 2 + (j % 2)
            dh, dw = i // 2, j // 2
            plane = xc_ref[0, p].astype(jnp.bfloat16)
            m = jnp.dot(plane, w_ref[i * 3 + j],
                        preferred_element_type=jnp.float32)
            m = m.reshape(hh, wh, cout)
            acc = acc + m[dh:dh + ho, dw:dw + wo, :]
    bias = b_ref[...].reshape(1, 1, cout)
    o_ref[0] = jnp.maximum(acc + bias, 0.0).astype(o_ref.dtype)


# ---------------------------------------------------------------------------
# Wrappers
# ---------------------------------------------------------------------------
def _parity_views(x):
    # Space-to-depth: (N, H, W, C) -> 4 parity planes so that every tap of a
    # 3x3 / stride-2 window is a contiguous static slice inside the kernel.
    # plane[p*2+q][hh, wh] = x[2*hh + p, 2*wh + q].  One XLA transpose (~1x
    # the input bytes); the extra views below are free contiguous reshapes.
    n, h, w, c = x.shape
    hh, wh = h // 2, w // 2
    xp = x.reshape(n, hh, 2, wh, 2, c).transpose(0, 2, 4, 1, 3, 5)
    xp = xp.reshape(n, 4, hh, wh, c)
    mat_view = xp.reshape(n, 4, hh * wh, c)     # matmul (im2col) view
    lane_view = xp.reshape(n, 4, hh, wh * c)    # lane-dense view for the pool
    return mat_view, lane_view, (hh, wh, c)


def _fused_conv1x1_conv3x3(x, w1, b1, w2, b2):
    n, h, w, cin = x.shape
    c1 = w1.shape[-1]
    c2 = w2.shape[-1]
    return pl.pallas_call(
        _conv1x1_conv3x3_kernel,
        out_shape=jax.ShapeDtypeStruct((n, h, w, c2), jnp.float32),
        grid=(n,),
        in_specs=[
            pl.BlockSpec((1, h, w, cin), lambda i: (i, 0, 0, 0)),
            pl.BlockSpec((cin, c1), lambda i: (0, 0)),
            pl.BlockSpec((1, c1), lambda i: (0, 0)),
            pl.BlockSpec((9, c1, c2), lambda i: (0, 0, 0)),
            pl.BlockSpec((1, c2), lambda i: (0, 0)),
        ],
        out_specs=pl.BlockSpec((1, h, w, c2), lambda i: (i, 0, 0, 0)),
        scratch_shapes=[pltpu.VMEM((h + 2, w + 2, c1), jnp.bfloat16)],
        compiler_params=pltpu.CompilerParams(
            dimension_semantics=("parallel",)),
    )(x, w1, b1, w2, b2)


def _fused_s2conv_maxpool(x, w, b):
    n = x.shape[0]
    xc, xf, (hh, wh, c) = _parity_views(x)
    ho, wo = hh - 1, wh - 1
    cout = w.shape[-1]
    kernel = functools.partial(_s2_conv_pool_kernel, hh=hh, wh=wh, c=c)
    conv_out, pool_out = pl.pallas_call(
        kernel,
        out_shape=(jax.ShapeDtypeStruct((n, ho, wo, cout), jnp.float32),
                   jax.ShapeDtypeStruct((n, ho, wo * c), jnp.float32)),
        grid=(n,),
        in_specs=[
            pl.BlockSpec((1, 4, hh * wh, c), lambda i: (i, 0, 0, 0)),
            pl.BlockSpec((1, 4, hh, wh * c), lambda i: (i, 0, 0, 0)),
            pl.BlockSpec((9, c, cout), lambda i: (0, 0, 0)),
            pl.BlockSpec((1, cout), lambda i: (0, 0)),
        ],
        out_specs=(pl.BlockSpec((1, ho, wo, cout), lambda i: (i, 0, 0, 0)),
                   pl.BlockSpec((1, ho, wo * c), lambda i: (i, 0, 0))),
        compiler_params=pltpu.CompilerParams(
            dimension_semantics=("parallel",)),
    )(xc, xf, w, b)
    return conv_out, pool_out.reshape(n, ho, wo, c)


def _s2conv(x, w, b):
    n = x.shape[0]
    xc, _, (hh, wh, c) = _parity_views(x)
    ho, wo = hh - 1, wh - 1
    cout = w.shape[-1]
    kernel = functools.partial(_s2_conv_kernel, hh=hh, wh=wh)
    return pl.pallas_call(
        kernel,
        out_shape=jax.ShapeDtypeStruct((n, ho, wo, cout), jnp.float32),
        grid=(n,),
        in_specs=[
            pl.BlockSpec((1, 4, hh * wh, c), lambda i: (i, 0, 0, 0)),
            pl.BlockSpec((9, c, cout), lambda i: (0, 0, 0)),
            pl.BlockSpec((1, cout), lambda i: (0, 0)),
        ],
        out_specs=pl.BlockSpec((1, ho, wo, cout), lambda i: (i, 0, 0, 0)),
        compiler_params=pltpu.CompilerParams(
            dimension_semantics=("parallel",)),
    )(xc, w, b)


# ---------------------------------------------------------------------------
# Parameter construction (deterministic, synthetic).  BN (eval mode, running
# mean 0 / var 1) is folded into the conv weights; weights stored in bf16.
# ---------------------------------------------------------------------------
def make_params(input_channels, key):
    defs = {
        # name: (KH, KW, Cin, Cout)
        "conv1_1": (3, 3, input_channels, 384),
        "conv2_1": (1, 1, input_channels, 64),
        "conv2_2": (3, 3, 64, 96),
        "conv2_3": (3, 3, 96, 96),
    }
    params = {}
    for name, (kh, kw, cin, cout) in defs.items():
        key, k1, k2, k3 = jax.random.split(key, 4)
        w = 0.05 * jax.random.normal(k1, (kh, kw, cin, cout), jnp.float32)
        gamma = 1.0 + 0.1 * jax.random.normal(k2, (cout,), jnp.float32)
        beta = 0.1 * jax.random.normal(k3, (cout,), jnp.float32)
        scale = gamma / jnp.sqrt(1.0 + _BN_EPS)     # running_mean=0, var=1
        wf = (w * scale).astype(jnp.bfloat16)       # fold BN scale into conv
        if kh == 1 and kw == 1:
            wf = wf.reshape(cin, cout)
        else:
            wf = wf.reshape(kh * kw, cin, cout)     # stacked-tap layout
        params[name] = (wf, beta.reshape(1, cout).astype(jnp.float32))
    return params


# ---------------------------------------------------------------------------
# Full forward pass
# ---------------------------------------------------------------------------
@jax.jit
def inception2_forward(x_nchw, params):
    x = jnp.transpose(x_nchw, (0, 2, 3, 1))          # NCHW -> NHWC (f32)

    # Branch 1 (conv1_1 3x3/s2 + BN + ReLU) and branch 3 (MaxPool 3x3/s2),
    # fused into one kernel reading the parity-split x once.
    w11, b11 = params["conv1_1"]
    br1, br3 = _fused_s2conv_maxpool(x, w11, b11)     # (N,7,7,384), (N,7,7,C)

    # Branch 2: conv2_1 (1x1) + conv2_2 (3x3 pad1) fused, then conv2_3 (3x3/s2).
    w21, b21 = params["conv2_1"]
    w22, b22 = params["conv2_2"]
    t = _fused_conv1x1_conv3x3(x, w21, b21, w22, b22)  # (N,16,16,96)
    w23, b23 = params["conv2_3"]
    br2 = _s2conv(t, w23, b23)                         # (N,7,7,96)

    out = jnp.concatenate([br1, br2, br3], axis=-1)    # channel concat (NHWC)
    return jnp.transpose(out, (0, 3, 1, 2))            # back to NCHW


# ---------------------------------------------------------------------------
if __name__ == "__main__":
    key = jax.random.PRNGKey(0)
    key, xk = jax.random.split(key)

    batch, in_ch, spatial = 2, 4, 16
    x = jax.random.normal(xk, (batch, in_ch, spatial, spatial), jnp.float32)
    params = make_params(in_ch, key)

    out = inception2_forward(x, params)
    out = jax.block_until_ready(out)

    ho = (spatial - 3) // 2 + 1
    expected = (batch, 384 + 96 + in_ch, ho, ho)
    assert out.shape == expected, (out.shape, expected)
    assert out.dtype == jnp.float32
    assert bool(jnp.all(jnp.isfinite(out)))

    print("KERNEL_OK")
</pallas_src>

<mosaic_0001>
module attributes {stable_mosaic.version = 11 : i64} {
  func.func @_s2_conv_pool_kernel(%arg0: i32, %arg1: memref<1x4x64x4xf32, #tpu.memory_space<vmem>>, %arg2: memref<1x4x8x32xf32, #tpu.memory_space<vmem>>, %arg3: memref<9x4x384xbf16, #tpu.memory_space<vmem>>, %arg4: memref<1x384xf32, #tpu.memory_space<vmem>>, %arg5: memref<1x7x7x384xf32, #tpu.memory_space<vmem>>, %arg6: memref<1x7x28xf32, #tpu.memory_space<vmem>>) attributes {dimension_semantics = [#tpu.dimension_semantics<parallel>], iteration_bounds = array<i64: 2>, scalar_prefetch = 0 : i64, scratch_operands = 0 : i64, tpu.core_type = #tpu.core_type<tc>, window_params = [{transform_indices = @transform_0, window_bounds = array<i64: 1, 4, 64, 4>}, {transform_indices = @transform_1, window_bounds = array<i64: 1, 4, 8, 32>}, {pipeline_mode = #tpu.pipeline_mode<synchronous>, transform_indices = @transform_2, window_bounds = array<i64: 9, 4, 384>}, {pipeline_mode = #tpu.pipeline_mode<synchronous>, transform_indices = @transform_3, window_bounds = array<i64: 1, 384>}, {transform_indices = @transform_4, window_bounds = array<i64: 1, 7, 7, 384>}, {transform_indices = @transform_5, window_bounds = array<i64: 1, 7, 28>}]} {
    %cst = arith.constant 0.000000e+00 : f32
    %0 = vector.broadcast %cst : f32 to vector<7x7x384xf32>
    %c0 = arith.constant 0 : index
    %c0_0 = arith.constant 0 : index
    %c0_1 = arith.constant 0 : index
    %c0_2 = arith.constant 0 : index
    %1 = vector.load %arg1[%c0, %c0_0, %c0_1, %c0_2] : memref<1x4x64x4xf32, #tpu.memory_space<vmem>>, vector<1x1x64x4xf32>
    %2 = vector.shape_cast %1 : vector<1x1x64x4xf32> to vector<64x4xf32>
    %3 = arith.truncf %2 : vector<64x4xf32> to vector<64x4xbf16>
    %c0_3 = arith.constant 0 : index
    %c0_4 = arith.constant 0 : index
    %c0_5 = arith.constant 0 : index
    %4 = vector.load %arg3[%c0_3, %c0_4, %c0_5] : memref<9x4x384xbf16, #tpu.memory_space<vmem>>, vector<1x4x384xbf16>
    %5 = vector.shape_cast %4 : vector<1x4x384xbf16> to vector<4x384xbf16>
    %cst_6 = arith.constant dense<0.000000e+00> : vector<64x384xf32>
    %6 = tpu.matmul %3, %5, %cst_6 {dimension_numbers = #tpu.dot_dimension_numbers<[1], [0], [0], [1], [0, 0, 1, 1], [], []>} : vector<64x4xbf16>, vector<4x384xbf16>, vector<64x384xf32> -> vector<64x384xf32>
    %7 = vector.shape_cast %6 : vector<64x384xf32> to vector<8x8x384xf32>
    %8 = vector.extract_strided_slice %7 {offsets = [0, 0, 0], sizes = [7, 7, 384], strides = [1, 1, 1]} : vector<8x8x384xf32> to vector<7x7x384xf32>
    %9 = arith.addf %0, %8 : vector<7x7x384xf32>
    %c0_7 = arith.constant 0 : index
    %c0_8 = arith.constant 0 : index
    %c0_9 = arith.constant 0 : index
    %c0_10 = arith.constant 0 : index
    %10 = vector.load %arg2[%c0_7, %c0_8, %c0_9, %c0_10] : memref<1x4x8x32xf32, #tpu.memory_space<vmem>>, vector<1x1x7x28xf32>
    %11 = vector.shape_cast %10 : vector<1x1x7x28xf32> to vector<7x28xf32>
    %c0_11 = arith.constant 0 : index
    %c1 = arith.constant 1 : index
    %c0_12 = arith.constant 0 : index
    %c0_13 = arith.constant 0 : index
    %12 = vector.load %arg1[%c0_11, %c1, %c0_12, %c0_13] : memref<1x4x64x4xf32, #tpu.memory_space<vmem>>, vector<1x1x64x4xf32>
    %13 = vector.shape_cast %12 : vector<1x1x64x4xf32> to vector<64x4xf32>
    %14 = arith.truncf %13 : vector<64x4xf32> to vector<64x4xbf16>
    %c1_14 = arith.constant 1 : index
    %c0_15 = arith.constant 0 : index
    %c0_16 = arith.constant 0 : index
    %15 = vector.load %arg3[%c1_14, %c0_15, %c0_16] : memref<9x4x384xbf16, #tpu.memory_space<vmem>>, vector<1x4x384xbf16>
    %16 = vector.shape_cast %15 : vector<1x4x384xbf16> to vector<4x384xbf16>
    %cst_17 = arith.constant dense<0.000000e+00> : vector<64x384xf32>
    %17 = tpu.matmul %14, %16, %cst_17 {dimension_numbers = #tpu.dot_dimension_numbers<[1], [0], [0], [1], [0, 0, 1, 1], [], []>} : vector<64x4xbf16>, vector<4x384xbf16>, vector<64x384xf32> -> vector<64x384xf32>
    %18 = vector.shape_cast %17 : vector<64x384xf32> to vector<8x8x384xf32>
    %19 = vector.extract_strided_slice %18 {offsets = [0, 0, 0], sizes = [7, 7, 384], strides = [1, 1, 1]} : vector<8x8x384xf32> to vector<7x7x384xf32>
    %20 = arith.addf %9, %19 : vector<7x7x384xf32>
    %c0_18 = arith.constant 0 : index
    %c1_19 = arith.constant 1 : index
    %c0_20 = arith.constant 0 : index
    %c0_21 = arith.constant 0 : index
    %21 = vector.load %arg2[%c0_18, %c1_19, %c0_20, %c0_21] : memref<1x4x8x32xf32, #tpu.memory_space<vmem>>, vector<1x1x7x28xf32>
    %22 = vector.shape_cast %21 : vector<1x1x7x28xf32> to vector<7x28xf32>
    %23 = arith.maximumf %11, %22 : vector<7x28xf32>
    %c0_22 = arith.constant 0 : index
    %c0_23 = arith.constant 0 : index
    %c0_24 = arith.constant 0 : index
    %c0_25 = arith.constant 0 : index
    %24 = vector.load %arg1[%c0_22, %c0_23, %c0_24, %c0_25] : memref<1x4x64x4xf32, #tpu.memory_space<vmem>>, vector<1x1x64x4xf32>
    %25 = vector.shape_cast %24 : vector<1x1x64x4xf32> to vector<64x4xf32>
    %26 = arith.truncf %25 : vector<64x4xf32> to vector<64x4xbf16>
    %c2 = arith.constant 2 : index
    %c0_26 = arith.constant 0 : index
    %c0_27 = arith.constant 0 : index
    %27 = vector.load %arg3[%c2, %c0_26, %c0_27] : memref<9x4x384xbf16, #tpu.memory_space<vmem>>, vector<1x4x384xbf16>
    %28 = vector.shape_cast %27 : vector<1x4x384xbf16> to vector<4x384xbf16>
    %cst_28 = arith.constant dense<0.000000e+00> : vector<64x384xf32>
    %29 = tpu.matmul %26, %28, %cst_28 {dimension_numbers = #tpu.dot_dimension_numbers<[1], [0], [0], [1], [0, 0, 1, 1], [], []>} : vector<64x4xbf16>, vector<4x384xbf16>, vector<64x384xf32> -> vector<64x384xf32>
    %30 = vector.shape_cast %29 : vector<64x384xf32> to vector<8x8x384xf32>
    %31 = vector.extract_strided_slice %30 {offsets = [0, 1, 0], sizes = [7, 7, 384], strides = [1, 1, 1]} : vector<8x8x384xf32> to vector<7x7x384xf32>
    %32 = arith.addf %20, %31 : vector<7x7x384xf32>
    %c0_29 = arith.constant 0 : index
    %c0_30 = arith.constant 0 : index
    %c0_31 = arith.constant 0 : index
    %c4 = arith.constant 4 : index
    %33 = vector.load %arg2[%c0_29, %c0_30, %c0_31, %c4] : memref<1x4x8x32xf32, #tpu.memory_space<vmem>>, vector<1x1x7x28xf32>
    %34 = vector.shape_cast %33 : vector<1x1x7x28xf32> to vector<7x28xf32>
    %35 = arith.maximumf %23, %34 : vector<7x28xf32>
    %c0_32 = arith.constant 0 : index
    %c2_33 = arith.constant 2 : index
    %c0_34 = arith.constant 0 : index
    %c0_35 = arith.constant 0 : index
    %36 = vector.load %arg1[%c0_32, %c2_33, %c0_34, %c0_35] : memref<1x4x64x4xf32, #tpu.memory_space<vmem>>, vector<1x1x64x4xf32>
    %37 = vector.shape_cast %36 : vector<1x1x64x4xf32> to vector<64x4xf32>
    %38 = arith.truncf %37 : vector<64x4xf32> to vector<64x4xbf16>
    %c3 = arith.constant 3 : index
    %c0_36 = arith.constant 0 : index
    %c0_37 = arith.constant 0 : index
    %39 = vector.load %arg3[%c3, %c0_36, %c0_37] : memref<9x4x384xbf16, #tpu.memory_space<vmem>>, vector<1x4x384xbf16>
    %40 = vector.shape_cast %39 : vector<1x4x384xbf16> to vector<4x384xbf16>
    %cst_38 = arith.constant dense<0.000000e+00> : vector<64x384xf32>
    %41 = tpu.matmul %38, %40, %cst_38 {dimension_numbers = #tpu.dot_dimension_numbers<[1], [0], [0], [1], [0, 0, 1, 1], [], []>} : vector<64x4xbf16>, vector<4x384xbf16>, vector<64x384xf32> -> vector<64x384xf32>
    %42 = vector.shape_cast %41 : vector<64x384xf32> to vector<8x8x384xf32>
    %43 = vector.extract_strided_slice %42 {offsets = [0, 0, 0], sizes = [7, 7, 384], strides = [1, 1, 1]} : vector<8x8x384xf32> to vector<7x7x384xf32>
    %44 = arith.addf %32, %43 : vector<7x7x384xf32>
    %c0_39 = arith.constant 0 : index
    %c2_40 = arith.constant 2 : index
    %c0_41 = arith.constant 0 : index
    %c0_42 = arith.constant 0 : index
    %45 = vector.load %arg2[%c0_39, %c2_40, %c0_41, %c0_42] : memref<1x4x8x32xf32, #tpu.memory_space<vmem>>, vector<1x1x7x28xf32>
    %46 = vector.shape_cast %45 : vector<1x1x7x28xf32> to vector<7x28xf32>
    %47 = arith.maximumf %35, %46 : vector<7x28xf32>
    %c0_43 = arith.constant 0 : index
    %c3_44 = arith.constant 3 : index
    %c0_45 = arith.constant 0 : index
    %c0_46 = arith.constant 0 : index
    %48 = vector.load %arg1[%c0_43, %c3_44, %c0_45, %c0_46] : memref<1x4x64x4xf32, #tpu.memory_space<vmem>>, vector<1x1x64x4xf32>
    %49 = vector.shape_cast %48 : vector<1x1x64x4xf32> to vector<64x4xf32>
    %50 = arith.truncf %49 : vector<64x4xf32> to vector<64x4xbf16>
    %c4_47 = arith.constant 4 : index
    %c0_48 = arith.constant 0 : index
    %c0_49 = arith.constant 0 : index
    %51 = vector.load %arg3[%c4_47, %c0_48, %c0_49] : memref<9x4x384xbf16, #tpu.memory_space<vmem>>, vector<1x4x384xbf16>
    %52 = vector.shape_cast %51 : vector<1x4x384xbf16> to vector<4x384xbf16>
    %cst_50 = arith.constant dense<0.000000e+00> : vector<64x384xf32>
    %53 = tpu.matmul %50, %52, %cst_50 {dimension_numbers = #tpu.dot_dimension_numbers<[1], [0], [0], [1], [0, 0, 1, 1], [], []>} : vector<64x4xbf16>, vector<4x384xbf16>, vector<64x384xf32> -> vector<64x384xf32>
    %54 = vector.shape_cast %53 : vector<64x384xf32> to vector<8x8x384xf32>
    %55 = vector.extract_strided_slice %54 {offsets = [0, 0, 0], sizes = [7, 7, 384], strides = [1, 1, 1]} : vector<8x8x384xf32> to vector<7x7x384xf32>
    %56 = arith.addf %44, %55 : vector<7x7x384xf32>
    %c0_51 = arith.constant 0 : index
    %c3_52 = arith.constant 3 : index
    %c0_53 = arith.constant 0 : index
    %c0_54 = arith.constant 0 : index
    %57 = vector.load %arg2[%c0_51, %c3_52, %c0_53, %c0_54] : memref<1x4x8x32xf32, #tpu.memory_space<vmem>>, vector<1x1x7x28xf32>
    %58 = vector.shape_cast %57 : vector<1x1x7x28xf32> to vector<7x28xf32>
    %59 = arith.maximumf %47, %58 : vector<7x28xf32>
    %c0_55 = arith.constant 0 : index
    %c2_56 = arith.constant 2 : index
    %c0_57 = arith.constant 0 : index
    %c0_58 = arith.constant 0 : index
    %60 = vector.load %arg1[%c0_55, %c2_56, %c0_57, %c0_58] : memref<1x4x64x4xf32, #tpu.memory_space<vmem>>, vector<1x1x64x4xf32>
    %61 = vector.shape_cast %60 : vector<1x1x64x4xf32> to vector<64x4xf32>
    %62 = arith.truncf %61 : vector<64x4xf32> to vector<64x4xbf16>
    %c5 = arith.constant 5 : index
    %c0_59 = arith.constant 0 : index
    %c0_60 = arith.constant 0 : index
    %63 = vector.load %arg3[%c5, %c0_59, %c0_60] : memref<9x4x384xbf16, #tpu.memory_space<vmem>>, vector<1x4x384xbf16>
    %64 = vector.shape_cast %63 : vector<1x4x384xbf16> to vector<4x384xbf16>
    %cst_61 = arith.constant dense<0.000000e+00> : vector<64x384xf32>
    %65 = tpu.matmul %62, %64, %cst_61 {dimension_numbers = #tpu.dot_dimension_numbers<[1], [0], [0], [1], [0, 0, 1, 1], [], []>} : vector<64x4xbf16>, vector<4x384xbf16>, vector<64x384xf32> -> vector<64x384xf32>
    %66 = vector.shape_cast %65 : vector<64x384xf32> to vector<8x8x384xf32>
    %67 = vector.extract_strided_slice %66 {offsets = [0, 1, 0], sizes = [7, 7, 384], strides = [1, 1, 1]} : vector<8x8x384xf32> to vector<7x7x384xf32>
    %68 = arith.addf %56, %67 : vector<7x7x384xf32>
    %c0_62 = arith.constant 0 : index
    %c2_63 = arith.constant 2 : index
    %c0_64 = arith.constant 0 : index
    %c4_65 = arith.constant 4 : index
    %69 = vector.load %arg2[%c0_62, %c2_63, %c0_64, %c4_65] : memref<1x4x8x32xf32, #tpu.memory_space<vmem>>, vector<1x1x7x28xf32>
    %70 = vector.shape_cast %69 : vector<1x1x7x28xf32> to vector<7x28xf32>
    %71 = arith.maximumf %59, %70 : vector<7x28xf32>
    %c0_66 = arith.constant 0 : index
    %c0_67 = arith.constant 0 : index
    %c0_68 = arith.constant 0 : index
    %c0_69 = arith.constant 0 : index
    %72 = vector.load %arg1[%c0_66, %c0_67, %c0_68, %c0_69] : memref<1x4x64x4xf32, #tpu.memory_space<vmem>>, vector<1x1x64x4xf32>
    %73 = vector.shape_cast %72 : vector<1x1x64x4xf32> to vector<64x4xf32>
    %74 = arith.truncf %73 : vector<64x4xf32> to vector<64x4xbf16>
    %c6 = arith.constant 6 : index
    %c0_70 = arith.constant 0 : index
    %c0_71 = arith.constant 0 : index
    %75 = vector.load %arg3[%c6, %c0_70, %c0_71] : memref<9x4x384xbf16, #tpu.memory_space<vmem>>, vector<1x4x384xbf16>
    %76 = vector.shape_cast %75 : vector<1x4x384xbf16> to vector<4x384xbf16>
    %cst_72 = arith.constant dense<0.000000e+00> : vector<64x384xf32>
    %77 = tpu.matmul %74, %76, %cst_72 {dimension_numbers = #tpu.dot_dimension_numbers<[1], [0], [0], [1], [0, 0, 1, 1], [], []>} : vector<64x4xbf16>, vector<4x384xbf16>, vector<64x384xf32> -> vector<64x384xf32>
    %78 = vector.shape_cast %77 : vector<64x384xf32> to vector<8x8x384xf32>
    %79 = vector.extract_strided_slice %78 {offsets = [1, 0, 0], sizes = [7, 7, 384], strides = [1, 1, 1]} : vector<8x8x384xf32> to vector<7x7x384xf32>
    %80 = arith.addf %68, %79 : vector<7x7x384xf32>
    %c0_73 = arith.constant 0 : index
    %c0_74 = arith.constant 0 : index
    %c1_75 = arith.constant 1 : index
    %c0_76 = arith.constant 0 : index
    %81 = vector.load %arg2[%c0_73, %c0_74, %c1_75, %c0_76] : memref<1x4x8x32xf32, #tpu.memory_space<vmem>>, vector<1x1x7x28xf32>
    %82 = vector.shape_cast %81 : vector<1x1x7x28xf32> to vector<7x28xf32>
    %83 = arith.maximumf %71, %82 : vector<7x28xf32>
    %c0_77 = arith.constant 0 : index
    %c1_78 = arith.constant 1 : index
    %c0_79 = arith.constant 0 : index
    %c0_80 = arith.constant 0 : index
    %84 = vector.load %arg1[%c0_77, %c1_78, %c0_79, %c0_80] : memref<1x4x64x4xf32, #tpu.memory_space<vmem>>, vector<1x1x64x4xf32>
    %85 = vector.shape_cast %84 : vector<1x1x64x4xf32> to vector<64x4xf32>
    %86 = arith.truncf %85 : vector<64x4xf32> to vector<64x4xbf16>
    %c7 = arith.constant 7 : index
    %c0_81 = arith.constant 0 : index
    %c0_82 = arith.constant 0 : index
    %87 = vector.load %arg3[%c7, %c0_81, %c0_82] : memref<9x4x384xbf16, #tpu.memory_space<vmem>>, vector<1x4x384xbf16>
    %88 = vector.shape_cast %87 : vector<1x4x384xbf16> to vector<4x384xbf16>
    %cst_83 = arith.constant dense<0.000000e+00> : vector<64x384xf32>
    %89 = tpu.matmul %86, %88, %cst_83 {dimension_numbers = #tpu.dot_dimension_numbers<[1], [0], [0], [1], [0, 0, 1, 1], [], []>} : vector<64x4xbf16>, vector<4x384xbf16>, vector<64x384xf32> -> vector<64x384xf32>
    %90 = vector.shape_cast %89 : vector<64x384xf32> to vector<8x8x384xf32>
    %91 = vector.extract_strided_slice %90 {offsets = [1, 0, 0], sizes = [7, 7, 384], strides = [1, 1, 1]} : vector<8x8x384xf32> to vector<7x7x384xf32>
    %92 = arith.addf %80, %91 : vector<7x7x384xf32>
    %c0_84 = arith.constant 0 : index
    %c1_85 = arith.constant 1 : index
    %c1_86 = arith.constant 1 : index
    %c0_87 = arith.constant 0 : index
    %93 = vector.load %arg2[%c0_84, %c1_85, %c1_86, %c0_87] : memref<1x4x8x32xf32, #tpu.memory_space<vmem>>, vector<1x1x7x28xf32>
    %94 = vector.shape_cast %93 : vector<1x1x7x28xf32> to vector<7x28xf32>
    %95 = arith.maximumf %83, %94 : vector<7x28xf32>
    %c0_88 = arith.constant 0 : index
    %c0_89 = arith.constant 0 : index
    %c0_90 = arith.constant 0 : index
    %c0_91 = arith.constant 0 : index
    %96 = vector.load %arg1[%c0_88, %c0_89, %c0_90, %c0_91] : memref<1x4x64x4xf32, #tpu.memory_space<vmem>>, vector<1x1x64x4xf32>
    %97 = vector.shape_cast %96 : vector<1x1x64x4xf32> to vector<64x4xf32>
    %98 = arith.truncf %97 : vector<64x4xf32> to vector<64x4xbf16>
    %c8 = arith.constant 8 : index
    %c0_92 = arith.constant 0 : index
    %c0_93 = arith.constant 0 : index
    %99 = vector.load %arg3[%c8, %c0_92, %c0_93] : memref<9x4x384xbf16, #tpu.memory_space<vmem>>, vector<1x4x384xbf16>
    %100 = vector.shape_cast %99 : vector<1x4x384xbf16> to vector<4x384xbf16>
    %cst_94 = arith.constant dense<0.000000e+00> : vector<64x384xf32>
    %101 = tpu.matmul %98, %100, %cst_94 {dimension_numbers = #tpu.dot_dimension_numbers<[1], [0], [0], [1], [0, 0, 1, 1], [], []>} : vector<64x4xbf16>, vector<4x384xbf16>, vector<64x384xf32> -> vector<64x384xf32>
    %102 = vector.shape_cast %101 : vector<64x384xf32> to vector<8x8x384xf32>
    %103 = vector.extract_strided_slice %102 {offsets = [1, 1, 0], sizes = [7, 7, 384], strides = [1, 1, 1]} : vector<8x8x384xf32> to vector<7x7x384xf32>
    %104 = arith.addf %92, %103 : vector<7x7x384xf32>
    %c0_95 = arith.constant 0 : index
    %c0_96 = arith.constant 0 : index
    %c1_97 = arith.constant 1 : index
    %c4_98 = arith.constant 4 : index
    %105 = vector.load %arg2[%c0_95, %c0_96, %c1_97, %c4_98] : memref<1x4x8x32xf32, #tpu.memory_space<vmem>>, vector<1x1x7x28xf32>
    %106 = vector.shape_cast %105 : vector<1x1x7x28xf32> to vector<7x28xf32>
    %107 = arith.maximumf %95, %106 : vector<7x28xf32>
    %c0_99 = arith.constant 0 : index
    %c0_100 = arith.constant 0 : index
    %108 = vector.load %arg4[%c0_99, %c0_100] : memref<1x384xf32, #tpu.memory_space<vmem>>, vector<1x384xf32>
    %109 = vector.shape_cast %108 : vector<1x384xf32> to vector<1x1x384xf32>
    %110 = vector.broadcast %109 : vector<1x1x384xf32> to vector<7x7x384xf32>
    %111 = arith.addf %104, %110 : vector<7x7x384xf32>
    %cst_101 = arith.constant 0.000000e+00 : f32
    %112 = vector.broadcast %cst_101 : f32 to vector<7x7x384xf32>
    %113 = arith.maximumf %111, %112 : vector<7x7x384xf32>
    %c0_102 = arith.constant 0 : index
    %c0_103 = arith.constant 0 : index
    %c0_104 = arith.constant 0 : index
    %c0_105 = arith.constant 0 : index
    %114 = vector.load %arg5[%c0_102, %c0_103, %c0_104, %c0_105] : memref<1x7x7x384xf32, #tpu.memory_space<vmem>>, vector<1x7x7x384xf32>
    %115 = vector.shape_cast %114 : vector<1x7x7x384xf32> to vector<7x7x384xf32>
    %116 = vector.shape_cast %113 : vector<7x7x384xf32> to vector<1x7x7x384xf32>
    tpu.vector_store %arg5[%c0_102, %c0_103, %c0_104, %c0_105], %116 {strides = array<i32>} : memref<1x7x7x384xf32, #tpu.memory_space<vmem>>, vector<1x7x7x384xf32>,
    %c0_106 = arith.constant 0 : index
    %c0_107 = arith.constant 0 : index
    %c0_108 = arith.constant 0 : index
    %117 = vector.load %arg6[%c0_106, %c0_107, %c0_108] : memref<1x7x28xf32, #tpu.memory_space<vmem>>, vector<1x7x28xf32>
    %118 = vector.shape_cast %117 : vector<1x7x28xf32> to vector<7x28xf32>
    %119 = vector.shape_cast %107 : vector<7x28xf32> to vector<1x7x28xf32>
    tpu.vector_store %arg6[%c0_106, %c0_107, %c0_108], %119 {strides = array<i32>} : memref<1x7x28xf32, #tpu.memory_space<vmem>>, vector<1x7x28xf32>,
    return
  }
  func.func @transform_0(%arg0: i32) -> (i32, i32, i32, i32) {
    %c0_i32 = arith.constant 0 : i32
    %c0_i32_0 = arith.constant 0 : i32
    %c0_i32_1 = arith.constant 0 : i32
    %c0_i32_2 = arith.constant 0 : i32
    return %arg0, %c0_i32, %c0_i32_0, %c0_i32_1 : i32, i32, i32, i32
  }
  func.func @transform_1(%arg0: i32) -> (i32, i32, i32, i32) {
    %c0_i32 = arith.constant 0 : i32
    %c0_i32_0 = arith.constant 0 : i32
    %c0_i32_1 = arith.constant 0 : i32
    %c0_i32_2 = arith.constant 0 : i32
    return %arg0, %c0_i32, %c0_i32_0, %c0_i32_1 : i32, i32, i32, i32
  }
  func.func @transform_2(%arg0: i32) -> (i32, i32, i32) {
    %c0_i32 = arith.constant 0 : i32
    %c0_i32_0 = arith.constant 0 : i32
    %c0_i32_1 = arith.constant 0 : i32
    %c0_i32_2 = arith.constant 0 : i32
    return %c0_i32, %c0_i32_0, %c0_i32_1 : i32, i32, i32
  }
  func.func @transform_3(%arg0: i32) -> (i32, i32) {
    %c0_i32 = arith.constant 0 : i32
    %c0_i32_0 = arith.constant 0 : i32
    %c0_i32_1 = arith.constant 0 : i32
    return %c0_i32, %c0_i32_0 : i32, i32
  }
  func.func @transform_4(%arg0: i32) -> (i32, i32, i32, i32) {
    %c0_i32 = arith.constant 0 : i32
    %c0_i32_0 = arith.constant 0 : i32
    %c0_i32_1 = arith.constant 0 : i32
    %c0_i32_2 = arith.constant 0 : i32
    return %arg0, %c0_i32, %c0_i32_0, %c0_i32_1 : i32, i32, i32, i32
  }
  func.func @transform_5(%arg0: i32) -> (i32, i32, i32) {
    %c0_i32 = arith.constant 0 : i32
    %c0_i32_0 = arith.constant 0 : i32
    %c0_i32_1 = arith.constant 0 : i32
    return %arg0, %c0_i32, %c0_i32_0 : i32, i32, i32
  }
}

module attributes {stable_mosaic.version = 11 : i64} {
  func.func @_conv1x1_conv3x3_kernel(%arg0: i32, %arg1: memref<1x16x16x4xf32, #tpu.memory_space<vmem>>, %arg2: memref<4x64xbf16, #tpu.memory_space<vmem>>, %arg3: memref<1x64xf32, #tpu.memory_space<vmem>>, %arg4: memref<9x64x96xbf16, #tpu.memory_space<vmem>>, %arg5: memref<1x96xf32, #tpu.memory_space<vmem>>, %arg6: memref<1x16x16x96xf32, #tpu.memory_space<vmem>>, %arg7: memref<18x18x64xbf16, #tpu.memory_space<vmem>>) attributes {dimension_semantics = [#tpu.dimension_semantics<parallel>], iteration_bounds = array<i64: 2>, scalar_prefetch = 0 : i64, scratch_operands = 1 : i64, tpu.core_type = #tpu.core_type<tc>, window_params = [{transform_indices = @transform_0, window_bounds = array<i64: 1, 16, 16, 4>}, {pipeline_mode = #tpu.pipeline_mode<synchronous>, transform_indices = @transform_1, window_bounds = array<i64: 4, 64>}, {pipeline_mode = #tpu.pipeline_mode<synchronous>, transform_indices = @transform_2, window_bounds = array<i64: 1, 64>}, {pipeline_mode = #tpu.pipeline_mode<synchronous>, transform_indices = @transform_3, window_bounds = array<i64: 9, 64, 96>}, {pipeline_mode = #tpu.pipeline_mode<synchronous>, transform_indices = @transform_4, window_bounds = array<i64: 1, 96>}, {transform_indices = @transform_5, window_bounds = array<i64: 1, 16, 16, 96>}]} {
    %c0 = arith.constant 0 : index
    %c0_0 = arith.constant 0 : index
    %c0_1 = arith.constant 0 : index
    %c0_2 = arith.constant 0 : index
    %0 = vector.load %arg1[%c0, %c0_0, %c0_1, %c0_2] : memref<1x16x16x4xf32, #tpu.memory_space<vmem>>, vector<1x16x16x4xf32>
    %1 = vector.shape_cast %0 : vector<1x16x16x4xf32> to vector<16x16x4xf32>
    %2 = vector.shape_cast %1 : vector<16x16x4xf32> to vector<256x4xf32>
    %3 = arith.truncf %2 : vector<256x4xf32> to vector<256x4xbf16>
    %c0_3 = arith.constant 0 : index
    %c0_4 = arith.constant 0 : index
    %4 = vector.load %arg2[%c0_3, %c0_4] : memref<4x64xbf16, #tpu.memory_space<vmem>>, vector<4x64xbf16>
    %cst = arith.constant dense<0.000000e+00> : vector<256x64xf32>
    %5 = tpu.matmul %3, %4, %cst {dimension_numbers = #tpu.dot_dimension_numbers<[1], [0], [0], [1], [0, 0, 1, 1], [], []>} : vector<256x4xbf16>, vector<4x64xbf16>, vector<256x64xf32> -> vector<256x64xf32>
    %c0_5 = arith.constant 0 : index
    %c0_6 = arith.constant 0 : index
    %6 = vector.load %arg3[%c0_5, %c0_6] : memref<1x64xf32, #tpu.memory_space<vmem>>, vector<1x64xf32>
    %7 = vector.broadcast %6 : vector<1x64xf32> to vector<256x64xf32>
    %8 = arith.addf %5, %7 : vector<256x64xf32>
    %cst_7 = arith.constant 0.000000e+00 : f32
    %9 = vector.broadcast %cst_7 : f32 to vector<256x64xf32>
    %10 = arith.maximumf %8, %9 : vector<256x64xf32>
    %cst_8 = arith.constant 0.000000e+00 : bf16
    %11 = vector.broadcast %cst_8 : bf16 to vector<18x18x64xbf16>
    %c0_9 = arith.constant 0 : index
    %c0_10 = arith.constant 0 : index
    %c0_11 = arith.constant 0 : index
    %12 = vector.load %arg7[%c0_9, %c0_10, %c0_11] : memref<18x18x64xbf16, #tpu.memory_space<vmem>>, vector<18x18x64xbf16>
    tpu.vector_store %arg7[%c0_9, %c0_10, %c0_11], %11 {strides = array<i32>} : memref<18x18x64xbf16, #tpu.memory_space<vmem>>, vector<18x18x64xbf16>,
    %13 = vector.shape_cast %10 : vector<256x64xf32> to vector<16x16x64xf32>
    %14 = arith.truncf %13 : vector<16x16x64xf32> to vector<16x16x64xbf16>
    %c1 = arith.constant 1 : index
    %c1_12 = arith.constant 1 : index
    %c0_13 = arith.constant 0 : index
    %15 = vector.load %arg7[%c1, %c1_12, %c0_13] : memref<18x18x64xbf16, #tpu.memory_space<vmem>>, vector<16x16x64xbf16>
    tpu.vector_store %arg7[%c1, %c1_12, %c0_13], %14 {strides = array<i32>} : memref<18x18x64xbf16, #tpu.memory_space<vmem>>, vector<16x16x64xbf16>,
    %cst_14 = arith.constant 0.000000e+00 : f32
    %16 = vector.broadcast %cst_14 : f32 to vector<256x96xf32>
    %c0_15 = arith.constant 0 : index
    %c0_16 = arith.constant 0 : index
    %c0_17 = arith.constant 0 : index
    %17 = vector.load %arg7[%c0_15, %c0_16, %c0_17] : memref<18x18x64xbf16, #tpu.memory_space<vmem>>, vector<16x16x64xbf16>
    %18 = vector.shape_cast %17 : vector<16x16x64xbf16> to vector<256x64xbf16>
    %c0_18 = arith.constant 0 : index
    %c0_19 = arith.constant 0 : index
    %c0_20 = arith.constant 0 : index
    %19 = vector.load %arg4[%c0_18, %c0_19, %c0_20] : memref<9x64x96xbf16, #tpu.memory_space<vmem>>, vector<1x64x96xbf16>
    %20 = vector.shape_cast %19 : vector<1x64x96xbf16> to vector<64x96xbf16>
    %cst_21 = arith.constant dense<0.000000e+00> : vector<256x96xf32>
    %21 = tpu.matmul %18, %20, %cst_21 {dimension_numbers = #tpu.dot_dimension_numbers<[1], [0], [0], [1], [0, 0, 1, 1], [], []>} : vector<256x64xbf16>, vector<64x96xbf16>, vector<256x96xf32> -> vector<256x96xf32>
    %22 = arith.addf %16, %21 : vector<256x96xf32>
    %c0_22 = arith.constant 0 : index
    %c1_23 = arith.constant 1 : index
    %c0_24 = arith.constant 0 : index
    %23 = vector.load %arg7[%c0_22, %c1_23, %c0_24] : memref<18x18x64xbf16, #tpu.memory_space<vmem>>, vector<16x16x64xbf16>
    %24 = vector.shape_cast %23 : vector<16x16x64xbf16> to vector<256x64xbf16>
    %c1_25 = arith.constant 1 : index
    %c0_26 = arith.constant 0 : index
    %c0_27 = arith.constant 0 : index
    %25 = vector.load %arg4[%c1_25, %c0_26, %c0_27] : memref<9x64x96xbf16, #tpu.memory_space<vmem>>, vector<1x64x96xbf16>
    %26 = vector.shape_cast %25 : vector<1x64x96xbf16> to vector<64x96xbf16>
    %cst_28 = arith.constant dense<0.000000e+00> : vector<256x96xf32>
    %27 = tpu.matmul %24, %26, %cst_28 {dimension_numbers = #tpu.dot_dimension_numbers<[1], [0], [0], [1], [0, 0, 1, 1], [], []>} : vector<256x64xbf16>, vector<64x96xbf16>, vector<256x96xf32> -> vector<256x96xf32>
    %28 = arith.addf %22, %27 : vector<256x96xf32>
    %c0_29 = arith.constant 0 : index
    %c2 = arith.constant 2 : index
    %c0_30 = arith.constant 0 : index
    %29 = vector.load %arg7[%c0_29, %c2, %c0_30] : memref<18x18x64xbf16, #tpu.memory_space<vmem>>, vector<16x16x64xbf16>
    %30 = vector.shape_cast %29 : vector<16x16x64xbf16> to vector<256x64xbf16>
    %c2_31 = arith.constant 2 : index
    %c0_32 = arith.constant 0 : index
    %c0_33 = arith.constant 0 : index
    %31 = vector.load %arg4[%c2_31, %c0_32, %c0_33] : memref<9x64x96xbf16, #tpu.memory_space<vmem>>, vector<1x64x96xbf16>
    %32 = vector.shape_cast %31 : vector<1x64x96xbf16> to vector<64x96xbf16>
    %cst_34 = arith.constant dense<0.000000e+00> : vector<256x96xf32>
    %33 = tpu.matmul %30, %32, %cst_34 {dimension_numbers = #tpu.dot_dimension_numbers<[1], [0], [0], [1], [0, 0, 1, 1], [], []>} : vector<256x64xbf16>, vector<64x96xbf16>, vector<256x96xf32> -> vector<256x96xf32>
    %34 = arith.addf %28, %33 : vector<256x96xf32>
    %c1_35 = arith.constant 1 : index
    %c0_36 = arith.constant 0 : index
    %c0_37 = arith.constant 0 : index
    %35 = vector.load %arg7[%c1_35, %c0_36, %c0_37] : memref<18x18x64xbf16, #tpu.memory_space<vmem>>, vector<16x16x64xbf16>
    %36 = vector.shape_cast %35 : vector<16x16x64xbf16> to vector<256x64xbf16>
    %c3 = arith.constant 3 : index
    %c0_38 = arith.constant 0 : index
    %c0_39 = arith.constant 0 : index
    %37 = vector.load %arg4[%c3, %c0_38, %c0_39] : memref<9x64x96xbf16, #tpu.memory_space<vmem>>, vector<1x64x96xbf16>
    %38 = vector.shape_cast %37 : vector<1x64x96xbf16> to vector<64x96xbf16>
    %cst_40 = arith.constant dense<0.000000e+00> : vector<256x96xf32>
    %39 = tpu.matmul %36, %38, %cst_40 {dimension_numbers = #tpu.dot_dimension_numbers<[1], [0], [0], [1], [0, 0, 1, 1], [], []>} : vector<256x64xbf16>, vector<64x96xbf16>, vector<256x96xf32> -> vector<256x96xf32>
    %40 = arith.addf %34, %39 : vector<256x96xf32>
    %c1_41 = arith.constant 1 : index
    %c1_42 = arith.constant 1 : index
    %c0_43 = arith.constant 0 : index
    %41 = vector.load %arg7[%c1_41, %c1_42, %c0_43] : memref<18x18x64xbf16, #tpu.memory_space<vmem>>, vector<16x16x64xbf16>
    %42 = vector.shape_cast %41 : vector<16x16x64xbf16> to vector<256x64xbf16>
    %c4 = arith.constant 4 : index
    %c0_44 = arith.constant 0 : index
    %c0_45 = arith.constant 0 : index
    %43 = vector.load %arg4[%c4, %c0_44, %c0_45] : memref<9x64x96xbf16, #tpu.memory_space<vmem>>, vector<1x64x96xbf16>
    %44 = vector.shape_cast %43 : vector<1x64x96xbf16> to vector<64x96xbf16>
    %cst_46 = arith.constant dense<0.000000e+00> : vector<256x96xf32>
    %45 = tpu.matmul %42, %44, %cst_46 {dimension_numbers = #tpu.dot_dimension_numbers<[1], [0], [0], [1], [0, 0, 1, 1], [], []>} : vector<256x64xbf16>, vector<64x96xbf16>, vector<256x96xf32> -> vector<256x96xf32>
    %46 = arith.addf %40, %45 : vector<256x96xf32>
    %c1_47 = arith.constant 1 : index
    %c2_48 = arith.constant 2 : index
    %c0_49 = arith.constant 0 : index
    %47 = vector.load %arg7[%c1_47, %c2_48, %c0_49] : memref<18x18x64xbf16, #tpu.memory_space<vmem>>, vector<16x16x64xbf16>
    %48 = vector.shape_cast %47 : vector<16x16x64xbf16> to vector<256x64xbf16>
    %c5 = arith.constant 5 : index
    %c0_50 = arith.constant 0 : index
    %c0_51 = arith.constant 0 : index
    %49 = vector.load %arg4[%c5, %c0_50, %c0_51] : memref<9x64x96xbf16, #tpu.memory_space<vmem>>, vector<1x64x96xbf16>
    %50 = vector.shape_cast %49 : vector<1x64x96xbf16> to vector<64x96xbf16>
    %cst_52 = arith.constant dense<0.000000e+00> : vector<256x96xf32>
    %51 = tpu.matmul %48, %50, %cst_52 {dimension_numbers = #tpu.dot_dimension_numbers<[1], [0], [0], [1], [0, 0, 1, 1], [], []>} : vector<256x64xbf16>, vector<64x96xbf16>, vector<256x96xf32> -> vector<256x96xf32>
    %52 = arith.addf %46, %51 : vector<256x96xf32>
    %c2_53 = arith.constant 2 : index
    %c0_54 = arith.constant 0 : index
    %c0_55 = arith.constant 0 : index
    %53 = vector.load %arg7[%c2_53, %c0_54, %c0_55] : memref<18x18x64xbf16, #tpu.memory_space<vmem>>, vector<16x16x64xbf16>
    %54 = vector.shape_cast %53 : vector<16x16x64xbf16> to vector<256x64xbf16>
    %c6 = arith.constant 6 : index
    %c0_56 = arith.constant 0 : index
    %c0_57 = arith.constant 0 : index
    %55 = vector.load %arg4[%c6, %c0_56, %c0_57] : memref<9x64x96xbf16, #tpu.memory_space<vmem>>, vector<1x64x96xbf16>
    %56 = vector.shape_cast %55 : vector<1x64x96xbf16> to vector<64x96xbf16>
    %cst_58 = arith.constant dense<0.000000e+00> : vector<256x96xf32>
    %57 = tpu.matmul %54, %56, %cst_58 {dimension_numbers = #tpu.dot_dimension_numbers<[1], [0], [0], [1], [0, 0, 1, 1], [], []>} : vector<256x64xbf16>, vector<64x96xbf16>, vector<256x96xf32> -> vector<256x96xf32>
    %58 = arith.addf %52, %57 : vector<256x96xf32>
    %c2_59 = arith.constant 2 : index
    %c1_60 = arith.constant 1 : index
    %c0_61 = arith.constant 0 : index
    %59 = vector.load %arg7[%c2_59, %c1_60, %c0_61] : memref<18x18x64xbf16, #tpu.memory_space<vmem>>, vector<16x16x64xbf16>
    %60 = vector.shape_cast %59 : vector<16x16x64xbf16> to vector<256x64xbf16>
    %c7 = arith.constant 7 : index
    %c0_62 = arith.constant 0 : index
    %c0_63 = arith.constant 0 : index
    %61 = vector.load %arg4[%c7, %c0_62, %c0_63] : memref<9x64x96xbf16, #tpu.memory_space<vmem>>, vector<1x64x96xbf16>
    %62 = vector.shape_cast %61 : vector<1x64x96xbf16> to vector<64x96xbf16>
    %cst_64 = arith.constant dense<0.000000e+00> : vector<256x96xf32>
    %63 = tpu.matmul %60, %62, %cst_64 {dimension_numbers = #tpu.dot_dimension_numbers<[1], [0], [0], [1], [0, 0, 1, 1], [], []>} : vector<256x64xbf16>, vector<64x96xbf16>, vector<256x96xf32> -> vector<256x96xf32>
    %64 = arith.addf %58, %63 : vector<256x96xf32>
    %c2_65 = arith.constant 2 : index
    %c2_66 = arith.constant 2 : index
    %c0_67 = arith.constant 0 : index
    %65 = vector.load %arg7[%c2_65, %c2_66, %c0_67] : memref<18x18x64xbf16, #tpu.memory_space<vmem>>, vector<16x16x64xbf16>
    %66 = vector.shape_cast %65 : vector<16x16x64xbf16> to vector<256x64xbf16>
    %c8 = arith.constant 8 : index
    %c0_68 = arith.constant 0 : index
    %c0_69 = arith.constant 0 : index
    %67 = vector.load %arg4[%c8, %c0_68, %c0_69] : memref<9x64x96xbf16, #tpu.memory_space<vmem>>, vector<1x64x96xbf16>
    %68 = vector.shape_cast %67 : vector<1x64x96xbf16> to vector<64x96xbf16>
    %cst_70 = arith.constant dense<0.000000e+00> : vector<256x96xf32>
    %69 = tpu.matmul %66, %68, %cst_70 {dimension_numbers = #tpu.dot_dimension_numbers<[1], [0], [0], [1], [0, 0, 1, 1], [], []>} : vector<256x64xbf16>, vector<64x96xbf16>, vector<256x96xf32> -> vector<256x96xf32>
    %70 = arith.addf %64, %69 : vector<256x96xf32>
    %c0_71 = arith.constant 0 : index
    %c0_72 = arith.constant 0 : index
    %71 = vector.load %arg5[%c0_71, %c0_72] : memref<1x96xf32, #tpu.memory_space<vmem>>, vector<1x96xf32>
    %72 = vector.broadcast %71 : vector<1x96xf32> to vector<256x96xf32>
    %73 = arith.addf %70, %72 : vector<256x96xf32>
    %cst_73 = arith.constant 0.000000e+00 : f32
    %74 = vector.broadcast %cst_73 : f32 to vector<256x96xf32>
    %75 = arith.maximumf %73, %74 : vector<256x96xf32>
    %76 = vector.shape_cast %75 : vector<256x96xf32> to vector<16x16x96xf32>
    %c0_74 = arith.constant 0 : index
    %c0_75 = arith.constant 0 : index
    %c0_76 = arith.constant 0 : index
    %c0_77 = arith.constant 0 : index
    %77 = vector.load %arg6[%c0_74, %c0_75, %c0_76, %c0_77] : memref<1x16x16x96xf32, #tpu.memory_space<vmem>>, vector<1x16x16x96xf32>
    %78 = vector.shape_cast %77 : vector<1x16x16x96xf32> to vector<16x16x96xf32>
    %79 = vector.shape_cast %76 : vector<16x16x96xf32> to vector<1x16x16x96xf32>
    tpu.vector_store %arg6[%c0_74, %c0_75, %c0_76, %c0_77], %79 {strides = array<i32>} : memref<1x16x16x96xf32, #tpu.memory_space<vmem>>, vector<1x16x16x96xf32>,
    return
  }
  func.func @transform_0(%arg0: i32) -> (i32, i32, i32, i32) {
    %c0_i32 = arith.constant 0 : i32
    %c0_i32_0 = arith.constant 0 : i32
    %c0_i32_1 = arith.constant 0 : i32
    %c0_i32_2 = arith.constant 0 : i32
    return %arg0, %c0_i32, %c0_i32_0, %c0_i32_1 : i32, i32, i32, i32
  }
  func.func @transform_1(%arg0: i32) -> (i32, i32) {
    %c0_i32 = arith.constant 0 : i32
    %c0_i32_0 = arith.constant 0 : i32
    %c0_i32_1 = arith.constant 0 : i32
    return %c0_i32, %c0_i32_0 : i32, i32
  }
  func.func @transform_2(%arg0: i32) -> (i32, i32) {
    %c0_i32 = arith.constant 0 : i32
    %c0_i32_0 = arith.constant 0 : i32
    %c0_i32_1 = arith.constant 0 : i32
    return %c0_i32, %c0_i32_0 : i32, i32
  }
  func.func @transform_3(%arg0: i32) -> (i32, i32, i32) {
    %c0_i32 = arith.constant 0 : i32
    %c0_i32_0 = arith.constant 0 : i32
    %c0_i32_1 = arith.constant 0 : i32
    %c0_i32_2 = arith.constant 0 : i32
    return %c0_i32, %c0_i32_0, %c0_i32_1 : i32, i32, i32
  }
  func.func @transform_4(%arg0: i32) -> (i32, i32) {
    %c0_i32 = arith.constant 0 : i32
    %c0_i32_0 = arith.constant 0 : i32
    %c0_i32_1 = arith.constant 0 : i32
    return %c0_i32, %c0_i32_0 : i32, i32
  }
  func.func @transform_5(%arg0: i32) -> (i32, i32, i32, i32) {
    %c0_i32 = arith.constant 0 : i32
    %c0_i32_0 = arith.constant 0 : i32
    %c0_i32_1 = arith.constant 0 : i32
    %c0_i32_2 = arith.constant 0 : i32
    return %arg0, %c0_i32, %c0_i32_0, %c0_i32_1 : i32, i32, i32, i32
  }
}

module attributes {stable_mosaic.version = 11 : i64} {
  func.func @_s2_conv_kernel(%arg0: i32, %arg1: memref<1x4x64x96xf32, #tpu.memory_space<vmem>>, %arg2: memref<9x96x96xbf16, #tpu.memory_space<vmem>>, %arg3: memref<1x96xf32, #tpu.memory_space<vmem>>, %arg4: memref<1x7x7x96xf32, #tpu.memory_space<vmem>>) attributes {dimension_semantics = [#tpu.dimension_semantics<parallel>], iteration_bounds = array<i64: 2>, scalar_prefetch = 0 : i64, scratch_operands = 0 : i64, tpu.core_type = #tpu.core_type<tc>, window_params = [{transform_indices = @transform_0, window_bounds = array<i64: 1, 4, 64, 96>}, {pipeline_mode = #tpu.pipeline_mode<synchronous>, transform_indices = @transform_1, window_bounds = array<i64: 9, 96, 96>}, {pipeline_mode = #tpu.pipeline_mode<synchronous>, transform_indices = @transform_2, window_bounds = array<i64: 1, 96>}, {transform_indices = @transform_3, window_bounds = array<i64: 1, 7, 7, 96>}]} {
    %cst = arith.constant 0.000000e+00 : f32
    %0 = vector.broadcast %cst : f32 to vector<7x7x96xf32>
    %c0 = arith.constant 0 : index
    %c0_0 = arith.constant 0 : index
    %c0_1 = arith.constant 0 : index
    %c0_2 = arith.constant 0 : index
    %1 = vector.load %arg1[%c0, %c0_0, %c0_1, %c0_2] : memref<1x4x64x96xf32, #tpu.memory_space<vmem>>, vector<1x1x64x96xf32>
    %2 = vector.shape_cast %1 : vector<1x1x64x96xf32> to vector<64x96xf32>
    %3 = arith.truncf %2 : vector<64x96xf32> to vector<64x96xbf16>
    %c0_3 = arith.constant 0 : index
    %c0_4 = arith.constant 0 : index
    %c0_5 = arith.constant 0 : index
    %4 = vector.load %arg2[%c0_3, %c0_4, %c0_5] : memref<9x96x96xbf16, #tpu.memory_space<vmem>>, vector<1x96x96xbf16>
    %5 = vector.shape_cast %4 : vector<1x96x96xbf16> to vector<96x96xbf16>
    %cst_6 = arith.constant dense<0.000000e+00> : vector<64x96xf32>
    %6 = tpu.matmul %3, %5, %cst_6 {dimension_numbers = #tpu.dot_dimension_numbers<[1], [0], [0], [1], [0, 0, 1, 1], [], []>} : vector<64x96xbf16>, vector<96x96xbf16>, vector<64x96xf32> -> vector<64x96xf32>
    %7 = vector.shape_cast %6 : vector<64x96xf32> to vector<8x8x96xf32>
    %8 = vector.extract_strided_slice %7 {offsets = [0, 0, 0], sizes = [7, 7, 96], strides = [1, 1, 1]} : vector<8x8x96xf32> to vector<7x7x96xf32>
    %9 = arith.addf %0, %8 : vector<7x7x96xf32>
    %c0_7 = arith.constant 0 : index
    %c1 = arith.constant 1 : index
    %c0_8 = arith.constant 0 : index
    %c0_9 = arith.constant 0 : index
    %10 = vector.load %arg1[%c0_7, %c1, %c0_8, %c0_9] : memref<1x4x64x96xf32, #tpu.memory_space<vmem>>, vector<1x1x64x96xf32>
    %11 = vector.shape_cast %10 : vector<1x1x64x96xf32> to vector<64x96xf32>
    %12 = arith.truncf %11 : vector<64x96xf32> to vector<64x96xbf16>
    %c1_10 = arith.constant 1 : index
    %c0_11 = arith.constant 0 : index
    %c0_12 = arith.constant 0 : index
    %13 = vector.load %arg2[%c1_10, %c0_11, %c0_12] : memref<9x96x96xbf16, #tpu.memory_space<vmem>>, vector<1x96x96xbf16>
    %14 = vector.shape_cast %13 : vector<1x96x96xbf16> to vector<96x96xbf16>
    %cst_13 = arith.constant dense<0.000000e+00> : vector<64x96xf32>
    %15 = tpu.matmul %12, %14, %cst_13 {dimension_numbers = #tpu.dot_dimension_numbers<[1], [0], [0], [1], [0, 0, 1, 1], [], []>} : vector<64x96xbf16>, vector<96x96xbf16>, vector<64x96xf32> -> vector<64x96xf32>
    %16 = vector.shape_cast %15 : vector<64x96xf32> to vector<8x8x96xf32>
    %17 = vector.extract_strided_slice %16 {offsets = [0, 0, 0], sizes = [7, 7, 96], strides = [1, 1, 1]} : vector<8x8x96xf32> to vector<7x7x96xf32>
    %18 = arith.addf %9, %17 : vector<7x7x96xf32>
    %c0_14 = arith.constant 0 : index
    %c0_15 = arith.constant 0 : index
    %c0_16 = arith.constant 0 : index
    %c0_17 = arith.constant 0 : index
    %19 = vector.load %arg1[%c0_14, %c0_15, %c0_16, %c0_17] : memref<1x4x64x96xf32, #tpu.memory_space<vmem>>, vector<1x1x64x96xf32>
    %20 = vector.shape_cast %19 : vector<1x1x64x96xf32> to vector<64x96xf32>
    %21 = arith.truncf %20 : vector<64x96xf32> to vector<64x96xbf16>
    %c2 = arith.constant 2 : index
    %c0_18 = arith.constant 0 : index
    %c0_19 = arith.constant 0 : index
    %22 = vector.load %arg2[%c2, %c0_18, %c0_19] : memref<9x96x96xbf16, #tpu.memory_space<vmem>>, vector<1x96x96xbf16>
    %23 = vector.shape_cast %22 : vector<1x96x96xbf16> to vector<96x96xbf16>
    %cst_20 = arith.constant dense<0.000000e+00> : vector<64x96xf32>
    %24 = tpu.matmul %21, %23, %cst_20 {dimension_numbers = #tpu.dot_dimension_numbers<[1], [0], [0], [1], [0, 0, 1, 1], [], []>} : vector<64x96xbf16>, vector<96x96xbf16>, vector<64x96xf32> -> vector<64x96xf32>
    %25 = vector.shape_cast %24 : vector<64x96xf32> to vector<8x8x96xf32>
    %26 = vector.extract_strided_slice %25 {offsets = [0, 1, 0], sizes = [7, 7, 96], strides = [1, 1, 1]} : vector<8x8x96xf32> to vector<7x7x96xf32>
    %27 = arith.addf %18, %26 : vector<7x7x96xf32>
    %c0_21 = arith.constant 0 : index
    %c2_22 = arith.constant 2 : index
    %c0_23 = arith.constant 0 : index
    %c0_24 = arith.constant 0 : index
    %28 = vector.load %arg1[%c0_21, %c2_22, %c0_23, %c0_24] : memref<1x4x64x96xf32, #tpu.memory_space<vmem>>, vector<1x1x64x96xf32>
    %29 = vector.shape_cast %28 : vector<1x1x64x96xf32> to vector<64x96xf32>
    %30 = arith.truncf %29 : vector<64x96xf32> to vector<64x96xbf16>
    %c3 = arith.constant 3 : index
    %c0_25 = arith.constant 0 : index
    %c0_26 = arith.constant 0 : index
    %31 = vector.load %arg2[%c3, %c0_25, %c0_26] : memref<9x96x96xbf16, #tpu.memory_space<vmem>>, vector<1x96x96xbf16>
    %32 = vector.shape_cast %31 : vector<1x96x96xbf16> to vector<96x96xbf16>
    %cst_27 = arith.constant dense<0.000000e+00> : vector<64x96xf32>
    %33 = tpu.matmul %30, %32, %cst_27 {dimension_numbers = #tpu.dot_dimension_numbers<[1], [0], [0], [1], [0, 0, 1, 1], [], []>} : vector<64x96xbf16>, vector<96x96xbf16>, vector<64x96xf32> -> vector<64x96xf32>
    %34 = vector.shape_cast %33 : vector<64x96xf32> to vector<8x8x96xf32>
    %35 = vector.extract_strided_slice %34 {offsets = [0, 0, 0], sizes = [7, 7, 96], strides = [1, 1, 1]} : vector<8x8x96xf32> to vector<7x7x96xf32>
    %36 = arith.addf %27, %35 : vector<7x7x96xf32>
    %c0_28 = arith.constant 0 : index
    %c3_29 = arith.constant 3 : index
    %c0_30 = arith.constant 0 : index
    %c0_31 = arith.constant 0 : index
    %37 = vector.load %arg1[%c0_28, %c3_29, %c0_30, %c0_31] : memref<1x4x64x96xf32, #tpu.memory_space<vmem>>, vector<1x1x64x96xf32>
    %38 = vector.shape_cast %37 : vector<1x1x64x96xf32> to vector<64x96xf32>
    %39 = arith.truncf %38 : vector<64x96xf32> to vector<64x96xbf16>
    %c4 = arith.constant 4 : index
    %c0_32 = arith.constant 0 : index
    %c0_33 = arith.constant 0 : index
    %40 = vector.load %arg2[%c4, %c0_32, %c0_33] : memref<9x96x96xbf16, #tpu.memory_space<vmem>>, vector<1x96x96xbf16>
    %41 = vector.shape_cast %40 : vector<1x96x96xbf16> to vector<96x96xbf16>
    %cst_34 = arith.constant dense<0.000000e+00> : vector<64x96xf32>
    %42 = tpu.matmul %39, %41, %cst_34 {dimension_numbers = #tpu.dot_dimension_numbers<[1], [0], [0], [1], [0, 0, 1, 1], [], []>} : vector<64x96xbf16>, vector<96x96xbf16>, vector<64x96xf32> -> vector<64x96xf32>
    %43 = vector.shape_cast %42 : vector<64x96xf32> to vector<8x8x96xf32>
    %44 = vector.extract_strided_slice %43 {offsets = [0, 0, 0], sizes = [7, 7, 96], strides = [1, 1, 1]} : vector<8x8x96xf32> to vector<7x7x96xf32>
    %45 = arith.addf %36, %44 : vector<7x7x96xf32>
    %c0_35 = arith.constant 0 : index
    %c2_36 = arith.constant 2 : index
    %c0_37 = arith.constant 0 : index
    %c0_38 = arith.constant 0 : index
    %46 = vector.load %arg1[%c0_35, %c2_36, %c0_37, %c0_38] : memref<1x4x64x96xf32, #tpu.memory_space<vmem>>, vector<1x1x64x96xf32>
    %47 = vector.shape_cast %46 : vector<1x1x64x96xf32> to vector<64x96xf32>
    %48 = arith.truncf %47 : vector<64x96xf32> to vector<64x96xbf16>
    %c5 = arith.constant 5 : index
    %c0_39 = arith.constant 0 : index
    %c0_40 = arith.constant 0 : index
    %49 = vector.load %arg2[%c5, %c0_39, %c0_40] : memref<9x96x96xbf16, #tpu.memory_space<vmem>>, vector<1x96x96xbf16>
    %50 = vector.shape_cast %49 : vector<1x96x96xbf16> to vector<96x96xbf16>
    %cst_41 = arith.constant dense<0.000000e+00> : vector<64x96xf32>
    %51 = tpu.matmul %48, %50, %cst_41 {dimension_numbers = #tpu.dot_dimension_numbers<[1], [0], [0], [1], [0, 0, 1, 1], [], []>} : vector<64x96xbf16>, vector<96x96xbf16>, vector<64x96xf32> -> vector<64x96xf32>
    %52 = vector.shape_cast %51 : vector<64x96xf32> to vector<8x8x96xf32>
    %53 = vector.extract_strided_slice %52 {offsets = [0, 1, 0], sizes = [7, 7, 96], strides = [1, 1, 1]} : vector<8x8x96xf32> to vector<7x7x96xf32>
    %54 = arith.addf %45, %53 : vector<7x7x96xf32>
    %c0_42 = arith.constant 0 : index
    %c0_43 = arith.constant 0 : index
    %c0_44 = arith.constant 0 : index
    %c0_45 = arith.constant 0 : index
    %55 = vector.load %arg1[%c0_42, %c0_43, %c0_44, %c0_45] : memref<1x4x64x96xf32, #tpu.memory_space<vmem>>, vector<1x1x64x96xf32>
    %56 = vector.shape_cast %55 : vector<1x1x64x96xf32> to vector<64x96xf32>
    %57 = arith.truncf %56 : vector<64x96xf32> to vector<64x96xbf16>
    %c6 = arith.constant 6 : index
    %c0_46 = arith.constant 0 : index
    %c0_47 = arith.constant 0 : index
    %58 = vector.load %arg2[%c6, %c0_46, %c0_47] : memref<9x96x96xbf16, #tpu.memory_space<vmem>>, vector<1x96x96xbf16>
    %59 = vector.shape_cast %58 : vector<1x96x96xbf16> to vector<96x96xbf16>
    %cst_48 = arith.constant dense<0.000000e+00> : vector<64x96xf32>
    %60 = tpu.matmul %57, %59, %cst_48 {dimension_numbers = #tpu.dot_dimension_numbers<[1], [0], [0], [1], [0, 0, 1, 1], [], []>} : vector<64x96xbf16>, vector<96x96xbf16>, vector<64x96xf32> -> vector<64x96xf32>
    %61 = vector.shape_cast %60 : vector<64x96xf32> to vector<8x8x96xf32>
    %62 = vector.extract_strided_slice %61 {offsets = [1, 0, 0], sizes = [7, 7, 96], strides = [1, 1, 1]} : vector<8x8x96xf32> to vector<7x7x96xf32>
    %63 = arith.addf %54, %62 : vector<7x7x96xf32>
    %c0_49 = arith.constant 0 : index
    %c1_50 = arith.constant 1 : index
    %c0_51 = arith.constant 0 : index
    %c0_52 = arith.constant 0 : index
    %64 = vector.load %arg1[%c0_49, %c1_50, %c0_51, %c0_52] : memref<1x4x64x96xf32, #tpu.memory_space<vmem>>, vector<1x1x64x96xf32>
    %65 = vector.shape_cast %64 : vector<1x1x64x96xf32> to vector<64x96xf32>
    %66 = arith.truncf %65 : vector<64x96xf32> to vector<64x96xbf16>
    %c7 = arith.constant 7 : index
    %c0_53 = arith.constant 0 : index
    %c0_54 = arith.constant 0 : index
    %67 = vector.load %arg2[%c7, %c0_53, %c0_54] : memref<9x96x96xbf16, #tpu.memory_space<vmem>>, vector<1x96x96xbf16>
    %68 = vector.shape_cast %67 : vector<1x96x96xbf16> to vector<96x96xbf16>
    %cst_55 = arith.constant dense<0.000000e+00> : vector<64x96xf32>
    %69 = tpu.matmul %66, %68, %cst_55 {dimension_numbers = #tpu.dot_dimension_numbers<[1], [0], [0], [1], [0, 0, 1, 1], [], []>} : vector<64x96xbf16>, vector<96x96xbf16>, vector<64x96xf32> -> vector<64x96xf32>
    %70 = vector.shape_cast %69 : vector<64x96xf32> to vector<8x8x96xf32>
    %71 = vector.extract_strided_slice %70 {offsets = [1, 0, 0], sizes = [7, 7, 96], strides = [1, 1, 1]} : vector<8x8x96xf32> to vector<7x7x96xf32>
    %72 = arith.addf %63, %71 : vector<7x7x96xf32>
    %c0_56 = arith.constant 0 : index
    %c0_57 = arith.constant 0 : index
    %c0_58 = arith.constant 0 : index
    %c0_59 = arith.constant 0 : index
    %73 = vector.load %arg1[%c0_56, %c0_57, %c0_58, %c0_59] : memref<1x4x64x96xf32, #tpu.memory_space<vmem>>, vector<1x1x64x96xf32>
    %74 = vector.shape_cast %73 : vector<1x1x64x96xf32> to vector<64x96xf32>
    %75 = arith.truncf %74 : vector<64x96xf32> to vector<64x96xbf16>
    %c8 = arith.constant 8 : index
    %c0_60 = arith.constant 0 : index
    %c0_61 = arith.constant 0 : index
    %76 = vector.load %arg2[%c8, %c0_60, %c0_61] : memref<9x96x96xbf16, #tpu.memory_space<vmem>>, vector<1x96x96xbf16>
    %77 = vector.shape_cast %76 : vector<1x96x96xbf16> to vector<96x96xbf16>
    %cst_62 = arith.constant dense<0.000000e+00> : vector<64x96xf32>
    %78 = tpu.matmul %75, %77, %cst_62 {dimension_numbers = #tpu.dot_dimension_numbers<[1], [0], [0], [1], [0, 0, 1, 1], [], []>} : vector<64x96xbf16>, vector<96x96xbf16>, vector<64x96xf32> -> vector<64x96xf32>
    %79 = vector.shape_cast %78 : vector<64x96xf32> to vector<8x8x96xf32>
    %80 = vector.extract_strided_slice %79 {offsets = [1, 1, 0], sizes = [7, 7, 96], strides = [1, 1, 1]} : vector<8x8x96xf32> to vector<7x7x96xf32>
    %81 = arith.addf %72, %80 : vector<7x7x96xf32>
    %c0_63 = arith.constant 0 : index
    %c0_64 = arith.constant 0 : index
    %82 = vector.load %arg3[%c0_63, %c0_64] : memref<1x96xf32, #tpu.memory_space<vmem>>, vector<1x96xf32>
    %83 = vector.shape_cast %82 : vector<1x96xf32> to vector<1x1x96xf32>
    %84 = vector.broadcast %83 : vector<1x1x96xf32> to vector<7x7x96xf32>
    %85 = arith.addf %81, %84 : vector<7x7x96xf32>
    %cst_65 = arith.constant 0.000000e+00 : f32
    %86 = vector.broadcast %cst_65 : f32 to vector<7x7x96xf32>
    %87 = arith.maximumf %85, %86 : vector<7x7x96xf32>
    %c0_66 = arith.constant 0 : index
    %c0_67 = arith.constant 0 : index
    %c0_68 = arith.constant 0 : index
    %c0_69 = arith.constant 0 : index
    %88 = vector.load %arg4[%c0_66, %c0_67, %c0_68, %c0_69] : memref<1x7x7x96xf32, #tpu.memory_space<vmem>>, vector<1x7x7x96xf32>
    %89 = vector.shape_cast %88 : vector<1x7x7x96xf32> to vector<7x7x96xf32>
    %90 = vector.shape_cast %87 : vector<7x7x96xf32> to vector<1x7x7x96xf32>
    tpu.vector_store %arg4[%c0_66, %c0_67, %c0_68, %c0_69], %90 {strides = array<i32>} : memref<1x7x7x96xf32, #tpu.memory_space<vmem>>, vector<1x7x7x96xf32>,
    return
  }
  func.func @transform_0(%arg0: i32) -> (i32, i32, i32, i32) {
    %c0_i32 = arith.constant 0 : i32
    %c0_i32_0 = arith.constant 0 : i32
    %c0_i32_1 = arith.constant 0 : i32
    %c0_i32_2 = arith.constant 0 : i32
    return %arg0, %c0_i32, %c0_i32_0, %c0_i32_1 : i32, i32, i32, i32
  }
  func.func @transform_1(%arg0: i32) -> (i32, i32, i32) {
    %c0_i32 = arith.constant 0 : i32
    %c0_i32_0 = arith.constant 0 : i32
    %c0_i32_1 = arith.constant 0 : i32
    %c0_i32_2 = arith.constant 0 : i32
    return %c0_i32, %c0_i32_0, %c0_i32_1 : i32, i32, i32
  }
  func.func @transform_2(%arg0: i32) -> (i32, i32) {
    %c0_i32 = arith.constant 0 : i32
    %c0_i32_0 = arith.constant 0 : i32
    %c0_i32_1 = arith.constant 0 : i32
    return %c0_i32, %c0_i32_0 : i32, i32
  }
  func.func @transform_3(%arg0: i32) -> (i32, i32, i32, i32) {
    %c0_i32 = arith.constant 0 : i32
    %c0_i32_0 = arith.constant 0 : i32
    %c0_i32_1 = arith.constant 0 : i32
    %c0_i32_2 = arith.constant 0 : i32
    return %arg0, %c0_i32, %c0_i32_0, %c0_i32_1 : i32, i32, i32, i32
  }
}

</mosaic_0001>

<bundles_post_ra>
// kernel: inception2_forward.5
= control target key start
LH: loop header
LB: loop body
LE: loop exit
PB: predicated region body
PF: predicated region fallthrough
CT: control target
= control target key end

     0   :  { %s1658_s12 = smov 0   ;;  %s1996_s0 = inlined_call_operand.vmem [shape: f32[2,4,64,96], index: 0, kind: input, shape index: {}]   ;;  %s1997_s1 = inlined_call_operand.vmem [shape: bf16[9,96,96], index: 1, kind: input, shape index: {}]   ;;  %s1998_s2 = inlined_call_operand.vmem [shape: f32[1,96], index: 2, kind: input, shape index: {}]   ;;  %s1999_s3 = inlined_call_operand.vmem [shape: f32[2,7,7,96], index: 3, kind: output, shape index: {}]  }
   0x1 LB: > { %s1171_s13 = sadd.s32 4294967295, %s1636_s12   ;;  %p1175_p0 = scmp.ge.s32.totalorder %s1636_s12, 1  ;;  %s1636_s12 = sphi %s1658_s12, %s13_s12  }
   0x2   : > { %p137_p1 = scmp.lt.s32.totalorder %s1636_s12, 3 }
   0x4   : > { %p138_p2 = pnand %p1175_p0, %p137_p1 }
   0x5   : > { %p161_p3 = scmp.lt.s32.totalorder (!%p138_p2), %s1171_s13, 1 }
   0x6   : > { %141 = sbr.rel (%p138_p2) target bundleno = 320 (0x140), region = 32 }
   0xb   : > { %v1559_v0 = vld [vmem:[%s1997_s1 + $0x28] sm:$0xff]  ;;  %v1558_v2 = vld [vmem:[%s1997_s1 + $0x20] sm:$0xff]  ;;  %v1577_v4 = vld [vmem:[%s1997_s1 + $0xb8] sm:$0xff]  ;;  %s2001_s13 = smov (!%p161_p3, %s1171_s13), 1  ;;  %vm232_vm0 = vcmask 785408   ;;  %vm1108_vm1 = vcmask 784384  }
   0xc   : > { %v1571_v1 = vld [vmem:[%s1997_s1 + $0x88] sm:$0xff]  ;;  %247 = vmatpush.bf16.msra.mxu0 %v1559_v0  ;;  %1608 = vmatpush.bf16.msra.mxu1 %v1559_v0  ;;  %v1570_v3 = vld [vmem:[%s1997_s1 + $0x80] sm:$0xff]  ;;  %v1576_v5 = vld [vmem:[%s1997_s1 + $0xb0] sm:$0xff]  ;;  %s1553_s9 = sshll.u32 %s2001_s13, 8  ;;  %s1620_s30 = smul.u32 56, %s2001_s13 }
   0xd   : > { %440 = vmatpush.bf16.msra.mxu2 %v1571_v1  ;;  %570 = vmatpush.bf16.msra.mxu3 %v1577_v4  ;;  %v1557_v6 = vld [vmem:[%s1997_s1 + $0x18] sm:$0xff]  ;;  %v1575_v8 = vld [vmem:[%s1997_s1 + $0xa8] sm:$0xff]  ;;  %v1556_v9 = vld [vmem:[%s1997_s1 + $0x10] sm:$0xff]  ;;  %s1711_s18 = scalar_lea.vmem %s1996_s0, %s1553_s9 }
   0xe   : > { %v1569_v7 = vld [vmem:[%s1997_s1 + $0x78] sm:$0xff]  ;;  %v1568_v10 = vld [vmem:[%s1997_s1 + $0x70] sm:$0xff]  ;;  %v1574_v11 = vld [vmem:[%s1997_s1 + $0xa0] sm:$0xff]  ;;  %s1966_s6 = scalar_lea.vmem %s1999_s3, %s1620_s30 }
   0xf   : > { %v1555_v12 = vld [vmem:[%s1997_s1 + $0x8] sm:$0xff]  ;;  %v1554_v14 = vld [vmem:[%s1997_s1] sm:$0xff]  ;;  %v1573_v16 = vld [vmem:[%s1997_s1 + $0x98] sm:$0xff] }
  0x10   : > { %248 = vmatpush.bf16.msra.mxu0 %v1558_v2  ;;  %1609 = vmatpush.bf16.msra.mxu1 %v1558_v2  ;;  %v1567_v13 = vld [vmem:[%s1997_s1 + $0x68] sm:$0xff]  ;;  %v172_v15 = vld [vmem:[%s1711_s18] sm:$0xff]  ;;  %v1565_v21 = vld [vmem:[%s1997_s1 + $0x58] sm:$0xff] }
  0x11   : > { %441 = vmatpush.bf16.msra.mxu2 %v1570_v3  ;;  %571 = vmatpush.bf16.msra.mxu3 %v1576_v5  ;;  %v173_v17 = vld [vmem:[%s1711_s18 + $0x8] sm:$0xff]  ;;  %v176_v18 = vld [vmem:[%s1711_s18 + $0x20] sm:$0xff]  ;;  %v1572_v26 = vld [vmem:[%s1997_s1 + $0x90] sm:$0xff] }
  0x12   : > { %v177_v19 = vld [vmem:[%s1711_s18 + $0x28] sm:$0xff]  ;;  %v1566_v20 = vld [vmem:[%s1997_s1 + $0x60] sm:$0xff]  ;;  %v1738_v24 = vpack.c.bf16 %v173_v17, %v172_v15  ;;  %v1564_v29 = vld [vmem:[%s1997_s1 + $0x50] sm:$0xff] }
  0x13   : > { %v1595_v22 = vld [vmem:[%s1997_s1 + $0x148] sm:$0xff]  ;;  %v1740_v25 = vpack.c.bf16 %v177_v19, %v176_v18  ;;  %v1295_v27 = vld [vmem:[%s1711_s18 + $0x80] sm:$0xff]  ;;  %v1601_v30 = vld [vmem:[%s1997_s1 + $0x178] sm:$0xff] }
  0x14   : > { %249 = vmatpush.bf16.msra.mxu0 %v1557_v6  ;;  %1610 = vmatpush.bf16.msra.mxu1 %v1557_v6  ;;  %v1583_v23 = vld [vmem:[%s1997_s1 + $0xe8] sm:$0xff]  ;;  %v1582_v31 = vld [vmem:[%s1997_s1 + $0xe0] sm:$0xff]  ;;  %v1600_v35 = vld [vmem:[%s1997_s1 + $0x170] sm:$0xff] }
  0x15   : > { %442 = vmatpush.bf16.msra.mxu2 %v1569_v7  ;;  %572 = vmatpush.bf16.msra.mxu3 %v1575_v8  ;;  %v1296_v28 = vld [vmem:[%s1711_s18 + $0x88] sm:$0xff]  ;;  %v1594_v32 = vld [vmem:[%s1997_s1 + $0x140] sm:$0xff]  ;;  %v1581_v36 = vld [vmem:[%s1997_s1 + $0xd8] sm:$0xff] }
  0x16   : > { %v1763_v33 = vpack.c.bf16 %v1296_v28, %v1295_v27  ;;  %v1563_v34 = vld [vmem:[%s1997_s1 + $0x48] sm:$0xff]  ;;  %v1593_v37 = vld [vmem:[%s1997_s1 + $0x138] sm:$0xff]  ;;  %v1562_v38 = vld [vmem:[%s1997_s1 + $0x40] sm:$0xff] }
  0x17   : > { %v1599_v39 = vld [vmem:[%s1997_s1 + $0x168] sm:$0xff]  ;;  %v1580_v40 = vld [vmem:[%s1997_s1 + $0xd0] sm:$0xff]  ;;  %v175_v43 = vld [vmem:[%s1711_s18 + $0x18] sm:$0xff] }
  0x18   : > { %250 = vmatpush.bf16.msra.mxu0 %v1556_v9  ;;  %1611 = vmatpush.bf16.msra.mxu1 %v1556_v9  ;;  %v1592_v41 = vld [vmem:[%s1997_s1 + $0x130] sm:$0xff]  ;;  %v179_v45 = vld [vmem:[%s1711_s18 + $0x38] sm:$0xff]  ;;  %v1579_v47 = vld [vmem:[%s1997_s1 + $0xc8] sm:$0xff] }
  0x19   : > { %443 = vmatpush.bf16.msra.mxu2 %v1568_v10  ;;  %573 = vmatpush.bf16.msra.mxu3 %v1574_v11  ;;  %v174_v42 = vld [vmem:[%s1711_s18 + $0x10] sm:$0xff]  ;;  %v1561_v46 = vld [vmem:[%s1997_s1 + $0x38] sm:$0xff]  ;;  %v1578_v53 = vld [vmem:[%s1997_s1 + $0xc0] sm:$0xff] }
  0x1a   : > { %v178_v44 = vld [vmem:[%s1711_s18 + $0x30] sm:$0xff]  ;;  %v1803_v48 = vpack.c.bf16 %v175_v43, %v174_v42  ;;  %v1298_v51 = vld [vmem:[%s1711_s18 + $0x98] sm:$0xff]  ;;  %v1607_v56 = vld [vmem:[%s1997_s1 + $0x1a8] sm:$0xff] }
  0x1b   : > { %v1805_v49 = vpack.c.bf16 %v179_v45, %v178_v44  ;;  %v1297_v50 = vld [vmem:[%s1711_s18 + $0x90] sm:$0xff]  ;;  %v1589_v54 = vld [vmem:[%s1997_s1 + $0x118] sm:$0xff]  ;;  %v1591_v57 = vld [vmem:[%s1997_s1 + $0x128] sm:$0xff] }
  0x1c   : > { %251 = vmatpush.bf16.msra.mxu0 %v1555_v12  ;;  %1612 = vmatpush.bf16.msra.mxu1 %v1555_v12  ;;  %v1560_v52 = vld [vmem:[%s1997_s1 + $0x30] sm:$0xff]  ;;  %v1822_v55 = vpack.c.bf16 %v1298_v51, %v1297_v50  ;;  %v1598_v58 = vld [vmem:[%s1997_s1 + $0x160] sm:$0xff]  ;;  %v1587_v62 = vld [vmem:[%s1997_s1 + $0x108] sm:$0xff] }
  0x1d   : > { %444 = vmatpush.bf16.msra.mxu2 %v1567_v13  ;;  %574 = vmatpush.bf16.msra.mxu3 %v1573_v16  ;;  %v1588_v59 = vld [vmem:[%s1997_s1 + $0x110] sm:$0xff]  ;;  %v1606_v60 = vld [vmem:[%s1997_s1 + $0x1a0] sm:$0xff]  ;;  %v1208_v0 = vld [vmem:[%s1711_s18 + $0x48] sm:$0xff] }
  0x1e   : > { %v1590_v61 = vld [vmem:[%s1997_s1 + $0x120] sm:$0xff]  ;;  %v1344_v2 = vld [vmem:[%s1711_s18 + $0xc8] sm:$0xff]  ;;  %v1597_v9 = vld [vmem:[%s1997_s1 + $0x158] sm:$0xff] }
  0x1f   : > { %v1207_v63 = vld [vmem:[%s1711_s18 + $0x40] sm:$0xff]  ;;  %v1300_v6 = vld [vmem:[%s1711_s18 + $0xa8] sm:$0xff]  ;;  %v1605_v10 = vld [vmem:[%s1997_s1 + $0x198] sm:$0xff] }
  0x20   : > { %252 = vmatpush.bf16.msra.mxu0 %v1554_v14  ;;  %1613 = vmatpush.bf16.msra.mxu1 %v1554_v14  ;;  %v1343_v1 = vld [vmem:[%s1711_s18 + $0xc0] sm:$0xff]  ;;  %v289_v3 = vpack.c.bf16 %v1208_v0, %v1207_v63  ;;  %v1585_v11 = vld [vmem:[%s1997_s1 + $0xf8] sm:$0xff]  ;;  %v1596_v12 = vld [vmem:[%s1997_s1 + $0x150] sm:$0xff] }
  0x21   : > { %445 = vmatpush.bf16.msra.mxu2 %v1566_v20  ;;  %575 = vmatpush.bf16.msra.mxu3 %v1572_v26  ;;  %v612_v4 = vpack.c.bf16 %v1344_v2, %v1343_v1  ;;  %v1299_v5 = vld [vmem:[%s1711_s18 + $0xa0] sm:$0xff]  ;;  %v1604_v13 = vld [vmem:[%s1997_s1 + $0x190] sm:$0xff]  ;;  %v1210_v15 = vld [vmem:[%s1711_s18 + $0x58] sm:$0xff] }
  0x22   : > { %v1857_v7 = vpack.c.bf16 %v1300_v6, %v1299_v5  ;;  %v1586_v8 = vld [vmem:[%s1997_s1 + $0x100] sm:$0xff]  ;;  %v1209_v14 = vld [vmem:[%s1711_s18 + $0x50] sm:$0xff]  ;;  %v1346_v17 = vld [vmem:[%s1711_s18 + $0xd8] sm:$0xff] }
  0x23   : > { %1203 = vmatmul.msk.bf16.vlgmr.msra.gmra.mxu0 %vm232_vm0, %v1738_v24  ;;  %1205 = vmatmul.msk.bf16.vlgmr.msra.gmra.mxu1 %vm232_vm0, %v1740_v25  ;;  %v1345_v16 = vld [vmem:[%s1711_s18 + $0xd0] sm:$0xff]  ;;  %v290_v18 = vpack.c.bf16 %v1210_v15, %v1209_v14  ;;  %v1603_v26 = vld [vmem:[%s1997_s1 + $0x188] sm:$0xff]  ;;  %v1602_v27 = vld [vmem:[%s1997_s1 + $0x180] sm:$0xff] }
  0x24   : > { %356 = vmatpush.bf16.msrb.mxu1 %v1565_v21  ;;  %679 = vmatpush.bf16.msrb.mxu0 %v1583_v23  ;;  %v613_v19 = vpack.c.bf16 %v1346_v17, %v1345_v16  ;;  %v1301_v20 = vld [vmem:[%s1711_s18 + $0xb0] sm:$0xff]  ;;  %v1302_v21 = vld [vmem:[%s1711_s18 + $0xb8] sm:$0xff]  ;;  %v1211_v28 = vld [vmem:[%s1711_s18 + $0x60] sm:$0xff] }
  0x25   : > { %868 = vmatpush.bf16.msrb.mxu2 %v1595_v22  ;;  %952 = vmatpush.bf16.msrb.mxu3 %v1601_v30  ;;  %v506_v22 = vpack.c.bf16 %v1302_v21, %v1301_v20  ;;  %v1584_v23 = vld [vmem:[%s1997_s1 + $0xf0] sm:$0xff]  ;;  %v1347_v30 = vld [vmem:[%s1711_s18 + $0xe0] sm:$0xff] }
  0x26   : > { %1291 = vmatmul.msk.bf16.vlgmr.msra.gmra.mxu2 %vm232_vm0, %v1738_v24  ;;  %1339 = vmatmul.msk.bf16.vlgmr.msra.gmra.mxu3 %vm232_vm0, %v1763_v33 }
  0x28   : > { %357 = vmatpush.bf16.msrb.mxu1 %v1564_v29  ;;  %680 = vmatpush.bf16.msrb.mxu0 %v1582_v31  ;;  %v1212_v29 = vld [vmem:[%s1711_s18 + $0x68] sm:$0xff] }
  0x29   : > { %869 = vmatpush.bf16.msrb.mxu2 %v1594_v32  ;;  %953 = vmatpush.bf16.msrb.mxu3 %v1600_v35  ;;  %v1348_v31 = vld [vmem:[%s1711_s18 + $0xe8] sm:$0xff]  ;;  %v291_v32 = vpack.c.bf16 %v1212_v29, %v1211_v28  ;;  %v1213_v35 = vld [vmem:[%s1711_s18 + $0x70] sm:$0xff] }
  0x2c   : > { %358 = vmatpush.bf16.msrb.mxu1 %v1563_v34  ;;  %681 = vmatpush.bf16.msrb.mxu0 %v1581_v36  ;;  %v614_v34 = vpack.c.bf16 %v1348_v31, %v1347_v30  ;;  %v1214_v36 = vld [vmem:[%s1711_s18 + $0x78] sm:$0xff] }
  0x2d   : > { %870 = vmatpush.bf16.msrb.mxu2 %v1593_v37  ;;  %954 = vmatpush.bf16.msrb.mxu3 %v1599_v39  ;;  %v1349_v37 = vld [vmem:[%s1711_s18 + $0xf0] sm:$0xff]  ;;  %v292_v39 = vpack.c.bf16 %v1214_v36, %v1213_v35 }
  0x30   : > { %359 = vmatpush.bf16.msrb.mxu1 %v1562_v38  ;;  %682 = vmatpush.bf16.msrb.mxu0 %v1580_v40  ;;  %v1350_v38 = vld [vmem:[%s1711_s18 + $0xf8] sm:$0xff] }
  0x31   : > { %871 = vmatpush.bf16.msrb.mxu2 %v1592_v41  ;;  %955 = vmatpush.bf16.msrb.mxu3 %v1598_v58  ;;  %v615_v40 = vpack.c.bf16 %v1350_v38, %v1349_v37 }
  0x33   : > { %1204 = vmatmul.msk.bf16.gmra.mxu0 %vm232_vm0, %v1803_v48  ;;  %1206 = vmatmul.msk.bf16.gmra.mxu1 %vm232_vm0, %v1805_v49 }
  0x34   : > { %360 = vmatpush.bf16.msrb.mxu1 %v1561_v46  ;;  %683 = vmatpush.bf16.msrb.mxu0 %v1579_v47 }
  0x35   : > { %872 = vmatpush.bf16.msrb.mxu2 %v1591_v57  ;;  %956 = vmatpush.bf16.msrb.mxu3 %v1597_v9 }
  0x36   : > { %1292 = vmatmul.msk.bf16.gmra.mxu2 %vm232_vm0, %v1803_v48  ;;  %1340 = vmatmul.msk.bf16.gmra.mxu3 %vm232_vm0, %v1822_v55 }
  0x38   : > { %361 = vmatpush.bf16.msrb.mxu1 %v1560_v52  ;;  %684 = vmatpush.bf16.msrb.mxu0 %v1578_v53 }
  0x39   : > { %873 = vmatpush.bf16.msrb.mxu2 %v1590_v61  ;;  %957 = vmatpush.bf16.msrb.mxu3 %v1596_v12 }
  0x3c   : > { %763 = vmatpush.bf16.msra.mxu1 %v1589_v54  ;;  %1036 = vmatpush.bf16.msra.mxu0 %v1607_v56 }
  0x3d   : > { %1614 = vmatpush.bf16.msra.mxu2 %v1607_v56 }
  0x40   : > { %764 = vmatpush.bf16.msra.mxu1 %v1588_v59  ;;  %1037 = vmatpush.bf16.msra.mxu0 %v1606_v60 }
  0x41   : > { %1615 = vmatpush.bf16.msra.mxu2 %v1606_v60 }
  0x43   : > { %1251 = vmatmul.msk.bf16.vlgmr.msrb.gmra.mxu1 %vm232_vm0, %v289_v3  ;;  %1387 = vmatmul.msk.bf16.vlgmr.msrb.gmra.mxu0 %vm232_vm0, %v612_v4 }
  0x44   : > { %765 = vmatpush.bf16.msra.mxu1 %v1587_v62  ;;  %1038 = vmatpush.bf16.msra.mxu0 %v1605_v10 }
  0x45   : > { %1616 = vmatpush.bf16.msra.mxu2 %v1605_v10 }
  0x46   : > { %1293 = vmatmul.msk.bf16.gmra.mxu2 %vm232_vm0, %v1740_v25  ;;  %1341 = vmatmul.msk.bf16.gmra.mxu3 %vm232_vm0, %v1857_v7 }
  0x48   : > { %766 = vmatpush.bf16.msra.mxu1 %v1586_v8  ;;  %1039 = vmatpush.bf16.msra.mxu0 %v1604_v13 }
  0x49   : > { %1617 = vmatpush.bf16.msra.mxu2 %v1604_v13 }
  0x4c   : > { %767 = vmatpush.bf16.msra.mxu1 %v1585_v11  ;;  %1040 = vmatpush.bf16.msra.mxu0 %v1603_v26 }
  0x4d   : > { %1618 = vmatpush.bf16.msra.mxu2 %v1603_v26 }
  0x50   : > { %768 = vmatpush.bf16.msra.mxu1 %v1584_v23  ;;  %1041 = vmatpush.bf16.msra.mxu0 %v1602_v27 }
  0x51   : > { %1619 = vmatpush.bf16.msra.mxu2 %v1602_v27 }
  0x53   : > { %1252 = vmatmul.msk.bf16.gmra.mxu1 %vm232_vm0, %v290_v18  ;;  %1388 = vmatmul.msk.bf16.gmra.mxu0 %vm232_vm0, %v613_v19 }
  0x56   : > { %1294 = vmatmul.msk.bf16.gmra.mxu2 %vm232_vm0, %v1805_v49  ;;  %1342 = vmatmul.msk.bf16.gmra.mxu3 %vm232_vm0, %v506_v22 }
  0x63   : > { %1253 = vmatmul.msk.bf16.gmra.mxu1 %vm232_vm0, %v291_v32  ;;  %1389 = vmatmul.msk.bf16.gmra.mxu0 %vm232_vm0, %v614_v34 }
  0x66   : > { %1467 = vmatmul.msk.bf16.vlgmr.msrb.gmra.mxu2 %vm232_vm0, %v1738_v24  ;;  %1507 = vmatmul.msk.bf16.vlgmr.msrb.gmra.mxu3 %vm232_vm0, %v289_v3 }
  0x73   : > { %1254 = vmatmul.msk.bf16.gmra.mxu1 %vm232_vm0, %v292_v39  ;;  %1390 = vmatmul.msk.bf16.gmra.mxu0 %vm232_vm0, %v615_v40 }
  0x76   : > { %1468 = vmatmul.msk.bf16.gmra.mxu2 %vm232_vm0, %v1803_v48  ;;  %1508 = vmatmul.msk.bf16.gmra.mxu3 %vm232_vm0, %v290_v18 }
  0x83   : > { %1427 = vmatmul.msk.bf16.vlgmr.msra.gmra.mxu1 %vm232_vm0, %v1763_v33  ;;  %1547 = vmatmul.msk.bf16.vlgmr.msra.gmra.mxu0 %vm232_vm0, %v1738_v24 }
  0x86   : > { %1469 = vmatmul.msk.bf16.gmra.mxu2 %vm232_vm0, %v1740_v25  ;;  %1509 = vmatmul.msk.bf16.gmra.mxu3 %vm232_vm0, %v291_v32 }
  0x93   : > { %1428 = vmatmul.msk.bf16.gmra.mxu1 %vm232_vm0, %v1822_v55  ;;  %1548 = vmatmul.msk.bf16.gmra.mxu0 %vm232_vm0, %v1803_v48 }
  0x96   : > { %1470 = vmatmul.msk.bf16.gmra.mxu2 %vm232_vm0, %v1805_v49  ;;  %1510 = vmatmul.msk.bf16.gmra.mxu3 %vm232_vm0, %v292_v39 }
  0xa0   : > { %v254_v33 = vpop.f32.mrf.mxu0  ;;  %v264_v41 = vpop.f32.mrf.mxu1 }
  0xa3   : > { %1429 = vmatmul.msk.bf16.gmra.mxu1 %vm232_vm0, %v1857_v7  ;;  %1549 = vmatmul.msk.bf16.gmra.mxu0 %vm232_vm0, %v1740_v25 }
  0xa6   : > { %1550 = vmatmul.msk.bf16.vlgmr.msra.gmra.mxu2 %vm232_vm0, %v1805_v49 }
  0xa8   : > { %v256_v42 = vpop.f32.mrf.mxu0  ;;  %v266_v43 = vpop.f32.mrf.mxu1 }
  0xa9   : > { %v447_v24 = vpop.f32.mrf.mxu2  ;;  %v577_v44 = vpop.f32.mrf.mxu3 }
  0xaa   : > { %v473_v56 = vrot.slane %v447_v24, 1 }
  0xb0   : > { %v259_v46 = vpop.f32.mrf.mxu0  ;;  %v1939_v47 = vpop.f32.mrf.mxu1 }
  0xb1   : > { %v449_v45 = vpop.f32.mrf.mxu2  ;;  %v579_v48 = vpop.f32.mrf.mxu3 }
  0xb2   : > { %v474_v0 = vrot.slane %v449_v45, 1 }
  0xb3   : > { %1430 = vmatmul.msk.bf16.gmra.mxu1 %vm232_vm0, %v506_v22 }
  0xb8   : > { %v261_v51 = vpop.f32.mrf.mxu0  ;;  %v271_v52 = vpop.f32.mrf.mxu1 }
  0xb9   : > { %v452_v50 = vpop.f32.mrf.mxu2  ;;  %v582_v53 = vpop.f32.mrf.mxu3 }
  0xba   : > { %v475_v9 = vrot.slane %v452_v50, 1 }
  0xc0   : > { %v363_v25 = vpop.f32.mrf.mxu1  ;;  %v686_v55 = vpop.f32.mrf.mxu0 }
  0xc1   : > { %v454_v54 = vpop.f32.mrf.mxu2  ;;  %v382_v49 = vadd.f32 %v363_v25, %v254_v33  ;;  %v584_v57 = vpop.f32.mrf.mxu3 }
  0xc2   : > { %v476_v18 = vrot.slane %v454_v54, 1 }
  0xc3   : > { %v487_v58 = vadd.f32 %v473_v56, %v382_v49 }
  0xc5   : > { %v596_v59 = vadd.f32 %v577_v44, %v487_v58 }
  0xc7   : > { %v705_v60 = vadd.f32 %v686_v55, %v596_v59 }
  0xc8   : > { %v365_v62 = vpop.f32.mrf.mxu1  ;;  %v688_v63 = vpop.f32.mrf.mxu0 }
  0xc9   : > { %v457_v61 = vpop.f32.mrf.mxu2  ;;  %v383_v1 = vadd.f32 %v365_v62, %v256_v42  ;;  %v587_v2 = vpop.f32.mrf.mxu3 }
  0xca   : > { %v477_v29 = vrot.slane %v457_v61, 1 }
  0xcb   : > { %v488_v3 = vadd.f32 %v474_v0, %v383_v1 }
  0xcd   : > { %v597_v4 = vadd.f32 %v579_v48, %v488_v3 }
  0xcf   : > { %v1942_v5 = vadd.f32 %v688_v63, %v597_v4  ;;  %v1958_v4 = vld [vmem:[%s1998_s2] ss:$0 sm:$0xff] }
  0xd0   : > { %v368_v7 = vpop.f32.mrf.mxu1  ;;  %v691_v8 = vpop.f32.mrf.mxu0 }
  0xd1   : > { %v459_v6 = vpop.f32.mrf.mxu2  ;;  %v384_v10 = vadd.f32 %v368_v7, %v259_v46  ;;  %v589_v11 = vpop.f32.mrf.mxu3 }
  0xd2   : > { %v478_v39 = vrot.slane %v459_v6, 1 }
  0xd3   : > { %v489_v12 = vadd.f32 %v475_v9, %v384_v10 }
  0xd5   : > { %v598_v13 = vadd.f32 %v582_v53, %v489_v12 }
  0xd7   : > { %v1944_v14 = vadd.f32 %v691_v8, %v598_v13 }
  0xd8   : > { %v370_v16 = vpop.f32.mrf.mxu1  ;;  %v693_v17 = vpop.f32.mrf.mxu0 }
  0xd9   : > { %v462_v15 = vpop.f32.mrf.mxu2  ;;  %v385_v19 = vadd.f32 %v370_v16, %v261_v51  ;;  %v592_v20 = vpop.f32.mrf.mxu3 }
  0xda   : > { %v479_v50 = vrot.slane %v462_v15, 1 }
  0xdb   : > { %v490_v21 = vadd.f32 %v476_v18, %v385_v19 }
  0xdd   : > { %v599_v22 = vadd.f32 %v584_v57, %v490_v21 }
  0xdf   : > { %v1946_v23 = vadd.f32 %v693_v17, %v599_v22 }
  0xe0   : > { %v373_v27 = vpop.f32.mrf.mxu1  ;;  %v696_v28 = vpop.f32.mrf.mxu0 }
  0xe1   : > { %v464_v26 = vpop.f32.mrf.mxu2  ;;  %v386_v30 = vadd.f32 %v373_v27, %v264_v41  ;;  %v594_v31 = vpop.f32.mrf.mxu3 }
  0xe3   : > { %v491_v32 = vadd.f32 %v477_v29, %v386_v30 }
  0xe5   : > { %v600_v34 = vadd.f32 %v587_v2, %v491_v32 }
  0xe7   : > { %v1948_v35 = vadd.f32 %v696_v28, %v600_v34 }
  0xe8   : > { %v375_v37 = vpop.f32.mrf.mxu1  ;;  %v698_v38 = vpop.f32.mrf.mxu0 }
  0xe9   : > { %v875_v36 = vpop.f32.mrf.mxu2  ;;  %v387_v40 = vadd.f32 %v375_v37, %v266_v43  ;;  %v959_v33 = vpop.f32.mrf.mxu3 }
  0xeb   : > { %v492_v24 = vadd.f32 %v478_v39, %v387_v40 }
  0xed   : > { %v601_v42 = vadd.f32 %v589_v11, %v492_v24 }
  0xef   : > { %v1950_v44 = vadd.f32 %v698_v38, %v601_v42 }
  0xf0   : > { %v378_v46 = vpop.f32.mrf.mxu1  ;;  %v701_v48 = vpop.f32.mrf.mxu0 }
  0xf1   : > { %v876_v45 = vpop.f32.mrf.mxu2  ;;  %v388_v41 = vadd.f32 %v378_v46, %v1939_v47  ;;  %v960_v43 = vpop.f32.mrf.mxu3 }
  0xf3   : > { %v493_v51 = vadd.f32 %v479_v50, %v388_v41 }
  0xf5   : > { %v602_v52 = vadd.f32 %v592_v20, %v493_v51 }
  0xf7   : > { %v1953_v53 = vadd.f32 %v701_v48, %v602_v52 }
  0xf8   : > { %v380_v25 = vpop.f32.mrf.mxu1  ;;  %v703_v55 = vpop.f32.mrf.mxu0 }
  0xf9   : > { %v879_v54 = vpop.f32.mrf.mxu2  ;;  %v963_v61 = vpop.f32.mrf.mxu3 }
 0x100   : > { %v770_v49 = vpop.f32.mrf.mxu1  ;;  %v1043_v57 = vpop.f32.mrf.mxu0 }
 0x101   : > { %v881_v56 = vpop.f32.mrf.mxu2  ;;  %v796_v58 = vrot.slane %v770_v49, 1  ;;  %v965_v9 = vpop.f32.mrf.mxu3 }
 0x103   : > { %v810_v59 = vadd.f32 %v796_v58, %v705_v60 }
 0x105   : > { %v894_v62 = vadd.f32 %v876_v45, %v810_v59 }
 0x107   : > { %v978_v2 = vadd.f32 %v960_v43, %v894_v62 }
 0x108   : > { %v772_v0 = vpop.f32.mrf.mxu1  ;;  %v1044_v1 = vpop.f32.mrf.mxu0 }
 0x109   : > { %v884_v63 = vpop.f32.mrf.mxu2  ;;  %v797_v47 = vrot.slane %v772_v0, 1  ;;  %v1069_v3 = vrot.slane %v1044_v1, 1  ;;  %v968_v26 = vpop.f32.mrf.mxu3 }
 0x10b   : > { %v811_v6 = vadd.f32 %v797_v47, %v1942_v5  ;;  %v1083_v7 = vadd.f32 %v1069_v3, %v978_v2 }
 0x10d   : > { %v895_v8 = vadd.f32 %v879_v54, %v811_v6  ;;  %v1094_v60 = vadd.f32 %v1958_v4, %v1083_v7 }
 0x10f   : > { %v1101_v10 = vmax.f32 %v1094_v60, 0.0  ;;  %v979_v15 = vadd.f32 %v963_v61, %v895_v8 }
 0x110   : > { %v775_v12 = vpop.f32.mrf.mxu1  ;;  %v1047_v13 = vpop.f32.mrf.mxu0 }
 0x111   : > { %v886_v11 = vpop.f32.mrf.mxu2  ;;  %1109 = vst.msk [vmem:[%s1966_s6] sm:$0x7f] %vm1108_vm1, %v1101_v10  ;;  %v798_v5 = vrot.slane %v775_v12, 1  ;;  %v1070_v16 = vrot.slane %v1047_v13, 1  ;;  %v970_v45 = vpop.f32.mrf.mxu3 }
 0x113   : > { %v812_v17 = vadd.f32 %v798_v5, %v1944_v14  ;;  %v1084_v18 = vadd.f32 %v1070_v16, %v979_v15 }
 0x115   : > { %v896_v19 = vadd.f32 %v881_v56, %v812_v17  ;;  %v1095_v20 = vadd.f32 %v1958_v4, %v1084_v18 }
 0x117   : > { %v1102_v21 = vmax.f32 %v1095_v20, 0.0  ;;  %v980_v30 = vadd.f32 %v965_v9, %v896_v19 }
 0x118   : > { %v777_v27 = vpop.f32.mrf.mxu1  ;;  %v1049_v28 = vpop.f32.mrf.mxu0 }
 0x119   : > { %v889_v22 = vpop.f32.mrf.mxu2  ;;  %1110 = vst.msk [vmem:[%s1966_s6 + $0x8] sm:$0x7f] %vm1108_vm1, %v1102_v21  ;;  %v799_v29 = vrot.slane %v777_v27, 1  ;;  %v1071_v31 = vrot.slane %v1049_v28, 1  ;;  %v973_v57 = vpop.f32.mrf.mxu3 }
 0x11b   : > { %v813_v32 = vadd.f32 %v799_v29, %v1946_v23  ;;  %v1085_v34 = vadd.f32 %v1071_v31, %v980_v30 }
 0x11d   : > { %v897_v36 = vadd.f32 %v884_v63, %v813_v32  ;;  %v1096_v14 = vadd.f32 %v1958_v4, %v1085_v34 }
 0x11f   : > { %v1103_v37 = vmax.f32 %v1096_v14, 0.0  ;;  %v981_v24 = vadd.f32 %v968_v26, %v897_v36 }
 0x120   : > { %v780_v39 = vpop.f32.mrf.mxu1  ;;  %v1052_v40 = vpop.f32.mrf.mxu0 }
 0x121   : > { %v891_v38 = vpop.f32.mrf.mxu2  ;;  %1111 = vst.msk [vmem:[%s1966_s6 + $0x10] sm:$0x7f] %vm1108_vm1, %v1103_v37  ;;  %v800_v33 = vrot.slane %v780_v39, 1  ;;  %v1072_v42 = vrot.slane %v1052_v40, 1  ;;  %v975_v7 = vpop.f32.mrf.mxu3 }
 0x123   : > { %v814_v46 = vadd.f32 %v800_v33, %v1948_v35  ;;  %v1086_v48 = vadd.f32 %v1072_v42, %v981_v24 }
 0x125   : > { %v898_v50 = vadd.f32 %v886_v11, %v814_v46  ;;  %v1097_v23 = vadd.f32 %v1958_v4, %v1086_v48 }
 0x127   : > { %v1104_v41 = vmax.f32 %v1097_v23, 0.0  ;;  %v982_v25 = vadd.f32 %v970_v45, %v898_v50 }
 0x128   : > { %v782_v51 = vpop.f32.mrf.mxu1  ;;  %v1054_v52 = vpop.f32.mrf.mxu0 }
 0x129   : > { %1112 = vst.msk [vmem:[%s1966_s6 + $0x18] sm:$0x7f] %vm1108_vm1, %v1104_v41  ;;  %v801_v54 = vrot.slane %v782_v51, 1  ;;  %v1073_v55 = vrot.slane %v1054_v52, 1  ;;  %v1057_v43 = vpop.f32.mrf.mxu2 }
 0x12a   : > { %v1074_v35 = vrot.slane %v1057_v43, 1 }
 0x12b   : > { %v815_v56 = vadd.f32 %v801_v54, %v1950_v44  ;;  %v1087_v49 = vadd.f32 %v1073_v55, %v982_v25 }
 0x12d   : > { %v899_v58 = vadd.f32 %v889_v22, %v815_v56  ;;  %v1098_v59 = vadd.f32 %v1958_v4, %v1087_v49 }
 0x12f   : > { %v983_v61 = vadd.f32 %v973_v57, %v899_v58  ;;  %v1105_v62 = vmax.f32 %v1098_v59, 0.0 }
 0x130   : > { %v785_v63 = vpop.f32.mrf.mxu1 }
 0x131   : > { %v1088_v0 = vadd.f32 %v1074_v35, %v983_v61  ;;  %1113 = vst.msk [vmem:[%s1966_s6 + $0x20] sm:$0x7f] %vm1108_vm1, %v1105_v62  ;;  %v802_v1 = vrot.slane %v785_v63, 1  ;;  %v1059_v44 = vpop.f32.mrf.mxu2 }
 0x132   : > { %v1075_v8 = vrot.slane %v1059_v44, 1 }
 0x133   : > { %v1099_v47 = vadd.f32 %v1958_v4, %v1088_v0  ;;  %v816_v2 = vadd.f32 %v802_v1, %v1953_v53 }
 0x135   : > { %v1106_v3 = vmax.f32 %v1099_v47, 0.0  ;;  %v900_v6 = vadd.f32 %v891_v38, %v816_v2 }
 0x137   : > { %1114 = vst.msk [vmem:[%s1966_s6 + $0x28] sm:$0x7f] %vm1108_vm1, %v1106_v3  ;;  %v984_v60 = vadd.f32 %v975_v7, %v900_v6 }
 0x138   : > { %v787_v9 = vpop.f32.mrf.mxu1 }
 0x139   : > { %v1089_v10 = vadd.f32 %v1075_v8, %v984_v60 }
 0x13b   : > { %v1100_v11 = vadd.f32 %v1958_v4, %v1089_v10 }
 0x13d   : > { %v1107_v12 = vmax.f32 %v1100_v11, 0.0 }
 0x13f   : > { %1115 = vst.msk [vmem:[%s1966_s6 + $0x30] sm:$0x7f] %vm1108_vm1, %v1107_v12 }
 0x140 PF: > { %s13_s12 = sadd.s32 1, %s1636_s12  }
 0x141   : > { %p10_p4 = scmp.ge.s32.totalorder %s13_s12, 4  }
 0x143   :  { %12 = sbr.rel (!%p10_p4) target bundleno = 1 (0x1), region = 73 }

// kernel: inception2_forward.3
= control target key start
LH: loop header
LB: loop body
LE: loop exit
PB: predicated region body
PF: predicated region fallthrough
CT: control target
= control target key end

     0   :  { %s2023_s18 = smov 0   ;;  %s2792_s0 = inlined_call_operand.vmem [shape: f32[2,4,64,4], index: 0, kind: input, shape index: {}]   ;;  %s2793_s1 = inlined_call_operand.vmem [shape: f32[2,4,8,32], index: 1, kind: input, shape index: {}]   ;;  %s2794_s2 = inlined_call_operand.vmem [shape: bf16[9,4,384], index: 2, kind: input, shape index: {}]   ;;  %s2795_s3 = inlined_call_operand.vmem [shape: f32[1,384], index: 3, kind: input, shape index: {}]   ;;  %s2796_s4 = inlined_call_operand.vmem [shape: f32[2,7,7,384], index: 4, kind: output, shape index: {0}]   ;;  %s2797_s5 = inlined_call_operand.vmem [shape: f32[2,7,28], index: 5, kind: output, shape index: {1}]  }
   0x1 LB: > { %s1811_s19 = sadd.s32 4294967295, %s1990_s18   ;;  %p1815_p0 = scmp.ge.s32.totalorder %s1990_s18, 1  ;;  %s1990_s18 = sphi %s2023_s18, %s16_s18  }
   0x2   : > { %p200_p1 = scmp.lt.s32.totalorder %s1990_s18, 3 }
   0x4   : > { %p201_p2 = pnand %p1815_p0, %p200_p1 }
   0x5   : > { %p237_p3 = scmp.lt.s32.totalorder (!%p201_p2), %s1811_s19, 1  ;;  %s1992_s23 = smov (!%p201_p2), 124  }
   0x6   : > { %204 = sbr.rel (%p201_p2) target bundleno = 591 (0x24f), region = 36 }
   0xb   : > { %v269_v0 = vld [vmem:[%s2794_s2] sm:$0x3f]  ;;  %s2799_s19 = smov (!%p237_p3, %s1811_s19), 1  ;;  %vm288_vm0 = vcmask 1041408   ;;  %v1842_v4 = vld [vmem:[%s2794_s2 + $0x6] sm:$0x3f] }
   0xc   : > { %271 = vst [vmem:[#allocation1] ss:$4 sm:$0xff] %v269_v0  ;;  %s1969_s22 = sshll.u32 %s2799_s19, 8  ;;  %vm275_vm1 = vcmask 31744   ;;  %v1856_v14 = vld [vmem:[%s2794_s2 + $0xc] sm:$0x3f] }
   0xd   : > { %s2040_s25 = scalar_lea.vmem %s2792_s0, %s1969_s22  ;;  %v1877_v28 = vld [vmem:[%s2794_s2 + $0x12] sm:$0x3f]  ;;  %v1899_v51 = vld [vmem:[%s2794_s2 + $0x18] sm:$0x3f]  ;;  %s1970_s17 = sshll.u32 %s2799_s19, 5  ;;  %vm1711_vm2 = vcmask 227328  }
   0xe   : > { %v257_v1 = vld [vmem:[%s2040_s25] sm:$0xff]  ;;  %v258_v2 = vld [vmem:[%s2040_s25 + $0x8] sm:$0xff]  ;;  %v259_v3 = vld [vmem:[%s2040_s25 + $0x10] sm:$0xff]  ;;  %s2591_s22 = scalar_lea.vmem %s2793_s1, %s1970_s17  ;;  %s1974_s26 = smul.u32 168, %s2799_s19 }
   0xf   : > { %v260_v5 = vld [vmem:[%s2040_s25 + $0x18] sm:$0xff]  ;;  %v2051_v11 = vpack.c.bf16 %v258_v2, %v257_v1  ;;  %v261_v20 = vld [vmem:[%s2040_s25 + $0x20] sm:$0xff]  ;;  %v262_v21 = vld [vmem:[%s2040_s25 + $0x28] sm:$0xff]  ;;  %s1821_s30 = sshll.u32 %s2799_s19, 3 }
  0x10   : > { %v2053_v12 = vpack.c.bf16 %v260_v5, %v259_v3  ;;  %v2071_v22 = vpack.c.bf16 %v262_v21, %v261_v20  ;;  %v263_v30 = vld [vmem:[%s2040_s25 + $0x30] sm:$0xff]  ;;  %v264_v31 = vld [vmem:[%s2040_s25 + $0x38] sm:$0xff]  ;;  %v1834_v38 = vld [vmem:[%s2040_s25 + $0x40] sm:$0xff]  ;;  %s2702_s29 = scalar_lea.vmem %s2796_s4, %s1974_s26  ;;  %s255_s7 = scalar_lea.vmem %s2797_s5, %s1821_s30 }
  0x11   : > { %v2090_v34 = vpack.c.bf16 %v264_v31, %v263_v30  ;;  %v1835_v39 = vld [vmem:[%s2040_s25 + $0x48] sm:$0xff]  ;;  %v1836_v41 = vld [vmem:[%s2040_s25 + $0x50] sm:$0xff]  ;;  %v1837_v42 = vld [vmem:[%s2040_s25 + $0x58] sm:$0xff] }
  0x12   : > { %v2104_v40 = vpack.c.bf16 %v1835_v39, %v1834_v38  ;;  %v2116_v43 = vpack.c.bf16 %v1837_v42, %v1836_v41  ;;  %v1838_v44 = vld [vmem:[%s2040_s25 + $0x60] sm:$0xff]  ;;  %v1839_v45 = vld [vmem:[%s2040_s25 + $0x68] sm:$0xff]  ;;  %v1840_v47 = vld [vmem:[%s2040_s25 + $0x70] sm:$0xff] }
  0x13   : > { %v272_v6 = vld.sshfl [vmem:[#allocation1] sm:$0xff pattern:$0x73625140]  ;;  %v273_v7 = vld.sshfl [vmem:[#allocation1 + $0x8] sm:$0xff pattern:$0x73625140]  ;;  %v2128_v46 = vpack.c.bf16 %v1839_v45, %v1838_v44 }
  0x14   : > { %v289_v8 = vsel %vm288_vm0, %v272_v6, 0  ;;  %v291_v9 = vsel %vm288_vm0, %v273_v7, 0  ;;  %v274_v10 = vld.sshfl [vmem:[#allocation1 + $0x10] sm:$0xff pattern:$0x73625140]  ;;  %v1841_v48 = vld [vmem:[%s2040_s25 + $0x78] sm:$0xff] }
  0x15   : > { %302 = vmatpush.bf16.msra.mxu0 %v289_v8  ;;  %1971 = vmatpush.bf16.msra.mxu3 %v289_v8  ;;  %v293_v13 = vsel %vm288_vm0, %v274_v10, 0  ;;  %417 = vst [vmem:[#allocation1] ss:$4 sm:$0xff] %v1842_v4  ;;  %v2140_v49 = vpack.c.bf16 %v1841_v48, %v1840_v47  ;;  %v1869_v59 = vld [vmem:[%s2040_s25 + $0x80] sm:$0xff]  ;;  %v1870_v60 = vld [vmem:[%s2040_s25 + $0x88] sm:$0xff]  ;;  %v1871_v62 = vld [vmem:[%s2040_s25 + $0x90] sm:$0xff] }
  0x16   : > { %1972 = vmatpush.bf16.msra.mxu1 %v291_v9  ;;  %1973 = vmatpush.bf16.msra.mxu2 %v293_v13  ;;  %v2159_v61 = vpack.c.bf16 %v1870_v60, %v1869_v59  ;;  %v1872_v63 = vld [vmem:[%s2040_s25 + $0x98] sm:$0xff]  ;;  %v1873_v7 = vld [vmem:[%s2040_s25 + $0xa0] sm:$0xff]  ;;  %v1874_v8 = vld [vmem:[%s2040_s25 + $0xa8] sm:$0xff] }
  0x17   : > { %v2173_v1 = vpack.c.bf16 %v1872_v63, %v1871_v62  ;;  %v1875_v20 = vld [vmem:[%s2040_s25 + $0xb0] sm:$0xff]  ;;  %v1876_v21 = vld [vmem:[%s2040_s25 + $0xb8] sm:$0xff]  ;;  %v1891_v41 = vld [vmem:[%s2040_s25 + $0xc0] sm:$0xff] }
  0x18   : > { %1822 = vmatmul.msk.bf16.vlgmr.msra.gmra.mxu0 %vm275_vm1, %v2051_v11  ;;  %1823 = vmatmul.msk.bf16.vlgmr.msra.gmra.mxu3 %vm275_vm1, %v2053_v12  ;;  %v1892_v42 = vld [vmem:[%s2040_s25 + $0xc8] sm:$0xff] }
  0x19   : > { %330 = vmatpush.bf16.msrb.mxu0 %v291_v9  ;;  %1827 = vmatmul.msk.bf16.vlgmr.msra.gmra.mxu1 %vm275_vm1, %v2053_v12  ;;  %v889_v48 = vpack.c.bf16 %v1892_v42, %v1891_v41 }
  0x1a   : > { %1831 = vmatmul.msk.bf16.vlgmr.msra.gmra.mxu2 %vm275_vm1, %v2053_v12 }
  0x1c   : > { %v418_v15 = vld.sshfl [vmem:[#allocation1] sm:$0xff pattern:$0x73625140]  ;;  %v419_v16 = vld.sshfl [vmem:[#allocation1 + $0x8] sm:$0xff pattern:$0x73625140] }
  0x1d   : > { %358 = vmatpush.bf16.msra.mxu0 %v293_v13  ;;  %v420_v17 = vld.sshfl [vmem:[#allocation1 + $0x10] sm:$0xff pattern:$0x73625140]  ;;  %v433_v18 = vsel %vm288_vm0, %v418_v15, 0  ;;  %v435_v26 = vsel %vm288_vm0, %v419_v16, 0 }
  0x1e   : > { %446 = vmatpush.bf16.msrb.mxu3 %v433_v18  ;;  %550 = vst [vmem:[#allocation1] ss:$4 sm:$0xff] %v1856_v14  ;;  %v437_v19 = vsel %vm288_vm0, %v420_v17, 0  ;;  %v2199_v14 = vpack.c.bf16 %v1874_v8, %v1873_v7 }
  0x1f   : > { %502 = vmatpush.bf16.msrb.mxu1 %v437_v19 }
  0x25   : > { %v551_v23 = vld.sshfl [vmem:[#allocation1] sm:$0xff pattern:$0x73625140]  ;;  %v553_v25 = vld.sshfl [vmem:[#allocation1 + $0x10] sm:$0xff pattern:$0x73625140] }
  0x26   : > { %v554_v24 = vsel %vm288_vm0, %v551_v23, 0  ;;  %v552_v27 = vld.sshfl [vmem:[#allocation1 + $0x8] sm:$0xff pattern:$0x73625140]  ;;  %v558_v35 = vsel %vm288_vm0, %v553_v25, 0 }
  0x27   : > { %567 = vmatpush.bf16.msrb.mxu2 %v554_v24  ;;  %v556_v29 = vsel %vm288_vm0, %v552_v27, 0  ;;  %750 = vst [vmem:[#allocation1] ss:$4 sm:$0xff] %v1877_v28  ;;  %v1913_v28 = vld [vmem:[%s2794_s2 + $0x1e] sm:$0x3f] }
  0x28   : > { %1824 = vmatmul.msk.bf16.gmra.mxu3 %vm275_vm1, %v2071_v22  ;;  %1826 = vmatmul.msk.bf16.vlgmr.msrb.gmra.mxu0 %vm275_vm1, %v2051_v11 }
  0x29   : > { %1828 = vmatmul.msk.bf16.gmra.mxu1 %vm275_vm1, %v2071_v22  ;;  %474 = vmatpush.bf16.msrb.mxu0 %v435_v26  ;;  %v2223_v26 = vpack.c.bf16 %v1876_v21, %v1875_v20  ;;  %v1894_v20 = vld [vmem:[%s2040_s25 + $0xd8] sm:$0xff] }
  0x2a   : > { %1832 = vmatmul.msk.bf16.gmra.mxu2 %vm275_vm1, %v2071_v22  ;;  %595 = vmatpush.bf16.msra.mxu3 %v556_v29 }
  0x2e   : > { %v752_v32 = vld.sshfl [vmem:[#allocation1 + $0x8] sm:$0xff pattern:$0x73625140]  ;;  %v751_v36 = vld.sshfl [vmem:[#allocation1] sm:$0xff pattern:$0x73625140] }
  0x2f   : > { %v768_v33 = vsel %vm288_vm0, %v752_v32, 0  ;;  %v766_v37 = vsel %vm288_vm0, %v751_v36, 0  ;;  %v753_v50 = vld.sshfl [vmem:[#allocation1 + $0x10] sm:$0xff pattern:$0x73625140] }
  0x30   : > { %807 = vmatpush.bf16.msra.mxu2 %v768_v33  ;;  %779 = vmatpush.bf16.msra.mxu1 %v766_v37  ;;  %v770_v52 = vsel %vm288_vm0, %v753_v50, 0  ;;  %896 = vst [vmem:[#allocation1] ss:$4 sm:$0xff] %v1899_v51  ;;  %v1927_v33 = vld [vmem:[%s2794_s2 + $0x24] sm:$0x3f] }
  0x37   : > { %v899_v53 = vld.sshfl [vmem:[#allocation1 + $0x10] sm:$0xff pattern:$0x73625140]  ;;  %v897_v54 = vld.sshfl [vmem:[#allocation1] sm:$0xff pattern:$0x73625140] }
  0x38   : > { %1825 = vmatmul.msk.bf16.gmra.mxu3 %vm275_vm1, %v2090_v34  ;;  %1830 = vmatmul.msk.bf16.vlgmr.msra.gmra.mxu0 %vm275_vm1, %v2051_v11  ;;  %v916_v55 = vsel %vm288_vm0, %v899_v53, 0  ;;  %v912_v56 = vsel %vm288_vm0, %v897_v54, 0  ;;  %v898_v57 = vld.sshfl [vmem:[#allocation1 + $0x8] sm:$0xff pattern:$0x73625140] }
  0x39   : > { %1829 = vmatmul.msk.bf16.gmra.mxu1 %vm275_vm1, %v2090_v34  ;;  %623 = vmatpush.bf16.msra.mxu0 %v558_v35  ;;  %v914_v58 = vsel %vm288_vm0, %v898_v57, 0  ;;  %1029 = vst [vmem:[#allocation1] ss:$4 sm:$0xff] %v1913_v28 }
  0x3a   : > { %1833 = vmatmul.msk.bf16.gmra.mxu2 %vm275_vm1, %v2090_v34 }
  0x40   : > { %v1030_v35 = vld.sshfl [vmem:[#allocation1] sm:$0xff pattern:$0x73625140]  ;;  %v1031_v36 = vld.sshfl [vmem:[#allocation1 + $0x8] sm:$0xff pattern:$0x73625140] }
  0x41   : > { %v1032_v37 = vld.sshfl [vmem:[#allocation1 + $0x10] sm:$0xff pattern:$0x73625140]  ;;  %v1033_v38 = vsel %vm288_vm0, %v1030_v35, 0  ;;  %v1035_v39 = vsel %vm288_vm0, %v1031_v36, 0 }
  0x42   : > { %1216 = vst [vmem:[#allocation1] ss:$4 sm:$0xff] %v1927_v33  ;;  %v1037_v44 = vsel %vm288_vm0, %v1032_v37, 0 }
  0x48   : > { %1843 = vmatmul.msk.bf16.vlgmr.msrb.gmra.mxu3 %vm275_vm1, %v2104_v40  ;;  %1847 = vmatmul.msk.bf16.vlgmr.msrb.gmra.mxu0 %vm275_vm1, %v2104_v40 }
  0x49   : > { %1851 = vmatmul.msk.bf16.vlgmr.msrb.gmra.mxu1 %vm275_vm1, %v2104_v40  ;;  %835 = vmatpush.bf16.msrb.mxu3 %v770_v52  ;;  %v1217_v54 = vld.sshfl [vmem:[#allocation1] sm:$0xff pattern:$0x73625140] }
  0x4a   : > { %1857 = vmatmul.msk.bf16.vlgmr.msrb.gmra.mxu2 %vm275_vm1, %v2051_v11  ;;  %925 = vmatpush.bf16.msrb.mxu0 %v912_v56 }
  0x4b   : > { %981 = vmatpush.bf16.msrb.mxu2 %v916_v55  ;;  %953 = vmatpush.bf16.msrb.mxu1 %v914_v58  ;;  %v1220_v55 = vsel %vm288_vm0, %v1217_v54, 0 }
  0x58   : > { %1844 = vmatmul.msk.bf16.gmra.mxu3 %vm275_vm1, %v2116_v43  ;;  %1848 = vmatmul.msk.bf16.gmra.mxu0 %vm275_vm1, %v2116_v43 }
  0x59   : > { %1852 = vmatmul.msk.bf16.gmra.mxu1 %vm275_vm1, %v2116_v43 }
  0x5a   : > { %1858 = vmatmul.msk.bf16.gmra.mxu2 %vm275_vm1, %v2053_v12 }
  0x68   : > { %1845 = vmatmul.msk.bf16.gmra.mxu3 %vm275_vm1, %v2128_v46  ;;  %1849 = vmatmul.msk.bf16.gmra.mxu0 %vm275_vm1, %v2128_v46 }
  0x69   : > { %1853 = vmatmul.msk.bf16.gmra.mxu1 %vm275_vm1, %v2128_v46 }
  0x6a   : > { %1859 = vmatmul.msk.bf16.gmra.mxu2 %vm275_vm1, %v2071_v22 }
  0x78   : > { %1846 = vmatmul.msk.bf16.gmra.mxu3 %vm275_vm1, %v2140_v49  ;;  %1850 = vmatmul.msk.bf16.gmra.mxu0 %vm275_vm1, %v2140_v49 }
  0x79   : > { %1854 = vmatmul.msk.bf16.gmra.mxu1 %vm275_vm1, %v2140_v49 }
  0x7a   : > { %1860 = vmatmul.msk.bf16.gmra.mxu2 %vm275_vm1, %v2090_v34 }
  0x88   : > { %1861 = vmatmul.msk.bf16.vlgmr.msra.gmra.mxu3 %vm275_vm1, %v2051_v11  ;;  %1865 = vmatmul.msk.bf16.vlgmr.msra.gmra.mxu0 %vm275_vm1, %v2051_v11 }
  0x89   : > { %1878 = vmatmul.msk.bf16.vlgmr.msra.gmra.mxu1 %vm275_vm1, %v2159_v61  ;;  %1046 = vmatpush.bf16.msra.mxu3 %v1033_v38 }
  0x8a   : > { %1882 = vmatmul.msk.bf16.vlgmr.msra.gmra.mxu2 %vm275_vm1, %v2159_v61  ;;  %1074 = vmatpush.bf16.msra.mxu0 %v1035_v39 }
  0x8b   : > { %1102 = vmatpush.bf16.msra.mxu1 %v1037_v44  ;;  %1233 = vmatpush.bf16.msra.mxu2 %v1220_v55 }
  0x95   : > { %v2171_v0 = vpop.f32.mrf.mxu0 }
  0x96   : > { %v2175_v2 = vpop.f32.mrf.mxu1 }
  0x98   : > { %1862 = vmatmul.msk.bf16.gmra.mxu3 %vm275_vm1, %v2053_v12  ;;  %1866 = vmatmul.msk.bf16.gmra.mxu0 %vm275_vm1, %v2053_v12 }
  0x99   : > { %1879 = vmatmul.msk.bf16.gmra.mxu1 %vm275_vm1, %v2173_v1 }
  0x9a   : > { %1883 = vmatmul.msk.bf16.gmra.mxu2 %vm275_vm1, %v2173_v1 }
  0x9b   : > { %v2185_v3 = vpop.f32.mrf.mxu3 }
  0x9d   : > { %v2187_v4 = vpop.f32.mrf.mxu2  ;;  %v2189_v5 = vpop.f32.mrf.mxu0 }
  0x9e   : > { %v2191_v6 = vpop.f32.mrf.mxu1 }
  0xa3   : > { %v2195_v9 = vpop.f32.mrf.mxu3 }
  0xa5   : > { %v2197_v10 = vpop.f32.mrf.mxu2  ;;  %v332_v13 = vpop.f32.mrf.mxu0 }
  0xa6   : > { %v2201_v15 = vpop.f32.mrf.mxu1 }
  0xa8   : > { %1863 = vmatmul.msk.bf16.gmra.mxu3 %vm275_vm1, %v2071_v22  ;;  %1867 = vmatmul.msk.bf16.gmra.mxu0 %vm275_vm1, %v2071_v22 }
  0xa9   : > { %1880 = vmatmul.msk.bf16.gmra.mxu1 %vm275_vm1, %v2199_v14 }
  0xaa   : > { %1884 = vmatmul.msk.bf16.gmra.mxu2 %vm275_vm1, %v2199_v14 }
  0xab   : > { %v2211_v16 = vpop.f32.mrf.mxu3 }
  0xad   : > { %v2213_v17 = vpop.f32.mrf.mxu2  ;;  %v334_v18 = vpop.f32.mrf.mxu0 }
  0xae   : > { %v2215_v19 = vpop.f32.mrf.mxu1 }
  0xb3   : > { %v2219_v23 = vpop.f32.mrf.mxu3 }
  0xb5   : > { %v2221_v24 = vpop.f32.mrf.mxu2  ;;  %v360_v25 = vpop.f32.mrf.mxu0 }
  0xb6   : > { %v2225_v27 = vpop.f32.mrf.mxu1 }
  0xb8   : > { %1864 = vmatmul.msk.bf16.gmra.mxu3 %vm275_vm1, %v2090_v34  ;;  %1868 = vmatmul.msk.bf16.gmra.mxu0 %vm275_vm1, %v2090_v34 }
  0xb9   : > { %1881 = vmatmul.msk.bf16.gmra.mxu1 %vm275_vm1, %v2223_v26 }
  0xba   : > { %1885 = vmatmul.msk.bf16.gmra.mxu2 %vm275_vm1, %v2223_v26 }
  0xbb   : > { %v2238_v29 = vpop.f32.mrf.mxu3 }
  0xbd   : > { %v2240_v30 = vpop.f32.mrf.mxu2  ;;  %v362_v31 = vpop.f32.mrf.mxu0 }
  0xbe   : > { %v349_v32 = vpop.f32.mrf.mxu1 }
  0xc3   : > { %v321_v45 = vpop.f32.mrf.mxu3 }
  0xc4   : > { %v1895_v45 = vld [vmem:[%s2040_s25 + $0xe0] sm:$0xff] }
  0xc5   : > { %v377_v47 = vpop.f32.mrf.mxu2  ;;  %v476_v50 = vpop.f32.mrf.mxu0 }
  0xc6   : > { %v2250_v51 = vadd.f32 %v476_v50, %v332_v13  ;;  %v504_v52 = vpop.f32.mrf.mxu1  ;;  %v1893_v13 = vld [vmem:[%s2040_s25 + $0xd0] sm:$0xff]  ;;  %v1896_v47 = vld [vmem:[%s2040_s25 + $0xe8] sm:$0xff] }
  0xc7   : > { %v2252_v53 = vadd.f32 %v504_v52, %v360_v25  ;;  %v890_v32 = vpack.c.bf16 %v1894_v20, %v1893_v13  ;;  %v891_v54 = vpack.c.bf16 %v1896_v47, %v1895_v45 }
  0xc8   : > { %1886 = vmatmul.msk.bf16.vlgmr.msrb.gmra.mxu3 %vm275_vm1, %v2159_v61  ;;  %1900 = vmatmul.msk.bf16.vlgmr.msrb.gmra.mxu0 %vm275_vm1, %v889_v48 }
  0xc9   : > { %1904 = vmatmul.msk.bf16.vlgmr.msrb.gmra.mxu1 %vm275_vm1, %v889_v48 }
  0xca   : > { %1908 = vmatmul.msk.bf16.vlgmr.msrb.gmra.mxu2 %vm275_vm1, %v889_v48 }
  0xcb   : > { %v448_v56 = vpop.f32.mrf.mxu3 }
  0xcc   : > { %v523_v57 = vadd.f32 %v448_v56, %v2171_v0 }
  0xcd   : > { %v569_v58 = vpop.f32.mrf.mxu2  ;;  %v478_v60 = vpop.f32.mrf.mxu0 }
  0xce   : > { %v665_v59 = vrot.slane %v569_v58, 1  ;;  %v2261_v62 = vadd.f32 %v478_v60, %v334_v18  ;;  %v506_v63 = vpop.f32.mrf.mxu1 }
  0xcf   : > { %v2263_v7 = vadd.f32 %v506_v63, %v362_v31 }
  0xd0   : > { %v2265_v8 = vadd.f32 %v665_v59, %v523_v57 }
  0xd3   : > { %v450_v21 = vpop.f32.mrf.mxu3 }
  0xd4   : > { %v526_v25 = vadd.f32 %v450_v21, %v2189_v5  ;;  %v1897_v21 = vld [vmem:[%s2040_s25 + $0xf0] sm:$0xff] }
  0xd5   : > { %v571_v28 = vpop.f32.mrf.mxu2  ;;  %v481_v35 = vpop.f32.mrf.mxu0 }
  0xd6   : > { %v668_v33 = vrot.slane %v571_v28, 1  ;;  %v2271_v0 = vadd.f32 %v481_v35, %v2175_v2  ;;  %v509_v36 = vpop.f32.mrf.mxu1 }
  0xd7   : > { %v2274_v18 = vadd.f32 %v509_v36, %v2187_v4 }
  0xd8   : > { %v2276_v31 = vadd.f32 %v668_v33, %v526_v25  ;;  %1887 = vmatmul.msk.bf16.gmra.mxu3 %vm275_vm1, %v2173_v1  ;;  %1901 = vmatmul.msk.bf16.gmra.mxu0 %vm275_vm1, %v890_v32  ;;  %v1898_v25 = vld [vmem:[%s2040_s25 + $0xf8] sm:$0xff] }
  0xd9   : > { %1905 = vmatmul.msk.bf16.gmra.mxu1 %vm275_vm1, %v890_v32  ;;  %v892_v35 = vpack.c.bf16 %v1898_v25, %v1897_v21 }
  0xda   : > { %1909 = vmatmul.msk.bf16.gmra.mxu2 %vm275_vm1, %v890_v32 }
  0xdb   : > { %v453_v5 = vpop.f32.mrf.mxu3 }
  0xdc   : > { %v529_v2 = vadd.f32 %v453_v5, %v2185_v3  ;;  %v1219_v5 = vld.sshfl [vmem:[#allocation1 + $0x10] sm:$0xff pattern:$0x73625140] }
  0xdd   : > { %v574_v37 = vpop.f32.mrf.mxu2  ;;  %v483_v39 = vpop.f32.mrf.mxu0 }
  0xde   : > { %v671_v38 = vrot.slane %v574_v37, 1  ;;  %v2285_v4 = vadd.f32 %v483_v39, %v2191_v6  ;;  %v511_v41 = vpop.f32.mrf.mxu1 }
  0xdf   : > { %v2288_v42 = vadd.f32 %v511_v41, %v2197_v10 }
  0xe0   : > { %v2290_v44 = vadd.f32 %v671_v38, %v529_v2  ;;  %v1940_v38 = vld [vmem:[%s2794_s2 + $0x2a] sm:$0x3f] }
  0xe3   : > { %v455_v48 = vpop.f32.mrf.mxu3 }
  0xe4   : > { %v532_v50 = vadd.f32 %v455_v48, %v2195_v9 }
  0xe5   : > { %v576_v52 = vpop.f32.mrf.mxu2  ;;  %v486_v55 = vpop.f32.mrf.mxu0 }
  0xe6   : > { %v674_v3 = vrot.slane %v576_v52, 1  ;;  %v2296_v56 = vadd.f32 %v486_v55, %v2201_v15  ;;  %v514_v6 = vpop.f32.mrf.mxu1 }
  0xe7   : > { %v2299_v57 = vadd.f32 %v514_v6, %v2213_v17 }
  0xe8   : > { %v2301_v10 = vadd.f32 %v674_v3, %v532_v50  ;;  %1888 = vmatmul.msk.bf16.gmra.mxu3 %vm275_vm1, %v2199_v14  ;;  %1902 = vmatmul.msk.bf16.gmra.mxu0 %vm275_vm1, %v891_v54 }
  0xe9   : > { %1906 = vmatmul.msk.bf16.gmra.mxu1 %vm275_vm1, %v891_v54 }
  0xea   : > { %1910 = vmatmul.msk.bf16.gmra.mxu2 %vm275_vm1, %v891_v54  ;;  %v1224_v54 = vsel %vm288_vm0, %v1219_v5, 0 }
  0xeb   : > { %v458_v9 = vpop.f32.mrf.mxu3  ;;  %1289 = vmatpush.bf16.msrb.mxu0 %v1224_v54 }
  0xec   : > { %v535_v15 = vadd.f32 %v458_v9, %v2211_v16 }
  0xed   : > { %v579_v58 = vpop.f32.mrf.mxu2  ;;  %v488_v60 = vpop.f32.mrf.mxu0 }
  0xee   : > { %v677_v59 = vrot.slane %v579_v58, 1  ;;  %v2310_v17 = vadd.f32 %v488_v60, %v2215_v19  ;;  %v516_v63 = vpop.f32.mrf.mxu1 }
  0xef   : > { %v2313_v13 = vadd.f32 %v516_v63, %v2221_v24 }
  0xf0   : > { %v2315_v20 = vadd.f32 %v677_v59, %v535_v15 }
  0xf3   : > { %v460_v28 = vpop.f32.mrf.mxu3 }
  0xf4   : > { %v538_v32 = vadd.f32 %v460_v28, %v2219_v23  ;;  %v1218_v23 = vld.sshfl [vmem:[#allocation1 + $0x8] sm:$0xff pattern:$0x73625140] }
  0xf5   : > { %v581_v33 = vpop.f32.mrf.mxu2  ;;  %v491_v36 = vpop.f32.mrf.mxu0  ;;  %1336 = vst [vmem:[#allocation1] ss:$4 sm:$0xff] %v1940_v38 }
  0xf6   : > { %v680_v16 = vrot.slane %v581_v33, 1  ;;  %v2321_v2 = vadd.f32 %v491_v36, %v2225_v27  ;;  %v519_v19 = vpop.f32.mrf.mxu1  ;;  %v1222_v27 = vsel %vm288_vm0, %v1218_v23, 0 }
  0xf7   : > { %v2324_v37 = vadd.f32 %v519_v19, %v2240_v30  ;;  %1261 = vmatpush.bf16.msrb.mxu3 %v1222_v27 }
  0xf8   : > { %v2326_v24 = vadd.f32 %v680_v16, %v538_v32  ;;  %1889 = vmatmul.msk.bf16.gmra.mxu3 %vm275_vm1, %v2223_v26  ;;  %1903 = vmatmul.msk.bf16.gmra.mxu0 %vm275_vm1, %v892_v35 }
  0xf9   : > { %1907 = vmatmul.msk.bf16.gmra.mxu1 %vm275_vm1, %v892_v35 }
  0xfa   : > { %1911 = vmatmul.msk.bf16.gmra.mxu2 %vm275_vm1, %v892_v35 }
  0xfb   : > { %v463_v30 = vpop.f32.mrf.mxu3 }
  0xfc   : > { %v541_v39 = vadd.f32 %v463_v30, %v2238_v29  ;;  %v1338_v52 = vld.sshfl [vmem:[#allocation1 + $0x8] sm:$0xff pattern:$0x73625140]  ;;  %v1337_v55 = vld.sshfl [vmem:[#allocation1] sm:$0xff pattern:$0x73625140] }
  0xfd   : > { %v584_v41 = vpop.f32.mrf.mxu2  ;;  %v493_v47 = vpop.f32.mrf.mxu0  ;;  %v1342_v3 = vsel %vm288_vm0, %v1338_v52, 0  ;;  %v1340_v6 = vsel %vm288_vm0, %v1337_v55, 0 }
  0xfe   : > { %v683_v45 = vrot.slane %v584_v41, 1  ;;  %v521_v48 = vpop.f32.mrf.mxu1  ;;  %1381 = vmatpush.bf16.msrb.mxu2 %v1342_v3  ;;  %1353 = vmatpush.bf16.msrb.mxu1 %v1340_v6 }
 0x100   : > { %v2338_v50 = vadd.f32 %v683_v45, %v541_v39 }
 0x103   : > { %v465_v9 = vpop.f32.mrf.mxu3 }
 0x105   : > { %v586_v15 = vpop.f32.mrf.mxu2  ;;  %v625_v29 = vpop.f32.mrf.mxu0 }
 0x106   : > { %v667_v58 = vrot.slane %v625_v29, 1  ;;  %v781_v59 = vpop.f32.mrf.mxu1 }
 0x107   : > { %v2344_v60 = vadd.f32 %v781_v59, %v2265_v8 }
 0x108   : > { %1914 = vmatmul.msk.bf16.vlgmr.msra.gmra.mxu3 %vm275_vm1, %v2159_v61  ;;  %1918 = vmatmul.msk.bf16.vlgmr.msra.gmra.mxu0 %vm275_vm1, %v2159_v61  ;;  %v2351_v63 = vadd.f32 %v667_v58, %v2252_v53 }
 0x109   : > { %1922 = vmatmul.msk.bf16.vlgmr.msra.gmra.mxu1 %vm275_vm1, %v2159_v61 }
 0x10a   : > { %1928 = vmatmul.msk.bf16.vlgmr.msra.gmra.mxu2 %vm275_vm1, %v2051_v11 }
 0x10b   : > { %v597_v21 = vpop.f32.mrf.mxu3 }
 0x10c   : > { %v666_v25 = vrot.slane %v597_v21, 1 }
 0x10d   : > { %v809_v28 = vpop.f32.mrf.mxu2  ;;  %v627_v8 = vpop.f32.mrf.mxu0 }
 0x10e   : > { %v708_v32 = vadd.f32 %v666_v25, %v2250_v51  ;;  %v670_v33 = vrot.slane %v627_v8, 1  ;;  %v783_v35 = vpop.f32.mrf.mxu1 }
 0x10f   : > { %v2359_v16 = vadd.f32 %v783_v35, %v2276_v31 }
 0x110   : > { %v2361_v36 = vadd.f32 %v809_v28, %v708_v32  ;;  %v2364_v53 = vadd.f32 %v670_v33, %v2263_v7 }
 0x113   : > { %v599_v61 = vpop.f32.mrf.mxu3 }
 0x114   : > { %v669_v5 = vrot.slane %v599_v61, 1 }
 0x115   : > { %v811_v19 = vpop.f32.mrf.mxu2  ;;  %v630_v23 = vpop.f32.mrf.mxu0 }
 0x116   : > { %v711_v38 = vadd.f32 %v669_v5, %v2261_v62  ;;  %v673_v27 = vrot.slane %v630_v23, 1  ;;  %v786_v30 = vpop.f32.mrf.mxu1 }
 0x117   : > { %v2368_v51 = vadd.f32 %v786_v30, %v2290_v44 }
 0x118   : > { %v2370_v39 = vadd.f32 %v811_v19, %v711_v38  ;;  %1915 = vmatmul.msk.bf16.gmra.mxu3 %vm275_vm1, %v2173_v1  ;;  %1919 = vmatmul.msk.bf16.gmra.mxu0 %vm275_vm1, %v2173_v1  ;;  %v2377_v7 = vadd.f32 %v673_v27, %v2274_v18  ;;  %v1339_v38 = vld.sshfl [vmem:[#allocation1 + $0x10] sm:$0xff pattern:$0x73625140] }
 0x119   : > { %1923 = vmatmul.msk.bf16.gmra.mxu1 %vm275_vm1, %v2173_v1 }
 0x11a   : > { %1929 = vmatmul.msk.bf16.gmra.mxu2 %vm275_vm1, %v2053_v12 }
 0x11b   : > { %v602_v62 = vpop.f32.mrf.mxu3 }
 0x11c   : > { %v672_v31 = vrot.slane %v602_v62, 1 }
 0x11d   : > { %v814_v44 = vpop.f32.mrf.mxu2  ;;  %v632_v41 = vpop.f32.mrf.mxu0 }
 0x11e   : > { %v714_v45 = vadd.f32 %v672_v31, %v2271_v0  ;;  %v676_v47 = vrot.slane %v632_v41, 1  ;;  %v788_v48 = vpop.f32.mrf.mxu1 }
 0x11f   : > { %v2385_v52 = vadd.f32 %v788_v48, %v2301_v10 }
 0x120   : > { %v2387_v54 = vadd.f32 %v814_v44, %v714_v45  ;;  %v2390_v18 = vadd.f32 %v676_v47, %v2288_v42 }
 0x123   : > { %v604_v1 = vpop.f32.mrf.mxu3 }
 0x124   : > { %v675_v3 = vrot.slane %v604_v1, 1 }
 0x125   : > { %v816_v55 = vpop.f32.mrf.mxu2  ;;  %v635_v6 = vpop.f32.mrf.mxu0 }
 0x126   : > { %v717_v9 = vadd.f32 %v675_v3, %v2285_v4  ;;  %v679_v15 = vrot.slane %v635_v6, 1  ;;  %v791_v29 = vpop.f32.mrf.mxu1 }
 0x127   : > { %v2394_v0 = vadd.f32 %v791_v29, %v2315_v20 }
 0x128   : > { %v2396_v58 = vadd.f32 %v816_v55, %v717_v9  ;;  %1916 = vmatmul.msk.bf16.gmra.mxu3 %vm275_vm1, %v2199_v14  ;;  %1920 = vmatmul.msk.bf16.gmra.mxu0 %vm275_vm1, %v2199_v14  ;;  %v2403_v42 = vadd.f32 %v679_v15, %v2299_v57 }
 0x129   : > { %1924 = vmatmul.msk.bf16.gmra.mxu1 %vm275_vm1, %v2199_v14 }
 0x12a   : > { %1930 = vmatmul.msk.bf16.gmra.mxu2 %vm275_vm1, %v2071_v22 }
 0x12b   : > { %v607_v4 = vpop.f32.mrf.mxu3 }
 0x12c   : > { %v678_v10 = vrot.slane %v607_v4, 1 }
 0x12d   : > { %v819_v20 = vpop.f32.mrf.mxu2  ;;  %v637_v59 = vpop.f32.mrf.mxu0 }
 0x12e   : > { %v720_v21 = vadd.f32 %v678_v10, %v2296_v56  ;;  %v682_v25 = vrot.slane %v637_v59, 1  ;;  %v793_v28 = vpop.f32.mrf.mxu1 }
 0x12f   : > { %v2411_v8 = vadd.f32 %v793_v28, %v2326_v24  ;;  %v1954_v24 = vld [vmem:[%s2794_s2 + $0x30] sm:$0x3f] }
 0x130   : > { %v2413_v32 = vadd.f32 %v819_v20, %v720_v21  ;;  %v2416_v57 = vadd.f32 %v682_v25, %v2313_v13  ;;  %1456 = vst [vmem:[#allocation1] ss:$4 sm:$0xff] %v1954_v24 }
 0x133   : > { %v609_v14 = vpop.f32.mrf.mxu3 }
 0x134   : > { %v681_v33 = vrot.slane %v609_v14, 1 }
 0x135   : > { %v821_v35 = vpop.f32.mrf.mxu2  ;;  %v640_v61 = vpop.f32.mrf.mxu0 }
 0x136   : > { %v723_v5 = vadd.f32 %v681_v33, %v2310_v17  ;;  %v685_v19 = vrot.slane %v640_v61, 1  ;;  %v796_v23 = vpop.f32.mrf.mxu1  ;;  %v1344_v17 = vsel %vm288_vm0, %v1339_v38, 0 }
 0x137   : > { %v2420_v56 = vadd.f32 %v796_v23, %v2338_v50  ;;  %1409 = vmatpush.bf16.msra.mxu3 %v1344_v17  ;;  %v1459_v45 = vld.sshfl [vmem:[#allocation1 + $0x10] sm:$0xff pattern:$0x73625140]  ;;  %v1457_v47 = vld.sshfl [vmem:[#allocation1] sm:$0xff pattern:$0x73625140] }
 0x138   : > { %v2425_v27 = vadd.f32 %v821_v35, %v723_v5  ;;  %1917 = vmatmul.msk.bf16.gmra.mxu3 %vm275_vm1, %v2223_v26  ;;  %1921 = vmatmul.msk.bf16.gmra.mxu0 %vm275_vm1, %v2223_v26  ;;  %v2433_v13 = vadd.f32 %v685_v19, %v2324_v37  ;;  %v1464_v37 = vsel %vm288_vm0, %v1459_v45, 0  ;;  %v1460_v1 = vsel %vm288_vm0, %v1457_v47, 0 }
 0x139   : > { %1925 = vmatmul.msk.bf16.gmra.mxu1 %vm275_vm1, %v2223_v26  ;;  %v1458_v26 = vld.sshfl [vmem:[#allocation1 + $0x8] sm:$0xff pattern:$0x73625140]  ;;  %1529 = vmatpush.bf16.msra.mxu2 %v1464_v37 }
 0x13a   : > { %1931 = vmatmul.msk.bf16.gmra.mxu2 %vm275_vm1, %v2090_v34  ;;  %1473 = vmatpush.bf16.msra.mxu0 %v1460_v1  ;;  %v1462_v3 = vsel %vm288_vm0, %v1458_v26, 0 }
 0x13b   : > { %v612_v50 = vpop.f32.mrf.mxu3  ;;  %1501 = vmatpush.bf16.msra.mxu1 %v1462_v3 }
 0x13c   : > { %v684_v30 = vrot.slane %v612_v50, 1 }
 0x13d   : > { %v824_v62 = vpop.f32.mrf.mxu2  ;;  %v642_v31 = vpop.f32.mrf.mxu0 }
 0x13e   : > { %v726_v44 = vadd.f32 %v684_v30, %v2321_v2  ;;  %v798_v41 = vpop.f32.mrf.mxu1 }
 0x140   : > { %v2440_v48 = vadd.f32 %v824_v62, %v726_v44 }
 0x143   : > { %v614_v55 = vpop.f32.mrf.mxu3 }
 0x145   : > { %v826_v6 = vpop.f32.mrf.mxu2  ;;  %v927_v9 = vpop.f32.mrf.mxu0 }
 0x146   : > { %v2446_v2 = vadd.f32 %v927_v9, %v2344_v60  ;;  %v955_v15 = vpop.f32.mrf.mxu1 }
 0x147   : > { %v2449_v29 = vadd.f32 %v955_v15, %v2361_v36 }
 0x148   : > { %1932 = vmatmul.msk.bf16.vlgmr.msrb.gmra.mxu3 %vm275_vm1, %v2051_v11  ;;  %1936 = vmatmul.msk.bf16.vlgmr.msrb.gmra.mxu0 %vm275_vm1, %v2051_v11 }
 0x149   : > { %1941 = vmatmul.msk.bf16.vlgmr.msrb.gmra.mxu1 %vm275_vm1, %v2104_v40 }
 0x14a   : > { %1945 = vmatmul.msk.bf16.vlgmr.msrb.gmra.mxu2 %vm275_vm1, %v2104_v40 }
 0x14b   : > { %v837_v4 = vpop.f32.mrf.mxu3 }
 0x14c   : > { %v858_v60 = vadd.f32 %v837_v4, %v2351_v63 }
 0x14d   : > { %v983_v10 = vpop.f32.mrf.mxu2  ;;  %v929_v20 = vpop.f32.mrf.mxu0 }
 0x14e   : > { %v2460_v59 = vadd.f32 %v983_v10, %v858_v60  ;;  %v2463_v36 = vadd.f32 %v929_v20, %v2359_v16  ;;  %v957_v21 = vpop.f32.mrf.mxu1 }
 0x14f   : > { %v2466_v25 = vadd.f32 %v957_v21, %v2370_v39 }
 0x153   : > { %v839_v28 = vpop.f32.mrf.mxu3 }
 0x154   : > { %v861_v14 = vadd.f32 %v839_v28, %v2364_v53 }
 0x155   : > { %v985_v33 = vpop.f32.mrf.mxu2  ;;  %v932_v35 = vpop.f32.mrf.mxu0 }
 0x156   : > { %v2469_v61 = vadd.f32 %v985_v33, %v861_v14  ;;  %v2472_v63 = vadd.f32 %v932_v35, %v2368_v51  ;;  %v960_v5 = vpop.f32.mrf.mxu1 }
 0x157   : > { %v2475_v19 = vadd.f32 %v960_v5, %v2387_v54 }
 0x158   : > { %1933 = vmatmul.msk.bf16.gmra.mxu3 %vm275_vm1, %v2053_v12  ;;  %1937 = vmatmul.msk.bf16.gmra.mxu0 %vm275_vm1, %v2053_v12 }
 0x159   : > { %1942 = vmatmul.msk.bf16.gmra.mxu1 %vm275_vm1, %v2116_v43 }
 0x15a   : > { %1946 = vmatmul.msk.bf16.gmra.mxu2 %vm275_vm1, %v2116_v43 }
 0x15b   : > { %v842_v16 = vpop.f32.mrf.mxu3 }
 0x15c   : > { %v864_v53 = vadd.f32 %v842_v16, %v2377_v7 }
 0x15d   : > { %v988_v51 = vpop.f32.mrf.mxu2  ;;  %v934_v39 = vpop.f32.mrf.mxu0 }
 0x15e   : > { %v2486_v23 = vadd.f32 %v988_v51, %v864_v53  ;;  %v2489_v54 = vadd.f32 %v934_v39, %v2385_v52  ;;  %v962_v38 = vpop.f32.mrf.mxu1 }
 0x15f   : > { %v2492_v24 = vadd.f32 %v962_v38, %v2396_v58 }
 0x163   : > { %v844_v17 = vpop.f32.mrf.mxu3 }
 0x164   : > { %v867_v50 = vadd.f32 %v844_v17, %v2390_v18 }
 0x165   : > { %v990_v30 = vpop.f32.mrf.mxu2  ;;  %v937_v62 = vpop.f32.mrf.mxu0 }
 0x166   : > { %v2495_v31 = vadd.f32 %v990_v30, %v867_v50  ;;  %v2498_v7 = vadd.f32 %v937_v62, %v2394_v0  ;;  %v965_v44 = vpop.f32.mrf.mxu1 }
 0x167   : > { %v2501_v41 = vadd.f32 %v965_v44, %v2413_v32 }
 0x168   : > { %1934 = vmatmul.msk.bf16.gmra.mxu3 %vm275_vm1, %v2071_v22  ;;  %1938 = vmatmul.msk.bf16.gmra.mxu0 %vm275_vm1, %v2071_v22 }
 0x169   : > { %1943 = vmatmul.msk.bf16.gmra.mxu1 %vm275_vm1, %v2128_v46 }
 0x16a   : > { %1947 = vmatmul.msk.bf16.gmra.mxu2 %vm275_vm1, %v2128_v46 }
 0x16b   : > { %v847_v52 = vpop.f32.mrf.mxu3 }
 0x16c   : > { %v870_v18 = vadd.f32 %v847_v52, %v2403_v42 }
 0x16d   : > { %v993_v0 = vpop.f32.mrf.mxu2  ;;  %v939_v58 = vpop.f32.mrf.mxu0 }
 0x16e   : > { %v2512_v45 = vadd.f32 %v993_v0, %v870_v18  ;;  %v2515_v32 = vadd.f32 %v939_v58, %v2411_v8  ;;  %v967_v47 = vpop.f32.mrf.mxu1 }
 0x16f   : > { %v2518_v37 = vadd.f32 %v967_v47, %v2425_v27 }
 0x173   : > { %v849_v1 = vpop.f32.mrf.mxu3 }
 0x174   : > { %v873_v26 = vadd.f32 %v849_v1, %v2416_v57 }
 0x175   : > { %v995_v3 = vpop.f32.mrf.mxu2  ;;  %v942_v55 = vpop.f32.mrf.mxu0 }
 0x176   : > { %v2521_v6 = vadd.f32 %v995_v3, %v873_v26  ;;  %v2524_v42 = vadd.f32 %v942_v55, %v2420_v56  ;;  %v970_v9 = vpop.f32.mrf.mxu1 }
 0x177   : > { %v2527_v15 = vadd.f32 %v970_v9, %v2440_v48 }
 0x178   : > { %1935 = vmatmul.msk.bf16.gmra.mxu3 %vm275_vm1, %v2090_v34  ;;  %1939 = vmatmul.msk.bf16.gmra.mxu0 %vm275_vm1, %v2090_v34 }
 0x179   : > { %1944 = vmatmul.msk.bf16.gmra.mxu1 %vm275_vm1, %v2140_v49 }
 0x17a   : > { %1948 = vmatmul.msk.bf16.gmra.mxu2 %vm275_vm1, %v2140_v49 }
 0x17b   : > { %v852_v8 = vpop.f32.mrf.mxu3 }
 0x17c   : > { %v876_v57 = vadd.f32 %v852_v8, %v2433_v13 }
 0x17d   : > { %v998_v56 = vpop.f32.mrf.mxu2  ;;  %v944_v27 = vpop.f32.mrf.mxu0 }
 0x17e   : > { %v2538_v4 = vadd.f32 %v998_v56, %v876_v57  ;;  %v972_v48 = vpop.f32.mrf.mxu1 }
 0x183   : > { %v854_v60 = vpop.f32.mrf.mxu3 }
 0x184   : > { %v728_v60 = vld [vmem:[%s2591_s22] sm:$0x7f] }
 0x185   : > { %v1000_v10 = vpop.f32.mrf.mxu2  ;;  %v1076_v20 = vpop.f32.mrf.mxu0  ;;  %730 = vrot.lane.b32.xlu0 %v728_v60, %s1992_s23 }
 0x186   : > { %v1145_v21 = vrot.slane %v1076_v20, 1  ;;  %v1104_v28 = vpop.f32.mrf.mxu1 }
 0x187   : > { %v1146_v14 = vrot.slane %v1104_v28, 1 }
 0x188   : > { %1949 = vmatmul.msk.bf16.vlgmr.msra.gmra.mxu3 %vm275_vm1, %v2104_v40  ;;  %1955 = vmatmul.msk.bf16.vlgmr.msra.gmra.mxu0 %vm275_vm1, %v2051_v11  ;;  %v2545_v33 = vadd.f32 %v1145_v21, %v2449_v29 }
 0x189   : > { %1959 = vmatmul.msk.bf16.vlgmr.msra.gmra.mxu1 %vm275_vm1, %v2051_v11  ;;  %v2552_v13 = vadd.f32 %v1146_v14, %v2460_v59 }
 0x18a   : > { %1963 = vmatmul.msk.bf16.vlgmr.msra.gmra.mxu2 %vm275_vm1, %v2051_v11 }
 0x18b   : > { %v1048_v35 = vpop.f32.mrf.mxu3 }
 0x18c   : > { %v1144_v5 = vrot.slane %v1048_v35, 1 }
 0x18d   : > { %v1235_v16 = vpop.f32.mrf.mxu2  ;;  %v1078_v53 = vpop.f32.mrf.mxu0 }
 0x18e   : > { %v1148_v40 = vrot.slane %v1078_v53, 1  ;;  %v1106_v51 = vpop.f32.mrf.mxu1  ;;  %v1186_v39 = vadd.f32 %v1144_v5, %v2446_v2  ;;  %v1926_v16 = vld [vmem:[%s2591_s22 + $0x10] sm:$0x7f] }
 0x18f   : > { %v1149_v38 = vrot.slane %v1106_v51, 1  ;;  %1209 = vrot.lane.b32.xlu0 %v1926_v16, %s1992_s23 }
 0x190   : > { %v2556_v29 = vadd.f32 %v1148_v40, %v2466_v25 }
 0x191   : > { %v2559_v17 = vadd.f32 %v1149_v38, %v2469_v61 }
 0x193   : > { %v1050_v50 = vpop.f32.mrf.mxu3 }
 0x194   : > { %v1147_v11 = vrot.slane %v1050_v50, 1  ;;  %v1634_v50 = vld [vmem:[%s2591_s22 + $0x1] sm:$0x7f] }
 0x195   : > { %v1236_v30 = vpop.f32.mrf.mxu2  ;;  %v1081_v62 = vpop.f32.mrf.mxu0  ;;  %1636 = vrot.lane.b32.xlu1 %v1634_v50, %s1992_s23 }
 0x196   : > { %v2561_v59 = vadd.f32 %v1236_v30, %v1186_v39  ;;  %v1151_v44 = vrot.slane %v1081_v62, 1  ;;  %v1109_v52 = vpop.f32.mrf.mxu1  ;;  %v1189_v18 = vadd.f32 %v1147_v11, %v2463_v36 }
 0x197   : > { %v1152_v0 = vrot.slane %v1109_v52, 1 }
 0x198   : > { %1950 = vmatmul.msk.bf16.gmra.mxu3 %vm275_vm1, %v2116_v43  ;;  %1956 = vmatmul.msk.bf16.gmra.mxu0 %vm275_vm1, %v2053_v12  ;;  %v2569_v2 = vadd.f32 %v1151_v44, %v2475_v19 }
 0x199   : > { %1960 = vmatmul.msk.bf16.gmra.mxu1 %vm275_vm1, %v2053_v12  ;;  %v2576_v25 = vadd.f32 %v1152_v0, %v2486_v23 }
 0x19a   : > { %1964 = vmatmul.msk.bf16.gmra.mxu2 %vm275_vm1, %v2053_v12 }
 0x19b   : > { %v1053_v36 = vpop.f32.mrf.mxu3 }
 0x19c   : > { %v1150_v61 = vrot.slane %v1053_v36, 1 }
 0x19d   : > { %v1239_v58 = vpop.f32.mrf.mxu2  ;;  %v1083_v47 = vpop.f32.mrf.mxu0 }
 0x19e   : > { %v2578_v43 = vadd.f32 %v1239_v58, %v1189_v18  ;;  %v1154_v1 = vrot.slane %v1083_v47, 1  ;;  %v1111_v26 = vpop.f32.mrf.mxu1  ;;  %v1192_v19 = vadd.f32 %v1150_v61, %v2472_v63 }
 0x19f   : > { %v1155_v3 = vrot.slane %v1111_v26, 1 }
 0x1a0   : > { %v2582_v55 = vadd.f32 %v1154_v1, %v2492_v24 }
 0x1a1   : > { %v2586_v12 = vadd.f32 %v1155_v3, %v2495_v31 }
 0x1a3   : > { %v1055_v23 = vpop.f32.mrf.mxu3 }
 0x1a4   : > { %v1153_v9 = vrot.slane %v1055_v23, 1 }
 0x1a5   : > { %v1241_v8 = vpop.f32.mrf.mxu2  ;;  %v1086_v63 = vpop.f32.mrf.mxu0 }
 0x1a6   : > { %v2593_v57 = vadd.f32 %v1241_v8, %v1192_v19  ;;  %v1157_v56 = vrot.slane %v1086_v63, 1  ;;  %v1114_v27 = vpop.f32.mrf.mxu1  ;;  %v1195_v24 = vadd.f32 %v1153_v9, %v2489_v54 }
 0x1a7   : > { %v1158_v48 = vrot.slane %v1114_v27, 1 }
 0x1a8   : > { %1951 = vmatmul.msk.bf16.gmra.mxu3 %vm275_vm1, %v2128_v46  ;;  %1957 = vmatmul.msk.bf16.gmra.mxu0 %vm275_vm1, %v2071_v22  ;;  %v2602_v31 = vadd.f32 %v1157_v56, %v2501_v41 }
 0x1a9   : > { %1961 = vmatmul.msk.bf16.gmra.mxu1 %vm275_vm1, %v2071_v22  ;;  %v2609_v54 = vadd.f32 %v1158_v48, %v2512_v45 }
 0x1aa   : > { %1965 = vmatmul.msk.bf16.gmra.mxu2 %vm275_vm1, %v2071_v22 }
 0x1ab   : > { %v1058_v10 = vpop.f32.mrf.mxu3 }
 0x1ac   : > { %v1156_v46 = vrot.slane %v1058_v10, 1 }
 0x1ad   : > { %v1244_v20 = vpop.f32.mrf.mxu2  ;;  %v1088_v28 = vpop.f32.mrf.mxu0 }
 0x1ae   : > { %v2611_v21 = vadd.f32 %v1244_v20, %v1195_v24  ;;  %v1160_v41 = vrot.slane %v1088_v28, 1  ;;  %v1116_v14 = vpop.f32.mrf.mxu1  ;;  %v1198_v35 = vadd.f32 %v1156_v46, %v2498_v7 }
 0x1af   : > { %v1161_v5 = vrot.slane %v1116_v14, 1 }
 0x1b0   : > { %v2616_v22 = vadd.f32 %v1160_v41, %v2518_v37 }
 0x1b1   : > { %v1203_v45 = vadd.f32 %v1161_v5, %v2521_v6 }
 0x1b3   : > { %v1060_v53 = vpop.f32.mrf.mxu3 }
 0x1b4   : > { %v1159_v40 = vrot.slane %v1060_v53, 1 }
 0x1b5   : > { %v1246_v51 = vpop.f32.mrf.mxu2  ;;  %v1091_v38 = vpop.f32.mrf.mxu0 }
 0x1b6   : > { %v2619_v39 = vadd.f32 %v1246_v51, %v1198_v35  ;;  %v1163_v11 = vrot.slane %v1091_v38, 1  ;;  %v1119_v30 = vpop.f32.mrf.mxu1  ;;  %v1201_v62 = vadd.f32 %v1159_v40, %v2515_v32 }
 0x1b7   : > { %v1164_v7 = vrot.slane %v1119_v30, 1 }
 0x1b8   : > { %1952 = vmatmul.msk.bf16.gmra.mxu3 %vm275_vm1, %v2140_v49  ;;  %1958 = vmatmul.msk.bf16.gmra.mxu0 %vm275_vm1, %v2090_v34  ;;  %v2628_v37 = vadd.f32 %v1163_v11, %v2527_v15 }
 0x1b9   : > { %1962 = vmatmul.msk.bf16.gmra.mxu1 %vm275_vm1, %v2090_v34  ;;  %v1206_v6 = vadd.f32 %v1164_v7, %v2538_v4 }
 0x1ba   : > { %1966 = vmatmul.msk.bf16.gmra.mxu2 %vm275_vm1, %v2090_v34 }
 0x1bb   : > { %v1063_v32 = vpop.f32.mrf.mxu3 }
 0x1bc   : > { %v1162_v44 = vrot.slane %v1063_v32, 1 }
 0x1bd   : > { %v1249_v52 = vpop.f32.mrf.mxu2  ;;  %v1093_v49 = vpop.f32.mrf.mxu0 }
 0x1be   : > { %v2635_v18 = vadd.f32 %v1249_v52, %v1201_v62  ;;  %v1121_v0 = vpop.f32.mrf.mxu1  ;;  %v1204_v36 = vadd.f32 %v1162_v44, %v2524_v42  ;;  %v1640_v52 = vld [vmem:[%s2795_s3] sm:$0x7] }
 0x1c3   : > { %v1065_v61 = vpop.f32.mrf.mxu3 }
 0x1c4   : > { %v2692_v61 = vperm.slane %v1640_v52, 0 }
 0x1c5   : > { %v1251_v15 = vpop.f32.mrf.mxu2  ;;  %v1291_v47 = vpop.f32.mrf.mxu0 }
 0x1c6   : > { %v2638_v58 = vadd.f32 %v1251_v15, %v1204_v36  ;;  %v1355_v1 = vpop.f32.mrf.mxu1 }
 0x1cb   : > { %v1263_v26 = vpop.f32.mrf.mxu3 }
 0x1cc   : > { %v2695_v26 = vperm.slane %v1640_v52, 1 }
 0x1cd   : > { %v1383_v19 = vpop.f32.mrf.mxu2  ;;  %v1292_v34 = vpop.f32.mrf.mxu0 }
 0x1ce   : > { %v1312_v4 = vadd.f32 %v1292_v34, %v2552_v13  ;;  %v1356_v3 = vpop.f32.mrf.mxu1 }
 0x1d3   : > { %v1264_v23 = vpop.f32.mrf.mxu3 }
 0x1d5   : > { %v1384_v9 = vpop.f32.mrf.mxu2  ;;  %v1295_v8 = vpop.f32.mrf.mxu0 }
 0x1d6   : > { %v2642_v63 = vadd.f32 %v1295_v8, %v2559_v17  ;;  %v1359_v56 = vpop.f32.mrf.mxu1 }
 0x1db   : > { %v1267_v42 = vpop.f32.mrf.mxu3 }
 0x1dd   : > { %v1387_v27 = vpop.f32.mrf.mxu2  ;;  %v1297_v24 = vpop.f32.mrf.mxu0 }
 0x1de   : > { %v2645_v48 = vadd.f32 %v1297_v24, %v2576_v25  ;;  %v2647_v60 = vpop.f32.mrf.mxu1 }
 0x1e3   : > { %v2649_v10 = vpop.f32.mrf.mxu3 }
 0x1e5   : > { %v2651_v46 = vpop.f32.mrf.mxu2  ;;  %v1300_v13 = vpop.f32.mrf.mxu0 }
 0x1e6   : > { %v2654_v20 = vadd.f32 %v1300_v13, %v2586_v12  ;;  %v2656_v28 = vpop.f32.mrf.mxu1 }
 0x1eb   : > { %v2658_v17 = vpop.f32.mrf.mxu3 }
 0x1ed   : > { %v2660_v41 = vpop.f32.mrf.mxu2  ;;  %v1302_v14 = vpop.f32.mrf.mxu0 }
 0x1ee   : > { %v2663_v25 = vadd.f32 %v1302_v14, %v2609_v54  ;;  %v2665_v35 = vpop.f32.mrf.mxu1 }
 0x1f3   : > { %v2667_v5 = vpop.f32.mrf.mxu3 }
 0x1f5   : > { %v2669_v16 = vpop.f32.mrf.mxu2  ;;  %v1305_v53 = vpop.f32.mrf.mxu0 }
 0x1f6   : > { %v2671_v40 = vadd.f32 %v1305_v53, %v1203_v45  ;;  %v2673_v12 = vpop.f32.mrf.mxu1  ;;  %v1311_v45 = vadd.f32 %v1264_v23, %v2545_v33  ;;  %v1314_v23 = vadd.f32 %v1267_v42, %v2556_v29  ;;  %v2705_v53 = vperm.slane %v1640_v52, 2  ;;  %v1855_v52 = vld [vmem:[%s2591_s22 + $0x8] sm:$0x7f] }
 0x1f7   : > { %v1433_v42 = vadd.f32 %v1359_v56, %v2578_v43  ;;  %v1317_v43 = vadd.f32 %v2649_v10, %v2569_v2  ;;  %v1436_v2 = vadd.f32 %v2647_v60, %v2593_v57  ;;  %v1320_v60 = vadd.f32 %v2658_v17, %v2582_v55 }
 0x1f8   : > { %v1431_v47 = vadd.f32 %v1384_v9, %v1311_v45  ;;  %v1439_v55 = vadd.f32 %v2656_v28, %v2611_v21  ;;  %v1323_v28 = vadd.f32 %v2667_v5, %v2602_v31  ;;  %v1442_v31 = vadd.f32 %v2665_v35, %v2619_v39 }
 0x1fb   : > { %v2675_v51 = vpop.f32.mrf.mxu3 }
 0x1fc   : > { %v1326_v39 = vadd.f32 %v2675_v51, %v2616_v22 }
 0x1fd   : > { %v2677_v38 = vpop.f32.mrf.mxu2  ;;  %v1307_v50 = vpop.f32.mrf.mxu0 }
 0x1fe   : > { %v2679_v11 = vadd.f32 %v1307_v50, %v1206_v6  ;;  %v2681_v54 = vpop.f32.mrf.mxu1  ;;  %v1430_v6 = vadd.f32 %v1356_v3, %v2561_v59  ;;  %v1446_v22 = vadd.f32 %v2677_v38, %v1326_v39 }
 0x203   : > { %v2683_v30 = vpop.f32.mrf.mxu3 }
 0x205   : > { %v2685_v62 = vpop.f32.mrf.mxu2  ;;  %v1475_v7 = vpop.f32.mrf.mxu0 }
 0x206   : > { %v1503_v32 = vpop.f32.mrf.mxu1 }
 0x207   : > { %v1434_v32 = vadd.f32 %v1387_v27, %v1314_v23 }
 0x20b   : > { %v1411_v44 = vpop.f32.mrf.mxu3 }
 0x20d   : > { %v1531_v49 = vpop.f32.mrf.mxu2  ;;  %v1476_v0 = vpop.f32.mrf.mxu0 }
 0x20e   : > { %v1571_v36 = vrot.slane %v1476_v0, 1  ;;  %v1504_v15 = vpop.f32.mrf.mxu1 }
 0x20f   : > { %v1572_v1 = vrot.slane %v1504_v15, 1 }
 0x210   : > { %v1613_v19 = vadd.f32 %v1571_v36, %v1430_v6  ;;  %v400_v36 = vld [vmem:[%s2591_s22] sm:$0x7f] }
 0x211   : > { %v1614_v33 = vadd.f32 %v1572_v1, %v1431_v47  ;;  %v546_v47 = vmax.f32 %v400_v36, %v1855_v52  ;;  %v1331_v36 = vld [vmem:[%s2591_s22 + $0x1] sm:$0x7f] }
 0x212   : > { %v1648_v34 = vadd.f32 %v2692_v61, %v1613_v19 }
 0x213   : > { %v1649_v59 = vadd.f32 %v2695_v26, %v1614_v33  ;;  %v1412_v3 = vpop.f32.mrf.mxu3 }
 0x214   : > { %v1669_v9 = vmax.f32 %v1648_v34, 0.0  ;;  %v1432_v8 = vadd.f32 %v1412_v3, %v1312_v4  ;;  %v731_v34 = vpop.permute.xlu0 %730 }
 0x215   : > { %v1532_v24 = vpop.f32.mrf.mxu2  ;;  %v1670_v13 = vmax.f32 %v1649_v59, 0.0  ;;  %v1479_v29 = vpop.f32.mrf.mxu0 }
 0x216   : > { %v1573_v14 = vrot.slane %v1532_v24, 1  ;;  %1690 = vst [vmem:[%s2702_s29] sm:$0x7f] %v1669_v9  ;;  %v1574_v50 = vrot.slane %v1479_v29, 1  ;;  %v1507_v7 = vpop.f32.mrf.mxu1  ;;  %v733_v9 = vmax.f32 %v546_v47, %v731_v34  ;;  %v1890_v24 = vld [vmem:[%s2591_s22 + $0x10] sm:$0x7f] }
 0x217   : > { %1691 = vst [vmem:[%s2702_s29 + $0x8] sm:$0x7f] %v1670_v13  ;;  %v1575_v44 = vrot.slane %v1507_v7, 1  ;;  %v1437_v13 = vadd.f32 %v2651_v46, %v1317_v43 }
 0x218   : > { %v1615_v45 = vadd.f32 %v1573_v14, %v1432_v8  ;;  %v1616_v49 = vadd.f32 %v1574_v50, %v1433_v42  ;;  %v879_v29 = vmax.f32 %v733_v9, %v1890_v24  ;;  %v1912_v50 = vld [vmem:[%s2591_s22 + $0x18] sm:$0x7f]  ;;  %v1637_v9 = vpop.permute.xlu1 %1636 }
 0x219   : > { %v1617_v0 = vadd.f32 %v1575_v44, %v1434_v32 }
 0x21a   : > { %v1650_v4 = vadd.f32 %v2705_v53, %v1615_v45  ;;  %v1651_v6 = vadd.f32 %v2692_v61, %v1616_v49  ;;  %v1025_v45 = vmax.f32 %v879_v29, %v1912_v50 }
 0x21b   : > { %v1652_v15 = vadd.f32 %v2695_v26, %v1617_v0  ;;  %v1415_v27 = vpop.f32.mrf.mxu3 }
 0x21c   : > { %v1671_v56 = vmax.f32 %v1650_v4, 0.0  ;;  %v1672_v1 = vmax.f32 %v1651_v6, 0.0  ;;  %v1435_v19 = vadd.f32 %v1415_v27, %v2642_v63  ;;  %v1210_v52 = vpop.permute.xlu0 %1209 }
 0x21d   : > { %v1535_v33 = vpop.f32.mrf.mxu2  ;;  %v1673_v23 = vmax.f32 %v1652_v15, 0.0  ;;  %v1481_v3 = vpop.f32.mrf.mxu0  ;;  %v1212_v27 = vmax.f32 %v1025_v45, %v1210_v52 }
 0x21e   : > { %1692 = vst [vmem:[%s2702_s29 + $0x10] sm:$0x7f] %v1671_v56  ;;  %v1576_v59 = vrot.slane %v1535_v33, 1  ;;  %v1577_v10 = vrot.slane %v1481_v3, 1  ;;  %v1509_v8 = vpop.f32.mrf.mxu1 }
 0x21f   : > { %1693 = vst [vmem:[%s2702_s29 + $0x18] sm:$0x7f] %v1672_v1  ;;  %v1578_v63 = vrot.slane %v1509_v8, 1  ;;  %v1953_v1 = vld [vmem:[%s2591_s22 + $0x9] sm:$0x7f]  ;;  %v1332_v34 = vmax.f32 %v1212_v27, %v1331_v36 }
 0x220   : > { %1694 = vst [vmem:[%s2702_s29 + $0x20] sm:$0x7f] %v1673_v23  ;;  %v1618_v14 = vadd.f32 %v1576_v59, %v1435_v19  ;;  %v1619_v42 = vadd.f32 %v1577_v10, %v1436_v2  ;;  %v1440_v19 = vadd.f32 %v2660_v41, %v1320_v60 }
 0x221   : > { %v1620_v32 = vadd.f32 %v1578_v63, %v1437_v13  ;;  %v1452_v2 = vmax.f32 %v1332_v34, %v1953_v1 }
 0x222   : > { %v1653_v7 = vadd.f32 %v2705_v53, %v1618_v14  ;;  %v1654_v57 = vadd.f32 %v2692_v61, %v1619_v42 }
 0x223   : > { %v1655_v46 = vadd.f32 %v2695_v26, %v1620_v32  ;;  %v1417_v49 = vpop.f32.mrf.mxu3  ;;  %v1639_v63 = vmax.f32 %v1452_v2, %v1637_v9  ;;  %v1443_v32 = vadd.f32 %v2669_v16, %v1323_v28  ;;  %v1448_v9 = vadd.f32 %v2681_v54, %v2638_v58 }
 0x224   : > { %v1674_v44 = vmax.f32 %v1653_v7, 0.0  ;;  %v1675_v4 = vmax.f32 %v1654_v57, 0.0  ;;  %v1438_v0 = vadd.f32 %v1417_v49, %v2645_v48 }
 0x225   : > { %v1537_v6 = vpop.f32.mrf.mxu2  ;;  %v1676_v43 = vmax.f32 %v1655_v46, 0.0  ;;  %v1484_v15 = vpop.f32.mrf.mxu0  ;;  %1712 = vst.msk [vmem:[%s255_s7] sm:$0x7f] %vm1711_vm2, %v1639_v63 }
 0x226   : > { %1695 = vst [vmem:[%s2702_s29 + $0x28] sm:$0x7f] %v1674_v44  ;;  %v1579_v56 = vrot.slane %v1537_v6, 1  ;;  %v1580_v17 = vrot.slane %v1484_v15, 1  ;;  %v1512_v47 = vpop.f32.mrf.mxu1 }
 0x227   : > { %1696 = vst [vmem:[%s2702_s29 + $0x30] sm:$0x7f] %v1675_v4  ;;  %v1581_v33 = vrot.slane %v1512_v47, 1 }
 0x228   : > { %1697 = vst [vmem:[%s2702_s29 + $0x38] sm:$0x7f] %v1676_v43  ;;  %v1621_v48 = vadd.f32 %v1579_v56, %v1438_v0  ;;  %v1622_v23 = vadd.f32 %v1580_v17, %v1439_v55  ;;  %v1445_v56 = vadd.f32 %v2673_v12, %v2635_v18 }
 0x229   : > { %v1623_v3 = vadd.f32 %v1581_v33, %v1440_v19  ;;  %v1329_v19 = vadd.f32 %v2683_v30, %v2628_v37 }
 0x22a   : > { %v1656_v59 = vadd.f32 %v2705_v53, %v1621_v48  ;;  %v1657_v21 = vadd.f32 %v2692_v61, %v1622_v23 }
 0x22b   : > { %v1658_v41 = vadd.f32 %v2695_v26, %v1623_v3  ;;  %v1420_v8 = vpop.f32.mrf.mxu3  ;;  %v1449_v30 = vadd.f32 %v2685_v62, %v1329_v19 }
 0x22c   : > { %v1677_v10 = vmax.f32 %v1656_v59, 0.0  ;;  %v1678_v24 = vmax.f32 %v1657_v21, 0.0  ;;  %v1441_v13 = vadd.f32 %v1420_v8, %v2654_v20 }
 0x22d   : > { %v1540_v14 = vpop.f32.mrf.mxu2  ;;  %v1679_v29 = vmax.f32 %v1658_v41, 0.0  ;;  %v1486_v50 = vpop.f32.mrf.mxu0 }
 0x22e   : > { %1698 = vst [vmem:[%s2702_s29 + $0x40] sm:$0x7f] %v1677_v10  ;;  %v1582_v42 = vrot.slane %v1540_v14, 1  ;;  %v1583_v5 = vrot.slane %v1486_v50, 1  ;;  %v1514_v7 = vpop.f32.mrf.mxu1 }
 0x22f   : > { %1699 = vst [vmem:[%s2702_s29 + $0x48] sm:$0x7f] %v1678_v24  ;;  %v1584_v45 = vrot.slane %v1514_v7, 1 }
 0x230   : > { %1700 = vst [vmem:[%s2702_s29 + $0x50] sm:$0x7f] %v1679_v29  ;;  %v1624_v20 = vadd.f32 %v1582_v42, %v1441_v13  ;;  %v1625_v57 = vadd.f32 %v1583_v5, %v1442_v31 }
 0x231   : > { %v1626_v44 = vadd.f32 %v1584_v45, %v1443_v32 }
 0x232   : > { %v1659_v60 = vadd.f32 %v2705_v53, %v1624_v20  ;;  %v1660_v46 = vadd.f32 %v2692_v61, %v1625_v57 }
 0x233   : > { %v1661_v49 = vadd.f32 %v2695_v26, %v1626_v44  ;;  %v1422_v16 = vpop.f32.mrf.mxu3 }
 0x234   : > { %v1680_v35 = vmax.f32 %v1659_v60, 0.0  ;;  %v1681_v4 = vmax.f32 %v1660_v46, 0.0  ;;  %v1444_v0 = vadd.f32 %v1422_v16, %v2663_v25 }
 0x235   : > { %v1542_v6 = vpop.f32.mrf.mxu2  ;;  %v1682_v36 = vmax.f32 %v1661_v49, 0.0  ;;  %v1489_v43 = vpop.f32.mrf.mxu0 }
 0x236   : > { %1701 = vst [vmem:[%s2702_s29 + $0x58] sm:$0x7f] %v1680_v35  ;;  %v1585_v52 = vrot.slane %v1542_v6, 1  ;;  %v1586_v15 = vrot.slane %v1489_v43, 1  ;;  %v1517_v27 = vpop.f32.mrf.mxu1 }
 0x237   : > { %1702 = vst [vmem:[%s2702_s29 + $0x60] sm:$0x7f] %v1681_v4  ;;  %v1587_v55 = vrot.slane %v1517_v27, 1 }
 0x238   : > { %1703 = vst [vmem:[%s2702_s29 + $0x68] sm:$0x7f] %v1682_v36  ;;  %v1627_v51 = vadd.f32 %v1585_v52, %v1444_v0  ;;  %v1628_v17 = vadd.f32 %v1586_v15, %v1445_v56 }
 0x239   : > { %v1629_v47 = vadd.f32 %v1587_v55, %v1446_v22 }
 0x23a   : > { %v1662_v25 = vadd.f32 %v2705_v53, %v1627_v51  ;;  %v1663_v1 = vadd.f32 %v2692_v61, %v1628_v17 }
 0x23b   : > { %v1664_v12 = vadd.f32 %v2695_v26, %v1629_v47  ;;  %v1425_v48 = vpop.f32.mrf.mxu3 }
 0x23c   : > { %v1683_v18 = vmax.f32 %v1662_v25, 0.0  ;;  %v1684_v33 = vmax.f32 %v1663_v1, 0.0  ;;  %v1447_v38 = vadd.f32 %v1425_v48, %v2671_v40 }
 0x23d   : > { %v1545_v34 = vpop.f32.mrf.mxu2  ;;  %v1685_v23 = vmax.f32 %v1664_v12, 0.0  ;;  %v1491_v3 = vpop.f32.mrf.mxu0 }
 0x23e   : > { %1704 = vst [vmem:[%s2702_s29 + $0x70] sm:$0x7f] %v1683_v18  ;;  %v1588_v59 = vrot.slane %v1545_v34, 1  ;;  %v1589_v2 = vrot.slane %v1491_v3, 1  ;;  %v1519_v37 = vpop.f32.mrf.mxu1 }
 0x23f   : > { %1705 = vst [vmem:[%s2702_s29 + $0x78] sm:$0x7f] %v1684_v33  ;;  %v1590_v28 = vrot.slane %v1519_v37, 1 }
 0x240   : > { %1706 = vst [vmem:[%s2702_s29 + $0x80] sm:$0x7f] %v1685_v23  ;;  %v1630_v21 = vadd.f32 %v1588_v59, %v1447_v38  ;;  %v1631_v40 = vadd.f32 %v1589_v2, %v1448_v9 }
 0x241   : > { %v1632_v41 = vadd.f32 %v1590_v28, %v1449_v30 }
 0x242   : > { %v1665_v10 = vadd.f32 %v2705_v53, %v1630_v21  ;;  %v1666_v8 = vadd.f32 %v2692_v61, %v1631_v40 }
 0x243   : > { %v1667_v58 = vadd.f32 %v2695_v26, %v1632_v41  ;;  %v1427_v54 = vpop.f32.mrf.mxu3 }
 0x244   : > { %v1686_v24 = vmax.f32 %v1665_v10, 0.0  ;;  %v1687_v13 = vmax.f32 %v1666_v8, 0.0  ;;  %v1450_v14 = vadd.f32 %v1427_v54, %v2679_v11 }
 0x245   : > { %v1547_v62 = vpop.f32.mrf.mxu2  ;;  %v1688_v63 = vmax.f32 %v1667_v58, 0.0 }
 0x246   : > { %1707 = vst [vmem:[%s2702_s29 + $0x88] sm:$0x7f] %v1686_v24  ;;  %v1591_v29 = vrot.slane %v1547_v62, 1 }
 0x247   : > { %1708 = vst [vmem:[%s2702_s29 + $0x90] sm:$0x7f] %v1687_v13 }
 0x248   : > { %1709 = vst [vmem:[%s2702_s29 + $0x98] sm:$0x7f] %v1688_v63  ;;  %v1633_v42 = vadd.f32 %v1591_v29, %v1450_v14 }
 0x24a   : > { %v1668_v50 = vadd.f32 %v2705_v53, %v1633_v42 }
 0x24c   : > { %v1689_v31 = vmax.f32 %v1668_v50, 0.0 }
 0x24e   : > { %1710 = vst [vmem:[%s2702_s29 + $0xa0] sm:$0x7f] %v1689_v31 }
 0x24f PF: > { %s16_s18 = sadd.s32 1, %s1990_s18  }
 0x250   : > { %p13_p4 = scmp.ge.s32.totalorder %s16_s18, 4  }
 0x252   :  { %15 = sbr.rel (!%p13_p4) target bundleno = 1 (0x1), region = 95 }

// kernel: inception2_forward.4
= control target key start
LH: loop header
LB: loop body
LE: loop exit
PB: predicated region body
PF: predicated region fallthrough
CT: control target
= control target key end

     0   :  { %s6093_s18 = smov 0   ;;  %s8194_s0 = inlined_call_operand.vmem [shape: f32[2,16,16,4], index: 0, kind: input, shape index: {}]   ;;  %s8195_s1 = inlined_call_operand.vmem [shape: bf16[4,64], index: 1, kind: input, shape index: {}]   ;;  %s8196_s2 = inlined_call_operand.vmem [shape: f32[1,64], index: 2, kind: input, shape index: {}]   ;;  %s8197_s3 = inlined_call_operand.vmem [shape: bf16[9,64,96], index: 3, kind: input, shape index: {}]   ;;  %s8198_s4 = inlined_call_operand.vmem [shape: f32[1,96], index: 4, kind: input, shape index: {}]   ;;  %s8199_s5 = inlined_call_operand.vmem [shape: f32[2,16,16,96], index: 5, kind: output, shape index: {}]  }
   0x1 LB: > { %s5299_s19 = sadd.s32 4294967295, %s6060_s18   ;;  %p5303_p0 = scmp.ge.s32.totalorder %s6060_s18, 1  ;;  %s6060_s18 = sphi %s6093_s18, %s15_s18  }
   0x2   : > { %p187_p1 = scmp.lt.s32.totalorder %s6060_s18, 3 }
   0x4   : > { %p188_p2 = pnand %p5303_p0, %p187_p1 }
   0x6   : > { %191 = sbr.rel (%p188_p2) target bundleno = 1086 (0x43e), region = 40 }
   0xb   : > { %v274_v0 = vld [vmem:[%s8195_s1] sm:$0x3]  ;;  %vm328_vm0 = vcmask 1041408   ;;  %p215_p3 = scmp.lt.s32.totalorder %s5299_s19, 1  ;;  %vm279_vm1 = vcmask 31744   ;;  %vm453_vm2 = vcmask 519168  }
   0xc   : > { %v330_v1 = vsel %vm328_vm0, %v274_v0, 0  ;;  %v6062_v41 = vmov 0   ;;  %v5947_v45 = vld [vmem:[%s8197_s3 + $0x58] sm:$0xff]  ;;  %v5946_v49 = vld [vmem:[%s8197_s3 + $0x50] sm:$0xff]  ;;  %v5945_v52 = vld [vmem:[%s8197_s3 + $0x48] sm:$0xff]  ;;  %vm456_vm3 = vcmask 516096  }
   0xd   : > { %339 = vmatpush.bf16.msra.mxu0 %v330_v1  ;;  %s8475_s19 = smov (!%p215_p3, %s5299_s19), 1  ;;  %6004 = vmatpush.bf16.msra.mxu3 %v330_v1  ;;  %458 = vst.msk [vmem:[#allocation2 + $0xc] sm:$0xf] %vm453_vm2, %v6062_v41  ;;  %v5943_v48 = vld [vmem:[%s8197_s3 + $0x38] sm:$0xff]  ;;  %v5942_v51 = vld [vmem:[%s8197_s3 + $0x30] sm:$0xff]  ;;  %v5941_v54 = vld [vmem:[%s8197_s3 + $0x28] sm:$0xff] }
   0xe   : > { %s5918_s22 = sshll.u32 %s8475_s19, 8  ;;  %454 = vst.msk [vmem:[#allocation2] sm:$0xf] %vm453_vm2, %v6062_v41  ;;  %1559 = vmatpush.bf16.msra.mxu1 %v5943_v48  ;;  %6005 = vmatpush.bf16.msra.mxu2 %v5943_v48  ;;  %v5967_v53 = vld [vmem:[%s8197_s3 + $0x78] sm:$0xff]  ;;  %v5944_v55 = vld [vmem:[%s8197_s3 + $0x40] sm:$0xff]  ;;  %v5966_v56 = vld [vmem:[%s8197_s3 + $0x70] sm:$0xff] }
   0xf   : > { %s6112_s25 = scalar_lea.vmem %s8194_s0, %s5918_s22  ;;  %455 = vst.msk [vmem:[#allocation2 + $0x4] sm:$0xf] %vm453_vm2, %v6062_v41  ;;  %v5940_v57 = vld [vmem:[%s8197_s3 + $0x20] sm:$0xff]  ;;  %v5965_v58 = vld [vmem:[%s8197_s3 + $0x68] sm:$0xff]  ;;  %vm866_vm4 = vsmask.f32 7938  ;;  %s7807_s15 = scalar_lea.vmem %s8199_s5, %s5918_s22 }
  0x10   : > { %v226_v2 = vld [vmem:[%s6112_s25] sm:$0xff]  ;;  %v227_v3 = vld [vmem:[%s6112_s25 + $0x8] sm:$0xff]  ;;  %v244_v5 = vld [vmem:[%s6112_s25 + $0x90] sm:$0xff]  ;;  %459 = vst.msk [vmem:[#allocation2 + $0x10] sm:$0xf] %vm453_vm2, %v6062_v41  ;;  %vm1933_vm5 = vcmask 1042432  }
  0x11   : > { %v258_v4 = vpack.c.bf16 %v227_v3, %v226_v2  ;;  %v245_v6 = vld [vmem:[%s6112_s25 + $0x98] sm:$0xff]  ;;  %v228_v8 = vld [vmem:[%s6112_s25 + $0x10] sm:$0xff]  ;;  %v246_v11 = vld [vmem:[%s6112_s25 + $0xa0] sm:$0xff]  ;;  %461 = vst.msk [vmem:[#allocation2 + $0x18] sm:$0xf] %vm453_vm2, %v6062_v41  ;;  %2181 = vmatpush.bf16.msrb.mxu3 %v5947_v45  ;;  %2495 = vmatpush.bf16.msrb.mxu0 %v5967_v53  ;;  %vm1934_vm6 = vcmask 1046532  }
  0x12   : > { %v267_v7 = vpack.c.bf16 %v245_v6, %v244_v5  ;;  %v229_v9 = vld [vmem:[%s6112_s25 + $0x18] sm:$0xff]  ;;  %v247_v12 = vld [vmem:[%s6112_s25 + $0xa8] sm:$0xff]  ;;  %v230_v14 = vld [vmem:[%s6112_s25 + $0x20] sm:$0xff]  ;;  %462 = vst.msk [vmem:[#allocation2 + $0x1c] sm:$0xf] %vm453_vm2, %v6062_v41  ;;  %1560 = vmatpush.bf16.msra.mxu1 %v5942_v51  ;;  %6006 = vmatpush.bf16.msra.mxu2 %v5942_v51  ;;  %vm1506_vm0 = vcmask 523264  }
  0x13   : > { %5308 = vmatmul.msk.bf16.vlgmr.msra.gmra.mxu0 %vm279_vm1, %v258_v4  ;;  %v259_v10 = vpack.c.bf16 %v229_v9, %v228_v8  ;;  %v268_v13 = vpack.c.bf16 %v247_v12, %v246_v11  ;;  %v231_v15 = vld [vmem:[%s6112_s25 + $0x28] sm:$0xff]  ;;  %v248_v17 = vld [vmem:[%s6112_s25 + $0xb0] sm:$0xff]  ;;  %v249_v18 = vld [vmem:[%s6112_s25 + $0xb8] sm:$0xff]  ;;  %464 = vst.msk [vmem:[#allocation2 + $0x24] sm:$0xf] %vm453_vm2, %v6062_v41 }
  0x14   : > { %5317 = vmatmul.msk.bf16.vlgmr.msra.gmra.mxu3 %vm279_vm1, %v267_v7  ;;  %v260_v16 = vpack.c.bf16 %v231_v15, %v230_v14  ;;  %v269_v19 = vpack.c.bf16 %v249_v18, %v248_v17  ;;  %v232_v20 = vld [vmem:[%s6112_s25 + $0x30] sm:$0xff]  ;;  %v233_v21 = vld [vmem:[%s6112_s25 + $0x38] sm:$0xff]  ;;  %v250_v23 = vld [vmem:[%s6112_s25 + $0xc0] sm:$0xff]  ;;  %465 = vst.msk [vmem:[#allocation2 + $0x28] sm:$0xf] %vm453_vm2, %v6062_v41 }
  0x15   : > { %v261_v22 = vpack.c.bf16 %v233_v21, %v232_v20  ;;  %v251_v24 = vld [vmem:[%s6112_s25 + $0xc8] sm:$0xff]  ;;  %v234_v26 = vld [vmem:[%s6112_s25 + $0x40] sm:$0xff]  ;;  %v252_v29 = vld [vmem:[%s6112_s25 + $0xd0] sm:$0xff]  ;;  %467 = vst.msk [vmem:[#allocation2 + $0x30] sm:$0xf] %vm453_vm2, %v6062_v41  ;;  %2182 = vmatpush.bf16.msrb.mxu3 %v5946_v49  ;;  %2496 = vmatpush.bf16.msrb.mxu0 %v5966_v56 }
  0x16   : > { %v270_v25 = vpack.c.bf16 %v251_v24, %v250_v23  ;;  %v235_v27 = vld [vmem:[%s6112_s25 + $0x48] sm:$0xff]  ;;  %v253_v30 = vld [vmem:[%s6112_s25 + $0xd8] sm:$0xff]  ;;  %v236_v32 = vld [vmem:[%s6112_s25 + $0x50] sm:$0xff]  ;;  %468 = vst.msk [vmem:[#allocation2 + $0x34] sm:$0xf] %vm453_vm2, %v6062_v41  ;;  %1561 = vmatpush.bf16.msra.mxu1 %v5941_v54  ;;  %6007 = vmatpush.bf16.msra.mxu2 %v5941_v54 }
  0x17   : > { %v262_v28 = vpack.c.bf16 %v235_v27, %v234_v26  ;;  %v271_v31 = vpack.c.bf16 %v253_v30, %v252_v29  ;;  %v237_v33 = vld [vmem:[%s6112_s25 + $0x58] sm:$0xff]  ;;  %v254_v35 = vld [vmem:[%s6112_s25 + $0xe0] sm:$0xff]  ;;  %v255_v36 = vld [vmem:[%s6112_s25 + $0xe8] sm:$0xff]  ;;  %470 = vst.msk [vmem:[#allocation2 + $0x3c] sm:$0xf] %vm453_vm2, %v6062_v41 }
  0x18   : > { %v263_v34 = vpack.c.bf16 %v237_v33, %v236_v32  ;;  %v272_v37 = vpack.c.bf16 %v255_v36, %v254_v35  ;;  %v238_v38 = vld [vmem:[%s6112_s25 + $0x60] sm:$0xff]  ;;  %v239_v39 = vld [vmem:[%s6112_s25 + $0x68] sm:$0xff]  ;;  %v256_v42 = vld [vmem:[%s6112_s25 + $0xf0] sm:$0xff]  ;;  %471 = vst.msk [vmem:[#allocation2 + $0x40] sm:$0xf] %vm453_vm2, %v6062_v41  ;;  %v8206_v36 = vmov 0 }
  0x19   : > { %v264_v40 = vpack.c.bf16 %v239_v39, %v238_v38  ;;  %v257_v43 = vld [vmem:[%s6112_s25 + $0xf8] sm:$0xff]  ;;  %v240_v46 = vld [vmem:[%s6112_s25 + $0x70] sm:$0xff]  ;;  %473 = vst.msk [vmem:[#allocation2 + $0x48] sm:$0xf] %vm453_vm2, %v6062_v41  ;;  %2183 = vmatpush.bf16.msrb.mxu3 %v5945_v52  ;;  %v242_v59 = vld [vmem:[%s6112_s25 + $0x80] sm:$0xff]  ;;  %2497 = vmatpush.bf16.msrb.mxu0 %v5965_v58 }
  0x1a   : > { %v273_v44 = vpack.c.bf16 %v257_v43, %v256_v42  ;;  %v241_v47 = vld [vmem:[%s6112_s25 + $0x78] sm:$0xff]  ;;  %474 = vst.msk [vmem:[#allocation2 + $0x4c] sm:$0xf] %vm453_vm2, %v6062_v41  ;;  %1562 = vmatpush.bf16.msra.mxu1 %v5940_v57  ;;  %6008 = vmatpush.bf16.msra.mxu2 %v5940_v57  ;;  %v243_v60 = vld [vmem:[%s6112_s25 + $0x88] sm:$0xff]  ;;  %v5964_v61 = vld [vmem:[%s8197_s3 + $0x60] sm:$0xff] }
  0x1b   : > { %v265_v50 = vpack.c.bf16 %v241_v47, %v240_v46  ;;  %476 = vst.msk [vmem:[#allocation2 + $0x54] sm:$0xf] %vm453_vm2, %v6062_v41  ;;  %v6250_v62 = vld [vmem:[%s8196_s2] ss:$0 sm:$0xff]  ;;  %v266_v63 = vpack.c.bf16 %v243_v60, %v242_v59  ;;  %v983_v3 = vld [vmem:[#allocation2 + $0x4] sm:$0xf]  ;;  %vm6285_vm7 = vmand %vm453_vm2, %vm866_vm4 }
  0x1c   : > { %477 = vst.msk [vmem:[#allocation2 + $0x58] sm:$0xf] %vm453_vm2, %v6062_v41  ;;  %v982_v0 = vld [vmem:[#allocation2] sm:$0xf]  ;;  %v1051_v7 = vshll.u32 %v983_v3, 16  ;;  %v1055_v8 = vshrl.u32 %v983_v3, 16  ;;  %vm6296_vm8 = vmor %vm1933_vm5, %vm1934_vm6 }
  0x1d   : > { %479 = vst.msk [vmem:[#allocation2 + $0x60] sm:$0xf] %vm453_vm2, %v6062_v41  ;;  %2184 = vmatpush.bf16.msrb.mxu3 %v5944_v55  ;;  %2498 = vmatpush.bf16.msrb.mxu0 %v5964_v61  ;;  %v1042_v4 = vshrl.u32 %v982_v0, 16  ;;  %v1045_v5 = vshll.u32 %v982_v0, 16  ;;  %v868_v21 = vld [vmem:[#allocation2 + $0xc] sm:$0xf] }
  0x1e   : > { %480 = vst.msk [vmem:[#allocation2 + $0x64] sm:$0xf] %vm453_vm2, %v6062_v41  ;;  %v6278_v15 = vrot.slane %v1051_v7, 5  ;;  %v1938_v26 = vrot.slane %v983_v3, 5  ;;  %vm1038_vm9 = vsmask.f32 3328 }
  0x1f   : > { %482 = vst.msk [vmem:[#allocation2 + $0x6c] sm:$0xf] %vm453_vm2, %v6062_v41  ;;  %v1047_v11 = vrot.slane %v1045_v5, 5  ;;  %vm1039_vm10 = vsmask.f32 7440 }
  0x20   : > { %483 = vst.msk [vmem:[#allocation2 + $0x70] sm:$0xf] %vm453_vm2, %v6062_v41  ;;  %vm541_vm11 = vsmask.f32 256  ;;  %vm542_vm12 = vsmask.f32 4368  ;;  %vm6310_vm13 = vmor %vm1038_vm9, %vm1039_vm10 }
  0x21   : > { %485 = vst.msk [vmem:[#allocation2 + $0x78] sm:$0xf] %vm453_vm2, %v6062_v41  ;;  %v1940_v35 = vrot.slane %v1938_v26, 4  ;;  %v8207_v36 = vsel %vm6310_vm13, 4294967295, %v8206_v36  ;;  %vm6317_vm14 = vmor %vm541_vm11, %vm542_vm12 }
  0x22   : > { %486 = vst.msk [vmem:[#allocation2 + $0x7c] sm:$0xf] %vm453_vm2, %v6062_v41  ;;  %vm6326_vm15 = vmand %vm456_vm3, %vm541_vm11 }
  0x23   : > { %5309 = vmatmul.msk.bf16.gmra.mxu0 %vm279_vm1, %v259_v10  ;;  %488 = vst.msk [vmem:[#allocation2 + $0x84] sm:$0xf] %vm453_vm2, %v6062_v41  ;;  %v1044_v10 = vrot.slane %v1042_v4, 4 }
  0x24   : > { %5318 = vmatmul.msk.bf16.gmra.mxu3 %vm279_vm1, %v268_v13  ;;  %489 = vst.msk [vmem:[#allocation2 + $0x88] sm:$0xf] %vm453_vm2, %v6062_v41  ;;  %v1885_v13 = vld [vmem:[#allocation2] sm:$0xe] }
  0x25   : > { %491 = vst.msk [vmem:[#allocation2 + $0x90] sm:$0xf] %vm453_vm2, %v6062_v41 }
  0x26   : > { %492 = vst.msk [vmem:[#allocation2 + $0x94] sm:$0xf] %vm453_vm2, %v6062_v41 }
  0x27   : > { %494 = vst.msk [vmem:[#allocation2 + $0x9c] sm:$0xf] %vm453_vm2, %v6062_v41 }
  0x28   : > { %495 = vst.msk [vmem:[#allocation2 + $0xa0] sm:$0xf] %vm453_vm2, %v6062_v41 }
  0x29   : > { %497 = vst.msk [vmem:[#allocation2 + $0xa8] sm:$0xf] %vm453_vm2, %v6062_v41 }
  0x2a   : > { %498 = vst.msk [vmem:[#allocation2 + $0xac] sm:$0xf] %vm453_vm2, %v6062_v41 }
  0x2b   : > { %500 = vst.msk [vmem:[#allocation2 + $0xb4] sm:$0xf] %vm453_vm2, %v6062_v41 }
  0x2c   : > { %501 = vst.msk [vmem:[#allocation2 + $0xb8] sm:$0xf] %vm453_vm2, %v6062_v41 }
  0x2d   : > { %503 = vst.msk [vmem:[#allocation2 + $0xc0] sm:$0xf] %vm453_vm2, %v6062_v41 }
  0x2e   : > { %504 = vst.msk [vmem:[#allocation2 + $0xc4] sm:$0xf] %vm453_vm2, %v6062_v41 }
  0x2f   : > { %506 = vst.msk [vmem:[#allocation2 + $0xcc] sm:$0xf] %vm453_vm2, %v6062_v41 }
  0x30   : > { %507 = vst.msk [vmem:[#allocation2 + $0xd0] sm:$0xf] %vm453_vm2, %v6062_v41 }
  0x31   : > { %460 = vst.msk [vmem:[#allocation2 + $0x14] sm:$0x1] %vm456_vm3, %v6062_v41 }
  0x32   : > { %457 = vst.msk [vmem:[#allocation2 + $0x8] sm:$0x1] %vm456_vm3, %v6062_v41 }
  0x33   : > { %5310 = vmatmul.msk.bf16.gmra.mxu0 %vm279_vm1, %v260_v16  ;;  %v1057_v16 = vrot.slane %v1055_v8, 4  ;;  %463 = vst.msk [vmem:[#allocation2 + $0x20] sm:$0x1] %vm456_vm3, %v6062_v41 }
  0x34   : > { %5319 = vmatmul.msk.bf16.gmra.mxu3 %vm279_vm1, %v269_v19  ;;  %466 = vst.msk [vmem:[#allocation2 + $0x2c] sm:$0x1] %vm456_vm3, %v6062_v41 }
  0x35   : > { %469 = vst.msk [vmem:[#allocation2 + $0x38] sm:$0x1] %vm456_vm3, %v6062_v41 }
  0x36   : > { %472 = vst.msk [vmem:[#allocation2 + $0x44] sm:$0x1] %vm456_vm3, %v6062_v41 }
  0x37   : > { %475 = vst.msk [vmem:[#allocation2 + $0x50] sm:$0x1] %vm456_vm3, %v6062_v41 }
  0x38   : > { %8208 = vst [vmem:[#allocation3_spill] sm:$0xff] %v8207_v36  ;;  %v874_v48 = vld [vmem:[#allocation2 + $0x14] sm:$0x1] }
  0x39   : > { %478 = vst.msk [vmem:[#allocation2 + $0x5c] sm:$0x1] %vm456_vm3, %v6062_v41  ;;  %v1022_v38 = vld [vmem:[#allocation2 + $0x8] sm:$0x1] }
  0x3a   : > { %481 = vst.msk [vmem:[#allocation2 + $0x68] sm:$0x1] %vm456_vm3, %v6062_v41  ;;  %v1941_v45 = vrot.slane %v1022_v38, 5  ;;  %v1061_v51 = vshll.u32 %v1022_v38, 16 }
  0x3b   : > { %484 = vst.msk [vmem:[#allocation2 + $0x74] sm:$0x1] %vm456_vm3, %v6062_v41 }
  0x3c   : > { %487 = vst.msk [vmem:[#allocation2 + $0x80] sm:$0x1] %vm456_vm3, %v6062_v41  ;;  %v1942_v55 = vsel %vm6296_vm8, %v1940_v35, %v1941_v45  ;;  %v1063_v57 = vrot.slane %v1061_v51, 5 }
  0x3d   : > { %490 = vst.msk [vmem:[#allocation2 + $0x8c] sm:$0x1] %vm456_vm3, %v6062_v41  ;;  %v2058_v56 = vunpack.c.l.b16 %v1942_v55 }
  0x3e   : > { %493 = vst.msk [vmem:[#allocation2 + $0x98] sm:$0x1] %vm456_vm3, %v6062_v41 }
  0x3f   : > { %496 = vst.msk [vmem:[#allocation2 + $0xa4] sm:$0x1] %vm456_vm3, %v6062_v41 }
  0x40   : > { %499 = vst.msk [vmem:[#allocation2 + $0xb0] sm:$0x1] %vm456_vm3, %v6062_v41 }
  0x41   : > { %502 = vst.msk [vmem:[#allocation2 + $0xbc] sm:$0x1] %vm456_vm3, %v6062_v41 }
  0x42   : > { %505 = vst.msk [vmem:[#allocation2 + $0xc8] sm:$0x1] %vm456_vm3, %v6062_v41 }
  0x43   : > { %5311 = vmatmul.msk.bf16.gmra.mxu0 %vm279_vm1, %v261_v22  ;;  %v1048_v22 = vor.u32 %v1047_v11, %v1044_v10  ;;  %508 = vst.msk [vmem:[#allocation2 + $0xd4] sm:$0x1] %vm456_vm3, %v6062_v41 }
  0x44   : > { %5320 = vmatmul.msk.bf16.gmra.mxu3 %vm279_vm1, %v270_v25  ;;  %v5460_v25 = vrot.slane %v1885_v13, 9  ;;  %v877_v13 = vld [vmem:[#allocation2 + $0x18] sm:$0xf] }
  0x53   : > { %5312 = vmatmul.msk.bf16.gmra.mxu0 %vm279_vm1, %v262_v28  ;;  %v1058_v28 = vor.u32 %v1057_v16, %v6278_v15 }
  0x54   : > { %5321 = vmatmul.msk.bf16.gmra.mxu3 %vm279_vm1, %v271_v31  ;;  %v1049_v31 = vrot.slane %v1048_v22, 4 }
  0x55   : > { %v1059_v39 = vrot.slane %v1058_v28, 4 }
  0x57   : > { %v1064_v0 = vsel %vm6310_vm13, %v1059_v39, %v1063_v57  ;;  %v881_v57 = vld [vmem:[#allocation2 + $0x20] sm:$0x1] }
  0x58   : > { %v1435_v4 = vunpack.c.l.b16 %v1064_v0 }
  0x63   : > { %5313 = vmatmul.msk.bf16.gmra.mxu0 %vm279_vm1, %v263_v34  ;;  %v1939_v34 = vsel %vm6296_vm8, %v5460_v25, %v1938_v26 }
  0x64   : > { %5322 = vmatmul.msk.bf16.gmra.mxu3 %vm279_vm1, %v272_v37  ;;  %v2057_v49 = vunpack.c.l.b16 %v1939_v34 }
  0x73   : > { %5314 = vmatmul.msk.bf16.gmra.mxu0 %vm279_vm1, %v264_v40 }
  0x74   : > { %5323 = vmatmul.msk.bf16.gmra.mxu3 %vm279_vm1, %v273_v44 }
  0x83   : > { %5315 = vmatmul.msk.bf16.gmra.mxu0 %vm279_vm1, %v265_v50  ;;  %v1054_v50 = vsel %vm6310_vm13, %v1049_v31, %v6278_v15 }
  0x84   : > { %v1434_v61 = vunpack.c.l.b16 %v1054_v50 }
  0x86   : > { %v1466_v15 = vpack.c.b16 %v1435_v4, %v1434_v61 }
  0x88   : > { %5348 = vmatmul.msk.bf16.vlgmr.msra.gmra.mxu1 %vm1506_vm0, %v1466_v15 }
  0x90   : > { %v341_v1 = vpop.f32.mrf.mxu0 }
  0x91   : > { %v342_v2 = vadd.f32 %v6250_v62, %v341_v1 }
  0x93   : > { %v421_v6 = vmax.f32 %v342_v2, 0.0  ;;  %5316 = vmatmul.msk.bf16.gmra.mxu0 %vm279_vm1, %v266_v63  ;;  %v2089_v63 = vpack.c.b16 %v2058_v56, %v2057_v49  ;;  %v933_v56 = vld [vmem:[#allocation2 + $0x78] sm:$0xf]  ;;  %vm5211_vm1 = vcmask 785408  }
  0x95   : > { %v509_v9 = vpack.c.bf16 %v421_v6, %v421_v6  ;;  %5500 = vmatmul.msk.bf16.vlgmr.msrb.gmra.mxu3 %vm1506_vm0, %v2089_v63 }
  0x97   : > { %v545_v12 = vshrl.u32 %v509_v9, 16  ;;  %v548_v18 = vshll.u32 %v509_v9, 16  ;;  %v386_v32 = vpop.f32.mrf.mxu3 }
  0x98   : > { %v343_v14 = vpop.f32.mrf.mxu0  ;;  %v387_v6 = vadd.f32 %v6250_v62, %v386_v32 }
  0x99   : > { %v547_v17 = vrot.slane %v545_v12, 7  ;;  %v344_v19 = vadd.f32 %v6250_v62, %v343_v14 }
  0x9a   : > { %v439_v16 = vmax.f32 %v387_v6, 0.0 }
  0x9b   : > { %v550_v23 = vor.u32 %v548_v18, %v547_v17  ;;  %v422_v24 = vmax.f32 %v344_v19, 0.0  ;;  %v551_v46 = vrot.slane %v547_v17, 4 }
  0x9d   : > { %v869_v29 = vsel %vm6285_vm7, %v550_v23, %v868_v21  ;;  %v510_v30 = vpack.c.bf16 %v422_v24, %v422_v24  ;;  %v527_v24 = vpack.c.bf16 %v439_v16, %v439_v16 }
  0x9e   : > { %870 = vst [vmem:[#allocation2 + $0xc] sm:$0xf] %v869_v29 }
  0x9f   : > { %v553_v33 = vshrl.u32 %v510_v30, 16  ;;  %v556_v43 = vshll.u32 %v510_v30, 16  ;;  %v388_v10 = vpop.f32.mrf.mxu3  ;;  %v698_v34 = vshrl.u32 %v527_v24, 16  ;;  %v701_v35 = vshll.u32 %v527_v24, 16 }
  0xa0   : > { %v346_v37 = vpop.f32.mrf.mxu0 }
  0xa1   : > { %v555_v42 = vrot.slane %v553_v33, 7  ;;  %v347_v44 = vadd.f32 %v6250_v62, %v346_v37 }
  0xa3   : > { %v558_v52 = vor.u32 %v556_v43, %v555_v42  ;;  %v560_v53 = vrot.slane %v555_v42, 4  ;;  %v423_v54 = vmax.f32 %v347_v44, 0.0  ;;  %v6373_v43 = vrot.slane %v698_v34, 7 }
  0xa4   : > { %v389_v44 = vadd.f32 %v6250_v62, %v388_v10 }
  0xa5   : > { %v559_v58 = vsel %vm6317_vm14, %v551_v46, %v558_v52  ;;  %v875_v59 = vsel %vm6326_vm15, %v560_v53, %v874_v48  ;;  %v511_v60 = vpack.c.bf16 %v423_v54, %v423_v54  ;;  %v984_v1 = vld [vmem:[#allocation2 + $0xc] sm:$0xf]  ;;  %v703_v55 = vor.u32 %v701_v35, %v6373_v43 }
  0xa6   : > { %871 = vst.msk [vmem:[#allocation2 + $0x10] sm:$0xf] %vm453_vm2, %v559_v58  ;;  %v1886_v5 = vld [vmem:[#allocation2 + $0xc] sm:$0xe]  ;;  %v1066_v8 = vshrl.u32 %v984_v1, 16  ;;  %v1069_v9 = vshll.u32 %v984_v1, 16 }
  0xa7   : > { %876 = vst [vmem:[#allocation2 + $0x14] sm:$0x1] %v875_v59  ;;  %v562_v2 = vshrl.u32 %v511_v60, 16  ;;  %v565_v3 = vshll.u32 %v511_v60, 16  ;;  %v6354_v11 = vld [vmem:[#allocation2 + $0xc] sm:$0xf]  ;;  %v391_v51 = vpop.f32.mrf.mxu3 }
  0xa8   : > { %v348_v7 = vpop.f32.mrf.mxu0  ;;  %v1068_v17 = vrot.slane %v1066_v8, 4  ;;  %v1071_v18 = vrot.slane %v1069_v9, 5  ;;  %v2661_v19 = vshrl.u32 %v6354_v11, 16  ;;  %v5461_v23 = vrot.slane %v1886_v5, 9 }
  0xa9   : > { %v564_v12 = vrot.slane %v562_v2, 7  ;;  %v349_v14 = vadd.f32 %v6250_v62, %v348_v7  ;;  %v2664_v29 = vshll.u32 %v6354_v11, 16 }
  0xaa   : > { %v1072_v26 = vor.u32 %v1071_v18, %v1068_v17  ;;  %v6367_v28 = vrot.slane %v2661_v19, 4  ;;  %v392_v19 = vadd.f32 %v6250_v62, %v391_v51 }
  0xab   : > { %v567_v21 = vor.u32 %v565_v3, %v564_v12  ;;  %v424_v22 = vmax.f32 %v349_v14, 0.0  ;;  %v568_v25 = vrot.slane %v564_v12, 4  ;;  %v934_v3 = vsel %vm6285_vm7, %v703_v55, %v933_v56 }
  0xac   : > { %v1073_v39 = vrot.slane %v1072_v26, 4  ;;  %935 = vst [vmem:[#allocation2 + $0x78] sm:$0xf] %v934_v3  ;;  %v440_v14 = vmax.f32 %v389_v44, 0.0  ;;  %v6391_v15 = vrot.slane %v2664_v29, 5 }
  0xad   : > { %v878_v30 = vsel %vm6285_vm7, %v567_v21, %v877_v13  ;;  %v512_v31 = vpack.c.bf16 %v424_v22, %v424_v22  ;;  %v5948_v32 = vld [vmem:[#allocation2 + $0xc] sm:$0xff] }
  0xae   : > { %v985_v33 = vld [vmem:[#allocation2 + $0x10] sm:$0xf]  ;;  %879 = vst [vmem:[#allocation2 + $0x18] sm:$0xf] %v878_v30  ;;  %v1023_v37 = vld [vmem:[#allocation2 + $0x14] sm:$0x1]  ;;  %5604 = vmatmul.msk.bf16.vlgmr.msrb.gmra.mxu0 %vm1506_vm0, %v5948_v32 }
  0xaf   : > { %v1945_v38 = vrot.slane %v985_v33, 5  ;;  %v570_v42 = vshrl.u32 %v512_v31, 16  ;;  %v1948_v41 = vrot.slane %v1023_v37, 5  ;;  %v1075_v49 = vshll.u32 %v985_v33, 16  ;;  %v884_v30 = vld [vmem:[#allocation2 + $0x24] sm:$0xf] }
  0xb0   : > { %v351_v45 = vpop.f32.mrf.mxu0  ;;  %v1079_v50 = vshrl.u32 %v985_v33, 16  ;;  %v573_v53 = vshll.u32 %v512_v31, 16  ;;  %v1085_v6 = vshll.u32 %v1023_v37, 16  ;;  %v441_v33 = vmax.f32 %v392_v19, 0.0 }
  0xb1   : > { %v1946_v46 = vsel %vm6296_vm8, %v5461_v23, %v1945_v38  ;;  %v1947_v48 = vrot.slane %v1945_v38, 4  ;;  %v572_v52 = vrot.slane %v570_v42, 7  ;;  %v352_v54 = vadd.f32 %v6250_v62, %v351_v45  ;;  %v6400_v42 = vld [vmem:[#allocation2 + $0x10] sm:$0xf] }
  0xb2   : > { %v2059_v59 = vunpack.c.l.b16 %v1946_v46  ;;  %v1077_v60 = vrot.slane %v1075_v49, 5  ;;  %v1081_v61 = vrot.slane %v1079_v50, 4  ;;  %v1087_v13 = vrot.slane %v1085_v6, 5  ;;  %v937_v50 = vld [vmem:[#allocation2 + $0x80] sm:$0x1] }
  0xb3   : > { %v1949_v58 = vsel %vm6296_vm8, %v1947_v48, %v1948_v41  ;;  %v575_v63 = vor.u32 %v573_v53, %v572_v52  ;;  %v577_v0 = vrot.slane %v572_v52, 4  ;;  %v425_v1 = vmax.f32 %v352_v54, 0.0 }
  0xb4   : > { %v2060_v2 = vunpack.c.l.b16 %v1949_v58  ;;  %v1078_v4 = vsel %vm6310_vm13, %v1073_v39, %v1077_v60  ;;  %v1082_v5 = vor.u32 %v1081_v61, %v1077_v60  ;;  %v528_v23 = vpack.c.bf16 %v440_v14, %v440_v14  ;;  %v393_v39 = vpop.f32.mrf.mxu3 }
  0xb5   : > { %v576_v7 = vsel %vm6317_vm14, %v568_v25, %v575_v63  ;;  %v882_v8 = vsel %vm6326_vm15, %v577_v0, %v881_v57  ;;  %v513_v9 = vpack.c.bf16 %v425_v1, %v425_v1  ;;  %v986_v11 = vld [vmem:[#allocation2 + $0x18] sm:$0xf]  ;;  %v1436_v18 = vunpack.c.l.b16 %v1078_v4 }
  0xb6   : > { %v2090_v10 = vpack.c.b16 %v2060_v2, %v2059_v59  ;;  %880 = vst.msk [vmem:[#allocation2 + $0x1c] sm:$0xf] %vm453_vm2, %v576_v7  ;;  %v1083_v12 = vrot.slane %v1082_v5, 4  ;;  %v1090_v24 = vshrl.u32 %v986_v11, 16  ;;  %v1093_v25 = vshll.u32 %v986_v11, 16 }
  0xb7   : > { %883 = vst [vmem:[#allocation2 + $0x20] sm:$0x1] %v882_v8  ;;  %v579_v16 = vshrl.u32 %v513_v9, 16  ;;  %v582_v17 = vshll.u32 %v513_v9, 16  ;;  %v1887_v32 = vld [vmem:[#allocation2 + $0x18] sm:$0xe]  ;;  %v529_v52 = vpack.c.bf16 %v441_v33, %v441_v33  ;;  %v394_v3 = vadd.f32 %v6250_v62, %v393_v39 }
  0xb8   : > { %5501 = vmatmul.msk.bf16.gmra.mxu3 %vm1506_vm0, %v2090_v10  ;;  %v353_v21 = vpop.f32.mrf.mxu0  ;;  %v1088_v22 = vsel %vm6310_vm13, %v1083_v12, %v1087_v13  ;;  %v706_v34 = vshrl.u32 %v528_v23, 16  ;;  %v709_v35 = vshll.u32 %v528_v23, 16  ;;  %v1092_v37 = vrot.slane %v1090_v24, 4  ;;  %v888_v13 = vld [vmem:[#allocation2 + $0x2c] sm:$0x1] }
  0xb9   : > { %v6397_v26 = vrot.slane %v579_v16, 7  ;;  %v354_v29 = vadd.f32 %v6250_v62, %v353_v21  ;;  %v1437_v31 = vunpack.c.l.b16 %v1088_v22  ;;  %v1095_v38 = vrot.slane %v1093_v25, 5  ;;  %v940_v24 = vld [vmem:[#allocation2 + $0x84] sm:$0xf] }
  0xba   : > { %v704_v45 = vrot.slane %v6373_v43, 4  ;;  %v708_v49 = vrot.slane %v706_v34, 7  ;;  %v5462_v51 = vrot.slane %v1887_v32, 9  ;;  %v2670_v57 = vshll.u32 %v6400_v42, 16 }
  0xbb   : > { %v584_v41 = vor.u32 %v582_v17, %v6397_v26  ;;  %v426_v44 = vmax.f32 %v354_v29, 0.0  ;;  %v1467_v46 = vpack.c.b16 %v1437_v31, %v1436_v18  ;;  %v585_v48 = vrot.slane %v6397_v26, 4 }
  0xbc   : > { %v2674_v58 = vshrl.u32 %v6400_v42, 16  ;;  %v711_v43 = vor.u32 %v709_v35, %v708_v49  ;;  %v713_v59 = vrot.slane %v708_v49, 4  ;;  %v1096_v63 = vor.u32 %v1095_v38, %v1092_v37  ;;  %v396_v31 = vpop.f32.mrf.mxu3  ;;  %v6586_v42 = vld [vmem:[%s8196_s2] ss:$0 sm:$0xff] }
  0xbd   : > { %v885_v53 = vsel %vm6285_vm7, %v584_v41, %v884_v30  ;;  %v514_v54 = vpack.c.bf16 %v426_v44, %v426_v44  ;;  %5349 = vmatmul.msk.bf16.gmra.mxu1 %vm1506_vm0, %v1467_v46  ;;  %v5949_v55 = vld [vmem:[#allocation2 + $0x18] sm:$0xff]  ;;  %v715_v2 = vshrl.u32 %v529_v52, 16  ;;  %v718_v17 = vshll.u32 %v529_v52, 16 }
  0xbe   : > { %v987_v56 = vld [vmem:[#allocation2 + $0x1c] sm:$0xf]  ;;  %886 = vst [vmem:[#allocation2 + $0x24] sm:$0xf] %v885_v53  ;;  %v1024_v60 = vld [vmem:[#allocation2 + $0x20] sm:$0x1]  ;;  %5605 = vmatmul.msk.bf16.gmra.mxu0 %vm1506_vm0, %v5949_v55  ;;  %v712_v5 = vsel %vm6317_vm14, %v704_v45, %v711_v43  ;;  %v938_v6 = vsel %vm6326_vm15, %v713_v59, %v937_v50  ;;  %v397_v55 = vadd.f32 %v6250_v62, %v396_v31 }
  0xbf   : > { %v1952_v61 = vrot.slane %v987_v56, 5  ;;  %v587_v0 = vshrl.u32 %v514_v54, 16  ;;  %v1955_v1 = vrot.slane %v1024_v60, 5  ;;  %v590_v10 = vshll.u32 %v514_v54, 16  ;;  %936 = vst.msk [vmem:[#allocation2 + $0x7c] sm:$0xf] %vm453_vm2, %v712_v5 }
  0xc0   : > { %v356_v4 = vpop.f32.mrf.mxu0  ;;  %v6420_v12 = vrot.slane %v715_v2, 7  ;;  %939 = vst [vmem:[#allocation2 + $0x80] sm:$0x1] %v938_v6  ;;  %v1099_v18 = vshll.u32 %v987_v56, 16  ;;  %v1097_v26 = vrot.slane %v1096_v63, 4  ;;  %v1103_v29 = vshrl.u32 %v987_v56, 16 }
  0xc1   : > { %v1953_v7 = vsel %vm6296_vm8, %v5462_v51, %v1952_v61  ;;  %v1954_v8 = vrot.slane %v1952_v61, 4  ;;  %v589_v9 = vrot.slane %v587_v0, 7  ;;  %v357_v11 = vadd.f32 %v6250_v62, %v356_v4  ;;  %v891_v61 = vld [vmem:[#allocation2 + $0x30] sm:$0xf] }
  0xc2   : > { %v2061_v16 = vunpack.c.l.b16 %v1953_v7  ;;  %v720_v25 = vor.u32 %v718_v17, %v6420_v12  ;;  %v1101_v30 = vrot.slane %v1099_v18, 5  ;;  %v1105_v41 = vrot.slane %v1103_v29, 4 }
  0xc3   : > { %v1956_v14 = vsel %vm6296_vm8, %v1954_v8, %v1955_v1  ;;  %v592_v19 = vor.u32 %v590_v10, %v589_v9  ;;  %v594_v21 = vrot.slane %v589_v9, 4  ;;  %v427_v22 = vmax.f32 %v357_v11, 0.0 }
  0xc4   : > { %v2062_v23 = vunpack.c.l.b16 %v1956_v14  ;;  %v941_v38 = vsel %vm6285_vm7, %v720_v25, %v940_v24  ;;  %v1102_v39 = vsel %vm6310_vm13, %v1097_v26, %v1101_v30  ;;  %v1109_v44 = vshll.u32 %v1024_v60, 16 }
  0xc5   : > { %v593_v32 = vsel %vm6317_vm14, %v585_v48, %v592_v19  ;;  %v889_v33 = vsel %vm6326_vm15, %v594_v21, %v888_v13  ;;  %v515_v34 = vpack.c.bf16 %v427_v22, %v427_v22  ;;  %v1888_v37 = vld [vmem:[#allocation2 + $0x24] sm:$0xe]  ;;  %v721_v49 = vrot.slane %v6420_v12, 4  ;;  %942 = vst [vmem:[#allocation2 + $0x84] sm:$0xf] %v941_v38  ;;  %v398_v22 = vpop.f32.mrf.mxu3 }
  0xc6   : > { %v2091_v35 = vpack.c.b16 %v2062_v23, %v2061_v16  ;;  %887 = vst.msk [vmem:[#allocation2 + $0x28] sm:$0xf] %vm453_vm2, %v593_v32  ;;  %v6434_v45 = vld [vmem:[#allocation2 + $0x24] sm:$0xf]  ;;  %v442_v50 = vmax.f32 %v394_v3, 0.0  ;;  %v1106_v52 = vor.u32 %v1105_v41, %v1101_v30  ;;  %v1111_v53 = vrot.slane %v1109_v44, 5 }
  0xc7   : > { %890 = vst [vmem:[#allocation2 + $0x2c] sm:$0x1] %v889_v33  ;;  %v596_v46 = vshrl.u32 %v515_v34, 16  ;;  %v599_v48 = vshll.u32 %v515_v34, 16  ;;  %v1438_v54 = vunpack.c.l.b16 %v1102_v39  ;;  %v1114_v60 = vshrl.u32 %v6434_v45, 16 }
  0xc8   : > { %5502 = vmatmul.msk.bf16.gmra.mxu3 %vm1506_vm0, %v2091_v35  ;;  %v358_v51 = vpop.f32.mrf.mxu0  ;;  %v530_v59 = vpack.c.bf16 %v442_v50, %v442_v50  ;;  %v1107_v63 = vrot.slane %v1106_v52, 4  ;;  %v5463_v0 = vrot.slane %v1888_v37, 9  ;;  %v443_v1 = vmax.f32 %v397_v55, 0.0  ;;  %v944_v30 = vld [vmem:[#allocation2 + $0x8c] sm:$0x1] }
  0xc9   : > { %v598_v56 = vrot.slane %v596_v46, 7  ;;  %v359_v43 = vadd.f32 %v6250_v62, %v358_v51  ;;  %v1117_v2 = vshll.u32 %v6434_v45, 16  ;;  %v6444_v10 = vrot.slane %v1114_v60, 4  ;;  %v895_v41 = vld [vmem:[#allocation2 + $0x38] sm:$0x1] }
  0xca   : > { %v723_v6 = vshrl.u32 %v530_v59, 16  ;;  %v1112_v7 = vsel %vm6310_vm13, %v1107_v63, %v1111_v53  ;;  %v726_v8 = vshll.u32 %v530_v59, 16  ;;  %v531_v9 = vpack.c.bf16 %v443_v1, %v443_v1 }
  0xcb   : > { %v601_v3 = vor.u32 %v599_v48, %v598_v56  ;;  %v602_v4 = vrot.slane %v598_v56, 4  ;;  %v428_v5 = vmax.f32 %v359_v43, 0.0  ;;  %v1439_v13 = vunpack.c.l.b16 %v1112_v7 }
  0xcc   : > { %v725_v16 = vrot.slane %v723_v6, 7  ;;  %v732_v21 = vshrl.u32 %v531_v9, 16  ;;  %v735_v48 = vshll.u32 %v531_v9, 16  ;;  %v1119_v55 = vrot.slane %v1117_v2, 5 }
  0xcd   : > { %v892_v11 = vsel %vm6285_vm7, %v601_v3, %v891_v61  ;;  %v516_v12 = vpack.c.bf16 %v428_v5, %v428_v5  ;;  %v5950_v14 = vld [vmem:[#allocation2 + $0x24] sm:$0xff]  ;;  %v1468_v25 = vpack.c.b16 %v1439_v13, %v1438_v54  ;;  %v947_v54 = vld [vmem:[#allocation2 + $0x90] sm:$0xf]  ;;  %v6468_v43 = vrot.slane %v2670_v57, 5  ;;  %v401_v57 = vpop.f32.mrf.mxu3 }
  0xce   : > { %v989_v17 = vld [vmem:[#allocation2 + $0x28] sm:$0xf]  ;;  %893 = vst [vmem:[#allocation2 + $0x30] sm:$0xf] %v892_v11  ;;  %v6448_v18 = vld [vmem:[#allocation2 + $0x2c] sm:$0x1]  ;;  %5606 = vmatmul.msk.bf16.gmra.mxu0 %vm1506_vm0, %v5950_v14  ;;  %v728_v26 = vor.u32 %v726_v8, %v725_v16  ;;  %v1120_v1 = vor.u32 %v1119_v55, %v6444_v10  ;;  %v399_v7 = vadd.f32 %v6250_v62, %v398_v22 }
  0xcf   : > { %v1959_v19 = vrot.slane %v989_v17, 5  ;;  %v604_v23 = vshrl.u32 %v516_v12, 16  ;;  %v607_v24 = vshll.u32 %v516_v12, 16  ;;  %v730_v31 = vrot.slane %v725_v16, 4  ;;  %5350 = vmatmul.msk.bf16.gmra.mxu1 %vm1506_vm0, %v1468_v25 }
  0xd0   : > { %v361_v29 = vpop.f32.mrf.mxu0  ;;  %v1962_v34 = vrot.slane %v6448_v18, 5  ;;  %v729_v38 = vsel %vm6317_vm14, %v721_v49, %v728_v26  ;;  %v6463_v46 = vrot.slane %v732_v21, 7  ;;  %v1123_v56 = vshll.u32 %v989_v17, 16 }
  0xd1   : > { %v1960_v32 = vsel %vm6296_vm8, %v5463_v0, %v1959_v19  ;;  %v1961_v33 = vrot.slane %v1959_v19, 4  ;;  %v606_v35 = vrot.slane %v604_v23, 7  ;;  %v362_v37 = vadd.f32 %v6250_v62, %v361_v29  ;;  %943 = vst.msk [vmem:[#allocation2 + $0x88] sm:$0xf] %vm453_vm2, %v729_v38 }
  0xd2   : > { %v2063_v39 = vunpack.c.l.b16 %v1960_v32  ;;  %v945_v44 = vsel %vm6326_vm15, %v730_v31, %v944_v30  ;;  %v737_v49 = vor.u32 %v735_v48, %v6463_v46  ;;  %v1125_v2 = vrot.slane %v1123_v56, 5 }
  0xd3   : > { %v1963_v45 = vsel %vm6296_vm8, %v1961_v33, %v1962_v34  ;;  %v609_v50 = vor.u32 %v607_v24, %v606_v35  ;;  %v611_v51 = vrot.slane %v606_v35, 4  ;;  %v429_v52 = vmax.f32 %v362_v37, 0.0  ;;  %946 = vst [vmem:[#allocation2 + $0x8c] sm:$0x1] %v945_v44 }
  0xd4   : > { %v2064_v53 = vunpack.c.l.b16 %v1963_v45  ;;  %v948_v0 = vsel %vm6285_vm7, %v737_v49, %v947_v54  ;;  %v1127_v3 = vshrl.u32 %v989_v17, 16  ;;  %v738_v12 = vrot.slane %v6463_v46, 4 }
  0xd5   : > { %v610_v59 = vsel %vm6317_vm14, %v602_v4, %v609_v50  ;;  %v896_v60 = vsel %vm6326_vm15, %v611_v51, %v895_v41  ;;  %v517_v61 = vpack.c.bf16 %v429_v52, %v429_v52  ;;  %v1889_v5 = vld [vmem:[#allocation2 + $0x30] sm:$0xe]  ;;  %v1133_v4 = vshll.u32 %v6448_v18, 16  ;;  %949 = vst [vmem:[#allocation2 + $0x90] sm:$0xf] %v948_v0  ;;  %v403_v52 = vpop.f32.mrf.mxu3 }
  0xd6   : > { %v2092_v63 = vpack.c.b16 %v2064_v53, %v2063_v39  ;;  %894 = vst.msk [vmem:[#allocation2 + $0x34] sm:$0xf] %vm453_vm2, %v610_v59  ;;  %v6480_v8 = vld [vmem:[#allocation2 + $0x30] sm:$0xf]  ;;  %v1129_v10 = vrot.slane %v1127_v3, 4  ;;  %v402_v13 = vadd.f32 %v6250_v62, %v401_v57  ;;  %v1121_v17 = vrot.slane %v1120_v1, 4 }
  0xd7   : > { %897 = vst [vmem:[#allocation2 + $0x38] sm:$0x1] %v896_v60  ;;  %v613_v6 = vshrl.u32 %v517_v61, 16  ;;  %v616_v9 = vshll.u32 %v517_v61, 16  ;;  %v444_v19 = vmax.f32 %v399_v7, 0.0  ;;  %v5464_v22 = vrot.slane %v1889_v5, 9 }
  0xd8   : > { %5503 = vmatmul.msk.bf16.gmra.mxu3 %vm1506_vm0, %v2092_v63  ;;  %v363_v11 = vpop.f32.mrf.mxu0  ;;  %v898_v18 = vld [vmem:[#allocation2 + $0x3c] sm:$0xf]  ;;  %v1130_v21 = vor.u32 %v1129_v10, %v1125_v2  ;;  %v445_v23 = vmax.f32 %v402_v13, 0.0  ;;  %v1138_v24 = vshrl.u32 %v6480_v8, 16  ;;  %v1126_v30 = vsel %vm6310_vm13, %v1121_v17, %v1125_v2  ;;  %v951_v3 = vld [vmem:[#allocation2 + $0x98] sm:$0x1] }
  0xd9   : > { %v615_v14 = vrot.slane %v613_v6, 7  ;;  %v364_v16 = vadd.f32 %v6250_v62, %v363_v11  ;;  %v1135_v29 = vrot.slane %v1133_v4, 5  ;;  %v532_v33 = vpack.c.bf16 %v444_v19, %v444_v19  ;;  %v902_v57 = vld [vmem:[#allocation2 + $0x44] sm:$0x1] }
  0xda   : > { %v1131_v32 = vrot.slane %v1130_v21, 4  ;;  %v533_v34 = vpack.c.bf16 %v445_v23, %v445_v23  ;;  %v1140_v41 = vrot.slane %v1138_v24, 4  ;;  %v1141_v44 = vshll.u32 %v6480_v8, 16  ;;  %v954_v24 = vld [vmem:[#allocation2 + $0x9c] sm:$0xf] }
  0xdb   : > { %v618_v25 = vor.u32 %v616_v9, %v615_v14  ;;  %v430_v26 = vmax.f32 %v364_v16, 0.0  ;;  %v619_v31 = vrot.slane %v615_v14, 4  ;;  %v1440_v46 = vunpack.c.l.b16 %v1126_v30 }
  0xdc   : > { %v1136_v45 = vsel %vm6310_vm13, %v1131_v32, %v1135_v29  ;;  %v740_v48 = vshrl.u32 %v532_v33, 16  ;;  %v743_v50 = vshll.u32 %v532_v33, 16  ;;  %v749_v61 = vshrl.u32 %v533_v34, 16 }
  0xdd   : > { %v899_v35 = vsel %vm6285_vm7, %v618_v25, %v898_v18  ;;  %v518_v37 = vpack.c.bf16 %v430_v26, %v430_v26  ;;  %v5951_v38 = vld [vmem:[#allocation2 + $0x30] sm:$0xff]  ;;  %v1441_v49 = vunpack.c.l.b16 %v1136_v45  ;;  %v752_v63 = vshll.u32 %v533_v34, 16  ;;  %v406_v32 = vpop.f32.mrf.mxu3 }
  0xde   : > { %v6491_v39 = vld [vmem:[#allocation2 + $0x34] sm:$0xf]  ;;  %900 = vst [vmem:[#allocation2 + $0x3c] sm:$0xf] %v899_v35  ;;  %v6496_v51 = vld [vmem:[#allocation2 + $0x38] sm:$0x1]  ;;  %5607 = vmatmul.msk.bf16.gmra.mxu0 %vm1506_vm0, %v5951_v38 }
  0xdf   : > { %v621_v53 = vshrl.u32 %v518_v37, 16  ;;  %v624_v54 = vshll.u32 %v518_v37, 16  ;;  %v1966_v55 = vrot.slane %v6491_v39, 5  ;;  %v742_v59 = vrot.slane %v740_v48, 7 }
  0xe0   : > { %v366_v56 = vpop.f32.mrf.mxu0  ;;  %v1969_v60 = vrot.slane %v6496_v51, 5  ;;  %v1469_v1 = vpack.c.b16 %v1441_v49, %v1440_v46  ;;  %v6505_v13 = vrot.slane %v749_v61, 7  ;;  %v1143_v19 = vrot.slane %v1141_v44, 5 }
  0xe1   : > { %v623_v0 = vrot.slane %v621_v53, 7  ;;  %v367_v2 = vadd.f32 %v6250_v62, %v366_v56  ;;  %v1967_v5 = vsel %vm6296_vm8, %v5464_v22, %v1966_v55  ;;  %v745_v6 = vor.u32 %v743_v50, %v742_v59 }
  0xe2   : > { %v747_v4 = vrot.slane %v742_v59, 4  ;;  %v1968_v7 = vrot.slane %v1966_v55, 4  ;;  %v2065_v8 = vunpack.c.l.b16 %v1967_v5  ;;  %5351 = vmatmul.msk.bf16.gmra.mxu1 %vm1506_vm0, %v1469_v1  ;;  %v755_v25 = vrot.slane %v6505_v13, 4 }
  0xe3   : > { %v626_v9 = vor.u32 %v624_v54, %v623_v0  ;;  %v628_v11 = vrot.slane %v623_v0, 4  ;;  %v431_v10 = vmax.f32 %v367_v2, 0.0  ;;  %v746_v14 = vsel %vm6317_vm14, %v738_v12, %v745_v6  ;;  %v905_v54 = vld [vmem:[#allocation2 + $0x48] sm:$0xf] }
  0xe4   : > { %v952_v16 = vsel %vm6326_vm15, %v747_v4, %v951_v3  ;;  %v1970_v17 = vsel %vm6296_vm8, %v1968_v7, %v1969_v60  ;;  %950 = vst.msk [vmem:[#allocation2 + $0x94] sm:$0xf] %vm453_vm2, %v746_v14  ;;  %v754_v12 = vor.u32 %v752_v63, %v6505_v13  ;;  %v1144_v26 = vor.u32 %v1143_v19, %v1140_v41 }
  0xe5   : > { %v627_v18 = vsel %vm6317_vm14, %v619_v31, %v626_v9  ;;  %v903_v21 = vsel %vm6326_vm15, %v628_v11, %v902_v57  ;;  %v519_v22 = vpack.c.bf16 %v431_v10, %v431_v10  ;;  %v2066_v23 = vunpack.c.l.b16 %v1970_v17  ;;  %v1890_v29 = vld [vmem:[#allocation2 + $0x3c] sm:$0xe]  ;;  %953 = vst [vmem:[#allocation2 + $0x98] sm:$0x1] %v952_v16 }
  0xe6   : > { %901 = vst.msk [vmem:[#allocation2 + $0x40] sm:$0xf] %vm453_vm2, %v627_v18  ;;  %v1147_v30 = vshll.u32 %v6491_v39, 16  ;;  %v1151_v35 = vshrl.u32 %v6491_v39, 16  ;;  %v955_v38 = vsel %vm6285_vm7, %v754_v12, %v954_v24  ;;  %v1145_v44 = vrot.slane %v1144_v26, 4  ;;  %v408_v26 = vpop.f32.mrf.mxu3 }
  0xe7   : > { %904 = vst [vmem:[#allocation2 + $0x44] sm:$0x1] %v903_v21  ;;  %v630_v31 = vshrl.u32 %v519_v22, 16  ;;  %v633_v33 = vshll.u32 %v519_v22, 16  ;;  %v2093_v34 = vpack.c.b16 %v2066_v23, %v2065_v8  ;;  %v1157_v46 = vshll.u32 %v6496_v51, 16 }
  0xe8   : > { %v368_v37 = vpop.f32.mrf.mxu0  ;;  %v1149_v45 = vrot.slane %v1147_v30, 5  ;;  %956 = vst [vmem:[#allocation2 + $0x9c] sm:$0xf] %v955_v38  ;;  %v1153_v50 = vrot.slane %v1151_v35, 4  ;;  %v404_v53 = vadd.f32 %v6250_v62, %v403_v52  ;;  %v992_v39 = vld [vmem:[#allocation2 + $0x3c] sm:$0xf]  ;;  %v407_v59 = vadd.f32 %v6250_v62, %v406_v32 }
  0xe9   : > { %v6526_v41 = vrot.slane %v630_v31, 7  ;;  %5504 = vmatmul.msk.bf16.gmra.mxu3 %vm1506_vm0, %v2093_v34  ;;  %v369_v48 = vadd.f32 %v6250_v62, %v368_v37  ;;  %v1159_v55 = vrot.slane %v1157_v46, 5  ;;  %v5465_v56 = vrot.slane %v1890_v29, 9 }
  0xea   : > { %v1150_v49 = vsel %vm6310_vm13, %v1145_v44, %v1149_v45  ;;  %v1154_v63 = vor.u32 %v1153_v50, %v1149_v45  ;;  %v446_v1 = vmax.f32 %v404_v53, 0.0  ;;  %v447_v2 = vmax.f32 %v407_v59, 0.0 }
  0xeb   : > { %v635_v51 = vor.u32 %v633_v33, %v6526_v41  ;;  %v636_v60 = vrot.slane %v6526_v41, 4  ;;  %v432_v61 = vmax.f32 %v369_v48, 0.0  ;;  %v1442_v0 = vunpack.c.l.b16 %v1150_v49  ;;  %v909_v33 = vld [vmem:[#allocation2 + $0x50] sm:$0x1]  ;;  %v958_v41 = vld [vmem:[#allocation2 + $0xa4] sm:$0x1] }
  0xec   : > { %v1162_v3 = vshrl.u32 %v992_v39, 16  ;;  %v1155_v57 = vrot.slane %v1154_v63, 4  ;;  %v1165_v7 = vshll.u32 %v992_v39, 16  ;;  %v534_v8 = vpack.c.bf16 %v446_v1, %v446_v1 }
  0xed   : > { %v906_v52 = vsel %vm6285_vm7, %v635_v51, %v905_v54  ;;  %v520_v5 = vpack.c.bf16 %v432_v61, %v432_v61  ;;  %v5952_v6 = vld [vmem:[#allocation2 + $0x3c] sm:$0xff]  ;;  %v535_v10 = vpack.c.bf16 %v447_v2, %v447_v2 }
  0xee   : > { %v6538_v4 = vld [vmem:[#allocation2 + $0x40] sm:$0xf]  ;;  %907 = vst [vmem:[#allocation2 + $0x48] sm:$0xf] %v906_v52  ;;  %v6540_v9 = vld [vmem:[#allocation2 + $0x44] sm:$0x1]  ;;  %v1160_v19 = vsel %vm6310_vm13, %v1155_v57, %v1159_v55  ;;  %5608 = vmatmul.msk.bf16.gmra.mxu0 %vm1506_vm0, %v5952_v6 }
  0xef   : > { %v1973_v11 = vrot.slane %v6538_v4, 5  ;;  %v6543_v14 = vrot.slane %v1162_v3, 4  ;;  %v638_v16 = vshrl.u32 %v520_v5, 16  ;;  %v641_v17 = vshll.u32 %v520_v5, 16  ;;  %v912_v52 = vld [vmem:[#allocation2 + $0x54] sm:$0xf] }
  0xf0   : > { %v1976_v18 = vrot.slane %v6540_v9, 5  ;;  %v1443_v21 = vunpack.c.l.b16 %v1160_v19  ;;  %v371_v22 = vpop.f32.mrf.mxu0  ;;  %v757_v23 = vshrl.u32 %v534_v8, 16  ;;  %v760_v24 = vshll.u32 %v534_v8, 16 }
  0xf1   : > { %v1974_v12 = vsel %vm6296_vm8, %v5465_v56, %v1973_v11  ;;  %v640_v30 = vrot.slane %v638_v16, 7  ;;  %v372_v29 = vadd.f32 %v6250_v62, %v371_v22  ;;  %v1975_v32 = vrot.slane %v1973_v11, 4  ;;  %v961_v56 = vld [vmem:[#allocation2 + $0xa8] sm:$0xf] }
  0xf2   : > { %v2067_v31 = vunpack.c.l.b16 %v1974_v12  ;;  %v1470_v34 = vpack.c.b16 %v1443_v21, %v1442_v0  ;;  %v759_v35 = vrot.slane %v757_v23, 7  ;;  %v766_v37 = vshrl.u32 %v535_v10, 16 }
  0xf3   : > { %v769_v38 = vshll.u32 %v535_v10, 16  ;;  %v643_v44 = vor.u32 %v641_v17, %v640_v30  ;;  %v645_v45 = vrot.slane %v640_v30, 4  ;;  %v433_v46 = vmax.f32 %v372_v29, 0.0  ;;  %v411_v17 = vpop.f32.mrf.mxu3 }
  0xf4   : > { %v1977_v48 = vsel %vm6296_vm8, %v1975_v32, %v1976_v18  ;;  %5352 = vmatmul.msk.bf16.gmra.mxu1 %vm1506_vm0, %v1470_v34  ;;  %v762_v50 = vor.u32 %v760_v24, %v759_v35  ;;  %v764_v53 = vrot.slane %v759_v35, 4  ;;  %v6555_v62 = vrot.slane %v766_v37, 7 }
  0xf5   : > { %v2068_v39 = vunpack.c.l.b16 %v1977_v48  ;;  %v644_v54 = vsel %vm6317_vm14, %v636_v60, %v643_v44  ;;  %v910_v49 = vsel %vm6326_vm15, %v645_v45, %v909_v33  ;;  %v521_v55 = vpack.c.bf16 %v433_v46, %v433_v46  ;;  %v1891_v2 = vld [vmem:[#allocation2 + $0x48] sm:$0xe] }
  0xf6   : > { %v1167_v59 = vrot.slane %v1165_v7, 5  ;;  %908 = vst.msk [vmem:[#allocation2 + $0x4c] sm:$0xf] %vm453_vm2, %v644_v54  ;;  %v763_v51 = vsel %vm6317_vm14, %v755_v25, %v762_v50  ;;  %v959_v61 = vsel %vm6326_vm15, %v764_v53, %v958_v41  ;;  %v771_v0 = vor.u32 %v769_v38, %v6555_v62  ;;  %v6590_v10 = vld [vmem:[#allocation2 + $0x48] sm:$0xf] }
  0xf7   : > { %v2094_v63 = vpack.c.b16 %v2068_v39, %v2067_v31  ;;  %911 = vst [vmem:[#allocation2 + $0x50] sm:$0x1] %v910_v49  ;;  %v647_v60 = vshrl.u32 %v521_v55, 16  ;;  %v6572_v3 = vrot.slane %v2674_v58, 4  ;;  %v1171_v5 = vshll.u32 %v6538_v4, 16 }
  0xf8   : > { %v1168_v1 = vor.u32 %v1167_v59, %v6543_v14  ;;  %957 = vst.msk [vmem:[#allocation2 + $0xa0] sm:$0xf] %vm453_vm2, %v763_v51  ;;  %v373_v13 = vpop.f32.mrf.mxu0  ;;  %v962_v25 = vsel %vm6285_vm7, %v771_v0, %v961_v56  ;;  %v1175_v57 = vshrl.u32 %v6538_v4, 16  ;;  %v1181_v6 = vshll.u32 %v6540_v9, 16 }
  0xf9   : > { %v6580_v7 = vrot.slane %v647_v60, 7  ;;  %v650_v8 = vshll.u32 %v521_v55, 16  ;;  %960 = vst [vmem:[#allocation2 + $0xa4] sm:$0x1] %v959_v61  ;;  %5505 = vmatmul.msk.bf16.gmra.mxu3 %vm1506_vm0, %v2094_v63  ;;  %v374_v58 = vadd.f32 %v6586_v42, %v373_v13  ;;  %v409_v11 = vadd.f32 %v6586_v42, %v408_v26  ;;  %v916_v61 = vld [vmem:[#allocation2 + $0x5c] sm:$0x1] }
  0xfa   : > { %v772_v4 = vrot.slane %v6555_v62, 4  ;;  %963 = vst [vmem:[#allocation2 + $0xa8] sm:$0xf] %v962_v25  ;;  %v1169_v9 = vrot.slane %v1168_v1, 4  ;;  %v1173_v14 = vrot.slane %v1171_v5, 5  ;;  %v1177_v16 = vrot.slane %v1175_v57, 4 }
  0xfb   : > { %v652_v19 = vor.u32 %v650_v8, %v6580_v7  ;;  %v434_v18 = vmax.f32 %v374_v58, 0.0  ;;  %v1183_v21 = vrot.slane %v1181_v6, 5  ;;  %v448_v22 = vmax.f32 %v409_v11, 0.0  ;;  %v965_v5 = vld [vmem:[#allocation2 + $0xb0] sm:$0x1]  ;;  %v413_v58 = vpop.f32.mrf.mxu3 }
  0xfc   : > { %v653_v23 = vrot.slane %v6580_v7, 4  ;;  %v1174_v24 = vsel %vm6310_vm13, %v1169_v9, %v1173_v14  ;;  %v1178_v12 = vor.u32 %v1177_v16, %v1173_v14  ;;  %v5466_v26 = vrot.slane %v1891_v2, 9 }
  0xfd   : > { %v913_v30 = vsel %vm6285_vm7, %v652_v19, %v912_v52  ;;  %v522_v29 = vpack.c.bf16 %v434_v18, %v434_v18  ;;  %v5953_v32 = vld [vmem:[#allocation2 + $0x48] sm:$0xff]  ;;  %v536_v31 = vpack.c.bf16 %v448_v22, %v448_v22  ;;  %v1186_v34 = vshrl.u32 %v6590_v10, 16 }
  0xfe   : > { %v6599_v33 = vld [vmem:[#allocation2 + $0x4c] sm:$0xf]  ;;  %914 = vst [vmem:[#allocation2 + $0x54] sm:$0xf] %v913_v30  ;;  %v1179_v35 = vrot.slane %v1178_v12, 4  ;;  %v1444_v37 = vunpack.c.l.b16 %v1174_v24  ;;  %v412_v45 = vadd.f32 %v6586_v42, %v411_v17  ;;  %5609 = vmatmul.msk.bf16.gmra.mxu0 %vm1506_vm0, %v5953_v32  ;;  %v1189_v16 = vshll.u32 %v6590_v10, 16 }
  0xff   : > { %v6602_v38 = vld [vmem:[#allocation2 + $0x50] sm:$0x1]  ;;  %v1980_v44 = vrot.slane %v6599_v33, 5  ;;  %v655_v46 = vshrl.u32 %v522_v29, 16  ;;  %v658_v41 = vshll.u32 %v522_v29, 16  ;;  %v774_v48 = vshrl.u32 %v536_v31, 16 }
 0x100   : > { %v777_v50 = vshll.u32 %v536_v31, 16  ;;  %v1184_v53 = vsel %vm6310_vm13, %v1179_v35, %v1183_v21  ;;  %v376_v39 = vpop.f32.mrf.mxu0  ;;  %v1983_v49 = vrot.slane %v6602_v38, 5  ;;  %v449_v60 = vmax.f32 %v412_v45, 0.0  ;;  %v968_v35 = vld [vmem:[#allocation2 + $0xb4] sm:$0xf]  ;;  %v5971_v45 = vld [vmem:[%s8197_s3 + $0x98] sm:$0xff] }
 0x101   : > { %v1981_v62 = vsel %vm6296_vm8, %v5466_v26, %v1980_v44  ;;  %v1982_v54 = vrot.slane %v1980_v44, 4  ;;  %v657_v55 = vrot.slane %v655_v46, 7  ;;  %v1445_v56 = vunpack.c.l.b16 %v1184_v53  ;;  %v919_v26 = vld [vmem:[#allocation2 + $0x60] sm:$0xf]  ;;  %3177 = vmatpush.bf16.msrb.mxu1 %v5971_v45 }
 0x102   : > { %v377_v59 = vadd.f32 %v6586_v42, %v376_v39  ;;  %v776_v51 = vrot.slane %v774_v48, 7  ;;  %v2069_v0 = vunpack.c.l.b16 %v1981_v62  ;;  %v1188_v1 = vrot.slane %v1186_v34, 4 }
 0x103   : > { %v1984_v63 = vsel %vm6296_vm8, %v1982_v54, %v1983_v49  ;;  %v660_v2 = vor.u32 %v658_v41, %v657_v55  ;;  %v662_v52 = vrot.slane %v657_v55, 4  ;;  %v1471_v13 = vpack.c.b16 %v1445_v56, %v1444_v37  ;;  %v5970_v54 = vld [vmem:[%s8197_s3 + $0x90] sm:$0xff] }
 0x104   : > { %v435_v25 = vmax.f32 %v377_v59, 0.0  ;;  %v779_v57 = vor.u32 %v777_v50, %v776_v51  ;;  %v781_v6 = vrot.slane %v776_v51, 4  ;;  %v2070_v7 = vunpack.c.l.b16 %v1984_v63 }
 0x105   : > { %v537_v8 = vpack.c.bf16 %v449_v60, %v449_v60  ;;  %v661_v11 = vsel %vm6317_vm14, %v653_v23, %v660_v2  ;;  %v917_v9 = vsel %vm6326_vm15, %v662_v52, %v916_v61  ;;  %5353 = vmatmul.msk.bf16.gmra.mxu1 %vm1506_vm0, %v1471_v13  ;;  %v1191_v12 = vrot.slane %v1189_v16, 5  ;;  %v1892_v48 = vld [vmem:[#allocation2 + $0x54] sm:$0xe] }
 0x106   : > { %v523_v14 = vpack.c.bf16 %v435_v25, %v435_v25  ;;  %915 = vst.msk [vmem:[#allocation2 + $0x58] sm:$0xf] %vm453_vm2, %v661_v11  ;;  %v780_v17 = vsel %vm6317_vm14, %v772_v4, %v779_v57  ;;  %v966_v19 = vsel %vm6326_vm15, %v781_v6, %v965_v5  ;;  %v2095_v18 = vpack.c.b16 %v2070_v7, %v2069_v0  ;;  %v416_v57 = vpop.f32.mrf.mxu3  ;;  %v6661_v11 = vld [vmem:[#allocation2 + $0x54] sm:$0xf] }
 0x107   : > { %v783_v21 = vshrl.u32 %v537_v8, 16  ;;  %918 = vst [vmem:[#allocation2 + $0x5c] sm:$0x1] %v917_v9  ;;  %v786_v24 = vshll.u32 %v537_v8, 16  ;;  %v1195_v29 = vshll.u32 %v6599_v33, 16  ;;  %v1199_v4 = vshrl.u32 %v6599_v33, 16  ;;  %3178 = vmatpush.bf16.msrb.mxu1 %v5970_v54 }
 0x108   : > { %v664_v22 = vshrl.u32 %v523_v14, 16  ;;  %v667_v23 = vshll.u32 %v523_v14, 16  ;;  %964 = vst.msk [vmem:[#allocation2 + $0xac] sm:$0xf] %vm453_vm2, %v780_v17  ;;  %v378_v30 = vpop.f32.mrf.mxu0  ;;  %v1205_v32 = vshll.u32 %v6602_v38, 16  ;;  %v1192_v37 = vor.u32 %v1191_v12, %v1188_v1  ;;  %v5969_v9 = vld [vmem:[%s8197_s3 + $0x88] sm:$0xff] }
 0x109   : > { %v6627_v10 = vrot.slane %v783_v21, 7  ;;  %967 = vst [vmem:[#allocation2 + $0xb0] sm:$0x1] %v966_v19  ;;  %5506 = vmatmul.msk.bf16.gmra.mxu3 %vm1506_vm0, %v2095_v18  ;;  %v379_v34 = vadd.f32 %v6586_v42, %v378_v30  ;;  %v414_v44 = vadd.f32 %v6586_v42, %v413_v58  ;;  %v1197_v38 = vrot.slane %v1195_v29, 5  ;;  %v923_v12 = vld [vmem:[#allocation2 + $0x68] sm:$0x1] }
 0x10a   : > { %v6632_v31 = vrot.slane %v664_v22, 7  ;;  %v1201_v41 = vrot.slane %v1199_v4, 4  ;;  %v1193_v62 = vrot.slane %v1192_v37, 4  ;;  %v1207_v56 = vrot.slane %v1205_v32, 5  ;;  %v972_v37 = vld [vmem:[#allocation2 + $0xbc] sm:$0x1] }
 0x10b   : > { %v788_v46 = vor.u32 %v786_v24, %v6627_v10  ;;  %v789_v33 = vrot.slane %v6627_v10, 4  ;;  %v436_v39 = vmax.f32 %v379_v34, 0.0  ;;  %v450_v59 = vmax.f32 %v414_v44, 0.0  ;;  %3179 = vmatpush.bf16.msrb.mxu1 %v5969_v9  ;;  %v5968_v44 = vld [vmem:[%s8197_s3 + $0x80] sm:$0xff] }
 0x10c   : > { %v669_v50 = vor.u32 %v667_v23, %v6632_v31  ;;  %v670_v53 = vrot.slane %v6632_v31, 4  ;;  %v1202_v55 = vor.u32 %v1201_v41, %v1197_v38  ;;  %v1198_v63 = vsel %vm6310_vm13, %v1193_v62, %v1197_v38 }
 0x10d   : > { %v969_v49 = vsel %vm6285_vm7, %v788_v46, %v968_v35  ;;  %v524_v61 = vpack.c.bf16 %v436_v39, %v436_v39  ;;  %v5954_v0 = vld [vmem:[#allocation2 + $0x54] sm:$0xff]  ;;  %v5467_v1 = vrot.slane %v1892_v48, 9  ;;  %v1446_v52 = vunpack.c.l.b16 %v1198_v63 }
 0x10e   : > { %v920_v51 = vsel %vm6285_vm7, %v669_v50, %v919_v26  ;;  %970 = vst [vmem:[#allocation2 + $0xb4] sm:$0xf] %v969_v49  ;;  %v6653_v60 = vld [vmem:[#allocation2 + $0x58] sm:$0xf]  ;;  %v1203_v2 = vrot.slane %v1202_v55, 4  ;;  %v538_v13 = vpack.c.bf16 %v450_v59, %v450_v59  ;;  %5610 = vmatmul.msk.bf16.gmra.mxu0 %vm1506_vm0, %v5954_v0  ;;  %v417_v58 = vadd.f32 %v6586_v42, %v416_v57 }
 0x10f   : > { %921 = vst [vmem:[#allocation2 + $0x60] sm:$0xf] %v920_v51  ;;  %v6655_v25 = vld [vmem:[#allocation2 + $0x5c] sm:$0x1]  ;;  %v1987_v5 = vrot.slane %v6653_v60, 5  ;;  %v672_v6 = vshrl.u32 %v524_v61, 16  ;;  %3180 = vmatpush.bf16.msrb.mxu1 %v5968_v44 }
 0x110   : > { %v675_v7 = vshll.u32 %v524_v61, 16  ;;  %v1990_v8 = vrot.slane %v6655_v25, 5  ;;  %v1208_v14 = vsel %vm6310_vm13, %v1203_v2, %v1207_v56  ;;  %v381_v16 = vpop.f32.mrf.mxu0  ;;  %v791_v17 = vshrl.u32 %v538_v13, 16  ;;  %v5939_v48 = vld [vmem:[%s8197_s3 + $0x18] sm:$0xff]  ;;  %v926_v0 = vld [vmem:[#allocation2 + $0x6c] sm:$0xf] }
 0x111   : > { %v794_v19 = vshll.u32 %v538_v13, 16  ;;  %v1988_v18 = vsel %vm6296_vm8, %v5467_v1, %v1987_v5  ;;  %v674_v21 = vrot.slane %v672_v6, 7  ;;  %v1447_v22 = vunpack.c.l.b16 %v1208_v14  ;;  %1800 = vmatpush.bf16.msrb.mxu2 %v5939_v48  ;;  %v418_v13 = vpop.f32.mrf.mxu3  ;;  %v975_v6 = vld [vmem:[#allocation2 + $0xc0] sm:$0xf] }
 0x112   : > { %v382_v23 = vadd.f32 %v6586_v42, %v381_v16  ;;  %v1989_v24 = vrot.slane %v1987_v5, 4  ;;  %v793_v26 = vrot.slane %v791_v17, 7  ;;  %v2071_v30 = vunpack.c.l.b16 %v1988_v18 }
 0x113   : > { %v451_v29 = vmax.f32 %v417_v58, 0.0  ;;  %v1210_v4 = vshrl.u32 %v6661_v11, 16  ;;  %v677_v32 = vor.u32 %v675_v7, %v674_v21  ;;  %v679_v31 = vrot.slane %v674_v21, 4 }
 0x114   : > { %v1472_v34 = vpack.c.b16 %v1447_v22, %v1446_v52  ;;  %v437_v35 = vmax.f32 %v382_v23, 0.0  ;;  %v796_v45 = vor.u32 %v794_v19, %v793_v26  ;;  %v798_v46 = vrot.slane %v793_v26, 4 }
 0x115   : > { %v1991_v38 = vsel %vm6296_vm8, %v1989_v24, %v1990_v8  ;;  %v539_v41 = vpack.c.bf16 %v451_v29, %v451_v29  ;;  %v678_v50 = vsel %vm6317_vm14, %v670_v53, %v677_v32  ;;  %v924_v39 = vsel %vm6326_vm15, %v679_v31, %v923_v12 }
 0x116   : > { %5354 = vmatmul.msk.bf16.gmra.mxu1 %vm1506_vm0, %v1472_v34  ;;  %v525_v62 = vpack.c.bf16 %v437_v35, %v437_v35  ;;  %v2072_v54 = vunpack.c.l.b16 %v1991_v38  ;;  %922 = vst.msk [vmem:[#allocation2 + $0x64] sm:$0xf] %vm453_vm2, %v678_v50  ;;  %v797_v49 = vsel %vm6317_vm14, %v789_v33, %v796_v45  ;;  %v973_v55 = vsel %vm6326_vm15, %v798_v46, %v972_v37  ;;  %v998_v46 = vld [vmem:[#allocation2 + $0x60] sm:$0xf] }
 0x117   : > { %v800_v56 = vshrl.u32 %v539_v41, 16  ;;  %v803_v59 = vshll.u32 %v539_v41, 16  ;;  %925 = vst [vmem:[#allocation2 + $0x68] sm:$0x1] %v924_v39  ;;  %v1212_v63 = vrot.slane %v1210_v4, 4  ;;  %v1213_v33 = vshll.u32 %v6661_v11, 16 }
 0x118   : > { %v681_v53 = vshrl.u32 %v525_v62, 16  ;;  %v684_v51 = vshll.u32 %v525_v62, 16  ;;  %v2096_v61 = vpack.c.b16 %v2072_v54, %v2071_v30  ;;  %971 = vst.msk [vmem:[#allocation2 + $0xb8] sm:$0xf] %vm453_vm2, %v797_v49  ;;  %v383_v1 = vpop.f32.mrf.mxu0  ;;  %v1219_v2 = vshll.u32 %v6653_v60, 16 }
 0x119   : > { %v6693_v10 = vrot.slane %v800_v56, 7  ;;  %v1223_v52 = vshrl.u32 %v6653_v60, 16  ;;  %974 = vst [vmem:[#allocation2 + $0xbc] sm:$0x1] %v973_v55  ;;  %v384_v57 = vadd.f32 %v6586_v42, %v383_v1  ;;  %v1229_v7 = vshll.u32 %v6655_v25, 16 }
 0x11a   : > { %v6698_v5 = vrot.slane %v681_v53, 7  ;;  %5507 = vmatmul.msk.bf16.gmra.mxu3 %vm1506_vm0, %v2096_v61  ;;  %v419_v8 = vadd.f32 %v6586_v42, %v418_v13  ;;  %v1215_v9 = vrot.slane %v1213_v33, 5  ;;  %v1221_v14 = vrot.slane %v1219_v2, 5  ;;  %v1893_v60 = vld [vmem:[#allocation2 + $0x60] sm:$0xe] }
 0x11b   : > { %v805_v58 = vor.u32 %v803_v59, %v6693_v10  ;;  %v806_v11 = vrot.slane %v6693_v10, 4  ;;  %v438_v19 = vmax.f32 %v384_v57, 0.0  ;;  %v1225_v18 = vrot.slane %v1223_v52, 4  ;;  %v930_v49 = vld [vmem:[#allocation2 + $0x74] sm:$0x1] }
 0x11c   : > { %v686_v16 = vor.u32 %v684_v51, %v6698_v5  ;;  %v687_v17 = vrot.slane %v6698_v5, 4  ;;  %v1216_v22 = vor.u32 %v1215_v9, %v1212_v63  ;;  %v1231_v25 = vrot.slane %v1229_v7, 5  ;;  %v979_v63 = vld [vmem:[#allocation2 + $0xc8] sm:$0x1]  ;;  %v2614_v7 = vld [vmem:[#allocation2 + $0x14] sm:$0x1] }
 0x11d   : > { %v976_v21 = vsel %vm6285_vm7, %v805_v58, %v975_v6  ;;  %v452_v23 = vmax.f32 %v419_v8, 0.0  ;;  %v526_v24 = vpack.c.bf16 %v438_v19, %v438_v19  ;;  %v1226_v12 = vor.u32 %v1225_v18, %v1221_v14  ;;  %v5955_v26 = vld [vmem:[#allocation2 + $0x60] sm:$0xff]  ;;  %v6739_v18 = vpop.f32.mrf.mxu1 }
 0x11e   : > { %v927_v42 = vsel %vm6285_vm7, %v686_v16, %v926_v0  ;;  %977 = vst [vmem:[#allocation2 + $0xc0] sm:$0xf] %v976_v21  ;;  %v999_v30 = vld [vmem:[#allocation2 + $0x64] sm:$0xf]  ;;  %v5468_v29 = vrot.slane %v1893_v60, 9  ;;  %v1217_v4 = vrot.slane %v1216_v22, 4  ;;  %v2677_v35 = vor.u32 %v6572_v3, %v6468_v43  ;;  %5611 = vmatmul.msk.bf16.gmra.mxu0 %vm1506_vm0, %v5955_v26 }
 0x11f   : > { %928 = vst [vmem:[#allocation2 + $0x6c] sm:$0xf] %v927_v42  ;;  %v540_v32 = vpack.c.bf16 %v452_v23, %v452_v23  ;;  %v6712_v31 = vld [vmem:[#allocation2 + $0x68] sm:$0x1]  ;;  %v1994_v34 = vrot.slane %v999_v30, 5  ;;  %v689_v37 = vshrl.u32 %v526_v24, 16 }
 0x120   : > { %v692_v44 = vshll.u32 %v526_v24, 16  ;;  %v1227_v45 = vrot.slane %v1226_v12, 4  ;;  %v1997_v20 = vrot.slane %v6712_v31, 5  ;;  %v1222_v38 = vsel %vm6310_vm13, %v1217_v4, %v1221_v14 }
 0x121   : > { %v808_v41 = vshrl.u32 %v540_v32, 16  ;;  %v811_v48 = vshll.u32 %v540_v32, 16  ;;  %v1995_v50 = vsel %vm6296_vm8, %v5468_v29, %v1994_v34  ;;  %v691_v39 = vrot.slane %v689_v37, 7 }
 0x122   : > { %v1232_v3 = vsel %vm6310_vm13, %v1227_v45, %v1231_v25  ;;  %v1448_v62 = vunpack.c.l.b16 %v1222_v38  ;;  %v1996_v54 = vrot.slane %v1994_v34, 4  ;;  %v2073_v59 = vunpack.c.l.b16 %v1995_v50 }
 0x123   : > { %v1449_v55 = vunpack.c.l.b16 %v1232_v3  ;;  %v810_v56 = vrot.slane %v808_v41, 7  ;;  %v1234_v53 = vshrl.u32 %v998_v46, 16  ;;  %v694_v51 = vor.u32 %v692_v44, %v691_v39 }
 0x124   : > { %v696_v61 = vrot.slane %v691_v39, 4  ;;  %v1998_v0 = vsel %vm6296_vm8, %v1996_v54, %v1997_v20  ;;  %v1237_v1 = vshll.u32 %v998_v46, 16  ;;  %v1243_v14 = vshll.u32 %v999_v30, 16 }
 0x125   : > { %v1473_v10 = vpack.c.b16 %v1449_v55, %v1448_v62  ;;  %v813_v33 = vor.u32 %v811_v48, %v810_v56  ;;  %v815_v2 = vrot.slane %v810_v56, 4  ;;  %v2074_v52 = vunpack.c.l.b16 %v1998_v0 }
 0x126   : > { %v695_v13 = vsel %vm6317_vm14, %v687_v17, %v694_v51  ;;  %v931_v5 = vsel %vm6326_vm15, %v696_v61, %v930_v49  ;;  %v1236_v57 = vrot.slane %v1234_v53, 4  ;;  %v1239_v6 = vrot.slane %v1237_v1, 5  ;;  %v1000_v19 = vld [vmem:[#allocation2 + $0x6c] sm:$0xf]  ;;  %v2616_v49 = vld [vmem:[#allocation2 + $0x1c] sm:$0xf] }
 0x127   : > { %929 = vst.msk [vmem:[#allocation2 + $0x70] sm:$0xf] %vm453_vm2, %v695_v13  ;;  %5355 = vmatmul.msk.bf16.gmra.mxu1 %vm1506_vm0, %v1473_v10  ;;  %v814_v8 = vsel %vm6317_vm14, %v806_v11, %v813_v33  ;;  %v980_v58 = vsel %vm6326_vm15, %v815_v2, %v979_v63  ;;  %v2097_v9 = vpack.c.b16 %v2074_v52, %v2073_v59  ;;  %v1247_v16 = vshrl.u32 %v999_v30, 16  ;;  %v1894_v25 = vld [vmem:[#allocation2 + $0x6c] sm:$0xe] }
 0x128   : > { %932 = vst [vmem:[#allocation2 + $0x74] sm:$0x1] %v931_v5  ;;  %v1240_v60 = vor.u32 %v1239_v6, %v1236_v57  ;;  %v2667_v17 = vor.u32 %v6391_v15, %v6367_v28  ;;  %v1245_v21 = vrot.slane %v1243_v14, 5  ;;  %v1253_v40 = vshll.u32 %v6712_v31, 16  ;;  %v6743_v28 = vpop.f32.mrf.mxu3  ;;  %v2615_v30 = vld [vmem:[#allocation2 + $0x18] sm:$0xf] }
 0x129   : > { %978 = vst.msk [vmem:[#allocation2 + $0xc4] sm:$0xf] %vm453_vm2, %v814_v8  ;;  %v2678_v11 = vrot.slane %v2677_v35, 4  ;;  %v2680_v22 = vshll.u32 %v2614_v7, 16  ;;  %v1249_v47 = vrot.slane %v1247_v16, 4  ;;  %v1258_v24 = vshrl.u32 %v1000_v19, 16 }
 0x12a   : > { %981 = vst [vmem:[#allocation2 + $0xc8] sm:$0x1] %v980_v58  ;;  %5508 = vmatmul.msk.bf16.gmra.mxu3 %vm1506_vm0, %v2097_v9  ;;  %v1241_v23 = vrot.slane %v1240_v60, 4  ;;  %v1261_v12 = vshll.u32 %v1000_v19, 16  ;;  %v2668_v26 = vrot.slane %v2667_v17, 4  ;;  %v1255_v4 = vrot.slane %v1253_v40, 5 }
 0x12b   : > { %v2682_v42 = vrot.slane %v2680_v22, 5  ;;  %v1250_v15 = vor.u32 %v1249_v47, %v1245_v21  ;;  %v6749_v31 = vpop.f32.mrf.mxu0  ;;  %v5469_v34 = vrot.slane %v1894_v25, 9  ;;  %v1260_v20 = vrot.slane %v1258_v24, 4  ;;  %v2617_v7 = vld [vmem:[#allocation2 + $0x20] sm:$0x1]  ;;  %v5938_v17 = vld [vmem:[%s8197_s3 + $0x10] sm:$0xff] }
 0x12c   : > { %v1246_v29 = vsel %vm6310_vm13, %v1241_v23, %v1245_v21  ;;  %v2673_v37 = vsel %vm6310_vm13, %v2668_v26, %v6468_v43  ;;  %v1263_v46 = vrot.slane %v1261_v12, 5  ;;  %v2685_v39 = vshrl.u32 %v2615_v30, 16  ;;  %v6757_v43 = vpop.f32.mrf.mxu1  ;;  %v1003_v25 = vld [vmem:[#allocation2 + $0x7c] sm:$0xf]  ;;  %1801 = vmatpush.bf16.msrb.mxu2 %v5938_v17  ;;  %v1032_v26 = vld [vmem:[#allocation2 + $0x80] sm:$0x1] }
 0x12d   : > { %v2683_v32 = vsel %vm6310_vm13, %v2678_v11, %v2682_v42  ;;  %v1251_v35 = vrot.slane %v1250_v15, 4  ;;  %v1450_v62 = vunpack.c.l.b16 %v1246_v29  ;;  %v2688_v55 = vshll.u32 %v2615_v30, 16  ;;  %v1002_v11 = vld [vmem:[#allocation2 + $0x78] sm:$0xf] }
 0x12e   : > { %v5956_v44 = vld [vmem:[#allocation2 + $0x6c] sm:$0xff]  ;;  %v3054_v54 = vunpack.c.l.b16 %v2683_v32  ;;  %v3053_v61 = vunpack.c.l.b16 %v2673_v37  ;;  %v1264_v63 = vor.u32 %v1263_v46, %v1260_v20  ;;  %v2694_v52 = vshll.u32 %v2616_v49, 16  ;;  %v1895_v30 = vld [vmem:[#allocation2 + $0x78] sm:$0xe]  ;;  %v2619_v20 = vld [vmem:[#allocation2 + $0x28] sm:$0xf] }
 0x12f   : > { %v1001_v45 = vld [vmem:[#allocation2 + $0x70] sm:$0xf]  ;;  %v1031_v38 = vld [vmem:[#allocation2 + $0x74] sm:$0x1]  ;;  %v1256_v3 = vsel %vm6310_vm13, %v1251_v35, %v1255_v4  ;;  %5612 = vmatmul.msk.bf16.gmra.mxu0 %vm1506_vm0, %v5956_v44  ;;  %v2698_v8 = vshrl.u32 %v2616_v49, 16  ;;  %v2687_v14 = vrot.slane %v2685_v39, 4 }
 0x130   : > { %v2001_v41 = vrot.slane %v1001_v45, 5  ;;  %v1267_v48 = vshll.u32 %v1001_v45, 16  ;;  %v1271_v50 = vshrl.u32 %v1001_v45, 16  ;;  %v1451_v56 = vunpack.c.l.b16 %v1256_v3  ;;  %v6763_v13 = vpop.f32.mrf.mxu3 }
 0x131   : > { %v2004_v51 = vrot.slane %v1031_v38, 5  ;;  %v1277_v2 = vshll.u32 %v1031_v38, 16  ;;  %v3085_v58 = vpack.c.b16 %v3054_v54, %v3053_v61  ;;  %v2690_v60 = vrot.slane %v2688_v55, 5  ;;  %v2618_v55 = vld [vmem:[#allocation2 + $0x24] sm:$0xf] }
 0x132   : > { %v2002_v59 = vsel %vm6296_vm8, %v5469_v34, %v2001_v41  ;;  %v2003_v53 = vrot.slane %v2001_v41, 4  ;;  %v1269_v0 = vrot.slane %v1267_v48, 5  ;;  %v1273_v1 = vrot.slane %v1271_v50, 4 }
 0x133   : > { %v1474_v10 = vpack.c.b16 %v1451_v56, %v1450_v62  ;;  %v2075_v5 = vunpack.c.l.b16 %v2002_v59  ;;  %v6766_v9 = vpop.f32.mrf.mxu0  ;;  %v2696_v16 = vrot.slane %v2694_v52, 5  ;;  %v2700_v40 = vrot.slane %v2698_v8, 4  ;;  %v5957_v56 = vld [vmem:[#allocation2 + $0x78] sm:$0xff] }
 0x134   : > { %v2005_v33 = vsel %vm6296_vm8, %v2003_v53, %v2004_v51  ;;  %v1274_v6 = vor.u32 %v1273_v1, %v1269_v0  ;;  %v1279_v22 = vrot.slane %v1277_v2, 5  ;;  %v2704_v47 = vshll.u32 %v2617_v7, 16 }
 0x135   : > { %v2076_v57 = vunpack.c.l.b16 %v2005_v33  ;;  %5356 = vmatmul.msk.bf16.vlgmr.msra.gmra.mxu2 %vm1506_vm0, %v1474_v10  ;;  %v1265_v23 = vrot.slane %v1264_v63, 4  ;;  %v2701_v42 = vor.u32 %v2700_v40, %v2696_v16  ;;  %v2008_v24 = vrot.slane %v1003_v25, 5 }
 0x136   : > { %v1275_v21 = vrot.slane %v1274_v6, 4  ;;  %v2691_v15 = vor.u32 %v2690_v60, %v2687_v14  ;;  %v1282_v29 = vshrl.u32 %v1002_v11, 16  ;;  %v1285_v34 = vshll.u32 %v1002_v11, 16  ;;  %v2620_v11 = vld [vmem:[#allocation2 + $0x2c] sm:$0x1] }
 0x137   : > { %v2098_v19 = vpack.c.b16 %v2076_v57, %v2075_v5  ;;  %5644 = vmatmul.msk.bf16.vlgmr.msrb.gmra.mxu1 %vm1506_vm0, %v3085_v58  ;;  %v1270_v4 = vsel %vm6310_vm13, %v1265_v23, %v1269_v0  ;;  %v2702_v32 = vrot.slane %v2701_v42, 4  ;;  %v1291_v35 = vshll.u32 %v1003_v25, 16 }
 0x138   : > { %v1280_v12 = vsel %vm6310_vm13, %v1275_v21, %v1279_v22  ;;  %v2706_v44 = vrot.slane %v2704_v47, 5  ;;  %v1295_v45 = vshrl.u32 %v1003_v25, 16  ;;  %v5470_v41 = vrot.slane %v1895_v30, 9 }
 0x139   : > { %v1453_v38 = vunpack.c.l.b16 %v1280_v12  ;;  %v2010_v48 = vrot.slane %v2008_v24, 4  ;;  %v2011_v50 = vrot.slane %v1032_v26, 5  ;;  %v1452_v39 = vunpack.c.l.b16 %v1270_v4  ;;  %v1005_v12 = vld [vmem:[#allocation2 + $0x88] sm:$0xf]  ;;  %v6803_v4 = vld [vmem:[#allocation2 + $0x8c] sm:$0x1] }
 0x13a   : > { %5509 = vmatmul.msk.bf16.gmra.mxu3 %vm1506_vm0, %v2098_v19  ;;  %v6777_v37 = vpop.f32.mrf.mxu1  ;;  %v2692_v3 = vrot.slane %v2691_v15, 4  ;;  %v2707_v62 = vsel %vm6310_vm13, %v2702_v32, %v2706_v44  ;;  %v1284_v49 = vrot.slane %v1282_v29, 4  ;;  %v1287_v59 = vrot.slane %v1285_v34, 5  ;;  %v1896_v15 = vld [vmem:[#allocation2 + $0x84] sm:$0xe] }
 0x13b   : > { %v6779_v46 = vpop.f32.mrf.mxu3  ;;  %v6783_v54 = vpop.f32.mrf.mxu0  ;;  %v1293_v53 = vrot.slane %v1291_v35, 5  ;;  %v1297_v51 = vrot.slane %v1295_v45, 4  ;;  %v2718_v61 = vshll.u32 %v2619_v20, 16  ;;  %v1475_v0 = vpack.c.b16 %v1453_v38, %v1452_v39  ;;  %v1004_v32 = vld [vmem:[#allocation2 + $0x84] sm:$0xf] }
 0x13c   : > { %v2697_v63 = vsel %vm6310_vm13, %v2692_v3, %v2696_v16  ;;  %v2009_v1 = vsel %vm6296_vm8, %v5470_v41, %v2008_v24  ;;  %v2012_v10 = vsel %vm6296_vm8, %v2010_v48, %v2011_v50  ;;  %v2722_v33 = vshrl.u32 %v2619_v20, 16  ;;  %v2622_v38 = vld [vmem:[#allocation2 + $0x34] sm:$0xf] }
 0x13d   : > { %v3056_v2 = vunpack.c.l.b16 %v2707_v62  ;;  %v1301_v52 = vshll.u32 %v1032_v26, 16  ;;  %v2709_v5 = vshrl.u32 %v2618_v55, 16  ;;  %v2712_v57 = vshll.u32 %v2618_v55, 16 }
 0x13e   : > { %v1288_v6 = vor.u32 %v1287_v59, %v1284_v49  ;;  %v1298_v7 = vor.u32 %v1297_v51, %v1293_v53  ;;  %v6792_v8 = vrot.slane %v2718_v61, 5  ;;  %v2724_v58 = vrot.slane %v2722_v33, 4 }
 0x13f   : > { %5613 = vmatmul.msk.bf16.gmra.mxu0 %vm1506_vm0, %v5957_v56  ;;  %v3055_v14 = vunpack.c.l.b16 %v2697_v63  ;;  %v2077_v16 = vunpack.c.l.b16 %v2009_v1  ;;  %v2078_v17 = vunpack.c.l.b16 %v2012_v10  ;;  %v2711_v22 = vrot.slane %v2709_v5, 4  ;;  %v5958_v10 = vld [vmem:[#allocation2 + $0x84] sm:$0xff] }
 0x140   : > { %v2714_v47 = vrot.slane %v2712_v57, 5  ;;  %v1289_v25 = vrot.slane %v1288_v6, 4  ;;  %v1299_v23 = vrot.slane %v1298_v7, 4  ;;  %v1303_v42 = vrot.slane %v1301_v52, 5 }
 0x141   : > { %v3086_v19 = vpack.c.b16 %v3056_v2, %v3055_v14  ;;  %v2725_v24 = vor.u32 %v2724_v58, %v6792_v8  ;;  %v2015_v26 = vrot.slane %v1005_v12, 5  ;;  %v2099_v30 = vpack.c.b16 %v2078_v17, %v2077_v16 }
 0x142   : > { %v6797_v21 = vpop.f32.mrf.mxu1  ;;  %v2728_v29 = vshll.u32 %v2620_v11, 16  ;;  %v2715_v34 = vor.u32 %v2714_v47, %v2711_v22  ;;  %v1294_v35 = vsel %vm6310_vm13, %v1289_v25, %v1293_v53  ;;  %v1304_v44 = vsel %vm6310_vm13, %v1299_v23, %v1303_v42  ;;  %v2621_v53 = vld [vmem:[#allocation2 + $0x30] sm:$0xf] }
 0x143   : > { %v6794_v60 = vpop.f32.mrf.mxu3  ;;  %v6799_v40 = vpop.f32.mrf.mxu0  ;;  %v2726_v45 = vrot.slane %v2725_v24, 4  ;;  %v5471_v20 = vrot.slane %v1896_v15, 9  ;;  %v2017_v41 = vrot.slane %v2015_v26, 4  ;;  %v2018_v48 = vrot.slane %v6803_v4, 5  ;;  %v2623_v15 = vld [vmem:[#allocation2 + $0x38] sm:$0x1] }
 0x144   : > { %v1306_v50 = vshrl.u32 %v1004_v32, 16  ;;  %v1309_v39 = vshll.u32 %v1004_v32, 16  ;;  %v2730_v62 = vrot.slane %v2728_v29, 5  ;;  %v1315_v49 = vshll.u32 %v1005_v12, 16 }
 0x145   : > { %5357 = vmatmul.msk.bf16.gmra.mxu2 %vm1506_vm0, %v1475_v0  ;;  %v1319_v55 = vshrl.u32 %v1005_v12, 16  ;;  %v2716_v56 = vrot.slane %v2715_v34, 4  ;;  %v2742_v51 = vshll.u32 %v2622_v38, 16  ;;  %v2746_v61 = vshrl.u32 %v2622_v38, 16 }
 0x146   : > { %v1454_v63 = vunpack.c.l.b16 %v1294_v35  ;;  %v1455_v0 = vunpack.c.l.b16 %v1304_v44  ;;  %v2731_v1 = vsel %vm6310_vm13, %v2726_v45, %v2730_v62  ;;  %v2016_v33 = vsel %vm6296_vm8, %v5471_v20, %v2015_v26  ;;  %v5937_v35 = vld [vmem:[%s8197_s3 + $0x8] sm:$0xff]  ;;  %v1007_v44 = vld [vmem:[#allocation2 + $0x94] sm:$0xf]  ;;  %v1006_v45 = vld [vmem:[#allocation2 + $0x90] sm:$0xf] }
 0x147   : > { %5645 = vmatmul.msk.bf16.gmra.mxu1 %vm1506_vm0, %v3086_v19  ;;  %v2721_v52 = vsel %vm6310_vm13, %v2716_v56, %v6792_v8  ;;  %v2019_v5 = vsel %vm6296_vm8, %v2017_v41, %v2018_v48  ;;  %v1308_v57 = vrot.slane %v1306_v50, 4  ;;  %v1311_v6 = vrot.slane %v1309_v39, 5  ;;  %1802 = vmatpush.bf16.msrb.mxu2 %v5937_v35  ;;  %v1034_v62 = vld [vmem:[#allocation2 + $0x98] sm:$0x1] }
 0x148   : > { %v6827_v7 = vrot.slane %v1315_v49, 5  ;;  %v1321_v58 = vrot.slane %v1319_v55, 4  ;;  %v2733_v14 = vshrl.u32 %v2621_v53, 16  ;;  %v2736_v16 = vshll.u32 %v2621_v53, 16  ;;  %v1897_v49 = vld [vmem:[#allocation2 + $0x90] sm:$0xe] }
 0x149   : > { %v3058_v17 = vunpack.c.l.b16 %v2731_v1  ;;  %v6829_v19 = vrot.slane %v2742_v51, 5  ;;  %v2748_v11 = vrot.slane %v2746_v61, 4  ;;  %v2079_v22 = vunpack.c.l.b16 %v2016_v33  ;;  %v2624_v61 = vld [vmem:[#allocation2 + $0x3c] sm:$0xf] }
 0x14a   : > { %5510 = vmatmul.msk.bf16.gmra.mxu3 %vm1506_vm0, %v2099_v30  ;;  %v1476_v47 = vpack.c.b16 %v1455_v0, %v1454_v63  ;;  %v3057_v25 = vunpack.c.l.b16 %v2721_v52  ;;  %v2080_v8 = vunpack.c.l.b16 %v2019_v5  ;;  %v1312_v23 = vor.u32 %v1311_v6, %v1308_v57  ;;  %v2625_v5 = vld [vmem:[#allocation2 + $0x40] sm:$0xf] }
 0x14b   : > { %v6811_v3 = vpop.f32.mrf.mxu3  ;;  %v6813_v59 = vpop.f32.mrf.mxu0  ;;  %v1322_v24 = vor.u32 %v1321_v58, %v6827_v7  ;;  %v1325_v12 = vshll.u32 %v6803_v4, 16  ;;  %v2735_v26 = vrot.slane %v2733_v14, 4  ;;  %v2738_v30 = vrot.slane %v2736_v16, 5 }
 0x14c   : > { %8213 = vst [vmem:[#allocation4_spill] sm:$0xff] %v6813_v59  ;;  %v6819_v2 = vpop.f32.mrf.mxu1  ;;  %v3087_v29 = vpack.c.b16 %v3058_v17, %v3057_v25  ;;  %v2749_v34 = vor.u32 %v2748_v11, %v6829_v19  ;;  %v1313_v4 = vrot.slane %v1312_v23, 4  ;;  %v2752_v38 = vshll.u32 %v2623_v15, 16  ;;  %v5959_v25 = vld [vmem:[#allocation2 + $0x90] sm:$0xff] }
 0x14d   : > { %v2100_v41 = vpack.c.b16 %v2080_v8, %v2079_v22  ;;  %v1323_v48 = vrot.slane %v1322_v24, 4  ;;  %v1327_v50 = vrot.slane %v1325_v12, 5  ;;  %v2739_v39 = vor.u32 %v2738_v30, %v2735_v26 }
 0x14e   : > { %v2750_v55 = vrot.slane %v2749_v34, 4  ;;  %v2022_v56 = vrot.slane %v1007_v44, 5  ;;  %v1330_v53 = vshrl.u32 %v1006_v45, 16  ;;  %v1339_v51 = vshll.u32 %v1007_v44, 16 }
 0x14f   : > { %5614 = vmatmul.msk.bf16.gmra.mxu0 %vm1506_vm0, %v5958_v10  ;;  %v1333_v63 = vshll.u32 %v1006_v45, 16  ;;  %v1343_v0 = vshrl.u32 %v1007_v44, 16  ;;  %v1318_v1 = vsel %vm6310_vm13, %v1313_v4, %v6827_v7  ;;  %v2754_v10 = vrot.slane %v2752_v38, 5 }
 0x150   : > { %v5472_v33 = vrot.slane %v1897_v49, 9  ;;  %v2025_v52 = vrot.slane %v1034_v62, 5  ;;  %v1328_v6 = vsel %vm6310_vm13, %v1323_v48, %v1327_v50  ;;  %v2740_v58 = vrot.slane %v2739_v39, 4 }
 0x151   : > { %v2757_v14 = vshrl.u32 %v2624_v61, 16  ;;  %v2760_v16 = vshll.u32 %v2624_v61, 16  ;;  %v2755_v17 = vsel %vm6310_vm13, %v2750_v55, %v2754_v10  ;;  %v2024_v22 = vrot.slane %v2022_v56, 4 }
 0x152   : > { %v1341_v7 = vrot.slane %v1339_v51, 5  ;;  %v1335_v8 = vrot.slane %v1333_v63, 5  ;;  %v1345_v23 = vrot.slane %v1343_v0, 4  ;;  %v2766_v24 = vshll.u32 %v2625_v5, 16  ;;  %v2626_v0 = vld [vmem:[#allocation2 + $0x44] sm:$0x1] }
 0x153   : > { %v6831_v42 = vpop.f32.mrf.mxu3  ;;  %v6836_v32 = vpop.f32.mrf.mxu0  ;;  %v2770_v12 = vshrl.u32 %v2625_v5, 16  ;;  %v1456_v15 = vunpack.c.l.b16 %v1318_v1  ;;  %v1457_v26 = vunpack.c.l.b16 %v1328_v6  ;;  %v2745_v30 = vsel %vm6310_vm13, %v2740_v58, %v6829_v19  ;;  %v1009_v6 = vld [vmem:[#allocation2 + $0xa0] sm:$0xf]  ;;  %v1008_v58 = vld [vmem:[#allocation2 + $0x9c] sm:$0xf] }
 0x154   : > { %8214 = vst [vmem:[#allocation5_spill] sm:$0xff] %v6831_v42  ;;  %v6843_v20 = vpop.f32.mrf.mxu1  ;;  %v2759_v34 = vrot.slane %v2757_v14, 4  ;;  %v3060_v44 = vunpack.c.l.b16 %v2755_v17  ;;  %v2026_v45 = vsel %vm6296_vm8, %v2024_v22, %v2025_v52  ;;  %v1349_v4 = vshll.u32 %v1034_v62, 16  ;;  %v2627_v17 = vld [vmem:[#allocation2 + $0x48] sm:$0xf] }
 0x155   : > { %5358 = vmatmul.msk.bf16.gmra.mxu2 %vm1506_vm0, %v1476_v47  ;;  %8215 = vst [vmem:[#allocation6_spill] sm:$0xff] %v6836_v32  ;;  %v1332_v47 = vrot.slane %v1330_v53, 4  ;;  %v2762_v38 = vrot.slane %v2760_v16, 5  ;;  %v1346_v48 = vor.u32 %v1345_v23, %v1341_v7  ;;  %v2768_v50 = vrot.slane %v2766_v24, 5  ;;  %v1035_v23 = vld [vmem:[#allocation2 + $0xa4] sm:$0x1] }
 0x156   : > { %v2772_v39 = vrot.slane %v2770_v12, 4  ;;  %v1477_v49 = vpack.c.b16 %v1457_v26, %v1456_v15  ;;  %v3059_v19 = vunpack.c.l.b16 %v2745_v30  ;;  %v2082_v51 = vunpack.c.l.b16 %v2026_v45  ;;  %v1898_v24 = vld [vmem:[#allocation2 + $0x9c] sm:$0xe]  ;;  %v5924_v32 = vld [vmem:[#allocation2 + $0x30] sm:$0xff] }
 0x157   : > { %5646 = vmatmul.msk.bf16.gmra.mxu1 %vm1506_vm0, %v3087_v29  ;;  %v2023_v29 = vsel %vm6296_vm8, %v5472_v33, %v2022_v56  ;;  %v1351_v63 = vrot.slane %v1349_v4, 5  ;;  %v1347_v62 = vrot.slane %v1346_v48, 4  ;;  %v2763_v10 = vor.u32 %v2762_v38, %v2759_v34 }
 0x158   : > { %v2081_v53 = vunpack.c.l.b16 %v2023_v29  ;;  %v3088_v56 = vpack.c.b16 %v3060_v44, %v3059_v19  ;;  %v2773_v33 = vor.u32 %v2772_v39, %v2768_v50  ;;  %v2776_v5 = vshll.u32 %v2626_v0, 16  ;;  %v2628_v29 = vld [vmem:[#allocation2 + $0x4c] sm:$0xf] }
 0x159   : > { %v2029_v16 = vrot.slane %v1009_v6, 5  ;;  %v1354_v12 = vshrl.u32 %v1008_v58, 16  ;;  %v1357_v15 = vshll.u32 %v1008_v58, 16  ;;  %v1363_v26 = vshll.u32 %v1009_v6, 16 }
 0x15a   : > { %5511 = vmatmul.msk.bf16.gmra.mxu3 %vm1506_vm0, %v2100_v41  ;;  %v1336_v41 = vor.u32 %v1335_v8, %v1332_v47  ;;  %v2101_v52 = vpack.c.b16 %v2082_v51, %v2081_v53  ;;  %v1352_v47 = vsel %vm6310_vm13, %v1347_v62, %v1351_v63  ;;  %v2774_v8 = vrot.slane %v2773_v33, 4  ;;  %v5960_v51 = vld [vmem:[#allocation2 + $0x9c] sm:$0xff] }
 0x15b   : > { %v6849_v57 = vpop.f32.mrf.mxu3  ;;  %v6855_v11 = vpop.f32.mrf.mxu0  ;;  %v1367_v30 = vshrl.u32 %v1009_v6, 16  ;;  %v2778_v44 = vrot.slane %v2776_v5, 5  ;;  %v2781_v45 = vshrl.u32 %v2627_v17, 16  ;;  %v2784_v4 = vshll.u32 %v2627_v17, 16 }
 0x15c   : > { %8216 = vst [vmem:[#allocation7_spill] sm:$0xff] %v6849_v57  ;;  %v1337_v1 = vrot.slane %v1336_v41, 4  ;;  %v5473_v41 = vrot.slane %v1898_v24, 9  ;;  %v2031_v48 = vrot.slane %v2029_v16, 4  ;;  %v2032_v39 = vrot.slane %v1035_v23, 5 }
 0x15d   : > { %8217 = vst [vmem:[#allocation8_spill] sm:$0xff] %v6855_v11  ;;  %v2779_v19 = vsel %vm6310_vm13, %v2774_v8, %v2778_v44  ;;  %v2794_v63 = vshrl.u32 %v2628_v29, 16  ;;  %v1356_v0 = vrot.slane %v1354_v12, 4  ;;  %v1369_v62 = vrot.slane %v1367_v30, 4  ;;  %v2629_v30 = vld [vmem:[#allocation2 + $0x50] sm:$0x1] }
 0x15e   : > { %v1342_v22 = vsel %vm6310_vm13, %v1337_v1, %v1341_v7  ;;  %v1365_v1 = vrot.slane %v1363_v26, 5  ;;  %v3062_v33 = vunpack.c.l.b16 %v2779_v19  ;;  %v2033_v5 = vsel %vm6296_vm8, %v2031_v48, %v2032_v39  ;;  %v1899_v19 = vld [vmem:[#allocation2 + $0xa8] sm:$0xe] }
 0x15f   : > { %5615 = vmatmul.msk.bf16.gmra.mxu0 %vm1506_vm0, %v5959_v25  ;;  %v6863_v35 = vpop.f32.mrf.mxu1  ;;  %v2764_v25 = vrot.slane %v2763_v10, 4  ;;  %v1458_v7 = vunpack.c.l.b16 %v1342_v22  ;;  %v2783_v58 = vrot.slane %v2781_v45, 4  ;;  %v2786_v17 = vrot.slane %v2784_v4, 5  ;;  %v4047_v11 = vld [vmem:[#allocation2 + $0x48] sm:$0xf] }
 0x160   : > { %8218 = vst [vmem:[#allocation9_spill] sm:$0xff] %v6863_v35  ;;  %v1370_v24 = vor.u32 %v1369_v62, %v1365_v1  ;;  %v1373_v12 = vshll.u32 %v1035_v23, 16  ;;  %v2084_v26 = vunpack.c.l.b16 %v2033_v5  ;;  %v1036_v62 = vld [vmem:[#allocation2 + $0xb0] sm:$0x1]  ;;  %v4730_v35 = vld [vmem:[#allocation2 + $0xb4] sm:$0xe] }
 0x161   : > { %v2769_v34 = vsel %vm6310_vm13, %v2764_v25, %v2768_v50  ;;  %v1359_v50 = vrot.slane %v1357_v15, 5  ;;  %v2787_v44 = vor.u32 %v2786_v17, %v2783_v58  ;;  %v5474_v58 = vrot.slane %v1899_v19, 9  ;;  %v2630_v17 = vld [vmem:[#allocation2 + $0x54] sm:$0xf] }
 0x162   : > { %v3061_v10 = vunpack.c.l.b16 %v2769_v34  ;;  %v5936_v34 = vld [vmem:[%s8197_s3] sm:$0xff]  ;;  %v1375_v23 = vrot.slane %v1373_v12, 5 }
 0x163   : > { %v6867_v55 = vpop.f32.mrf.mxu3  ;;  %v6870_v61 = vpop.f32.mrf.mxu0  ;;  %v1360_v8 = vor.u32 %v1359_v50, %v1356_v0  ;;  %1803 = vmatpush.bf16.msrb.mxu2 %v5936_v34  ;;  %v2788_v0 = vrot.slane %v2787_v44, 4  ;;  %v2805_v44 = vshrl.u32 %v2630_v17, 16 }
 0x164   : > { %8219 = vst [vmem:[#allocation10_spill] sm:$0xff] %v6867_v55 }
 0x165   : > { %5359 = vmatmul.msk.bf16.gmra.mxu2 %vm1506_vm0, %v1477_v49  ;;  %8220 = vst [vmem:[#allocation11_spill] sm:$0xff] %v6870_v61  ;;  %v1459_v49 = vunpack.c.l.b16 %v1352_v47  ;;  %v2796_v47 = vrot.slane %v2794_v63, 4  ;;  %v1361_v4 = vrot.slane %v1360_v8, 4 }
 0x167   : > { %5647 = vmatmul.msk.bf16.gmra.mxu1 %vm1506_vm0, %v3088_v56  ;;  %v6873_v14 = vpop.f32.mrf.mxu1  ;;  %v2790_v56 = vshll.u32 %v2628_v29, 16  ;;  %v1478_v25 = vpack.c.b16 %v1459_v49, %v1458_v7  ;;  %v1371_v7 = vrot.slane %v1370_v24, 4  ;;  %v1011_v49 = vld [vmem:[#allocation2 + $0xac] sm:$0xf] }
 0x168   : > { %8221 = vst [vmem:[#allocation12_spill] sm:$0xff] %v6873_v14  ;;  %v1387_v8 = vshll.u32 %v1011_v49, 16  ;;  %v1391_v24 = vshrl.u32 %v1011_v49, 16  ;;  %v4723_v14 = vld [vmem:[#allocation2 + $0x60] sm:$0xe] }
 0x169   : > { %v6895_v22 = vrot.slane %v2790_v56, 5  ;;  %v1010_v56 = vld [vmem:[#allocation2 + $0xa8] sm:$0xf] }
 0x16a   : > { %5512 = vmatmul.msk.bf16.gmra.mxu3 %vm1506_vm0, %v2101_v52  ;;  %v2030_v52 = vsel %vm6296_vm8, %v5473_v41, %v2029_v16  ;;  %v3089_v16 = vpack.c.b16 %v3062_v33, %v3061_v10  ;;  %v2800_v41 = vshll.u32 %v2629_v30, 16  ;;  %v2631_v10 = vld [vmem:[#allocation2 + $0x58] sm:$0xf]  ;;  %v1366_v33 = vsel %vm6310_vm13, %v1361_v4, %v1365_v1  ;;  %v5961_v1 = vld [vmem:[#allocation2 + $0xa8] sm:$0xff] }
 0x16b   : > { %v6886_v53 = vpop.f32.mrf.mxu0  ;;  %v2083_v15 = vunpack.c.l.b16 %v2030_v52  ;;  %v2797_v45 = vor.u32 %v2796_v47, %v6895_v22  ;;  %v1376_v52 = vsel %vm6310_vm13, %v1371_v7, %v1375_v23  ;;  %v1378_v47 = vshrl.u32 %v1010_v56, 16 }
 0x16c   : > { %v6882_v38 = vpop.f32.mrf.mxu3  ;;  %8223 = vst [vmem:[#allocation14_spill] sm:$0xff] %v6886_v53  ;;  %v2802_v5 = vrot.slane %v2800_v41, 5  ;;  %v2814_v30 = vshll.u32 %v2631_v10, 16  ;;  %v1460_v4 = vunpack.c.l.b16 %v1366_v33  ;;  %v1461_v7 = vunpack.c.l.b16 %v1376_v52 }
 0x16d   : > { %8222 = vst [vmem:[#allocation13_spill] sm:$0xff] %v6882_v38  ;;  %v2102_v39 = vpack.c.b16 %v2084_v26, %v2083_v15  ;;  %v2798_v50 = vrot.slane %v2797_v45, 4  ;;  %v2039_v26 = vrot.slane %v1036_v62, 5  ;;  %v2808_v45 = vshll.u32 %v2630_v17, 16 }
 0x16e   : > { %v2793_v23 = vsel %vm6310_vm13, %v2788_v0, %v6895_v22  ;;  %v6924_v19 = vrot.slane %v1387_v8, 5  ;;  %v6928_v33 = vrot.slane %v2814_v30, 5 }
 0x16f   : > { %5616 = vmatmul.msk.bf16.gmra.mxu0 %vm1506_vm0, %v5960_v51  ;;  %v2036_v51 = vrot.slane %v1011_v49, 5  ;;  %v2803_v34 = vsel %vm6310_vm13, %v2798_v50, %v2802_v5  ;;  %v3063_v5 = vunpack.c.l.b16 %v2793_v23 }
 0x170   : > { %v3064_v50 = vunpack.c.l.b16 %v2803_v34  ;;  %v1397_v34 = vshll.u32 %v1036_v62, 16  ;;  %v5994_v62 = vld [vmem:[%s8197_s3 + $0xd0] sm:$0xff] }
 0x171   : > { %v6893_v6 = vpop.f32.mrf.mxu1  ;;  %v2038_v15 = vrot.slane %v2036_v51, 4  ;;  %v2037_v41 = vsel %vm6296_vm8, %v5474_v58, %v2036_v51  ;;  %v1479_v51 = vpack.c.b16 %v1461_v7, %v1460_v4  ;;  %v2807_v58 = vrot.slane %v2805_v44, 4  ;;  %v1013_v4 = vld [vmem:[#allocation2 + $0xb8] sm:$0xf]  ;;  %v1012_v7 = vld [vmem:[#allocation2 + $0xb4] sm:$0xf] }
 0x172   : > { %8224 = vst [vmem:[#allocation15_spill] sm:$0xff] %v6893_v6  ;;  %v2085_v0 = vunpack.c.l.b16 %v2037_v41  ;;  %v5921_v6 = vld [vmem:[#allocation2 + $0xc] sm:$0xff] }
 0x173   : > { %v6905_v48 = vpop.f32.mrf.mxu0 }
 0x174   : > { %v6898_v29 = vpop.f32.mrf.mxu3  ;;  %8226 = vst [vmem:[#allocation17_spill] sm:$0xff] %v6905_v48 }
 0x175   : > { %5360 = vmatmul.msk.bf16.gmra.mxu2 %vm1506_vm0, %v1478_v25  ;;  %8225 = vst [vmem:[#allocation16_spill] sm:$0xff] %v6898_v29  ;;  %v1381_v25 = vshll.u32 %v1010_v56, 16  ;;  %v1393_v56 = vrot.slane %v1391_v24, 4 }
 0x177   : > { %5648 = vmatmul.msk.bf16.gmra.mxu1 %vm1506_vm0, %v3089_v16  ;;  %v2818_v16 = vshrl.u32 %v2631_v10, 16  ;;  %v1383_v49 = vrot.slane %v1381_v25, 5  ;;  %v2040_v10 = vsel %vm6296_vm8, %v2038_v15, %v2039_v26  ;;  %v1394_v24 = vor.u32 %v1393_v56, %v6924_v19  ;;  %v5995_v15 = vld [vmem:[%s8197_s3 + $0xd8] sm:$0xff] }
 0x178   : > { %v2086_v25 = vunpack.c.l.b16 %v2040_v10  ;;  %v3090_v26 = vpack.c.b16 %v3064_v50, %v3063_v5  ;;  %3918 = vmatpush.bf16.msra.mxu3 %v5995_v15  ;;  %v6946_v50 = vld [vmem:[#allocation2 + $0xbc] sm:$0x1]  ;;  %v2043_v10 = vrot.slane %v1013_v4, 5  ;;  %v1900_v5 = vld [vmem:[#allocation2 + $0xb4] sm:$0xe] }
 0x179   : > { %v6907_v63 = vpop.f32.mrf.mxu1  ;;  %v2820_v52 = vrot.slane %v2818_v16, 4 }
 0x17a   : > { %8227 = vst [vmem:[#allocation18_spill] sm:$0xff] %v6907_v63  ;;  %5513 = vmatmul.msk.bf16.gmra.mxu3 %vm1506_vm0, %v2102_v39  ;;  %v1380_v39 = vrot.slane %v1378_v47, 4  ;;  %v2810_v47 = vrot.slane %v2808_v45, 5  ;;  %v2103_v23 = vpack.c.b16 %v2086_v25, %v2085_v0  ;;  %v6951_v0 = vld [vmem:[#allocation2 + $0x18] sm:$0xf] }
 0x17b   : > { %v6930_v17 = vpop.f32.mrf.mxu0  ;;  %v2821_v30 = vor.u32 %v2820_v52, %v6928_v33  ;;  %v2634_v52 = vld [vmem:[#allocation2 + $0x64] sm:$0xf] }
 0x17c   : > { %v6914_v12 = vpop.f32.mrf.mxu3  ;;  %8229 = vst [vmem:[#allocation20_spill] sm:$0xff] %v6930_v17  ;;  %v1384_v8 = vor.u32 %v1383_v49, %v1380_v39  ;;  %v2811_v44 = vor.u32 %v2810_v47, %v2807_v58  ;;  %v1395_v39 = vrot.slane %v1394_v24, 4  ;;  %v1399_v49 = vrot.slane %v1397_v34, 5  ;;  %3919 = vmatpush.bf16.msra.mxu3 %v5994_v62  ;;  %v2633_v34 = vld [vmem:[#allocation2 + $0x60] sm:$0xf]  ;;  %v5998_v17 = vld [vmem:[%s8197_s3 + $0xf0] sm:$0xff] }
 0x17d   : > { %8228 = vst [vmem:[#allocation19_spill] sm:$0xff] %v6914_v12  ;;  %v2822_v56 = vrot.slane %v2821_v30, 4  ;;  %v1405_v58 = vshll.u32 %v1012_v7, 16  ;;  %v1411_v47 = vshll.u32 %v1013_v4, 16  ;;  %v2838_v30 = vshll.u32 %v2634_v52, 16 }
 0x17e   : > { %v1385_v41 = vrot.slane %v1384_v8, 4  ;;  %v1400_v24 = vsel %vm6310_vm13, %v1395_v39, %v1399_v49  ;;  %v5475_v62 = vrot.slane %v1900_v5, 9  ;;  %v2829_v48 = vshrl.u32 %v2633_v34, 16 }
 0x17f   : > { %5617 = vmatmul.msk.bf16.gmra.mxu0 %vm1506_vm0, %v5961_v1  ;;  %v2632_v1 = vld [vmem:[#allocation2 + $0x5c] sm:$0x1]  ;;  %v1407_v49 = vrot.slane %v1405_v58, 5  ;;  %v1463_v12 = vunpack.c.l.b16 %v1400_v24  ;;  %v4084_v5 = vshrl.u32 %v6951_v0, 16 }
 0x180   : > { %v2824_v45 = vshll.u32 %v2632_v1, 16  ;;  %v1415_v1 = vshrl.u32 %v1013_v4, 16  ;;  %v1390_v8 = vsel %vm6310_vm13, %v1385_v41, %v6924_v19  ;;  %v2046_v19 = vrot.slane %v6946_v50, 5  ;;  %v5962_v41 = vld [vmem:[#allocation2 + $0xb4] sm:$0xff] }
 0x182   : > { %v6932_v22 = vpop.f32.mrf.mxu1 }
 0x183   : > { %8230 = vst [vmem:[#allocation21_spill] sm:$0xff] %v6932_v22  ;;  %v6953_v25 = vpop.f32.mrf.mxu0  ;;  %v4087_v22 = vshll.u32 %v6951_v0, 16 }
 0x184   : > { %v6940_v16 = vpop.f32.mrf.mxu3  ;;  %8233 = vst [vmem:[#allocation24_spill] sm:$0xff] %v6953_v25  ;;  %v6969_v25 = vrot.slane %v1411_v47, 5  ;;  %v2832_v47 = vshll.u32 %v2633_v34, 16 }
 0x185   : > { %5361 = vmatmul.msk.bf16.gmra.mxu2 %vm1506_vm0, %v1479_v51  ;;  %8231 = vst [vmem:[#allocation22_spill] sm:$0xff] %v6940_v16  ;;  %v1402_v51 = vshrl.u32 %v1012_v7, 16  ;;  %v2826_v16 = vrot.slane %v2824_v45, 5  ;;  %v2842_v7 = vshrl.u32 %v2634_v52, 16  ;;  %v5999_v45 = vld [vmem:[%s8197_s3 + $0xf8] sm:$0xff]  ;;  %v1417_v52 = vrot.slane %v1415_v1, 4 }
 0x186   : > { %4600 = vmatpush.bf16.msra.mxu0 %v5999_v45  ;;  %v6986_v1 = vrot.slane %v2838_v30, 5  ;;  %v2834_v0 = vrot.slane %v2832_v47, 5  ;;  %v7013_v47 = vrot.slane %v4084_v5, 4 }
 0x187   : > { %5649 = vmatmul.msk.bf16.gmra.mxu1 %vm1506_vm0, %v3090_v26  ;;  %v2812_v26 = vrot.slane %v2811_v44, 4  ;;  %v5993_v44 = vld [vmem:[%s8197_s3 + $0xc8] sm:$0xff]  ;;  %v2827_v4 = vsel %vm6310_vm13, %v2822_v56, %v2826_v16  ;;  %v1404_v39 = vrot.slane %v1402_v51, 4  ;;  %v5992_v16 = vld [vmem:[%s8197_s3 + $0xc0] sm:$0xff]  ;;  %v6977_v56 = vld [vmem:[#allocation2 + $0x1c] sm:$0xf]  ;;  %v1418_v29 = vor.u32 %v1417_v52, %v6969_v25 }
 0x188   : > { %3920 = vmatpush.bf16.msra.mxu3 %v5993_v44  ;;  %v3066_v24 = vunpack.c.l.b16 %v2827_v4  ;;  %v2044_v44 = vsel %vm6296_vm8, %v5475_v62, %v2043_v10  ;;  %v2635_v4 = vld [vmem:[#allocation2 + $0x68] sm:$0x1]  ;;  %v4717_v52 = vld [vmem:[#allocation2 + $0x18] sm:$0xe] }
 0x189   : > { %v2817_v58 = vsel %vm6310_vm13, %v2812_v26, %v6928_v33  ;;  %v1421_v33 = vshll.u32 %v6946_v50, 16  ;;  %v4093_v26 = vshll.u32 %v6977_v56, 16  ;;  %v2087_v62 = vunpack.c.l.b16 %v2044_v44 }
 0x18a   : > { %5514 = vmatmul.msk.bf16.gmra.mxu3 %vm1506_vm0, %v2103_v23  ;;  %v6949_v15 = vpop.f32.mrf.mxu1  ;;  %v2045_v23 = vrot.slane %v2043_v10, 4  ;;  %4601 = vmatpush.bf16.msra.mxu0 %v5998_v17  ;;  %v4097_v10 = vshrl.u32 %v6977_v56, 16  ;;  %v5997_v17 = vld [vmem:[%s8197_s3 + $0xe8] sm:$0xff] }
 0x18b   : > { %8232 = vst [vmem:[#allocation23_spill] sm:$0xff] %v6949_v15  ;;  %v1462_v15 = vunpack.c.l.b16 %v1390_v8  ;;  %v2844_v8 = vrot.slane %v2842_v7, 4  ;;  %v3065_v7 = vunpack.c.l.b16 %v2817_v58  ;;  %v5996_v58 = vld [vmem:[%s8197_s3 + $0xe0] sm:$0xff] }
 0x18c   : > { %v6980_v51 = vpop.f32.mrf.mxu3  ;;  %v2047_v45 = vsel %vm6296_vm8, %v2045_v23, %v2046_v19  ;;  %3921 = vmatpush.bf16.msra.mxu3 %v5992_v16  ;;  %v5975_v16 = vld [vmem:[%s8197_s3 + $0xb8] sm:$0xff] }
 0x18d   : > { %8234 = vst [vmem:[#allocation25_spill] sm:$0xff] %v6980_v51  ;;  %v1408_v51 = vor.u32 %v1407_v49, %v1404_v39  ;;  %v1480_v30 = vpack.c.b16 %v1463_v12, %v1462_v15  ;;  %v2088_v23 = vunpack.c.l.b16 %v2047_v45  ;;  %v2845_v19 = vor.u32 %v2844_v8, %v6986_v1  ;;  %v7004_v39 = vpop.f32.mrf.mxu0  ;;  %v7019_v45 = vld [vmem:[#allocation2 + $0x20] sm:$0x1]  ;;  %3603 = vmatpush.bf16.msra.mxu2 %v5975_v16 }
 0x18e   : > { %v3091_v50 = vpack.c.b16 %v3066_v24, %v3065_v7  ;;  %8236 = vst [vmem:[#allocation27_spill] sm:$0xff] %v7004_v39  ;;  %v1419_v15 = vrot.slane %v1418_v29, 4  ;;  %v2848_v49 = vshll.u32 %v2635_v4, 16  ;;  %4602 = vmatpush.bf16.msra.mxu0 %v5997_v17  ;;  %v7015_v8 = vrot.slane %v4087_v22, 5 }
 0x18f   : > { %5618 = vmatmul.msk.bf16.gmra.mxu0 %vm1506_vm0, %v5962_v41  ;;  %v2831_v41 = vrot.slane %v2829_v48, 4  ;;  %v1409_v12 = vrot.slane %v1408_v51, 4  ;;  %v1423_v48 = vrot.slane %v1421_v33, 5  ;;  %v7017_v51 = vrot.slane %v4093_v26, 5 }
 0x190   : > { %v2104_v29 = vpack.c.b16 %v2088_v23, %v2087_v62  ;;  %v2846_v44 = vrot.slane %v2845_v19, 4  ;;  %v4099_v33 = vrot.slane %v4097_v10, 4  ;;  %v5860_v7 = vrot.slane %v4717_v52, 9 }
 0x191   : > { %v2835_v24 = vor.u32 %v2834_v0, %v2831_v41  ;;  %v4783_v4 = vrot.slane %v6977_v56, 5  ;;  %v1414_v22 = vsel %vm6310_vm13, %v1409_v12, %v6969_v25  ;;  %v1424_v5 = vsel %vm6310_vm13, %v1419_v15, %v1423_v48  ;;  %v2637_v41 = vld [vmem:[#allocation2 + $0x70] sm:$0xf]  ;;  %v4718_v0 = vld [vmem:[#allocation2 + $0x24] sm:$0xe] }
 0x192   : > { %v2850_v26 = vrot.slane %v2848_v49, 5  ;;  %4603 = vmatpush.bf16.msra.mxu0 %v5996_v58  ;;  %v4786_v23 = vrot.slane %v7019_v45, 5  ;;  %v5963_v12 = vld [vmem:[#allocation2 + $0xc0] sm:$0xff]  ;;  %v2636_v15 = vld [vmem:[#allocation2 + $0x6c] sm:$0xf]  ;;  %v4090_v48 = vor.u32 %v7015_v8, %v7013_v47  ;;  %v4100_v49 = vor.u32 %v4099_v33, %v7017_v51 }
 0x193   : > { %v6996_v34 = vpop.f32.mrf.mxu1  ;;  %v4784_v62 = vsel %vm6296_vm8, %v5860_v7, %v4783_v4  ;;  %v4785_v56 = vrot.slane %v4783_v4, 4  ;;  %v1465_v52 = vunpack.c.l.b16 %v1424_v5  ;;  %v2862_v16 = vshll.u32 %v2637_v41, 16 }
 0x194   : > { %8235 = vst [vmem:[#allocation26_spill] sm:$0xff] %v6996_v34  ;;  %v7024_v17 = vpop.f32.mrf.mxu3  ;;  %v2851_v25 = vsel %vm6310_vm13, %v2846_v44, %v2850_v26  ;;  %v2866_v58 = vshrl.u32 %v2637_v41, 16  ;;  %v1464_v4 = vunpack.c.l.b16 %v1414_v22  ;;  %v5861_v26 = vrot.slane %v4718_v0, 9  ;;  %v6003_v22 = vld [vmem:[%s8197_s3 + $0x118] sm:$0xff] }
 0x195   : > { %5362 = vmatmul.msk.bf16.gmra.mxu2 %vm1506_vm0, %v1480_v30  ;;  %v7021_v30 = vld [vmem:[#allocation2 + $0x28] sm:$0xf]  ;;  %8237 = vst [vmem:[#allocation28_spill] sm:$0xff] %v7024_v17  ;;  %v4787_v7 = vsel %vm6296_vm8, %v4785_v56, %v4786_v23  ;;  %v4902_v17 = vunpack.c.l.b16 %v4784_v62  ;;  %v2853_v8 = vshrl.u32 %v2636_v15, 16  ;;  %v4103_v33 = vshll.u32 %v7019_v45, 16  ;;  %v7053_v41 = vpop.f32.mrf.mxu0  ;;  %5026 = vmatpush.bf16.msra.mxu1 %v6003_v22 }
 0x196   : > { %v4790_v19 = vrot.slane %v7021_v30, 5  ;;  %v4903_v44 = vunpack.c.l.b16 %v4787_v7  ;;  %8239 = vst [vmem:[#allocation30_spill] sm:$0xff] %v7053_v41  ;;  %v2856_v39 = vshll.u32 %v2636_v15, 16  ;;  %v7059_v62 = vld [vmem:[#allocation2 + $0x38] sm:$0x1]  ;;  %v3068_v45 = vunpack.c.l.b16 %v2851_v25 }
 0x197   : > { %5650 = vmatmul.msk.bf16.gmra.mxu1 %vm1506_vm0, %v3091_v50  ;;  %v2836_v50 = vrot.slane %v2835_v24, 4  ;;  %v7047_v24 = vld [vmem:[#allocation2 + $0x34] sm:$0xf]  ;;  %v7066_v0 = vrot.slane %v2862_v16, 5  ;;  %v4719_v7 = vld [vmem:[#allocation2 + $0x30] sm:$0xe]  ;;  %v1481_v15 = vpack.c.b16 %v1465_v52, %v1464_v4 }
 0x198   : > { %v4792_v5 = vrot.slane %v4790_v19, 4  ;;  %v7061_v56 = vpack.c.b16 %v4903_v44, %v4902_v17  ;;  %v2638_v16 = vld [vmem:[#allocation2 + $0x74] sm:$0x1]  ;;  %v2858_v63 = vrot.slane %v2856_v39, 5  ;;  %v4105_v38 = vrot.slane %v4103_v33, 5 }
 0x199   : > { %v2841_v47 = vsel %vm6310_vm13, %v2836_v50, %v6986_v1  ;;  %v4791_v1 = vsel %vm6296_vm8, %v5861_v26, %v4790_v19  ;;  %v2868_v50 = vrot.slane %v2866_v58, 4  ;;  %v4800_v19 = vrot.slane %v7059_v62, 5  ;;  %v4038_v33 = vld [vmem:[#allocation2 + $0x24] sm:$0xf] }
 0x19a   : > { %5515 = vmatmul.msk.bf16.gmra.mxu3 %vm1506_vm0, %v2104_v29  ;;  %v7043_v29 = vld [vmem:[#allocation2 + $0x2c] sm:$0x1]  ;;  %v3067_v41 = vunpack.c.l.b16 %v2841_v47  ;;  %v4904_v44 = vunpack.c.l.b16 %v4791_v1  ;;  %v2855_v58 = vrot.slane %v2853_v8, 4  ;;  %v5862_v52 = vrot.slane %v4719_v7, 9 }
 0x19b   : > { %v7032_v10 = vpop.f32.mrf.mxu1  ;;  %v4793_v23 = vrot.slane %v7043_v29, 5  ;;  %v2869_v4 = vor.u32 %v2868_v50, %v7066_v0  ;;  %v4091_v22 = vrot.slane %v4090_v48, 4  ;;  %v2872_v8 = vshll.u32 %v2638_v16, 16  ;;  %v2639_v50 = vld [vmem:[#allocation2 + $0x78] sm:$0xf] }
 0x19c   : > { %8238 = vst [vmem:[#allocation29_spill] sm:$0xff] %v7032_v10  ;;  %v4101_v10 = vrot.slane %v4100_v49, 4  ;;  %v3092_v49 = vpack.c.b16 %v3068_v45, %v3067_v41  ;;  %v4117_v41 = vshll.u32 %v7021_v30, 16  ;;  %v2859_v48 = vor.u32 %v2858_v63, %v2855_v58 }
 0x19d   : > { %v4794_v17 = vsel %vm6296_vm8, %v4792_v5, %v4793_v23  ;;  %v7074_v25 = vpop.f32.mrf.mxu3  ;;  %v4121_v23 = vshrl.u32 %v7021_v30, 16  ;;  %v2870_v45 = vrot.slane %v2869_v4, 4  ;;  %v2877_v58 = vshrl.u32 %v2639_v50, 16  ;;  %v7101_v4 = vld [vmem:[#allocation2 + $0x40] sm:$0xf] }
 0x19e   : > { %v4905_v34 = vunpack.c.l.b16 %v4794_v17  ;;  %8241 = vst [vmem:[#allocation32_spill] sm:$0xff] %v7074_v25  ;;  %v4106_v39 = vsel %vm6310_vm13, %v4101_v10, %v4105_v38  ;;  %v2640_v10 = vld [vmem:[#allocation2 + $0x7c] sm:$0xf]  ;;  %v4108_v17 = vshrl.u32 %v4038_v33, 16  ;;  %v7095_v30 = vrot.slane %v4117_v41, 5 }
 0x19f   : > { %5619 = vmatmul.msk.bf16.gmra.mxu0 %vm1506_vm0, %v5963_v12  ;;  %v4797_v12 = vrot.slane %v7047_v24, 5  ;;  %v4477_v38 = vunpack.c.l.b16 %v4106_v39  ;;  %v4123_v16 = vrot.slane %v4121_v23, 4  ;;  %v2890_v39 = vshrl.u32 %v2640_v10, 16 }
 0x1a0   : > { %v7078_v47 = vpack.c.b16 %v4905_v34, %v4904_v44  ;;  %v5976_v34 = vld [vmem:[#allocation2 + $0x18] sm:$0xff]  ;;  %v4111_v44 = vshll.u32 %v4038_v33, 16  ;;  %v4110_v41 = vrot.slane %v4108_v17, 4  ;;  %v5920_v17 = vld [vmem:[#allocation2] sm:$0xff] }
 0x1a1   : > { %v4799_v53 = vrot.slane %v4797_v12, 4  ;;  %v4798_v1 = vsel %vm6296_vm8, %v5862_v52, %v4797_v12 }
 0x1a2   : > { %v4906_v7 = vunpack.c.l.b16 %v4798_v1  ;;  %v2886_v1 = vshll.u32 %v2640_v10, 16  ;;  %v4113_v23 = vrot.slane %v4111_v44, 5 }
 0x1a3   : > { %v4801_v5 = vsel %vm6296_vm8, %v4799_v53, %v4800_v19  ;;  %v4096_v53 = vsel %vm6310_vm13, %v4091_v22, %v7017_v51  ;;  %v2874_v19 = vrot.slane %v2872_v8, 5 }
 0x1a4   : > { %v7072_v26 = vpop.f32.mrf.mxu1  ;;  %v4907_v12 = vunpack.c.l.b16 %v4801_v5  ;;  %v4476_v63 = vunpack.c.l.b16 %v4096_v53  ;;  %v2860_v5 = vrot.slane %v2859_v48, 4  ;;  %v4804_v48 = vrot.slane %v7101_v4, 5 }
 0x1a5   : > { %8240 = vst [vmem:[#allocation31_spill] sm:$0xff] %v7072_v26  ;;  %5363 = vmatmul.msk.bf16.gmra.mxu2 %vm1506_vm0, %v1481_v15  ;;  %v7092_v15 = vpop.f32.mrf.mxu0  ;;  %v2875_v22 = vsel %vm6310_vm13, %v2870_v45, %v2874_v19  ;;  %v7105_v33 = vpop.f32.mrf.mxu3  ;;  %v2879_v45 = vrot.slane %v2877_v58, 4  ;;  %v2888_v44 = vrot.slane %v2886_v1, 5  ;;  %v2892_v19 = vrot.slane %v2890_v39, 4 }
 0x1a6   : > { %8242 = vst [vmem:[#allocation33_spill] sm:$0xff] %v7092_v15  ;;  %v7097_v52 = vpack.c.b16 %v4907_v12, %v4906_v7  ;;  %v4508_v8 = vpack.c.b16 %v4477_v38, %v4476_v63  ;;  %v2865_v53 = vsel %vm6310_vm13, %v2860_v5, %v7066_v0  ;;  %v4720_v7 = vld [vmem:[#allocation2 + $0x3c] sm:$0xe]  ;;  %v3070_v12 = vunpack.c.l.b16 %v2875_v22  ;;  %v2641_v0 = vld [vmem:[#allocation2 + $0x80] sm:$0x1] }
 0x1a7   : > { %5651 = vmatmul.msk.bf16.gmra.mxu1 %vm1506_vm0, %v3092_v49  ;;  %v2880_v49 = vshll.u32 %v2639_v50, 16  ;;  %8244 = vst [vmem:[#allocation35_spill] sm:$0xff] %v7105_v33  ;;  %v4124_v50 = vor.u32 %v4123_v16, %v7095_v30  ;;  %v4127_v38 = vshll.u32 %v7043_v29, 16  ;;  %v4806_v63 = vrot.slane %v4804_v48, 4 }
 0x1a8   : > { %v3069_v15 = vunpack.c.l.b16 %v2865_v53  ;;  %v4114_v5 = vor.u32 %v4113_v23, %v4110_v41  ;;  %v5863_v16 = vrot.slane %v4720_v7, 9  ;;  %v2896_v53 = vshll.u32 %v2641_v0, 16  ;;  %v4041_v41 = vld [vmem:[#allocation2 + $0x30] sm:$0xf] }
 0x1a9   : > { %v2882_v10 = vrot.slane %v2880_v49, 5  ;;  %v4129_v29 = vrot.slane %v4127_v38, 5  ;;  %v4141_v7 = vshll.u32 %v7047_v24, 16 }
 0x1aa   : > { %5804 = vmatmul.msk.bf16.vlgmr.msra.gmra.mxu3 %vm1506_vm0, %v5976_v34  ;;  %v7107_v34 = vld [vmem:[#allocation2 + $0x44] sm:$0x1]  ;;  %v3093_v49 = vpack.c.b16 %v3070_v12, %v3069_v15  ;;  %v4805_v1 = vsel %vm6296_vm8, %v5863_v16, %v4804_v48 }
 0x1ab   : > { %v4807_v33 = vrot.slane %v7107_v34, 5  ;;  %v2883_v39 = vor.u32 %v2882_v10, %v2879_v45  ;;  %v4908_v12 = vunpack.c.l.b16 %v4805_v1  ;;  %v5977_v45 = vld [vmem:[#allocation2 + $0x24] sm:$0xff] }
 0x1ac   : > { %v7099_v51 = vpop.f32.mrf.mxu1  ;;  %v2642_v16 = vld [vmem:[#allocation2 + $0x84] sm:$0xf] }
 0x1ad   : > { %8243 = vst [vmem:[#allocation34_spill] sm:$0xff] %v7099_v51  ;;  %v4125_v51 = vrot.slane %v4124_v50, 4  ;;  %v4808_v22 = vsel %vm6296_vm8, %v4806_v63, %v4807_v33  ;;  %v7119_v25 = vpop.f32.mrf.mxu0  ;;  %v4115_v50 = vrot.slane %v4114_v5, 4  ;;  %v4145_v33 = vshrl.u32 %v7047_v24, 16  ;;  %v7131_v38 = vpop.f32.mrf.mxu3 }
 0x1ae   : > { %8245 = vst [vmem:[#allocation36_spill] sm:$0xff] %v7119_v25  ;;  %v4909_v23 = vunpack.c.l.b16 %v4808_v22  ;;  %v2884_v63 = vrot.slane %v2883_v39, 4  ;;  %v2898_v24 = vrot.slane %v2896_v53, 5  ;;  %v7141_v22 = vrot.slane %v4141_v7, 5 }
 0x1af   : > { %5844 = vmatmul.msk.bf16.vlgmr.msra.gmra.mxu0 %vm1506_vm0, %v4508_v8  ;;  %v2893_v8 = vor.u32 %v2892_v19, %v2888_v44  ;;  %v4130_v15 = vsel %vm6310_vm13, %v4125_v51, %v4129_v29  ;;  %8246 = vst [vmem:[#allocation37_spill] sm:$0xff] %v7131_v38  ;;  %v4120_v10 = vsel %vm6310_vm13, %v4115_v50, %v7095_v30  ;;  %v4135_v19 = vshll.u32 %v4041_v41, 16  ;;  %v2643_v29 = vld [vmem:[#allocation2 + $0x88] sm:$0xf]  ;;  %v7145_v50 = vld [vmem:[#allocation2 + $0x4c] sm:$0xf] }
 0x1b0   : > { %v7138_v5 = vpack.c.b16 %v4909_v23, %v4908_v12  ;;  %v4479_v51 = vunpack.c.l.b16 %v4130_v15  ;;  %v4478_v38 = vunpack.c.l.b16 %v4120_v10  ;;  %v2889_v39 = vsel %vm6310_vm13, %v2884_v63, %v2888_v44  ;;  %v4721_v10 = vld [vmem:[#allocation2 + $0x48] sm:$0xe] }
 0x1b1   : > { %v2894_v0 = vrot.slane %v2893_v8, 4  ;;  %v4137_v30 = vrot.slane %v4135_v19, 5  ;;  %v2901_v53 = vshrl.u32 %v2642_v16, 16  ;;  %v2914_v15 = vshrl.u32 %v2643_v29, 16 }
 0x1b2   : > { %v4509_v7 = vpack.c.b16 %v4479_v51, %v4478_v38  ;;  %v3071_v44 = vunpack.c.l.b16 %v2889_v39  ;;  %v5864_v61 = vrot.slane %v4721_v10, 9 }
 0x1b3   : > { %v2899_v8 = vsel %vm6310_vm13, %v2894_v0, %v2898_v24  ;;  %v4151_v24 = vshll.u32 %v7059_v62, 16 }
 0x1b4   : > { %v7121_v58 = vpop.f32.mrf.mxu1  ;;  %v3072_v63 = vunpack.c.l.b16 %v2899_v8 }
 0x1b5   : > { %5444 = vmatmul.msk.bf16.vlgmr.msrb.gmra.mxu2 %vm1506_vm0, %v5920_v17  ;;  %v4132_v17 = vshrl.u32 %v4041_v41, 16  ;;  %v2904_v41 = vshll.u32 %v2642_v16, 16  ;;  %v7151_v23 = vpop.f32.mrf.mxu0  ;;  %v2903_v16 = vrot.slane %v2901_v53, 4 }
 0x1b6   : > { %8248 = vst [vmem:[#allocation39_spill] sm:$0xff] %v7151_v23 }
 0x1b7   : > { %5652 = vmatmul.msk.bf16.gmra.mxu1 %vm1506_vm0, %v3093_v49  ;;  %v4147_v49 = vrot.slane %v4145_v33, 4  ;;  %v4134_v25 = vrot.slane %v4132_v17, 4  ;;  %v2910_v33 = vshll.u32 %v2643_v29, 16  ;;  %v4811_v17 = vrot.slane %v7145_v50, 5 }
 0x1b8   : > { %v7133_v48 = vpop.f32.mrf.mxu2  ;;  %v2906_v38 = vrot.slane %v2904_v41, 5  ;;  %v4044_v41 = vld [vmem:[#allocation2 + $0x3c] sm:$0xf] }
 0x1b9   : > { %8247 = vst [vmem:[#allocation38_spill] sm:$0xff] %v7133_v48  ;;  %v4148_v12 = vor.u32 %v4147_v49, %v7141_v22  ;;  %v4138_v0 = vor.u32 %v4137_v30, %v4134_v25  ;;  %v4813_v51 = vrot.slane %v4811_v17, 4  ;;  %v7162_v49 = vpop.f32.mrf.mxu3  ;;  %v2912_v23 = vrot.slane %v2910_v33, 5 }
 0x1ba   : > { %5805 = vmatmul.msk.bf16.gmra.mxu3 %vm1506_vm0, %v5977_v45  ;;  %v7154_v45 = vld [vmem:[#allocation2 + $0x50] sm:$0x1]  ;;  %8250 = vst [vmem:[#allocation41_spill] sm:$0xff] %v7162_v49  ;;  %v2916_v48 = vrot.slane %v2914_v15, 4  ;;  %v4153_v25 = vrot.slane %v4151_v24, 5  ;;  %v4812_v62 = vsel %vm6296_vm8, %v5864_v61, %v4811_v17  ;;  %v3094_v30 = vpack.c.b16 %v3072_v63, %v3071_v44 }
 0x1bb   : > { %v4814_v29 = vrot.slane %v7154_v45, 5  ;;  %v4149_v26 = vrot.slane %v4148_v12, 4  ;;  %v2907_v53 = vor.u32 %v2906_v38, %v2903_v16  ;;  %v4139_v12 = vrot.slane %v4138_v0, 4  ;;  %v5978_v17 = vld [vmem:[#allocation2 + $0x30] sm:$0xff] }
 0x1bc   : > { %v7143_v1 = vpop.f32.mrf.mxu1  ;;  %v2917_v33 = vor.u32 %v2916_v48, %v2912_v23  ;;  %v4169_v24 = vshrl.u32 %v7101_v4, 16  ;;  %v4159_v44 = vshll.u32 %v4044_v41, 16  ;;  %v2645_v38 = vld [vmem:[#allocation2 + $0x90] sm:$0xf] }
 0x1bd   : > { %v4815_v39 = vsel %vm6296_vm8, %v4813_v51, %v4814_v29  ;;  %v4154_v10 = vsel %vm6310_vm13, %v4149_v26, %v4153_v25  ;;  %v4165_v51 = vshll.u32 %v7101_v4, 16  ;;  %v4910_v29 = vunpack.c.l.b16 %v4812_v62  ;;  %v7176_v61 = vpop.f32.mrf.mxu0  ;;  %v2646_v25 = vld [vmem:[#allocation2 + $0x94] sm:$0xf] }
 0x1be   : > { %8251 = vst [vmem:[#allocation42_spill] sm:$0xff] %v7176_v61  ;;  %v4144_v48 = vsel %vm6310_vm13, %v4139_v12, %v7141_v22  ;;  %v2908_v63 = vrot.slane %v2907_v53, 4  ;;  %v4481_v26 = vunpack.c.l.b16 %v4154_v10  ;;  %v2918_v16 = vrot.slane %v2917_v33, 4  ;;  %v7192_v53 = vld [vmem:[#allocation2 + $0x58] sm:$0xf] }
 0x1bf   : > { %5845 = vmatmul.msk.bf16.gmra.mxu0 %vm1506_vm0, %v4509_v7  ;;  %v4911_v7 = vunpack.c.l.b16 %v4815_v39  ;;  %v4480_v39 = vunpack.c.l.b16 %v4144_v48  ;;  %v7186_v62 = vrot.slane %v4165_v51, 5  ;;  %v2925_v33 = vshrl.u32 %v2645_v38, 16 }
 0x1c0   : > { %v7157_v19 = vpop.f32.mrf.mxu2  ;;  %v2928_v51 = vshll.u32 %v2645_v38, 16 }
 0x1c1   : > { %8249 = vst [vmem:[#allocation40_spill] sm:$0xff] %v7157_v19  ;;  %v2644_v19 = vld [vmem:[#allocation2 + $0x8c] sm:$0x1]  ;;  %v7183_v0 = vpack.c.b16 %v4911_v7, %v4910_v29  ;;  %v7188_v61 = vpop.f32.mrf.mxu3  ;;  %v2913_v7 = vsel %vm6310_vm13, %v2908_v63, %v2912_v23  ;;  %v4510_v12 = vpack.c.b16 %v4481_v26, %v4480_v39  ;;  %v2934_v29 = vshll.u32 %v2646_v25, 16 }
 0x1c2   : > { %v2920_v15 = vshll.u32 %v2644_v19, 16  ;;  %v4156_v19 = vshrl.u32 %v4044_v41, 16  ;;  %8253 = vst [vmem:[#allocation44_spill] sm:$0xff] %v7188_v61  ;;  %v4161_v41 = vrot.slane %v4159_v44, 5  ;;  %v3073_v61 = vunpack.c.l.b16 %v2913_v7 }
 0x1c3   : > { %v4175_v63 = vshll.u32 %v7107_v34, 16  ;;  %v2930_v49 = vrot.slane %v2928_v51, 5 }
 0x1c4   : > { %v7166_v8 = vpop.f32.mrf.mxu1  ;;  %v2922_v4 = vrot.slane %v2920_v15, 5  ;;  %v4158_v22 = vrot.slane %v4156_v19, 4  ;;  %v4722_v15 = vld [vmem:[#allocation2 + $0x54] sm:$0xe]  ;;  %v4818_v19 = vrot.slane %v7192_v53, 5 }
 0x1c5   : > { %5445 = vmatmul.msk.bf16.gmra.mxu2 %vm1506_vm0, %v5921_v6  ;;  %v5865_v26 = vrot.slane %v4722_v15, 9 }
 0x1c6   : > { %v2923_v10 = vsel %vm6310_vm13, %v2918_v16, %v2922_v4  ;;  %v4162_v23 = vor.u32 %v4161_v41, %v4158_v22  ;;  %v2927_v16 = vrot.slane %v2925_v33, 4  ;;  %v4820_v4 = vrot.slane %v4818_v19, 4 }
 0x1c7   : > { %5653 = vmatmul.msk.bf16.gmra.mxu1 %vm1506_vm0, %v3094_v30  ;;  %v4171_v30 = vrot.slane %v4169_v24, 4  ;;  %v2938_v24 = vshrl.u32 %v2646_v25, 16  ;;  %v3074_v39 = vunpack.c.l.b16 %v2923_v10  ;;  %v7207_v25 = vpop.f32.mrf.mxu0  ;;  %v4819_v7 = vsel %vm6296_vm8, %v5865_v26, %v4818_v19 }
 0x1c8   : > { %v7178_v6 = vpop.f32.mrf.mxu2  ;;  %8255 = vst [vmem:[#allocation46_spill] sm:$0xff] %v7207_v25  ;;  %v4177_v10 = vrot.slane %v4175_v63, 5  ;;  %v4912_v51 = vunpack.c.l.b16 %v4819_v7  ;;  %v4163_v26 = vrot.slane %v4162_v23, 4  ;;  %v4193_v63 = vshrl.u32 %v7145_v50, 16 }
 0x1c9   : > { %8252 = vst [vmem:[#allocation43_spill] sm:$0xff] %v7178_v6  ;;  %v4172_v48 = vor.u32 %v4171_v30, %v7186_v62  ;;  %v7209_v30 = vrot.slane %v2934_v29, 5  ;;  %v2940_v55 = vrot.slane %v2938_v24, 4  ;;  %v3095_v15 = vpack.c.b16 %v3074_v39, %v3073_v61  ;;  %v7218_v29 = vpop.f32.mrf.mxu3 }
 0x1ca   : > { %5806 = vmatmul.msk.bf16.gmra.mxu3 %vm1506_vm0, %v5978_v17  ;;  %v7198_v17 = vld [vmem:[#allocation2 + $0x5c] sm:$0x1]  ;;  %8257 = vst [vmem:[#allocation48_spill] sm:$0xff] %v7218_v29  ;;  %v2931_v24 = vor.u32 %v2930_v49, %v2927_v16  ;;  %v4189_v61 = vshll.u32 %v7145_v50, 16  ;;  %v4168_v23 = vsel %vm6310_vm13, %v4163_v26, %v7186_v62  ;;  %v4183_v7 = vshll.u32 %v4047_v11, 16 }
 0x1cb   : > { %v4821_v38 = vrot.slane %v7198_v17, 5  ;;  %v4173_v22 = vrot.slane %v4172_v48, 4  ;;  %v2941_v25 = vor.u32 %v2940_v55, %v7209_v30  ;;  %v5979_v55 = vld [vmem:[#allocation2 + $0x3c] sm:$0xff] }
 0x1cc   : > { %v7190_v6 = vpop.f32.mrf.mxu1  ;;  %v2648_v16 = vld [vmem:[#allocation2 + $0x9c] sm:$0xf] }
 0x1cd   : > { %v4822_v34 = vsel %vm6296_vm8, %v4820_v4, %v4821_v38  ;;  %v4178_v48 = vsel %vm6310_vm13, %v4173_v22, %v4177_v10  ;;  %v2649_v4 = vld [vmem:[#allocation2 + $0xa0] sm:$0xf]  ;;  %v4180_v38 = vshrl.u32 %v4047_v11, 16  ;;  %v2942_v22 = vrot.slane %v2941_v25, 4 }
 0x1ce   : > { %v4913_v33 = vunpack.c.l.b16 %v4822_v34  ;;  %v4483_v50 = vunpack.c.l.b16 %v4178_v48  ;;  %v4195_v10 = vrot.slane %v4193_v63, 4  ;;  %v2949_v26 = vshrl.u32 %v2648_v16, 16 }
 0x1cf   : > { %5846 = vmatmul.msk.bf16.gmra.mxu0 %vm1506_vm0, %v4510_v12  ;;  %v2647_v12 = vld [vmem:[#allocation2 + $0x98] sm:$0x1]  ;;  %v2958_v29 = vshll.u32 %v2649_v4, 16  ;;  %v2962_v11 = vshrl.u32 %v2649_v4, 16  ;;  %v4185_v48 = vrot.slane %v4183_v7, 5 }
 0x1d0   : > { %v7202_v44 = vpop.f32.mrf.mxu2  ;;  %v2944_v19 = vshll.u32 %v2647_v12, 16  ;;  %v7229_v39 = vpack.c.b16 %v4913_v33, %v4912_v51  ;;  %v2932_v12 = vrot.slane %v2931_v24, 4  ;;  %v4482_v33 = vunpack.c.l.b16 %v4168_v23  ;;  %v7239_v51 = vld [vmem:[#allocation2 + $0x64] sm:$0xf] }
 0x1d1   : > { %8254 = vst [vmem:[#allocation45_spill] sm:$0xff] %v7202_v44  ;;  %v5922_v44 = vld [vmem:[#allocation2 + $0x18] sm:$0xff]  ;;  %v4199_v23 = vshll.u32 %v7154_v45, 16  ;;  %v4825_v4 = vrot.slane %v7239_v51, 5  ;;  %v2964_v7 = vrot.slane %v2962_v11, 4  ;;  %v4217_v11 = vshrl.u32 %v7192_v53, 16 }
 0x1d2   : > { %v2946_v34 = vrot.slane %v2944_v19, 5  ;;  %v2937_v25 = vsel %vm6310_vm13, %v2932_v12, %v7209_v30  ;;  %v4511_v19 = vpack.c.b16 %v4483_v50, %v4482_v33  ;;  %v2951_v30 = vrot.slane %v2949_v26, 4  ;;  %v5923_v26 = vld [vmem:[#allocation2 + $0x24] sm:$0xff] }
 0x1d3   : > { %v3075_v50 = vunpack.c.l.b16 %v2937_v25  ;;  %v4827_v33 = vrot.slane %v4825_v4, 4 }
 0x1d4   : > { %v7215_v41 = vpop.f32.mrf.mxu1  ;;  %v2947_v24 = vsel %vm6310_vm13, %v2942_v22, %v2946_v34  ;;  %v7260_v22 = vrot.slane %v2958_v29, 5  ;;  %v6002_v34 = vld [vmem:[%s8197_s3 + $0x110] sm:$0xff]  ;;  %v4213_v29 = vshll.u32 %v7192_v53, 16 }
 0x1d5   : > { %8256 = vst [vmem:[#allocation47_spill] sm:$0xff] %v7215_v41  ;;  %5446 = vmatmul.msk.bf16.gmra.mxu2 %vm1506_vm0, %v5922_v44  ;;  %v5974_v44 = vld [vmem:[%s8197_s3 + $0xb0] sm:$0xff]  ;;  %v3076_v45 = vunpack.c.l.b16 %v2947_v24  ;;  %5027 = vmatpush.bf16.msra.mxu1 %v6002_v34 }
 0x1d6   : > { %3604 = vmatpush.bf16.msra.mxu2 %v5974_v44  ;;  %v2952_v44 = vshll.u32 %v2648_v16, 16  ;;  %v5866_v16 = vrot.slane %v4723_v14, 9  ;;  %v2650_v14 = vld [vmem:[#allocation2 + $0xa4] sm:$0x1] }
 0x1d7   : > { %5654 = vmatmul.msk.bf16.gmra.mxu1 %vm1506_vm0, %v3095_v15  ;;  %v7237_v15 = vrot.slane %v4189_v61, 5  ;;  %v7250_v61 = vld [vmem:[#allocation2 + $0x68] sm:$0x1]  ;;  %v2968_v57 = vshll.u32 %v2650_v14, 16 }
 0x1d8   : > { %v7231_v49 = vpop.f32.mrf.mxu2  ;;  %v2954_v12 = vrot.slane %v2952_v44, 5 }
 0x1d9   : > { %8258 = vst [vmem:[#allocation49_spill] sm:$0xff] %v7231_v49  ;;  %v7241_v49 = vpop.f32.mrf.mxu0  ;;  %v4196_v63 = vor.u32 %v4195_v10, %v7237_v15  ;;  %v4828_v10 = vrot.slane %v7250_v61, 5 }
 0x1da   : > { %5807 = vmatmul.msk.bf16.gmra.mxu3 %vm1506_vm0, %v5979_v55  ;;  %8259 = vst [vmem:[#allocation50_spill] sm:$0xff] %v7241_v49  ;;  %v4182_v55 = vrot.slane %v4180_v38, 4  ;;  %v7255_v49 = vpop.f32.mrf.mxu3  ;;  %v2955_v24 = vor.u32 %v2954_v12, %v2951_v30  ;;  %v4219_v30 = vrot.slane %v4217_v11, 4 }
 0x1db   : > { %8261 = vst [vmem:[#allocation52_spill] sm:$0xff] %v7255_v49  ;;  %v4197_v44 = vrot.slane %v4196_v63, 4 }
 0x1dc   : > { %v7243_v62 = vpop.f32.mrf.mxu1  ;;  %v4186_v49 = vor.u32 %v4185_v48, %v4182_v55  ;;  %v3096_v48 = vpack.c.b16 %v3076_v45, %v3075_v50  ;;  %v2956_v50 = vrot.slane %v2955_v24, 4  ;;  %v2970_v45 = vrot.slane %v2968_v57, 5 }
 0x1dd   : > { %8260 = vst [vmem:[#allocation51_spill] sm:$0xff] %v7243_v62  ;;  %v2965_v62 = vor.u32 %v2964_v7, %v7260_v22  ;;  %v5980_v7 = vld [vmem:[#allocation2 + $0x48] sm:$0xff]  ;;  %v4223_v24 = vshll.u32 %v7198_v17, 16 }
 0x1de   : > { %v4187_v34 = vrot.slane %v4186_v49, 4  ;;  %v2961_v57 = vsel %vm6310_vm13, %v2956_v50, %v7260_v22 }
 0x1df   : > { %5847 = vmatmul.msk.bf16.gmra.mxu0 %vm1506_vm0, %v4511_v19  ;;  %v4826_v19 = vsel %vm6296_vm8, %v5866_v16, %v4825_v4  ;;  %v4201_v16 = vrot.slane %v4199_v23, 5  ;;  %v2966_v23 = vrot.slane %v2965_v62, 4 }
 0x1e0   : > { %v7257_v38 = vpop.f32.mrf.mxu2  ;;  %v4914_v4 = vunpack.c.l.b16 %v4826_v19  ;;  %v4192_v49 = vsel %vm6310_vm13, %v4187_v34, %v7237_v15 }
 0x1e1   : > { %8262 = vst [vmem:[#allocation53_spill] sm:$0xff] %v7257_v38  ;;  %v4829_v38 = vsel %vm6296_vm8, %v4827_v33, %v4828_v10  ;;  %v7276_v63 = vpop.f32.mrf.mxu0  ;;  %v4202_v53 = vsel %vm6310_vm13, %v4197_v44, %v4201_v16  ;;  %v4050_v33 = vld [vmem:[#allocation2 + $0x54] sm:$0xf]  ;;  %v7281_v10 = vrot.slane %v4213_v29, 5  ;;  %v2652_v44 = vld [vmem:[#allocation2 + $0xac] sm:$0xf]  ;;  %v2971_v15 = vsel %vm6310_vm13, %v2966_v23, %v2970_v45 }
 0x1e2   : > { %v4915_v55 = vunpack.c.l.b16 %v4829_v38  ;;  %8264 = vst [vmem:[#allocation55_spill] sm:$0xff] %v7276_v63  ;;  %v7290_v14 = vpop.f32.mrf.mxu3  ;;  %v4485_v19 = vunpack.c.l.b16 %v4202_v53  ;;  %v4204_v29 = vshrl.u32 %v4050_v33, 16  ;;  %v4207_v11 = vshll.u32 %v4050_v33, 16  ;;  %v7302_v16 = vld [vmem:[#allocation2 + $0x70] sm:$0xf] }
 0x1e3   : > { %8266 = vst [vmem:[#allocation57_spill] sm:$0xff] %v7290_v14  ;;  %v4484_v62 = vunpack.c.l.b16 %v4192_v49  ;;  %v2982_v53 = vshll.u32 %v2652_v44, 16  ;;  %v2986_v33 = vshrl.u32 %v2652_v44, 16  ;;  %v7304_v63 = vld [vmem:[#allocation2 + $0x74] sm:$0x1]  ;;  %v4832_v22 = vrot.slane %v7302_v16, 5 }
 0x1e4   : > { %v7272_v25 = vpop.f32.mrf.mxu1  ;;  %v7283_v12 = vpack.c.b16 %v4915_v55, %v4914_v4  ;;  %v4220_v55 = vor.u32 %v4219_v30, %v7281_v10  ;;  %v4206_v30 = vrot.slane %v4204_v29, 4  ;;  %v3077_v45 = vunpack.c.l.b16 %v2961_v57 }
 0x1e5   : > { %8263 = vst [vmem:[#allocation54_spill] sm:$0xff] %v7272_v25  ;;  %5447 = vmatmul.msk.bf16.gmra.mxu2 %vm1506_vm0, %v5923_v26  ;;  %v2651_v26 = vld [vmem:[#allocation2 + $0xa8] sm:$0xf]  ;;  %v3078_v17 = vunpack.c.l.b16 %v2971_v15  ;;  %v4225_v49 = vrot.slane %v4223_v24, 5  ;;  %v2988_v29 = vrot.slane %v2986_v33, 4  ;;  %v4835_v25 = vrot.slane %v7304_v63, 5 }
 0x1e6   : > { %v2973_v4 = vshrl.u32 %v2651_v26, 16  ;;  %v2976_v34 = vshll.u32 %v2651_v26, 16  ;;  %v4221_v14 = vrot.slane %v4220_v55, 4  ;;  %v4724_v26 = vld [vmem:[#allocation2 + $0x6c] sm:$0xe]  ;;  %v4237_v24 = vshll.u32 %v7239_v51, 16 }
 0x1e7   : > { %5655 = vmatmul.msk.bf16.gmra.mxu1 %vm1506_vm0, %v3096_v48  ;;  %v3097_v15 = vpack.c.b16 %v3078_v17, %v3077_v45 }
 0x1e8   : > { %v7285_v38 = vpop.f32.mrf.mxu2  ;;  %v2978_v44 = vrot.slane %v2976_v34, 5 }
 0x1e9   : > { %8265 = vst [vmem:[#allocation56_spill] sm:$0xff] %v7285_v38  ;;  %v4209_v38 = vrot.slane %v4207_v11, 5  ;;  %v7307_v50 = vpop.f32.mrf.mxu0  ;;  %v2653_v11 = vld [vmem:[#allocation2 + $0xb0] sm:$0x1] }
 0x1ea   : > { %5808 = vmatmul.msk.bf16.gmra.mxu3 %vm1506_vm0, %v5980_v7  ;;  %v4512_v7 = vpack.c.b16 %v4485_v19, %v4484_v62  ;;  %8268 = vst [vmem:[#allocation59_spill] sm:$0xff] %v7307_v50  ;;  %v2984_v19 = vrot.slane %v2982_v53, 5  ;;  %v4834_v62 = vrot.slane %v4832_v22, 4  ;;  %v4226_v50 = vsel %vm6310_vm13, %v4221_v14, %v4225_v49  ;;  %v7315_v57 = vpop.f32.mrf.mxu3 }
 0x1eb   : > { %v4210_v55 = vor.u32 %v4209_v38, %v4206_v30  ;;  %8270 = vst [vmem:[#allocation61_spill] sm:$0xff] %v7315_v57  ;;  %v2992_v30 = vshll.u32 %v2653_v11, 16  ;;  %v5981_v57 = vld [vmem:[#allocation2 + $0x54] sm:$0xff] }
 0x1ec   : > { %v7294_v48 = vpop.f32.mrf.mxu1  ;;  %v4836_v34 = vsel %vm6296_vm8, %v4834_v62, %v4835_v25  ;;  %v2989_v33 = vor.u32 %v2988_v29, %v2984_v19 }
 0x1ed   : > { %8267 = vst [vmem:[#allocation58_spill] sm:$0xff] %v7294_v48  ;;  %v2975_v48 = vrot.slane %v2973_v4, 4  ;;  %v4241_v4 = vshrl.u32 %v7239_v51, 16  ;;  %v4211_v49 = vrot.slane %v4210_v55, 4  ;;  %v4917_v45 = vunpack.c.l.b16 %v4836_v34  ;;  %v2655_v34 = vld [vmem:[#allocation2 + $0xb8] sm:$0xf] }
 0x1ee   : > { %v2990_v11 = vrot.slane %v2989_v33, 4  ;;  %v2994_v62 = vrot.slane %v2992_v30, 5 }
 0x1ef   : > { %5848 = vmatmul.msk.bf16.gmra.mxu0 %vm1506_vm0, %v4512_v7  ;;  %v4053_v7 = vld [vmem:[#allocation2 + $0x60] sm:$0xf]  ;;  %v2979_v53 = vor.u32 %v2978_v44, %v2975_v48  ;;  %v4216_v25 = vsel %vm6310_vm13, %v4211_v49, %v7281_v10  ;;  %v4239_v48 = vrot.slane %v4237_v24, 5 }
 0x1f0   : > { %v7309_v23 = vpop.f32.mrf.mxu2  ;;  %v4228_v17 = vshrl.u32 %v4053_v7, 16 }
 0x1f1   : > { %8269 = vst [vmem:[#allocation60_spill] sm:$0xff] %v7309_v23  ;;  %v5867_v23 = vrot.slane %v4724_v26, 9  ;;  %v4231_v26 = vshll.u32 %v4053_v7, 16  ;;  %v2980_v29 = vrot.slane %v2979_v53, 4  ;;  %v2654_v7 = vld [vmem:[#allocation2 + $0xb4] sm:$0xf] }
 0x1f2   : > { %v2997_v33 = vshrl.u32 %v2654_v7, 16  ;;  %v3000_v30 = vshll.u32 %v2654_v7, 16 }
 0x1f3   : > { %v4833_v14 = vsel %vm6296_vm8, %v5867_v23, %v4832_v22  ;;  %v4243_v22 = vrot.slane %v4241_v4, 4  ;;  %v7332_v23 = vpop.f32.mrf.mxu0  ;;  %v2985_v10 = vsel %vm6310_vm13, %v2980_v29, %v2984_v19  ;;  %v7341_v4 = vpop.f32.mrf.mxu3  ;;  %v4247_v19 = vshll.u32 %v7250_v61, 16 }
 0x1f4   : > { %v7321_v38 = vpop.f32.mrf.mxu1  ;;  %v4916_v44 = vunpack.c.l.b16 %v4833_v14  ;;  %8273 = vst [vmem:[#allocation64_spill] sm:$0xff] %v7332_v23  ;;  %v3010_v14 = vshrl.u32 %v2655_v34, 16  ;;  %v3002_v29 = vrot.slane %v3000_v30, 5  ;;  %v4265_v30 = vshrl.u32 %v7302_v16, 16 }
 0x1f5   : > { %8271 = vst [vmem:[#allocation62_spill] sm:$0xff] %v7321_v38  ;;  %5448 = vmatmul.msk.bf16.gmra.mxu2 %vm1506_vm0, %v5924_v32  ;;  %v4487_v32 = vunpack.c.l.b16 %v4226_v50  ;;  %v4233_v38 = vrot.slane %v4231_v26, 5  ;;  %v2995_v50 = vsel %vm6310_vm13, %v2990_v11, %v2994_v62  ;;  %v4244_v53 = vor.u32 %v4243_v22, %v4239_v48  ;;  %v5925_v22 = vld [vmem:[#allocation2 + $0x3c] sm:$0xff] }
 0x1f6   : > { %v7335_v55 = vpack.c.b16 %v4917_v45, %v4916_v44  ;;  %8274 = vst [vmem:[#allocation65_spill] sm:$0xff] %v7341_v4  ;;  %v3080_v26 = vunpack.c.l.b16 %v2995_v50  ;;  %v3012_v62 = vrot.slane %v3010_v14, 4  ;;  %v4249_v4 = vrot.slane %v4247_v19, 5  ;;  %v2657_v19 = vld [vmem:[#allocation2 + $0xc0] sm:$0xf] }
 0x1f7   : > { %5656 = vmatmul.msk.bf16.gmra.mxu1 %vm1506_vm0, %v3097_v15  ;;  %v4486_v15 = vunpack.c.l.b16 %v4216_v25  ;;  %v4245_v44 = vrot.slane %v4244_v53, 4  ;;  %v4056_v53 = vld [vmem:[#allocation2 + $0x6c] sm:$0xf] }
 0x1f8   : > { %v7327_v51 = vpop.f32.mrf.mxu2 }
 0x1f9   : > { %8272 = vst [vmem:[#allocation63_spill] sm:$0xff] %v7327_v51  ;;  %v4230_v51 = vrot.slane %v4228_v17, 4  ;;  %v4513_v24 = vpack.c.b16 %v4487_v32, %v4486_v15  ;;  %v3079_v17 = vunpack.c.l.b16 %v2985_v10  ;;  %v2999_v32 = vrot.slane %v2997_v33, 4  ;;  %v2656_v15 = vld [vmem:[#allocation2 + $0xbc] sm:$0x1] }
 0x1fa   : > { %5809 = vmatmul.msk.bf16.gmra.mxu3 %vm1506_vm0, %v5981_v57  ;;  %v3006_v57 = vshll.u32 %v2655_v34, 16  ;;  %v3016_v50 = vshll.u32 %v2656_v15, 16  ;;  %v4261_v33 = vshll.u32 %v7302_v16, 16  ;;  %v3021_v15 = vshrl.u32 %v2657_v19, 16 }
 0x1fb   : > { %v4234_v45 = vor.u32 %v4233_v38, %v4230_v51  ;;  %v7349_v34 = vpop.f32.mrf.mxu0  ;;  %v3098_v38 = vpack.c.b16 %v3080_v26, %v3079_v17  ;;  %v3003_v61 = vor.u32 %v3002_v29, %v2999_v32  ;;  %v2658_v32 = vld [vmem:[#allocation2 + $0xc4] sm:$0xf]  ;;  %v4252_v29 = vshrl.u32 %v4056_v53, 16 }
 0x1fc   : > { %v7343_v49 = vpop.f32.mrf.mxu1  ;;  %v3008_v11 = vrot.slane %v3006_v57, 5  ;;  %8277 = vst [vmem:[#allocation68_spill] sm:$0xff] %v7349_v34  ;;  %v7359_v57 = vpop.f32.mrf.mxu3  ;;  %v3024_v16 = vshll.u32 %v2657_v19, 16  ;;  %v7371_v34 = vld [vmem:[#allocation2 + $0x7c] sm:$0xf] }
 0x1fd   : > { %8275 = vst [vmem:[#allocation66_spill] sm:$0xff] %v7343_v49  ;;  %v4235_v7 = vrot.slane %v4234_v45, 4  ;;  %v5982_v45 = vld [vmem:[#allocation2 + $0x60] sm:$0xff] }
 0x1fe   : > { %v3013_v10 = vor.u32 %v3012_v62, %v3008_v11  ;;  %8278 = vst [vmem:[#allocation69_spill] sm:$0xff] %v7359_v57  ;;  %v3018_v62 = vrot.slane %v3016_v50, 5  ;;  %v4254_v57 = vrot.slane %v4252_v29, 4 }
 0x1ff   : > { %5849 = vmatmul.msk.bf16.gmra.mxu0 %vm1506_vm0, %v4513_v24  ;;  %v4240_v51 = vsel %vm6310_vm13, %v4235_v7, %v4239_v48  ;;  %v4250_v24 = vsel %vm6310_vm13, %v4245_v44, %v4249_v4  ;;  %v3004_v4 = vrot.slane %v3003_v61, 4  ;;  %v7366_v7 = vrot.slane %v4261_v33, 5 }
 0x200   : > { %v7345_v25 = vpop.f32.mrf.mxu2  ;;  %v4488_v17 = vunpack.c.l.b16 %v4240_v51  ;;  %v4489_v26 = vunpack.c.l.b16 %v4250_v24  ;;  %v3014_v44 = vrot.slane %v3013_v10, 4  ;;  %v6001_v51 = vld [vmem:[%s8197_s3 + $0x108] sm:$0xff]  ;;  %v3023_v33 = vrot.slane %v3021_v15, 4 }
 0x201   : > { %8276 = vst [vmem:[#allocation67_spill] sm:$0xff] %v7345_v25  ;;  %v3034_v25 = vshrl.u32 %v2658_v32, 16  ;;  %v3009_v61 = vsel %vm6310_vm13, %v3004_v4, %v3008_v11  ;;  %5028 = vmatpush.bf16.msra.mxu1 %v6001_v51  ;;  %v4271_v51 = vshll.u32 %v7304_v63, 16  ;;  %v6000_v63 = vld [vmem:[%s8197_s3 + $0x100] sm:$0xff] }
 0x202   : > { %v4514_v24 = vpack.c.b16 %v4489_v26, %v4488_v17  ;;  %v3019_v10 = vsel %vm6310_vm13, %v3014_v44, %v3018_v62  ;;  %v7381_v17 = vld [vmem:[#allocation2 + $0x80] sm:$0x1]  ;;  %v4725_v26 = vld [vmem:[#allocation2 + $0x78] sm:$0xe]  ;;  %v3081_v44 = vunpack.c.l.b16 %v3009_v61 }
 0x203   : > { %v3036_v11 = vrot.slane %v3034_v25, 4  ;;  %v5868_v4 = vrot.slane %v4725_v26, 9  ;;  %v3082_v62 = vunpack.c.l.b16 %v3019_v10  ;;  %v4842_v23 = vrot.slane %v7381_v17, 5  ;;  %v4059_v25 = vld [vmem:[#allocation2 + $0x78] sm:$0xf] }
 0x204   : > { %v7363_v48 = vpop.f32.mrf.mxu1  ;;  %v7387_v15 = vpop.f32.mrf.mxu3 }
 0x205   : > { %5449 = vmatmul.msk.bf16.gmra.mxu2 %vm1506_vm0, %v5925_v22  ;;  %8280 = vst [vmem:[#allocation71_spill] sm:$0xff] %v7363_v48  ;;  %v4255_v22 = vshll.u32 %v4056_v53, 16  ;;  %v4839_v53 = vrot.slane %v7371_v34, 5  ;;  %5029 = vmatpush.bf16.msra.mxu1 %v6000_v63 }
 0x206   : > { %8283 = vst [vmem:[#allocation74_spill] sm:$0xff] %v7387_v15 }
 0x207   : > { %5657 = vmatmul.msk.bf16.gmra.mxu1 %vm1506_vm0, %v3098_v38  ;;  %v4267_v38 = vrot.slane %v4265_v30, 4  ;;  %v4257_v50 = vrot.slane %v4255_v22, 5  ;;  %v3026_v30 = vrot.slane %v3024_v16, 5  ;;  %v2659_v22 = vld [vmem:[#allocation2 + $0xc8] sm:$0x1] }
 0x208   : > { %v7361_v14 = vpop.f32.mrf.mxu2  ;;  %v3040_v10 = vshll.u32 %v2659_v22, 16 }
 0x209   : > { %8279 = vst [vmem:[#allocation70_spill] sm:$0xff] %v7361_v14  ;;  %v3030_v14 = vshll.u32 %v2658_v32, 16  ;;  %v4268_v19 = vor.u32 %v4267_v38, %v7366_v7  ;;  %v4258_v16 = vor.u32 %v4257_v50, %v4254_v57  ;;  %v4840_v38 = vsel %vm6296_vm8, %v5868_v4, %v4839_v53 }
 0x20a   : > { %5810 = vmatmul.msk.bf16.gmra.mxu3 %vm1506_vm0, %v5982_v45  ;;  %v7373_v45 = vpop.f32.mrf.mxu0  ;;  %v4918_v26 = vunpack.c.l.b16 %v4840_v38  ;;  %v3027_v48 = vor.u32 %v3026_v30, %v3023_v33  ;;  %v3099_v50 = vpack.c.b16 %v3082_v62, %v3081_v44  ;;  %v4276_v33 = vshrl.u32 %v4059_v25, 16 }
 0x20b   : > { %8281 = vst [vmem:[#allocation72_spill] sm:$0xff] %v7373_v45  ;;  %v3032_v29 = vrot.slane %v3030_v14, 5  ;;  %v4841_v45 = vrot.slane %v4839_v53, 4  ;;  %v4269_v14 = vrot.slane %v4268_v19, 4  ;;  %v4273_v53 = vrot.slane %v4271_v51, 5  ;;  %v5973_v19 = vld [vmem:[%s8197_s3 + $0xa8] sm:$0xff] }
 0x20c   : > { %v4259_v38 = vrot.slane %v4258_v16, 4  ;;  %v4279_v30 = vshll.u32 %v4059_v25, 16  ;;  %3605 = vmatpush.bf16.msra.mxu2 %v5973_v19  ;;  %v5983_v51 = vld [vmem:[#allocation2 + $0x6c] sm:$0xff]  ;;  %v3028_v16 = vrot.slane %v3027_v48, 4  ;;  %v3042_v25 = vrot.slane %v3040_v10, 5 }
 0x20d   : > { %v3037_v61 = vor.u32 %v3036_v11, %v3032_v29  ;;  %v4843_v57 = vsel %vm6296_vm8, %v4841_v45, %v4842_v23  ;;  %v4274_v11 = vsel %vm6310_vm13, %v4269_v14, %v4273_v53  ;;  %v4285_v23 = vshll.u32 %v7371_v34, 16  ;;  %v7418_v53 = vpop.f32.mrf.mxu3 }
 0x20e   : > { %v4919_v4 = vunpack.c.l.b16 %v4843_v57  ;;  %v4289_v45 = vshrl.u32 %v7371_v34, 16  ;;  %v4264_v63 = vsel %vm6310_vm13, %v4259_v38, %v7366_v7  ;;  %v4491_v14 = vunpack.c.l.b16 %v4274_v11  ;;  %8287 = vst [vmem:[#allocation78_spill] sm:$0xff] %v7418_v53 }
 0x20f   : > { %5850 = vmatmul.msk.bf16.gmra.mxu0 %vm1506_vm0, %v4514_v24  ;;  %v5926_v24 = vld [vmem:[#allocation2 + $0x48] sm:$0xff]  ;;  %v4278_v57 = vrot.slane %v4276_v33, 4  ;;  %v4287_v34 = vrot.slane %v4285_v23, 5  ;;  %v3033_v19 = vsel %vm6310_vm13, %v3028_v16, %v3032_v29  ;;  %v4295_v23 = vshll.u32 %v7381_v17, 16  ;;  %v4062_v17 = vld [vmem:[#allocation2 + $0x84] sm:$0xf] }
 0x210   : > { %v7383_v32 = vpop.f32.mrf.mxu2  ;;  %v7408_v44 = vpack.c.b16 %v4919_v4, %v4918_v26  ;;  %v4291_v26 = vrot.slane %v4289_v45, 4  ;;  %v4063_v4 = vld [vmem:[#allocation2 + $0x88] sm:$0xf]  ;;  %v3083_v11 = vunpack.c.l.b16 %v3033_v19  ;;  %v4064_v45 = vld [vmem:[#allocation2 + $0x8c] sm:$0x1] }
 0x211   : > { %8282 = vst [vmem:[#allocation73_spill] sm:$0xff] %v7383_v32  ;;  %v7392_v32 = vpop.f32.mrf.mxu1  ;;  %v4297_v19 = vrot.slane %v4295_v23, 5 }
 0x212   : > { %8284 = vst [vmem:[#allocation75_spill] sm:$0xff] %v7392_v32  ;;  %v7410_v62 = vpop.f32.mrf.mxu0 }
 0x213   : > { %8285 = vst [vmem:[#allocation76_spill] sm:$0xff] %v7410_v62  ;;  %v4727_v62 = vld [vmem:[#allocation2 + $0x90] sm:$0xe] }
 0x215   : > { %5450 = vmatmul.msk.bf16.gmra.mxu2 %vm1506_vm0, %v5926_v24  ;;  %v3038_v24 = vrot.slane %v3037_v61, 4  ;;  %v4490_v61 = vunpack.c.l.b16 %v4264_v63 }
 0x217   : > { %5658 = vmatmul.msk.bf16.gmra.mxu1 %vm1506_vm0, %v3099_v50  ;;  %v4281_v50 = vrot.slane %v4279_v30, 5  ;;  %v3043_v48 = vsel %vm6310_vm13, %v3038_v24, %v3042_v25  ;;  %v4515_v7 = vpack.c.b16 %v4491_v14, %v4490_v61  ;;  %v4292_v30 = vor.u32 %v4291_v26, %v4287_v34 }
 0x218   : > { %v7412_v22 = vpop.f32.mrf.mxu2  ;;  %v3084_v33 = vunpack.c.l.b16 %v3043_v48  ;;  %v4849_v14 = vrot.slane %v4064_v45, 5 }
 0x219   : > { %8286 = vst [vmem:[#allocation77_spill] sm:$0xff] %v7412_v22  ;;  %v7424_v10 = vpop.f32.mrf.mxu1  ;;  %v4282_v38 = vor.u32 %v4281_v50, %v4278_v57  ;;  %v4726_v22 = vld [vmem:[#allocation2 + $0x84] sm:$0xe]  ;;  %v5927_v57 = vld [vmem:[#allocation2 + $0x54] sm:$0xff]  ;;  %v4293_v26 = vrot.slane %v4292_v30, 4  ;;  %v4313_v30 = vshrl.u32 %v4063_v4, 16 }
 0x21a   : > { %5811 = vmatmul.msk.bf16.gmra.mxu3 %vm1506_vm0, %v5983_v51  ;;  %8288 = vst [vmem:[#allocation79_spill] sm:$0xff] %v7424_v10  ;;  %v4846_v51 = vrot.slane %v4063_v4, 5  ;;  %v5869_v29 = vrot.slane %v4726_v22, 9  ;;  %v7430_v24 = vpop.f32.mrf.mxu0  ;;  %v3100_v50 = vpack.c.b16 %v3084_v33, %v3083_v11  ;;  %v4309_v33 = vshll.u32 %v4063_v4, 16  ;;  %v4729_v10 = vld [vmem:[#allocation2 + $0xa8] sm:$0xe] }
 0x21b   : > { %8290 = vst [vmem:[#allocation81_spill] sm:$0xff] %v7430_v24  ;;  %v4283_v25 = vrot.slane %v4282_v38, 4  ;;  %v4298_v11 = vsel %vm6310_vm13, %v4293_v26, %v4297_v19 }
 0x21c   : > { %v4848_v16 = vrot.slane %v4846_v51, 4  ;;  %v4847_v63 = vsel %vm6296_vm8, %v5869_v29, %v4846_v51  ;;  %v4303_v51 = vshll.u32 %v4062_v17, 16 }
 0x21d   : > { %v4920_v61 = vunpack.c.l.b16 %v4847_v63  ;;  %v4288_v38 = vsel %vm6310_vm13, %v4283_v25, %v4287_v34  ;;  %v5984_v63 = vld [vmem:[#allocation2 + $0x78] sm:$0xff]  ;;  %v4493_v34 = vunpack.c.l.b16 %v4298_v11 }
 0x21e   : > { %v4850_v48 = vsel %vm6296_vm8, %v4848_v16, %v4849_v14  ;;  %v4492_v14 = vunpack.c.l.b16 %v4288_v38 }
 0x21f   : > { %5851 = vmatmul.msk.bf16.gmra.mxu0 %vm1506_vm0, %v4515_v7  ;;  %v4921_v22 = vunpack.c.l.b16 %v4850_v48  ;;  %v7437_v7 = vpop.f32.mrf.mxu3  ;;  %v4315_v48 = vrot.slane %v4313_v30, 4 }
 0x220   : > { %v7427_v53 = vpop.f32.mrf.mxu2  ;;  %8291 = vst [vmem:[#allocation82_spill] sm:$0xff] %v7437_v7  ;;  %v4516_v24 = vpack.c.b16 %v4493_v34, %v4492_v14  ;;  %v4065_v34 = vld [vmem:[#allocation2 + $0x90] sm:$0xf] }
 0x221   : > { %8289 = vst [vmem:[#allocation80_spill] sm:$0xff] %v7427_v53  ;;  %v4300_v53 = vshrl.u32 %v4062_v17, 16  ;;  %v7441_v29 = vpop.f32.mrf.mxu1  ;;  %v7446_v23 = vpack.c.b16 %v4921_v22, %v4920_v61  ;;  %v4311_v17 = vrot.slane %v4309_v33, 5  ;;  %v4319_v61 = vshll.u32 %v4064_v45, 16  ;;  %v4067_v22 = vld [vmem:[#allocation2 + $0x98] sm:$0x1] }
 0x222   : > { %8292 = vst [vmem:[#allocation83_spill] sm:$0xff] %v7441_v29  ;;  %v7451_v7 = vpop.f32.mrf.mxu0  ;;  %v4856_v30 = vrot.slane %v4067_v22, 5 }
 0x223   : > { %v4302_v25 = vrot.slane %v4300_v53, 4  ;;  %8294 = vst [vmem:[#allocation85_spill] sm:$0xff] %v7451_v7  ;;  %v4316_v4 = vor.u32 %v4315_v48, %v4311_v17  ;;  %v5870_v53 = vrot.slane %v4727_v62, 9  ;;  %v4321_v45 = vrot.slane %v4319_v61, 5  ;;  %v4070_v7 = vld [vmem:[#allocation2 + $0xa4] sm:$0x1] }
 0x225   : > { %5451 = vmatmul.msk.bf16.gmra.mxu2 %vm1506_vm0, %v5927_v57  ;;  %v4305_v57 = vrot.slane %v4303_v51, 5  ;;  %v4317_v14 = vrot.slane %v4316_v4, 4 }
 0x227   : > { %5659 = vmatmul.msk.bf16.gmra.mxu1 %vm1506_vm0, %v3100_v50  ;;  %v4066_v50 = vld [vmem:[#allocation2 + $0x94] sm:$0xf]  ;;  %v4306_v26 = vor.u32 %v4305_v57, %v4302_v25 }
 0x228   : > { %v7448_v16 = vpop.f32.mrf.mxu2  ;;  %v4853_v19 = vrot.slane %v4066_v50, 5  ;;  %v4333_v4 = vshll.u32 %v4066_v50, 16  ;;  %v4337_v61 = vshrl.u32 %v4066_v50, 16 }
 0x229   : > { %8293 = vst [vmem:[#allocation84_spill] sm:$0xff] %v7448_v16  ;;  %v7453_v16 = vpop.f32.mrf.mxu3  ;;  %v7458_v51 = vpop.f32.mrf.mxu1  ;;  %v4307_v11 = vrot.slane %v4306_v26, 4  ;;  %v4324_v26 = vshrl.u32 %v4065_v34, 16 }
 0x22a   : > { %5812 = vmatmul.msk.bf16.gmra.mxu3 %vm1506_vm0, %v5984_v63  ;;  %8295 = vst [vmem:[#allocation86_spill] sm:$0xff] %v7453_v16  ;;  %v4855_v38 = vrot.slane %v4853_v19, 4  ;;  %v4854_v33 = vsel %vm6296_vm8, %v5870_v53, %v4853_v19  ;;  %v5928_v63 = vld [vmem:[#allocation2 + $0x60] sm:$0xff]  ;;  %v7465_v62 = vpop.f32.mrf.mxu0  ;;  %v4322_v19 = vsel %vm6310_vm13, %v4317_v14, %v4321_v45  ;;  %v4343_v16 = vshll.u32 %v4067_v22, 16 }
 0x22b   : > { %8297 = vst [vmem:[#allocation88_spill] sm:$0xff] %v7458_v51  ;;  %v4922_v57 = vunpack.c.l.b16 %v4854_v33  ;;  %v4312_v48 = vsel %vm6310_vm13, %v4307_v11, %v4311_v17  ;;  %v5985_v33 = vld [vmem:[#allocation2 + $0x84] sm:$0xff]  ;;  %v4495_v11 = vunpack.c.l.b16 %v4322_v19  ;;  %v4069_v14 = vld [vmem:[#allocation2 + $0xa0] sm:$0xf]  ;;  %v4728_v51 = vld [vmem:[#allocation2 + $0x9c] sm:$0xe] }
 0x22c   : > { %v4857_v25 = vsel %vm6296_vm8, %v4855_v38, %v4856_v30  ;;  %8298 = vst [vmem:[#allocation89_spill] sm:$0xff] %v7465_v62  ;;  %v4494_v17 = vunpack.c.l.b16 %v4312_v48  ;;  %v4339_v62 = vrot.slane %v4337_v61, 4  ;;  %v5871_v48 = vrot.slane %v4728_v51, 9  ;;  %v5929_v61 = vld [vmem:[#allocation2 + $0x6c] sm:$0xff] }
 0x22e   : > { %v4517_v45 = vpack.c.b16 %v4495_v11, %v4494_v17  ;;  %v4345_v17 = vrot.slane %v4343_v16, 5 }
 0x22f   : > { %5852 = vmatmul.msk.bf16.gmra.mxu0 %vm1506_vm0, %v4516_v24  ;;  %v4923_v24 = vunpack.c.l.b16 %v4857_v25 }
 0x230   : > { %v7455_v15 = vpop.f32.mrf.mxu2 }
 0x231   : > { %8296 = vst [vmem:[#allocation87_spill] sm:$0xff] %v7455_v15  ;;  %v4327_v15 = vshll.u32 %v4065_v34, 16  ;;  %v7473_v53 = vpack.c.b16 %v4923_v24, %v4922_v57  ;;  %v7477_v30 = vpop.f32.mrf.mxu3  ;;  %v7480_v25 = vpop.f32.mrf.mxu1  ;;  %v4860_v57 = vrot.slane %v4069_v14, 5 }
 0x232   : > { %8299 = vst [vmem:[#allocation90_spill] sm:$0xff] %v7477_v30  ;;  %v7482_v29 = vpop.f32.mrf.mxu0 }
 0x233   : > { %v4329_v34 = vrot.slane %v4327_v15, 5  ;;  %8300 = vst [vmem:[#allocation91_spill] sm:$0xff] %v7480_v25  ;;  %v4862_v15 = vrot.slane %v4860_v57, 4  ;;  %v4861_v19 = vsel %vm6296_vm8, %v5871_v48, %v4860_v57  ;;  %v4361_v48 = vshrl.u32 %v4069_v14, 16 }
 0x234   : > { %8301 = vst [vmem:[#allocation92_spill] sm:$0xff] %v7482_v29  ;;  %v4072_v29 = vld [vmem:[#allocation2 + $0xac] sm:$0xf] }
 0x235   : > { %5452 = vmatmul.msk.bf16.gmra.mxu2 %vm1506_vm0, %v5928_v63  ;;  %v4326_v63 = vrot.slane %v4324_v26, 4 }
 0x237   : > { %5900 = vmatmul.msk.bf16.vlgmr.msra.gmra.mxu1 %vm1506_vm0, %v7061_v56  ;;  %v4335_v56 = vrot.slane %v4333_v4, 5  ;;  %v4330_v50 = vor.u32 %v4329_v34, %v4326_v63  ;;  %v4863_v4 = vrot.slane %v4070_v7, 5  ;;  %v4924_v63 = vunpack.c.l.b16 %v4861_v19 }
 0x238   : > { %v7475_v38 = vpop.f32.mrf.mxu2 }
 0x239   : > { %v4340_v24 = vor.u32 %v4339_v62, %v4335_v56  ;;  %v4331_v26 = vrot.slane %v4330_v50, 4  ;;  %v4068_v62 = vld [vmem:[#allocation2 + $0x9c] sm:$0xf]  ;;  %v7489_v22 = vpop.f32.mrf.mxu3  ;;  %v4864_v11 = vsel %vm6296_vm8, %v4862_v15, %v4863_v4  ;;  %v7493_v34 = vpop.f32.mrf.mxu1  ;;  %v5986_v4 = vld [vmem:[#allocation2 + $0x90] sm:$0xff] }
 0x23a   : > { %5813 = vmatmul.msk.bf16.gmra.mxu3 %vm1506_vm0, %v5985_v33  ;;  %8302 = vst [vmem:[#allocation93_spill] sm:$0xff] %v7489_v22  ;;  %v4925_v51 = vunpack.c.l.b16 %v4864_v11  ;;  %v4348_v50 = vshrl.u32 %v4068_v62, 16  ;;  %v4351_v57 = vshll.u32 %v4068_v62, 16 }
 0x23b   : > { %v4341_v33 = vrot.slane %v4340_v24, 4  ;;  %8303 = vst [vmem:[#allocation94_spill] sm:$0xff] %v7493_v34  ;;  %v4357_v24 = vshll.u32 %v4069_v14, 16  ;;  %v7509_v34 = vld [vmem:[#allocation2 + $0xb0] sm:$0x1] }
 0x23c   : > { %v7502_v15 = vpack.c.b16 %v4925_v51, %v4924_v63  ;;  %v4350_v62 = vrot.slane %v4348_v50, 4  ;;  %v4353_v11 = vrot.slane %v4351_v57, 5  ;;  %v4867_v63 = vrot.slane %v4072_v29, 5 }
 0x23d   : > { %v4346_v16 = vsel %vm6310_vm13, %v4341_v33, %v4345_v17  ;;  %v4359_v22 = vrot.slane %v4357_v24, 5  ;;  %v4870_v57 = vrot.slane %v7509_v34, 5  ;;  %v4071_v24 = vld [vmem:[#allocation2 + $0xa8] sm:$0xf]  ;;  %v4391_v32 = vshll.u32 %v7509_v34, 16 }
 0x23e   : > { %v4354_v17 = vor.u32 %v4353_v11, %v4350_v62  ;;  %v4869_v50 = vrot.slane %v4867_v63, 4 }
 0x23f   : > { %5853 = vmatmul.msk.bf16.gmra.mxu0 %vm1506_vm0, %v4517_v45  ;;  %v4336_v45 = vsel %vm6310_vm13, %v4331_v26, %v4335_v56  ;;  %v4497_v26 = vunpack.c.l.b16 %v4346_v16 }
 0x240   : > { %v7484_v30 = vpop.f32.mrf.mxu2  ;;  %v4496_v56 = vunpack.c.l.b16 %v4336_v45  ;;  %v5872_v45 = vrot.slane %v4729_v10, 9  ;;  %v4355_v16 = vrot.slane %v4354_v17, 4  ;;  %v5972_v10 = vld [vmem:[%s8197_s3 + $0xa0] sm:$0xff]  ;;  %v4375_v17 = vshll.u32 %v4071_v24, 16 }
 0x241   : > { %v7511_v33 = vpop.f32.mrf.mxu3  ;;  %v7513_v51 = vpop.f32.mrf.mxu1  ;;  %3606 = vmatpush.bf16.msra.mxu2 %v5972_v10 }
 0x242   : > { %8305 = vst [vmem:[#allocation96_spill] sm:$0xff] %v7511_v33  ;;  %v4518_v14 = vpack.c.b16 %v4497_v26, %v4496_v56  ;;  %v4871_v56 = vsel %vm6296_vm8, %v4869_v50, %v4870_v57  ;;  %v5930_v26 = vld [vmem:[#allocation2 + $0x78] sm:$0xff] }
 0x243   : > { %8306 = vst [vmem:[#allocation97_spill] sm:$0xff] %v7513_v51 }
 0x245   : > { %5453 = vmatmul.msk.bf16.gmra.mxu2 %vm1506_vm0, %v5929_v61  ;;  %v7506_v61 = vpop.f32.mrf.mxu0 }
 0x246   : > { %8304 = vst [vmem:[#allocation95_spill] sm:$0xff] %v7506_v61  ;;  %v4367_v61 = vshll.u32 %v4070_v7, 16 }
 0x247   : > { %5901 = vmatmul.msk.bf16.gmra.mxu1 %vm1506_vm0, %v7078_v47  ;;  %v4363_v47 = vrot.slane %v4361_v48, 4  ;;  %v4868_v48 = vsel %vm6296_vm8, %v5872_v45, %v4867_v63  ;;  %v4381_v63 = vshll.u32 %v4072_v29, 16  ;;  %v4385_v45 = vshrl.u32 %v4072_v29, 16 }
 0x248   : > { %v7504_v19 = vpop.f32.mrf.mxu2  ;;  %v4369_v7 = vrot.slane %v4367_v61, 5  ;;  %v4926_v11 = vunpack.c.l.b16 %v4868_v48  ;;  %v5987_v48 = vld [vmem:[#allocation2 + $0x9c] sm:$0xff] }
 0x249   : > { %v4364_v25 = vor.u32 %v4363_v47, %v4359_v22  ;;  %v4927_v47 = vunpack.c.l.b16 %v4871_v56  ;;  %v7537_v50 = vpop.f32.mrf.mxu3 }
 0x24a   : > { %5814 = vmatmul.msk.bf16.gmra.mxu3 %vm1506_vm0, %v5986_v4 }
 0x24b   : > { %v4365_v62 = vrot.slane %v4364_v25, 4  ;;  %v7529_v51 = vpack.c.b16 %v4927_v47, %v4926_v11  ;;  %v4360_v25 = vsel %vm6310_vm13, %v4355_v16, %v4359_v22  ;;  %v4383_v11 = vrot.slane %v4381_v63, 5  ;;  %v4075_v16 = vld [vmem:[#allocation2 + $0xb8] sm:$0xf] }
 0x24c   : > { %v4498_v29 = vunpack.c.l.b16 %v4360_v25  ;;  %v4387_v47 = vrot.slane %v4385_v45, 4  ;;  %v4874_v49 = vrot.slane %v4075_v16, 5 }
 0x24d   : > { %v7523_v33 = vpop.f32.mrf.mxu0  ;;  %v4370_v61 = vsel %vm6310_vm13, %v4365_v62, %v4369_v7 }
 0x24e   : > { %8307 = vst [vmem:[#allocation98_spill] sm:$0xff] %v7523_v33  ;;  %v4076_v33 = vld [vmem:[#allocation2 + $0xbc] sm:$0x1]  ;;  %v4388_v10 = vor.u32 %v4387_v47, %v4383_v11 }
 0x24f   : > { %5854 = vmatmul.msk.bf16.gmra.mxu0 %vm1506_vm0, %v4518_v14  ;;  %v4372_v14 = vshrl.u32 %v4071_v24, 16  ;;  %v7541_v24 = vpop.f32.mrf.mxu1  ;;  %v4877_v25 = vrot.slane %v4076_v33, 5  ;;  %v4415_v41 = vshll.u32 %v4076_v33, 16 }
 0x250   : > { %v7515_v4 = vpop.f32.mrf.mxu2  ;;  %8308 = vst [vmem:[#allocation99_spill] sm:$0xff] %v7541_v24 }
 0x251   : > { %v4374_v56 = vrot.slane %v4372_v14, 4  ;;  %v5873_v14 = vrot.slane %v4730_v35, 9  ;;  %v7550_v45 = vpop.f32.mrf.mxu3 }
 0x255   : > { %5454 = vmatmul.msk.bf16.gmra.mxu2 %vm1506_vm0, %v5930_v26  ;;  %v4377_v26 = vrot.slane %v4375_v17, 5  ;;  %v7544_v62 = vpop.f32.mrf.mxu0  ;;  %v4876_v17 = vrot.slane %v4874_v49, 4 }
 0x257   : > { %5902 = vmatmul.msk.bf16.gmra.mxu1 %vm1506_vm0, %v7097_v52  ;;  %v4499_v52 = vunpack.c.l.b16 %v4370_v61  ;;  %v4378_v22 = vor.u32 %v4377_v26, %v4374_v56  ;;  %v4389_v61 = vrot.slane %v4388_v10, 4  ;;  %v4875_v56 = vsel %vm6296_vm8, %v5873_v14, %v4874_v49  ;;  %v7556_v26 = vpop.f32.mrf.mxu1 }
 0x258   : > { %v7539_v57 = vpop.f32.mrf.mxu2  ;;  %v4878_v34 = vsel %vm6296_vm8, %v4876_v17, %v4877_v25  ;;  %8309 = vst [vmem:[#allocation100_spill] sm:$0xff] %v7556_v26  ;;  %v4405_v14 = vshll.u32 %v4075_v16, 16  ;;  %v4409_v17 = vshrl.u32 %v4075_v16, 16 }
 0x259   : > { %v4519_v7 = vpack.c.b16 %v4499_v52, %v4498_v29  ;;  %v4379_v63 = vrot.slane %v4378_v22, 4  ;;  %v5931_v29 = vld [vmem:[#allocation2 + $0x84] sm:$0xff]  ;;  %v4928_v52 = vunpack.c.l.b16 %v4875_v56  ;;  %v4929_v47 = vunpack.c.l.b16 %v4878_v34 }
 0x25a   : > { %5815 = vmatmul.msk.bf16.gmra.mxu3 %vm1506_vm0, %v5987_v48  ;;  %v4393_v48 = vrot.slane %v4391_v32, 5  ;;  %v5988_v34 = vld [vmem:[#allocation2 + $0xa8] sm:$0xff] }
 0x25b   : > { %v7559_v35 = vpack.c.b16 %v4929_v47, %v4928_v52  ;;  %v4384_v22 = vsel %vm6310_vm13, %v4379_v63, %v4383_v11  ;;  %v4407_v47 = vrot.slane %v4405_v14, 5 }
 0x25c   : > { %v4394_v32 = vsel %vm6310_vm13, %v4389_v61, %v4393_v48  ;;  %v4411_v61 = vrot.slane %v4409_v17, 4  ;;  %v7572_v48 = vpop.f32.mrf.mxu3 }
 0x25d   : > { %v7567_v25 = vpop.f32.mrf.mxu0  ;;  %v4501_v52 = vunpack.c.l.b16 %v4394_v32 }
 0x25e   : > { %v4412_v16 = vor.u32 %v4411_v61, %v4407_v47  ;;  %v7597_v61 = vld [vmem:[#allocation2 + $0xc4] sm:$0xf] }
 0x25f   : > { %5855 = vmatmul.msk.bf16.gmra.mxu0 %vm1506_vm0, %v4519_v7  ;;  %v4074_v7 = vld [vmem:[#allocation2 + $0xb4] sm:$0xf] }
 0x260   : > { %v7547_v24 = vpop.f32.mrf.mxu2  ;;  %v4396_v49 = vshrl.u32 %v4074_v7, 16  ;;  %v4399_v10 = vshll.u32 %v4074_v7, 16 }
 0x262   : > { %v4398_v11 = vrot.slane %v4396_v49, 4  ;;  %v4401_v63 = vrot.slane %v4399_v10, 5  ;;  %v4413_v49 = vrot.slane %v4412_v16, 4  ;;  %v4417_v10 = vrot.slane %v4415_v41, 5 }
 0x264   : > { %v4402_v26 = vor.u32 %v4401_v63, %v4398_v11  ;;  %v7582_v14 = vpop.f32.mrf.mxu3  ;;  %v4077_v63 = vld [vmem:[#allocation2 + $0xc0] sm:$0xf] }
 0x265   : > { %5455 = vmatmul.msk.bf16.gmra.mxu2 %vm1506_vm0, %v5931_v29  ;;  %v4500_v29 = vunpack.c.l.b16 %v4384_v22  ;;  %v5932_v22 = vld [vmem:[#allocation2 + $0x90] sm:$0xff]  ;;  %8313 = vst [vmem:[#allocation104_spill] sm:$0xff] %v7582_v14  ;;  %v4423_v16 = vshll.u32 %v4077_v63, 16 }
 0x266   : > { %v4403_v32 = vrot.slane %v4402_v26, 4  ;;  %v5989_v26 = vld [vmem:[#allocation2 + $0xb4] sm:$0xff] }
 0x267   : > { %5903 = vmatmul.msk.bf16.gmra.mxu1 %vm1506_vm0, %v7138_v5  ;;  %v7574_v5 = vpop.f32.mrf.mxu1  ;;  %v4520_v7 = vpack.c.b16 %v4501_v52, %v4500_v29 }
 0x268   : > { %v7569_v56 = vpop.f32.mrf.mxu2  ;;  %8311 = vst [vmem:[#allocation102_spill] sm:$0xff] %v7574_v5  ;;  %v4408_v33 = vsel %vm6310_vm13, %v4403_v32, %v4407_v47  ;;  %v4429_v47 = vshll.u32 %v7597_v61, 16 }
 0x269   : > { %8310 = vst [vmem:[#allocation101_spill] sm:$0xff] %v7569_v56  ;;  %v7579_v56 = vpop.f32.mrf.mxu0  ;;  %v4502_v41 = vunpack.c.l.b16 %v4408_v33 }
 0x26a   : > { %5816 = vmatmul.msk.bf16.gmra.mxu3 %vm1506_vm0, %v5988_v34  ;;  %v4418_v34 = vsel %vm6310_vm13, %v4413_v49, %v4417_v10  ;;  %v4431_v33 = vrot.slane %v4429_v47, 5 }
 0x26b   : > { %v4503_v52 = vunpack.c.l.b16 %v4418_v34 }
 0x26d   : > { %v4521_v32 = vpack.c.b16 %v4503_v52, %v4502_v41 }
 0x26f   : > { %5856 = vmatmul.msk.bf16.gmra.mxu0 %vm1506_vm0, %v4520_v7  ;;  %v7584_v17 = vpop.f32.mrf.mxu1  ;;  %v7599_v7 = vld [vmem:[#allocation2 + $0xc8] sm:$0x1] }
 0x270   : > { %v7576_v42 = vpop.f32.mrf.mxu2  ;;  %8314 = vst [vmem:[#allocation105_spill] sm:$0xff] %v7584_v17  ;;  %v4439_v49 = vshll.u32 %v7599_v7, 16  ;;  %v7604_v17 = vpop.f32.mrf.mxu3 }
 0x271   : > { %8312 = vst [vmem:[#allocation103_spill] sm:$0xff] %v7576_v42  ;;  %v7595_v11 = vpop.f32.mrf.mxu0 }
 0x272   : > { %8316 = vst [vmem:[#allocation107_spill] sm:$0xff] %v7595_v11  ;;  %v5933_v11 = vld [vmem:[#allocation2 + $0x9c] sm:$0xff]  ;;  %v4441_v41 = vrot.slane %v4439_v49, 5 }
 0x275   : > { %5456 = vmatmul.msk.bf16.gmra.mxu2 %vm1506_vm0, %v5932_v22  ;;  %v4433_v22 = vshrl.u32 %v7597_v61, 16 }
 0x277   : > { %5904 = vmatmul.msk.bf16.gmra.mxu1 %vm1506_vm0, %v7183_v0  ;;  %v4420_v0 = vshrl.u32 %v4077_v63, 16  ;;  %v4435_v34 = vrot.slane %v4433_v22, 4  ;;  %v5990_v22 = vld [vmem:[#allocation2 + $0xc0] sm:$0xff] }
 0x278   : > { %v7592_v29 = vpop.f32.mrf.mxu2 }
 0x279   : > { %8315 = vst [vmem:[#allocation106_spill] sm:$0xff] %v7592_v29  ;;  %v4422_v10 = vrot.slane %v4420_v0, 4  ;;  %v7609_v29 = vpop.f32.mrf.mxu1  ;;  %v4436_v42 = vor.u32 %v4435_v34, %v4431_v33  ;;  %v7612_v52 = vpop.f32.mrf.mxu0 }
 0x27a   : > { %5817 = vmatmul.msk.bf16.gmra.mxu3 %vm1506_vm0, %v5989_v26  ;;  %v4425_v26 = vrot.slane %v4423_v16, 5  ;;  %8317 = vst [vmem:[#allocation108_spill] sm:$0xff] %v7609_v29 }
 0x27b   : > { %v4437_v14 = vrot.slane %v4436_v42, 4 }
 0x27c   : > { %v4426_v63 = vor.u32 %v4425_v26, %v4422_v10 }
 0x27d   : > { %v4442_v16 = vsel %vm6310_vm13, %v4437_v14, %v4441_v41  ;;  %v5935_v41 = vld [vmem:[#allocation2 + $0xb4] sm:$0xff] }
 0x27e   : > { %v4427_v59 = vrot.slane %v4426_v63, 4 }
 0x27f   : > { %5857 = vmatmul.msk.bf16.gmra.mxu0 %vm1506_vm0, %v4521_v32  ;;  %v7622_v32 = vpop.f32.mrf.mxu3 }
 0x280   : > { %v7606_v5 = vpop.f32.mrf.mxu2  ;;  %v4432_v0 = vsel %vm6310_vm13, %v4427_v59, %v4431_v33  ;;  %v5934_v59 = vld [vmem:[#allocation2 + $0xa8] sm:$0xff] }
 0x281   : > { %v4504_v42 = vunpack.c.l.b16 %v4432_v0  ;;  %v7625_v49 = vpop.f32.mrf.mxu1  ;;  %v7627_v26 = vpop.f32.mrf.mxu0  ;;  %v6021_v0 = vld [vmem:[#allocation2 + $0x10] sm:$0xf] }
 0x282   : > { %8318 = vst [vmem:[#allocation109_spill] sm:$0xff] %v7625_v49 }
 0x285   : > { %5457 = vmatmul.msk.bf16.gmra.mxu2 %vm1506_vm0, %v5933_v11  ;;  %v4505_v11 = vunpack.c.l.b16 %v4442_v16  ;;  %v3360_v16 = vrot.slane %v6021_v0, 5 }
 0x287   : > { %5905 = vmatmul.msk.bf16.gmra.mxu1 %vm1506_vm0, %v7229_v39  ;;  %v4522_v10 = vpack.c.b16 %v4505_v11, %v4504_v42 }
 0x288   : > { %v7620_v47 = vpop.f32.mrf.mxu2 }
 0x289   : > { %v7632_v14 = vpop.f32.mrf.mxu1 }
 0x28a   : > { %5818 = vmatmul.msk.bf16.gmra.mxu3 %vm1506_vm0, %v5990_v22  ;;  %8319 = vst [vmem:[#allocation110_spill] sm:$0xff] %v7632_v14  ;;  %v3362_v22 = vrot.slane %v3360_v16, 4 }
 0x28f   : > { %5858 = vmatmul.msk.bf16.gmra.mxu0 %vm1506_vm0, %v4522_v10  ;;  %v6022_v10 = vld [vmem:[#allocation2 + $0x14] sm:$0x1] }
 0x290   : > { %v7629_v39 = vpop.f32.mrf.mxu2 }
 0x291   : > { %v7639_v34 = vpop.f32.mrf.mxu1 }
 0x292   : > { %8321 = vst [vmem:[#allocation112_spill] sm:$0xff] %v7639_v34 }
 0x295   : > { %5458 = vmatmul.msk.bf16.gmra.mxu2 %vm1506_vm0, %v5934_v59  ;;  %v3363_v59 = vrot.slane %v6022_v10, 5  ;;  %v3295_v10 = vld [vmem:[#allocation2 + $0x18] sm:$0xe] }
 0x297   : > { %5906 = vmatmul.msk.bf16.gmra.mxu1 %vm1506_vm0, %v7283_v12  ;;  %v3294_v12 = vld [vmem:[#allocation2 + $0xc] sm:$0xe]  ;;  %v3364_v34 = vsel %vm6296_vm8, %v3362_v22, %v3363_v59  ;;  %v6024_v59 = vld [vmem:[#allocation2 + $0x20] sm:$0x1] }
 0x298   : > { %v7637_v33 = vpop.f32.mrf.mxu2  ;;  %v5660_v14 = vrot.slane %v3294_v12, 9  ;;  %v3480_v49 = vunpack.c.l.b16 %v3364_v34  ;;  %v5661_v34 = vrot.slane %v3295_v10, 9 }
 0x299   : > { %8320 = vst [vmem:[#allocation111_spill] sm:$0xff] %v7637_v33  ;;  %v7648_v11 = vpop.f32.mrf.mxu1 }
 0x29a   : > { %8324 = vst [vmem:[#allocation115_spill] sm:$0xff] %v7648_v11  ;;  %v3361_v0 = vsel %vm6296_vm8, %v5660_v14, %v3360_v16  ;;  %v3370_v14 = vrot.slane %v6024_v59, 5  ;;  %v3296_v59 = vld [vmem:[#allocation2 + $0x24] sm:$0xe] }
 0x29b   : > { %v3479_v29 = vunpack.c.l.b16 %v3361_v0 }
 0x29d   : > { %v3511_v36 = vpack.c.b16 %v3480_v49, %v3479_v29 }
 0x2a0   : > { %v7641_v63 = vpop.f32.mrf.mxu2 }
 0x2a1   : > { %8322 = vst [vmem:[#allocation113_spill] sm:$0xff] %v7641_v63 }
 0x2a5   : > { %5459 = vmatmul.msk.bf16.gmra.mxu2 %vm1506_vm0, %v5935_v41 }
 0x2a7   : > { %5907 = vmatmul.msk.bf16.gmra.mxu1 %vm1506_vm0, %v7335_v55  ;;  %v7656_v55 = vpop.f32.mrf.mxu1 }
 0x2a8   : > { %v7646_v42 = vpop.f32.mrf.mxu2  ;;  %8326 = vst [vmem:[#allocation117_spill] sm:$0xff] %v7656_v55  ;;  %v6025_v55 = vld [vmem:[#allocation2 + $0x28] sm:$0xf] }
 0x2a9   : > { %8323 = vst [vmem:[#allocation114_spill] sm:$0xff] %v7646_v42  ;;  %v6023_v42 = vld [vmem:[#allocation2 + $0x1c] sm:$0xf]  ;;  %v3374_v11 = vrot.slane %v6025_v55, 5 }
 0x2aa   : > { %v3367_v63 = vrot.slane %v6023_v42, 5 }
 0x2ab   : > { %v3376_v10 = vrot.slane %v3374_v11, 4 }
 0x2ac   : > { %v3369_v22 = vrot.slane %v3367_v63, 4  ;;  %v3368_v29 = vsel %vm6296_vm8, %v5661_v34, %v3367_v63  ;;  %v5662_v34 = vrot.slane %v3296_v59, 9 }
 0x2ad   : > { %v3481_v42 = vunpack.c.l.b16 %v3368_v29 }
 0x2ae   : > { %v3371_v16 = vsel %vm6296_vm8, %v3369_v22, %v3370_v14  ;;  %v6026_v14 = vld [vmem:[#allocation2 + $0x2c] sm:$0x1]  ;;  %v3375_v55 = vsel %vm6296_vm8, %v5662_v34, %v3374_v11 }
 0x2af   : > { %v7665_v0 = vpop.f32.mrf.mxu1  ;;  %v3482_v49 = vunpack.c.l.b16 %v3371_v16  ;;  %v3377_v63 = vrot.slane %v6026_v14, 5  ;;  %v3297_v14 = vld [vmem:[#allocation2 + $0x30] sm:$0xe] }
 0x2b0   : > { %v7654_v41 = vpop.f32.mrf.mxu2  ;;  %8328 = vst [vmem:[#allocation119_spill] sm:$0xff] %v7665_v0 }
 0x2b1   : > { %8325 = vst [vmem:[#allocation116_spill] sm:$0xff] %v7654_v41  ;;  %v3378_v16 = vsel %vm6296_vm8, %v3376_v10, %v3377_v63  ;;  %v6028_v63 = vld [vmem:[#allocation2 + $0x38] sm:$0x1]  ;;  %v6035_v41 = vld [vmem:[#allocation2 + $0x64] sm:$0xf] }
 0x2b2   : > { %v3484_v29 = vunpack.c.l.b16 %v3378_v16  ;;  %v3384_v11 = vrot.slane %v6028_v63, 5  ;;  %v5663_v16 = vrot.slane %v3297_v14, 9  ;;  %v3298_v63 = vld [vmem:[#allocation2 + $0x3c] sm:$0xe] }
 0x2b5   : > { %5700 = vmatmul.msk.bf16.vlgmr.msra.gmra.mxu2 %vm1506_vm0, %v3511_v36 }
 0x2b7   : > { %5908 = vmatmul.msk.bf16.gmra.mxu1 %vm1506_vm0, %v7408_v44  ;;  %v3512_v44 = vpack.c.b16 %v3482_v49, %v3481_v42 }
 0x2b8   : > { %v7661_v12 = vpop.f32.mrf.mxu2 }
 0x2b9   : > { %8327 = vst [vmem:[#allocation118_spill] sm:$0xff] %v7661_v12  ;;  %v7672_v12 = vpop.f32.mrf.mxu1 }
 0x2ba   : > { %8330 = vst [vmem:[#allocation121_spill] sm:$0xff] %v7672_v12  ;;  %v6027_v12 = vld [vmem:[#allocation2 + $0x34] sm:$0xf] }
 0x2bb   : > { %v3381_v0 = vrot.slane %v6027_v12, 5 }
 0x2bd   : > { %v3383_v10 = vrot.slane %v3381_v0, 4  ;;  %v3382_v12 = vsel %vm6296_vm8, %v5663_v16, %v3381_v0  ;;  %v5664_v16 = vrot.slane %v3298_v63, 9 }
 0x2c0   : > { %v7669_v36 = vpop.f32.mrf.mxu2 }
 0x2c1   : > { %8329 = vst [vmem:[#allocation120_spill] sm:$0xff] %v7669_v36  ;;  %v7684_v42 = vpop.f32.mrf.mxu1 }
 0x2c2   : > { %8333 = vst [vmem:[#allocation124_spill] sm:$0xff] %v7684_v42  ;;  %v6029_v42 = vld [vmem:[#allocation2 + $0x40] sm:$0xf] }
 0x2c5   : > { %5701 = vmatmul.msk.bf16.gmra.mxu2 %vm1506_vm0, %v3512_v44  ;;  %v3483_v44 = vunpack.c.l.b16 %v3375_v55  ;;  %v3385_v55 = vsel %vm6296_vm8, %v3383_v10, %v3384_v11  ;;  %v6030_v11 = vld [vmem:[#allocation2 + $0x44] sm:$0x1] }
 0x2c6   : > { %v3391_v0 = vrot.slane %v6030_v11, 5 }
 0x2c7   : > { %5909 = vmatmul.msk.bf16.gmra.mxu1 %vm1506_vm0, %v7446_v23  ;;  %v3513_v23 = vpack.c.b16 %v3484_v29, %v3483_v44  ;;  %v3486_v29 = vunpack.c.l.b16 %v3385_v55 }
 0x2c8   : > { %v7676_v22 = vpop.f32.mrf.mxu2 }
 0x2c9   : > { %8331 = vst [vmem:[#allocation122_spill] sm:$0xff] %v7676_v22  ;;  %v7691_v34 = vpop.f32.mrf.mxu1 }
 0x2ca   : > { %8335 = vst [vmem:[#allocation126_spill] sm:$0xff] %v7691_v34  ;;  %v6031_v34 = vld [vmem:[#allocation2 + $0x4c] sm:$0xf] }
 0x2d0   : > { %v7682_v49 = vpop.f32.mrf.mxu2 }
 0x2d1   : > { %8332 = vst [vmem:[#allocation123_spill] sm:$0xff] %v7682_v49  ;;  %v7699_v49 = vpop.f32.mrf.mxu1 }
 0x2d5   : > { %5702 = vmatmul.msk.bf16.gmra.mxu2 %vm1506_vm0, %v3513_v23  ;;  %v3485_v23 = vunpack.c.l.b16 %v3382_v12 }
 0x2d7   : > { %5910 = vmatmul.msk.bf16.gmra.mxu1 %vm1506_vm0, %v7473_v53  ;;  %v3514_v53 = vpack.c.b16 %v3486_v29, %v3485_v23 }
 0x2d8   : > { %v7689_v59 = vpop.f32.mrf.mxu2 }
 0x2d9   : > { %8334 = vst [vmem:[#allocation125_spill] sm:$0xff] %v7689_v59  ;;  %v3388_v59 = vrot.slane %v6029_v42, 5  ;;  %v7710_v12 = vpop.f32.mrf.mxu1 }
 0x2db   : > { %v3390_v10 = vrot.slane %v3388_v59, 4  ;;  %v3389_v42 = vsel %vm6296_vm8, %v5664_v16, %v3388_v59  ;;  %v3299_v59 = vld [vmem:[#allocation2 + $0x48] sm:$0xe] }
 0x2dd   : > { %v3392_v55 = vsel %vm6296_vm8, %v3390_v10, %v3391_v0  ;;  %v6032_v0 = vld [vmem:[#allocation2 + $0x50] sm:$0x1] }
 0x2de   : > { %v3488_v29 = vunpack.c.l.b16 %v3392_v55  ;;  %v3398_v16 = vrot.slane %v6032_v0, 5  ;;  %v5665_v55 = vrot.slane %v3299_v59, 9  ;;  %v4881_v0 = vrot.slane %v7597_v61, 5 }
 0x2e0   : > { %v7697_v44 = vpop.f32.mrf.mxu2 }
 0x2e1   : > { %8336 = vst [vmem:[#allocation127_spill] sm:$0xff] %v7697_v44  ;;  %v7719_v11 = vpop.f32.mrf.mxu1 }
 0x2e5   : > { %5703 = vmatmul.msk.bf16.gmra.mxu2 %vm1506_vm0, %v3514_v53  ;;  %v3487_v53 = vunpack.c.l.b16 %v3389_v42 }
 0x2e7   : > { %5911 = vmatmul.msk.bf16.gmra.mxu1 %vm1506_vm0, %v7502_v15  ;;  %v3515_v15 = vpack.c.b16 %v3488_v29, %v3487_v53 }
 0x2e8   : > { %v7704_v14 = vpop.f32.mrf.mxu2 }
 0x2e9   : > { %8337 = vst [vmem:[#allocation128_spill] sm:$0xff] %v7704_v14  ;;  %v3395_v14 = vrot.slane %v6031_v34, 5 }
 0x2eb   : > { %v3397_v10 = vrot.slane %v3395_v14, 4  ;;  %v3396_v34 = vsel %vm6296_vm8, %v5665_v55, %v3395_v14  ;;  %v6034_v55 = vld [vmem:[#allocation2 + $0x5c] sm:$0x1] }
 0x2ed   : > { %v3399_v42 = vsel %vm6296_vm8, %v3397_v10, %v3398_v16  ;;  %v4731_v10 = vld [vmem:[#allocation2 + $0xc0] sm:$0xe]  ;;  %v3300_v16 = vld [vmem:[#allocation2 + $0x54] sm:$0xe] }
 0x2ee   : > { %v3490_v29 = vunpack.c.l.b16 %v3399_v42  ;;  %v3405_v42 = vrot.slane %v6034_v55, 5 }
 0x2f0   : > { %v7712_v23 = vpop.f32.mrf.mxu2 }
 0x2f1   : > { %8338 = vst [vmem:[#allocation129_spill] sm:$0xff] %v7712_v23  ;;  %v6033_v23 = vld [vmem:[#allocation2 + $0x58] sm:$0xf] }
 0x2f2   : > { %v3402_v44 = vrot.slane %v6033_v23, 5 }
 0x2f4   : > { %v3404_v14 = vrot.slane %v3402_v44, 4 }
 0x2f5   : > { %5704 = vmatmul.msk.bf16.gmra.mxu2 %vm1506_vm0, %v3515_v15  ;;  %v3489_v15 = vunpack.c.l.b16 %v3396_v34  ;;  %v5874_v34 = vrot.slane %v4731_v10, 9 }
 0x2f6   : > { %v3406_v23 = vsel %vm6296_vm8, %v3404_v14, %v3405_v42  ;;  %v3409_v14 = vrot.slane %v6035_v41, 5 }
 0x2f7   : > { %5912 = vmatmul.msk.bf16.gmra.mxu1 %vm1506_vm0, %v7529_v51  ;;  %v7727_v51 = vpop.f32.mrf.mxu1  ;;  %v4882_v61 = vsel %vm6296_vm8, %v5874_v34, %v4881_v0  ;;  %v3492_v55 = vunpack.c.l.b16 %v3406_v23  ;;  %v6036_v34 = vld [vmem:[#allocation2 + $0x68] sm:$0x1] }
 0x2f8   : > { %v7717_v63 = vpop.f32.mrf.mxu2 }
 0x2f9   : > { %8339 = vst [vmem:[#allocation130_spill] sm:$0xff] %v7717_v63  ;;  %v3516_v63 = vpack.c.b16 %v3490_v29, %v3489_v15  ;;  %v4884_v29 = vrot.slane %v7599_v7, 5  ;;  %v5666_v15 = vrot.slane %v3300_v16, 9  ;;  %v4930_v7 = vunpack.c.l.b16 %v4882_v61  ;;  %v6037_v61 = vld [vmem:[#allocation2 + $0x70] sm:$0xf] }
 0x300   : > { %v7725_v53 = vpop.f32.mrf.mxu2 }
 0x301   : > { %8340 = vst [vmem:[#allocation131_spill] sm:$0xff] %v7725_v53  ;;  %v4883_v53 = vrot.slane %v4881_v0, 4  ;;  %v3411_v0 = vrot.slane %v3409_v14, 4 }
 0x305   : > { %5705 = vmatmul.msk.bf16.gmra.mxu2 %vm1506_vm0, %v3516_v63  ;;  %v7738_v63 = vpop.f32.mrf.mxu1 }
 0x307   : > { %5913 = vmatmul.msk.bf16.gmra.mxu1 %vm1506_vm0, %v7559_v35  ;;  %v3403_v35 = vsel %vm6296_vm8, %v5666_v15, %v3402_v44 }
 0x308   : > { %v7733_v59 = vpop.f32.mrf.mxu2  ;;  %v3491_v22 = vunpack.c.l.b16 %v3403_v35 }
 0x309   : > { %8341 = vst [vmem:[#allocation132_spill] sm:$0xff] %v7733_v59  ;;  %v4885_v59 = vsel %vm6296_vm8, %v4883_v53, %v4884_v29  ;;  %v3301_v53 = vld [vmem:[#allocation2 + $0x60] sm:$0xe]  ;;  %v3412_v29 = vrot.slane %v6036_v34, 5 }
 0x30a   : > { %v4931_v16 = vunpack.c.l.b16 %v4885_v59  ;;  %v3517_v36 = vpack.c.b16 %v3492_v55, %v3491_v22  ;;  %v5667_v15 = vrot.slane %v3301_v53, 9  ;;  %v3416_v55 = vrot.slane %v6037_v61, 5  ;;  %v6038_v53 = vld [vmem:[#allocation2 + $0x74] sm:$0x1] }
 0x30b   : > { %v3413_v59 = vsel %vm6296_vm8, %v3411_v0, %v3412_v29  ;;  %v3419_v34 = vrot.slane %v6038_v53, 5  ;;  %v1806_v0 = vadd.f32 %v7475_v38, %v6739_v18  ;;  %v3303_v18 = vld [vmem:[#allocation2 + $0x78] sm:$0xe]  ;;  %v6039_v38 = vld [vmem:[#allocation2 + $0x7c] sm:$0xf] }
 0x30c   : > { %v4948_v42 = vpack.c.b16 %v4931_v16, %v4930_v7  ;;  %v3410_v41 = vsel %vm6296_vm8, %v5667_v15, %v3409_v14  ;;  %v3494_v22 = vunpack.c.l.b16 %v3413_v59  ;;  %v3418_v16 = vrot.slane %v3416_v55, 4 }
 0x30d   : > { %v7749_v33 = vpop.f32.mrf.mxu1  ;;  %v3493_v23 = vunpack.c.l.b16 %v3410_v41  ;;  %v2266_v59 = vadd.f32 %v6743_v28, %v1806_v0  ;;  %v6040_v0 = vld [vmem:[#allocation2 + $0x80] sm:$0x1] }
 0x30e   : > { %v3420_v14 = vsel %vm6296_vm8, %v3418_v16, %v3419_v34  ;;  %v5669_v16 = vrot.slane %v3303_v18, 9 }
 0x30f   : > { %v3518_v35 = vpack.c.b16 %v3494_v22, %v3493_v23  ;;  %v3496_v41 = vunpack.c.l.b16 %v3420_v14  ;;  %v2580_v53 = vadd.f32 %v6749_v31, %v2266_v59  ;;  %v7788_v59 = vpop.f32.mrf.mxu0 }
 0x310   : > { %v7746_v10 = vpop.f32.mrf.mxu2 }
 0x311   : > { %v3262_v28 = vadd.f32 %v7121_v58, %v2580_v53 }
 0x315   : > { %5706 = vmatmul.msk.bf16.gmra.mxu2 %vm1506_vm0, %v3517_v36 }
 0x317   : > { %5914 = vmatmul.msk.bf16.gmra.mxu1 %vm1506_vm0, %v4948_v42  ;;  %v3302_v42 = vld [vmem:[#allocation2 + $0x6c] sm:$0xe] }
 0x318   : > { %v7752_v44 = vpop.f32.mrf.mxu2  ;;  %v5668_v29 = vrot.slane %v3302_v42, 9  ;;  %v3423_v42 = vrot.slane %v6039_v38, 5 }
 0x31a   : > { %v3417_v15 = vsel %vm6296_vm8, %v5668_v29, %v3416_v55  ;;  %v3425_v34 = vrot.slane %v3423_v42, 4  ;;  %v3426_v29 = vrot.slane %v6040_v0, 5  ;;  %v3424_v31 = vsel %vm6296_vm8, %v5669_v16, %v3423_v42  ;;  %v6041_v42 = vld [vmem:[#allocation2 + $0x88] sm:$0xf] }
 0x31b   : > { %v3495_v23 = vunpack.c.l.b16 %v3417_v15  ;;  %v3430_v16 = vrot.slane %v6041_v42, 5  ;;  %v6043_v42 = vld [vmem:[#allocation2 + $0x94] sm:$0xf] }
 0x31c   : > { %v3427_v58 = vsel %vm6296_vm8, %v3425_v34, %v3426_v29  ;;  %v7819_v29 = vpop.f32.mrf.mxu0 }
 0x31d   : > { %v3519_v61 = vpack.c.b16 %v3496_v41, %v3495_v23  ;;  %v7794_v23 = vld [vmem:[%s8198_s4] ss:$0 sm:$0xff] }
 0x320   : > { %v7758_v36 = vpop.f32.mrf.mxu2 }
 0x325   : > { %5707 = vmatmul.msk.bf16.gmra.mxu2 %vm1506_vm0, %v3518_v35  ;;  %v1808_v35 = vadd.f32 %v7484_v30, %v6757_v43  ;;  %v1811_v43 = vadd.f32 %v7504_v19, %v6777_v37  ;;  %v3497_v37 = vunpack.c.l.b16 %v3424_v31  ;;  %v3498_v19 = vunpack.c.l.b16 %v3427_v58 }
 0x327   : > { %v2267_v55 = vadd.f32 %v6763_v13, %v1808_v35  ;;  %v7796_v35 = vpop.f32.mrf.mxu1 }
 0x328   : > { %v7761_v7 = vpop.f32.mrf.mxu2 }
 0x329   : > { %v2581_v13 = vadd.f32 %v6766_v9, %v2267_v55 }
 0x330   : > { %v7770_v22 = vpop.f32.mrf.mxu2 }
 0x331   : > { %8342 = vst [vmem:[#allocation133_spill] sm:$0xff] %v7770_v22  ;;  %v7778_v22 = vpop.f32.mrf.mxu3 }
 0x335   : > { %5708 = vmatmul.msk.bf16.gmra.mxu2 %vm1506_vm0, %v3519_v61  ;;  %v3263_v61 = vadd.f32 %v7143_v1, %v2581_v13 }
 0x338   : > { %v3608_v14 = vpop.f32.mrf.mxu2 }
 0x339   : > { %v3688_v15 = vadd.f32 %v3608_v14, %v3262_v28  ;;  %v3304_v28 = vld [vmem:[#allocation2 + $0x84] sm:$0xe]  ;;  %v7813_v34 = vpop.f32.mrf.mxu3 }
 0x33a   : > { %v5670_v14 = vrot.slane %v3304_v28, 9  ;;  %v8345_v28 = vld [vmem:[#allocation107_spill] sm:$0xff] }
 0x33b   : > { %v4003_v30 = vadd.f32 %v7537_v50, %v3688_v15  ;;  %v2268_v50 = vadd.f32 %v6779_v46, %v1811_v43  ;;  %v1813_v46 = vadd.f32 %v7515_v4, %v6797_v21  ;;  %v3432_v15 = vrot.slane %v3430_v16, 4  ;;  %v6042_v21 = vld [vmem:[#allocation2 + $0x8c] sm:$0x1]  ;;  %v7824_v43 = vpop.f32.mrf.mxu1 }
 0x33c   : > { %v3433_v4 = vrot.slane %v6042_v21, 5  ;;  %v3431_v58 = vsel %vm6296_vm8, %v5670_v14, %v3430_v16  ;;  %v3437_v16 = vrot.slane %v6043_v42, 5  ;;  %v6044_v21 = vld [vmem:[#allocation2 + $0x98] sm:$0x1] }
 0x33d   : > { %v4685_v41 = vadd.f32 %v7544_v62, %v4003_v30  ;;  %v3520_v62 = vpack.c.b16 %v3498_v19, %v3497_v37  ;;  %v2582_v55 = vadd.f32 %v6783_v54, %v2268_v50  ;;  %v1816_v37 = vadd.f32 %v7539_v57, %v6819_v2  ;;  %v7843_v57 = vpop.f32.mrf.mxu0 }
 0x33f   : > { %v5111_v9 = vadd.f32 %v7699_v49, %v4685_v41  ;;  %v3264_v31 = vadd.f32 %v7166_v8, %v2582_v55  ;;  %v3434_v41 = vsel %vm6296_vm8, %v3432_v15, %v3433_v4  ;;  %v3439_v15 = vrot.slane %v3437_v16, 4 }
 0x340   : > { %v3610_v53 = vpop.f32.mrf.mxu2  ;;  %v3440_v4 = vrot.slane %v6044_v21, 5  ;;  %v8355_v21 = vld [vmem:[#allocation8_spill] sm:$0xff] }
 0x341   : > { %v5147_v18 = vadd.f32 %v7794_v23, %v5111_v9  ;;  %v3689_v38 = vadd.f32 %v3610_v53, %v3263_v61  ;;  %v7838_v50 = vpop.f32.mrf.mxu3  ;;  %v3499_v9 = vunpack.c.l.b16 %v3431_v58  ;;  %v3500_v61 = vunpack.c.l.b16 %v3434_v41 }
 0x342   : > { %v2270_v53 = vadd.f32 %v6811_v3, %v1816_v37 }
 0x343   : > { %v5179_v49 = vmax.f32 %v5147_v18, 0.0  ;;  %v4004_v1 = vadd.f32 %v7550_v45, %v3689_v38  ;;  %v2269_v45 = vadd.f32 %v6794_v60, %v1813_v46  ;;  %v1818_v46 = vadd.f32 %v7547_v24, %v6843_v20  ;;  %v8347_v24 = vld [vmem:[#allocation47_spill] sm:$0xff] }
 0x345   : > { %5212 = vst.msk [vmem:[%s7807_s15] sm:$0xff] %vm5211_vm1, %v5179_v49  ;;  %v4686_v0 = vadd.f32 %v7567_v25, %v4004_v1  ;;  %5709 = vmatmul.msk.bf16.gmra.mxu2 %vm1506_vm0, %v3520_v62  ;;  %v2583_v8 = vadd.f32 %v6799_v40, %v2269_v45  ;;  %v7846_v62 = vpop.f32.mrf.mxu1  ;;  %v8343_v49 = vld [vmem:[#allocation104_spill] sm:$0xff]  ;;  %v8346_v45 = vld [vmem:[#allocation5_spill] sm:$0xff]  ;;  %v7862_v41 = vpop.f32.mrf.mxu0 }
 0x347   : > { %v5112_v54 = vadd.f32 %v7710_v12, %v4686_v0  ;;  %v3265_v2 = vadd.f32 %v7190_v6, %v2583_v8  ;;  %v3305_v6 = vld [vmem:[#allocation2 + $0x90] sm:$0xe]  ;;  %v8349_v8 = vld [vmem:[#allocation101_spill] sm:$0xff] }
 0x348   : > { %v3613_v30 = vpop.f32.mrf.mxu2  ;;  %v5671_v14 = vrot.slane %v3305_v6, 9 }
 0x349   : > { %v5148_v25 = vadd.f32 %v7794_v23, %v5112_v54  ;;  %v3690_v13 = vadd.f32 %v3613_v30, %v3264_v31  ;;  %v2271_v54 = vadd.f32 %v8346_v45, %v1818_v46  ;;  %v7859_v30 = vpop.f32.mrf.mxu3 }
 0x34a   : > { %v3438_v37 = vsel %vm6296_vm8, %v5671_v14, %v3437_v16  ;;  %v8352_v16 = vld [vmem:[#allocation51_spill] sm:$0xff] }
 0x34b   : > { %v5180_v60 = vmax.f32 %v5148_v25, 0.0  ;;  %v4005_v12 = vadd.f32 %v7572_v48, %v3690_v13 }
 0x34d   : > { %5213 = vst.msk [vmem:[%s7807_s15 + $0x8] sm:$0xff] %vm5211_vm1, %v5180_v60  ;;  %v4687_v19 = vadd.f32 %v7579_v56, %v4005_v12  ;;  %v3521_v56 = vpack.c.b16 %v3500_v61, %v3499_v9  ;;  %v3441_v60 = vsel %vm6296_vm8, %v3439_v15, %v3440_v4  ;;  %v8348_v12 = vld [vmem:[#allocation9_spill] sm:$0xff]  ;;  %v8350_v61 = vld [vmem:[#allocation6_spill] sm:$0xff]  ;;  %v7887_v45 = vpop.f32.mrf.mxu0 }
 0x34f   : > { %v5113_v18 = vadd.f32 %v7719_v11, %v4687_v19  ;;  %v8344_v11 = vld [vmem:[#allocation4_spill] sm:$0xff]  ;;  %v1821_v19 = vadd.f32 %v8349_v8, %v8348_v12 }
 0x350   : > { %v3615_v48 = vpop.f32.mrf.mxu2  ;;  %v2584_v55 = vadd.f32 %v8344_v11, %v2270_v53  ;;  %v2585_v53 = vadd.f32 %v8350_v61, %v2271_v54  ;;  %v8358_v61 = vld [vmem:[#allocation15_spill] sm:$0xff] }
 0x351   : > { %v5149_v40 = vadd.f32 %v7794_v23, %v5113_v18  ;;  %v3691_v38 = vadd.f32 %v3615_v48, %v3265_v2  ;;  %v7872_v18 = vpop.f32.mrf.mxu1  ;;  %v3501_v48 = vunpack.c.l.b16 %v3438_v37 }
 0x352   : > { %v3266_v31 = vadd.f32 %v8347_v24, %v2584_v55  ;;  %v3267_v46 = vadd.f32 %v8352_v16, %v2585_v53  ;;  %v6045_v55 = vld [vmem:[#allocation2 + $0xa0] sm:$0xf]  ;;  %v8359_v53 = vld [vmem:[#allocation106_spill] sm:$0xff] }
 0x353   : > { %v5181_v3 = vmax.f32 %v5149_v40, 0.0  ;;  %v4006_v1 = vadd.f32 %v8343_v49, %v3691_v38  ;;  %v3502_v40 = vunpack.c.l.b16 %v3441_v60  ;;  %v8351_v38 = vld [vmem:[#allocation7_spill] sm:$0xff]  ;;  %v3444_v6 = vrot.slane %v6045_v55, 5  ;;  %v8357_v60 = vld [vmem:[#allocation54_spill] sm:$0xff] }
 0x354   : > { %v8362_v55 = vld [vmem:[#allocation58_spill] sm:$0xff] }
 0x355   : > { %5214 = vst.msk [vmem:[%s7807_s15 + $0x10] sm:$0xff] %vm5211_vm1, %v5181_v3  ;;  %v4688_v0 = vadd.f32 %v8345_v28, %v4006_v1  ;;  %5710 = vmatmul.msk.bf16.gmra.mxu2 %vm1506_vm0, %v3521_v56  ;;  %v2272_v56 = vadd.f32 %v8351_v38, %v1821_v19  ;;  %v7881_v1 = vpop.f32.mrf.mxu3  ;;  %v3522_v11 = vpack.c.b16 %v3502_v40, %v3501_v48  ;;  %v8353_v28 = vld [vmem:[#allocation12_spill] sm:$0xff]  ;;  %v8360_v38 = vld [vmem:[#allocation11_spill] sm:$0xff]  ;;  %v7912_v16 = vpop.f32.mrf.mxu0 }
 0x357   : > { %v5114_v20 = vadd.f32 %v7727_v51, %v4688_v0  ;;  %v2586_v4 = vadd.f32 %v8355_v21, %v2272_v56  ;;  %v8363_v21 = vld [vmem:[#allocation18_spill] sm:$0xff] }
 0x358   : > { %v3618_v25 = vpop.f32.mrf.mxu2 }
 0x359   : > { %v5150_v13 = vadd.f32 %v7794_v23, %v5114_v20  ;;  %v3692_v58 = vadd.f32 %v3618_v25, %v3266_v31  ;;  %v7893_v20 = vpop.f32.mrf.mxu1  ;;  %v3446_v31 = vrot.slane %v3444_v6, 4  ;;  %v6046_v25 = vld [vmem:[#allocation2 + $0xa4] sm:$0x1]  ;;  %v3268_v12 = vadd.f32 %v8357_v60, %v2586_v4 }
 0x35a   : > { %v1828_v4 = vadd.f32 %v7606_v5, %v8363_v21  ;;  %v8365_v5 = vld [vmem:[#allocation16_spill] sm:$0xff] }
 0x35b   : > { %v5182_v51 = vmax.f32 %v5150_v13, 0.0  ;;  %v4007_v9 = vadd.f32 %v7604_v17, %v3692_v58  ;;  %v3447_v13 = vrot.slane %v6046_v25, 5  ;;  %v8356_v58 = vld [vmem:[#allocation10_spill] sm:$0xff] }
 0x35d   : > { %5215 = vst.msk [vmem:[%s7807_s15 + $0x18] sm:$0xff] %vm5211_vm1, %v5182_v51  ;;  %v4689_v2 = vadd.f32 %v7612_v52, %v4007_v9  ;;  %v8354_v52 = vld [vmem:[#allocation103_spill] sm:$0xff]  ;;  %v3448_v9 = vsel %vm6296_vm8, %v3446_v31, %v3447_v13  ;;  %v7907_v56 = vpop.f32.mrf.mxu3 }
 0x35e   : > { %v1823_v0 = vadd.f32 %v8354_v52, %v8353_v28 }
 0x35f   : > { %v5115_v42 = vadd.f32 %v7738_v63, %v4689_v2  ;;  %v3306_v63 = vld [vmem:[#allocation2 + $0x9c] sm:$0xe]  ;;  %v1826_v2 = vadd.f32 %v8359_v53, %v8358_v61 }
 0x360   : > { %v3620_v3 = vpop.f32.mrf.mxu2  ;;  %v5672_v24 = vrot.slane %v3306_v63, 9 }
 0x361   : > { %v5151_v17 = vadd.f32 %v7794_v23, %v5115_v42  ;;  %v3693_v49 = vadd.f32 %v3620_v3, %v3267_v46  ;;  %v3504_v3 = vunpack.c.l.b16 %v3448_v9 }
 0x363   : > { %v5183_v14 = vmax.f32 %v5151_v17, 0.0  ;;  %v4008_v15 = vadd.f32 %v7622_v32, %v3693_v49  ;;  %v2273_v32 = vadd.f32 %v8356_v58, %v1823_v0  ;;  %v8361_v17 = vld [vmem:[#allocation13_spill] sm:$0xff] }
 0x364   : > { %v2274_v49 = vadd.f32 %v8361_v17, %v1826_v2 }
 0x365   : > { %5216 = vst.msk [vmem:[%s7807_s15 + $0x20] sm:$0xff] %vm5211_vm1, %v5183_v14  ;;  %v4690_v54 = vadd.f32 %v7627_v26, %v4008_v15  ;;  %5711 = vmatmul.msk.bf16.gmra.mxu2 %vm1506_vm0, %v3522_v11  ;;  %v3445_v26 = vsel %vm6296_vm8, %v5672_v24, %v3444_v6  ;;  %v6047_v15 = vld [vmem:[#allocation2 + $0xac] sm:$0xf]  ;;  %v8364_v24 = vld [vmem:[#allocation14_spill] sm:$0xff]  ;;  %v7928_v13 = vpop.f32.mrf.mxu3 }
 0x366   : > { %v3503_v46 = vunpack.c.l.b16 %v3445_v26  ;;  %v2588_v31 = vadd.f32 %v8364_v24, %v2274_v49  ;;  %v8369_v49 = vld [vmem:[#allocation19_spill] sm:$0xff] }
 0x367   : > { %v5116_v37 = vadd.f32 %v7749_v33, %v4690_v54  ;;  %v2587_v33 = vadd.f32 %v8360_v38, %v2273_v32 }
 0x368   : > { %v3623_v8 = vpop.f32.mrf.mxu2  ;;  %v3523_v14 = vpack.c.b16 %v3504_v3, %v3503_v46 }
 0x369   : > { %v5152_v19 = vadd.f32 %v7794_v23, %v5116_v37  ;;  %v3694_v51 = vadd.f32 %v3623_v8, %v3268_v12  ;;  %v3269_v6 = vadd.f32 %v8362_v55, %v2587_v33  ;;  %v6048_v37 = vld [vmem:[#allocation2 + $0xb0] sm:$0x1]  ;;  %v2275_v12 = vadd.f32 %v8365_v5, %v1828_v4  ;;  %v8368_v33 = vld [vmem:[#allocation17_spill] sm:$0xff] }
 0x36a   : > { %v3454_v60 = vrot.slane %v6048_v37, 5  ;;  %v8366_v8 = vld [vmem:[#allocation62_spill] sm:$0xff] }
 0x36b   : > { %v5184_v48 = vmax.f32 %v5152_v19, 0.0  ;;  %v4009_v40 = vadd.f32 %v7778_v22, %v3694_v51  ;;  %v7917_v22 = vpop.f32.mrf.mxu1  ;;  %v3270_v19 = vadd.f32 %v8366_v8, %v2588_v31  ;;  %v7933_v51 = vpop.f32.mrf.mxu0  ;;  %v6049_v31 = vld [vmem:[#allocation2 + $0xb8] sm:$0xf]  ;;  %v8373_v37 = vld [vmem:[#allocation22_spill] sm:$0xff]  ;;  %v6050_v8 = vld [vmem:[#allocation2 + $0xbc] sm:$0x1] }
 0x36d   : > { %5217 = vst.msk [vmem:[%s7807_s15 + $0x28] sm:$0xff] %vm5211_vm1, %v5184_v48  ;;  %v4691_v42 = vadd.f32 %v7788_v59, %v4009_v40  ;;  %v3451_v59 = vrot.slane %v6047_v15, 5  ;;  %v8367_v48 = vld [vmem:[#allocation21_spill] sm:$0xff] }
 0x36e   : > { %v1831_v40 = vadd.f32 %v7620_v47, %v8367_v48 }
 0x36f   : > { %v5117_v11 = vadd.f32 %v7796_v35, %v4691_v42  ;;  %v3307_v35 = vld [vmem:[#allocation2 + $0xa8] sm:$0xe]  ;;  %v3453_v32 = vrot.slane %v3451_v59, 4  ;;  %v2589_v42 = vadd.f32 %v8368_v33, %v2275_v12 }
 0x370   : > { %v3625_v28 = vpop.f32.mrf.mxu2  ;;  %v5673_v58 = vrot.slane %v3307_v35, 9  ;;  %v3458_v35 = vrot.slane %v6049_v31, 5 }
 0x371   : > { %v5153_v52 = vadd.f32 %v7794_v23, %v5117_v11  ;;  %v3695_v0 = vadd.f32 %v3625_v28, %v3269_v6  ;;  %v3455_v2 = vsel %vm6296_vm8, %v3453_v32, %v3454_v60  ;;  %v2276_v11 = vadd.f32 %v8369_v49, %v1831_v40  ;;  %v8370_v6 = vld [vmem:[#allocation66_spill] sm:$0xff] }
 0x372   : > { %v3452_v53 = vsel %vm6296_vm8, %v5673_v58, %v3451_v59  ;;  %v3506_v17 = vunpack.c.l.b16 %v3455_v2  ;;  %v3271_v28 = vadd.f32 %v8370_v6, %v2589_v42  ;;  %v8371_v59 = vld [vmem:[#allocation23_spill] sm:$0xff]  ;;  %v5991_v58 = vld [vmem:[#allocation2 + $0xcc] sm:$0xff] }
 0x373   : > { %v5185_v63 = vmax.f32 %v5153_v52, 0.0  ;;  %v4010_v54 = vadd.f32 %v7813_v34, %v3695_v0  ;;  %v7936_v61 = vpop.f32.mrf.mxu1  ;;  %v3505_v3 = vunpack.c.l.b16 %v3452_v53  ;;  %v7952_v52 = vpop.f32.mrf.mxu3  ;;  %5819 = vmatmul.msk.bf16.gmra.mxu3 %vm1506_vm0, %v5991_v58 }
 0x375   : > { %5218 = vst.msk [vmem:[%s7807_s15 + $0x30] sm:$0xff] %vm5211_vm1, %v5185_v63  ;;  %v4692_v25 = vadd.f32 %v7819_v29, %v4010_v54  ;;  %5712 = vmatmul.msk.bf16.gmra.mxu2 %vm1506_vm0, %v3523_v14  ;;  %v7955_v14 = vpop.f32.mrf.mxu0  ;;  %v3524_v15 = vpack.c.b16 %v3506_v17, %v3505_v3  ;;  %v8372_v63 = vld [vmem:[#allocation20_spill] sm:$0xff]  ;;  %v3308_v54 = vld [vmem:[#allocation2 + $0xb4] sm:$0xe] }
 0x376   : > { %v5674_v32 = vrot.slane %v3308_v54, 9 }
 0x377   : > { %v5118_v34 = vadd.f32 %v7824_v43, %v4692_v25 }
 0x378   : > { %v3628_v26 = vpop.f32.mrf.mxu2 }
 0x379   : > { %v5154_v29 = vadd.f32 %v7794_v23, %v5118_v34  ;;  %v3696_v9 = vadd.f32 %v3628_v26, %v3270_v19  ;;  %v3460_v34 = vrot.slane %v3458_v35, 4  ;;  %v3461_v19 = vrot.slane %v6050_v8, 5  ;;  %v8375_v26 = vld [vmem:[#allocation26_spill] sm:$0xff] }
 0x37b   : > { %v5186_v43 = vmax.f32 %v5154_v29, 0.0  ;;  %v4011_v38 = vadd.f32 %v7838_v50, %v3696_v9  ;;  %v7961_v24 = vpop.f32.mrf.mxu1  ;;  %v8376_v29 = vld [vmem:[#allocation111_spill] sm:$0xff]  ;;  %v7974_v2 = vpop.f32.mrf.mxu3  ;;  %v3462_v42 = vsel %vm6296_vm8, %v3460_v34, %v3461_v19 }
 0x37d   : > { %5219 = vst.msk [vmem:[%s7807_s15 + $0x38] sm:$0xff] %vm5211_vm1, %v5186_v43  ;;  %v4693_v46 = vadd.f32 %v7843_v57, %v4011_v38  ;;  %v1833_v57 = vadd.f32 %v7629_v39, %v8371_v59  ;;  %v8377_v43 = vld [vmem:[#allocation24_spill] sm:$0xff]  ;;  %v7980_v33 = vpop.f32.mrf.mxu0  ;;  %v8379_v59 = vld [vmem:[#allocation75_spill] sm:$0xff] }
 0x37f   : > { %v5119_v55 = vadd.f32 %v7846_v62, %v4693_v46  ;;  %v2590_v62 = vadd.f32 %v8372_v63, %v2276_v11  ;;  %v2277_v39 = vadd.f32 %v8373_v37, %v1833_v57  ;;  %v8378_v46 = vld [vmem:[#allocation25_spill] sm:$0xff] }
 0x380   : > { %v3630_v47 = vpop.f32.mrf.mxu2  ;;  %v4080_v11 = vld [vmem:[#allocation2 + $0xcc] sm:$0xf] }
 0x381   : > { %v5155_v50 = vadd.f32 %v7794_v23, %v5119_v55  ;;  %v3697_v0 = vadd.f32 %v3630_v47, %v3271_v28  ;;  %v2591_v38 = vadd.f32 %v8377_v43, %v2277_v39  ;;  %v4081_v55 = vld [vmem:[#allocation2 + $0xd0] sm:$0xf]  ;;  %v4082_v28 = vld [vmem:[#allocation2 + $0xd4] sm:$0x1]  ;;  %v4447_v47 = vshll.u32 %v4080_v11, 16  ;;  %v8382_v39 = vld [vmem:[#allocation27_spill] sm:$0xff] }
 0x382   : > { %v4732_v43 = vld [vmem:[#allocation2 + $0xcc] sm:$0xe] }
 0x383   : > { %v5187_v21 = vmax.f32 %v5155_v50, 0.0  ;;  %v4012_v4 = vadd.f32 %v7859_v30, %v3697_v0  ;;  %v8374_v30 = vld [vmem:[#allocation71_spill] sm:$0xff]  ;;  %v7988_v6 = vpop.f32.mrf.mxu1  ;;  %v4453_v50 = vshll.u32 %v4081_v55, 16  ;;  %v4457_v0 = vshrl.u32 %v4081_v55, 16  ;;  %v7997_v19 = vpop.f32.mrf.mxu3 }
 0x384   : > { %v3272_v5 = vadd.f32 %v8374_v30, %v2590_v62  ;;  %v3273_v57 = vadd.f32 %v8379_v59, %v2591_v38  ;;  %v4449_v54 = vrot.slane %v4447_v47, 5  ;;  %v4888_v38 = vrot.slane %v4081_v55, 5 }
 0x385   : > { %5220 = vst.msk [vmem:[%s7807_s15 + $0x40] sm:$0xff] %vm5211_vm1, %v5187_v21  ;;  %v4694_v25 = vadd.f32 %v7862_v41, %v4012_v4  ;;  %5713 = vmatmul.msk.bf16.gmra.mxu2 %vm1506_vm0, %v3524_v15  ;;  %v1836_v41 = vadd.f32 %v8376_v29, %v8375_v26  ;;  %v3508_v21 = vunpack.c.l.b16 %v3462_v42  ;;  %v4463_v4 = vshll.u32 %v4082_v28, 16  ;;  %v3309_v26 = vld [vmem:[#allocation2 + $0xc0] sm:$0xe]  ;;  %v6051_v29 = vld [vmem:[#allocation2 + $0xc4] sm:$0xf] }
 0x386   : > { %v4459_v31 = vrot.slane %v4457_v0, 4  ;;  %v4891_v42 = vrot.slane %v4082_v28, 5  ;;  %v4890_v0 = vrot.slane %v4888_v38, 4  ;;  %v5675_v28 = vrot.slane %v3309_v26, 9 }
 0x387   : > { %v5120_v60 = vadd.f32 %v7872_v18, %v4694_v25  ;;  %v3459_v18 = vsel %vm6296_vm8, %v5674_v32, %v3458_v35  ;;  %v2278_v3 = vadd.f32 %v8378_v46, %v1836_v41  ;;  %v8380_v35 = vld [vmem:[#allocation29_spill] sm:$0xff]  ;;  %v3465_v41 = vrot.slane %v6051_v29, 5  ;;  %v8384_v46 = vld [vmem:[#allocation79_spill] sm:$0xff] }
 0x388   : > { %v3633_v12 = vpop.f32.mrf.mxu2  ;;  %v3507_v49 = vunpack.c.l.b16 %v3459_v18  ;;  %v8381_v25 = vld [vmem:[#allocation113_spill] sm:$0xff]  ;;  %v8383_v18 = vld [vmem:[#allocation28_spill] sm:$0xff]  ;;  %v8390_v29 = vld [vmem:[#allocation83_spill] sm:$0xff] }
 0x389   : > { %v5156_v9 = vadd.f32 %v7794_v23, %v5120_v60  ;;  %v3698_v53 = vadd.f32 %v3633_v12, %v3272_v5  ;;  %v1838_v58 = vadd.f32 %v8381_v25, %v8380_v35  ;;  %v2592_v60 = vadd.f32 %v8382_v39, %v2278_v3  ;;  %v8388_v39 = vld [vmem:[#allocation30_spill] sm:$0xff] }
 0x38a   : > { %v4465_v5 = vrot.slane %v4463_v4, 5  ;;  %v3525_v8 = vpack.c.b16 %v3508_v21, %v3507_v49  ;;  %v3467_v59 = vrot.slane %v3465_v41, 4 }
 0x38b   : > { %v5188_v48 = vmax.f32 %v5156_v9, 0.0  ;;  %v4013_v40 = vadd.f32 %v7881_v1, %v3698_v53  ;;  %v4444_v1 = vshrl.u32 %v4080_v11, 16  ;;  %v3274_v3 = vadd.f32 %v8384_v46, %v2592_v60  ;;  %v3963_v26 = vpop.f32.mrf.mxu3 }
 0x38d   : > { %5221 = vst.msk [vmem:[%s7807_s15 + $0x48] sm:$0xff] %vm5211_vm1, %v5188_v48  ;;  %v4695_v17 = vadd.f32 %v7887_v45, %v4013_v40  ;;  %v4446_v62 = vrot.slane %v4444_v1, 4  ;;  %v4455_v45 = vrot.slane %v4453_v50, 5  ;;  %v2279_v48 = vadd.f32 %v8383_v18, %v1838_v58 }
 0x38e   : > { %v5875_v1 = vrot.slane %v4732_v43, 9  ;;  %v8391_v43 = vld [vmem:[#allocation34_spill] sm:$0xff] }
 0x38f   : > { %v5121_v15 = vadd.f32 %v7893_v20, %v4695_v17  ;;  %v4450_v30 = vor.u32 %v4449_v54, %v4446_v62  ;;  %v4460_v20 = vor.u32 %v4459_v31, %v4455_v45  ;;  %v8387_v31 = vld [vmem:[#allocation114_spill] sm:$0xff]  ;;  %v2593_v60 = vadd.f32 %v8388_v39, %v2279_v48 }
 0x390   : > { %v3635_v63 = vpop.f32.mrf.mxu2  ;;  %v4889_v4 = vsel %vm6296_vm8, %v5875_v1, %v4888_v38  ;;  %v8392_v38 = vld [vmem:[#allocation116_spill] sm:$0xff]  ;;  %v8394_v1 = vld [vmem:[#allocation35_spill] sm:$0xff] }
 0x391   : > { %v5157_v32 = vadd.f32 %v7794_v23, %v5121_v15  ;;  %v3699_v37 = vadd.f32 %v3635_v63, %v3273_v57  ;;  %v4451_v9 = vrot.slane %v4450_v30, 4  ;;  %v4461_v53 = vrot.slane %v4460_v20, 4  ;;  %v8012_v15 = vpop.f32.mrf.mxu1  ;;  %v6052_v57 = vld [vmem:[#allocation2 + $0xc8] sm:$0x1] }
 0x392   : > { %v3468_v21 = vrot.slane %v6052_v57, 5  ;;  %v4932_v25 = vunpack.c.l.b16 %v4889_v4  ;;  %v3466_v30 = vsel %vm6296_vm8, %v5675_v28, %v3465_v41  ;;  %v8397_v4 = vld [vmem:[#allocation118_spill] sm:$0xff] }
 0x393   : > { %v5189_v12 = vmax.f32 %v5157_v32, 0.0  ;;  %v4014_v34 = vadd.f32 %v7907_v56, %v3699_v37  ;;  %v8004_v56 = vpop.f32.mrf.mxu0  ;;  %v4456_v49 = vsel %vm6310_vm13, %v4451_v9, %v4455_v45  ;;  %v4466_v11 = vsel %vm6310_vm13, %v4461_v53, %v4465_v5  ;;  %v8386_v45 = vld [vmem:[#allocation31_spill] sm:$0xff] }
 0x394   : > { %v4506_v50 = vunpack.c.l.b16 %v4456_v49  ;;  %v1841_v35 = vadd.f32 %v8387_v31, %v8386_v45  ;;  %v3469_v20 = vsel %vm6296_vm8, %v3467_v59, %v3468_v21  ;;  %v3275_v9 = vadd.f32 %v8390_v29, %v2593_v60  ;;  %v8393_v49 = vld [vmem:[#allocation33_spill] sm:$0xff]  ;;  %v8396_v21 = vld [vmem:[#allocation38_spill] sm:$0xff] }
 0x395   : > { %5222 = vst.msk [vmem:[%s7807_s15 + $0x50] sm:$0xff] %vm5211_vm1, %v5189_v12  ;;  %v4696_v40 = vadd.f32 %v7912_v16, %v4014_v34  ;;  %5714 = vmatmul.msk.bf16.gmra.mxu2 %vm1506_vm0, %v3525_v8  ;;  %v4507_v16 = vunpack.c.l.b16 %v4466_v11  ;;  %v8389_v34 = vld [vmem:[#allocation32_spill] sm:$0xff]  ;;  %v3509_v53 = vunpack.c.l.b16 %v3466_v30  ;;  %v3510_v41 = vunpack.c.l.b16 %v3469_v20  ;;  %v8399_v31 = vld [vmem:[#allocation37_spill] sm:$0xff] }
 0x396   : > { %v2280_v8 = vadd.f32 %v8389_v34, %v1841_v35  ;;  %v8402_v20 = vld [vmem:[#allocation120_spill] sm:$0xff] }
 0x397   : > { %v5122_v47 = vadd.f32 %v7917_v22, %v4696_v40  ;;  %v4523_v54 = vpack.c.b16 %v4507_v16, %v4506_v50  ;;  %v4892_v22 = vsel %vm6296_vm8, %v4890_v0, %v4891_v42  ;;  %v3526_v17 = vpack.c.b16 %v3510_v41, %v3509_v53  ;;  %v8395_v16 = vld [vmem:[#allocation88_spill] sm:$0xff] }
 0x398   : > { %v3638_v55 = vpop.f32.mrf.mxu2  ;;  %v4933_v58 = vunpack.c.l.b16 %v4892_v22  ;;  %v2594_v11 = vadd.f32 %v8393_v49, %v2280_v8  ;;  %v8403_v8 = vld [vmem:[#allocation39_spill] sm:$0xff]  ;;  %v8408_v49 = vld [vmem:[#allocation42_spill] sm:$0xff] }
 0x399   : > { %v5158_v63 = vadd.f32 %v7794_v23, %v5122_v47  ;;  %v3700_v62 = vadd.f32 %v3638_v55, %v3274_v3  ;;  %5859 = vmatmul.msk.bf16.gmra.mxu0 %vm1506_vm0, %v4523_v54  ;;  %v5071_v42 = vpop.f32.mrf.mxu1  ;;  %v3965_v55 = vpop.f32.mrf.mxu3  ;;  %v8398_v54 = vld [vmem:[#allocation36_spill] sm:$0xff] }
 0x39a   : > { %v4949_v5 = vpack.c.b16 %v4933_v58, %v4932_v25  ;;  %v3276_v0 = vadd.f32 %v8395_v16, %v2594_v11  ;;  %v8400_v58 = vld [vmem:[#allocation91_spill] sm:$0xff]  ;;  %v8410_v16 = vld [vmem:[#allocation97_spill] sm:$0xff] }
 0x39b   : > { %v5190_v32 = vmax.f32 %v5158_v63, 0.0  ;;  %v4015_v37 = vadd.f32 %v7928_v13, %v3700_v62  ;;  %v4645_v18 = vpop.f32.mrf.mxu0  ;;  %v1846_v63 = vadd.f32 %v8397_v4, %v8396_v21  ;;  %v8411_v4 = vld [vmem:[#allocation45_spill] sm:$0xff] }
 0x39c   : > { %5915 = vmatmul.msk.bf16.gmra.mxu1 %vm1506_vm0, %v4949_v5 }
 0x39d   : > { %5223 = vst.msk [vmem:[%s7807_s15 + $0x58] sm:$0xff] %vm5211_vm1, %v5190_v32  ;;  %v4697_v12 = vadd.f32 %v7933_v51, %v4015_v37  ;;  %v1843_v51 = vadd.f32 %v8392_v38, %v8391_v43  ;;  %v2282_v35 = vadd.f32 %v8399_v31, %v1846_v63 }
 0x39f   : > { %v5123_v13 = vadd.f32 %v7936_v61, %v4697_v12  ;;  %v2281_v47 = vadd.f32 %v8394_v1, %v1843_v51  ;;  %v8407_v51 = vld [vmem:[#allocation122_spill] sm:$0xff] }
 0x3a0   : > { %v3640_v27 = vpop.f32.mrf.mxu2 }
 0x3a1   : > { %v5159_v48 = vadd.f32 %v7794_v23, %v5123_v13  ;;  %v3701_v40 = vadd.f32 %v3640_v27, %v3275_v9  ;;  %v2595_v22 = vadd.f32 %v8398_v54, %v2281_v47  ;;  %v5073_v45 = vpop.f32.mrf.mxu1  ;;  %v3968_v30 = vpop.f32.mrf.mxu3  ;;  %v2596_v13 = vadd.f32 %v8403_v8, %v2282_v35  ;;  %v8404_v9 = vld [vmem:[#allocation41_spill] sm:$0xff]  ;;  %v8405_v27 = vld [vmem:[#allocation94_spill] sm:$0xff] }
 0x3a2   : > { %v8413_v54 = vld [vmem:[#allocation46_spill] sm:$0xff] }
 0x3a3   : > { %v5191_v46 = vmax.f32 %v5159_v48, 0.0  ;;  %v4016_v3 = vadd.f32 %v7952_v52, %v3701_v40  ;;  %v4647_v57 = vpop.f32.mrf.mxu0  ;;  %v3277_v32 = vadd.f32 %v8400_v58, %v2595_v22  ;;  %v3278_v48 = vadd.f32 %v8405_v27, %v2596_v13  ;;  %v8418_v8 = vld [vmem:[#allocation50_spill] sm:$0xff] }
 0x3a5   : > { %5224 = vst.msk [vmem:[%s7807_s15 + $0x60] sm:$0xff] %vm5211_vm1, %v5191_v46  ;;  %v4698_v61 = vadd.f32 %v7955_v14, %v4016_v3  ;;  %5715 = vmatmul.msk.bf16.gmra.mxu2 %vm1506_vm0, %v3526_v17 }
 0x3a7   : > { %v5124_v50 = vadd.f32 %v7961_v24, %v4698_v61 }
 0x3a8   : > { %v3643_v28 = vpop.f32.mrf.mxu2 }
 0x3a9   : > { %v5160_v52 = vadd.f32 %v7794_v23, %v5124_v50  ;;  %v3702_v59 = vadd.f32 %v3643_v28, %v3276_v0  ;;  %v5076_v29 = vpop.f32.mrf.mxu1 }
 0x3ab   : > { %v5192_v62 = vmax.f32 %v5160_v52, 0.0  ;;  %v4017_v14 = vadd.f32 %v7974_v2, %v3702_v59  ;;  %v8401_v2 = vld [vmem:[#allocation40_spill] sm:$0xff] }
 0x3ac   : > { %v1848_v5 = vadd.f32 %v8402_v20, %v8401_v2  ;;  %v8416_v20 = vld [vmem:[#allocation49_spill] sm:$0xff] }
 0x3ad   : > { %5225 = vst.msk [vmem:[%s7807_s15 + $0x68] sm:$0xff] %vm5211_vm1, %v5192_v62  ;;  %v4699_v24 = vadd.f32 %v7980_v33, %v4017_v14  ;;  %v4650_v33 = vpop.f32.mrf.mxu0 }
 0x3ae   : > { %v2283_v53 = vadd.f32 %v8404_v9, %v1848_v5 }
 0x3af   : > { %v5125_v25 = vadd.f32 %v7988_v6, %v4699_v24 }
 0x3b0   : > { %v3645_v37 = vpop.f32.mrf.mxu2  ;;  %v2597_v11 = vadd.f32 %v8408_v49, %v2283_v53  ;;  %v8420_v53 = vld [vmem:[#allocation100_spill] sm:$0xff] }
 0x3b1   : > { %v5161_v39 = vadd.f32 %v7794_v23, %v5125_v25  ;;  %v3703_v60 = vadd.f32 %v3645_v37, %v3277_v32  ;;  %v5078_v28 = vpop.f32.mrf.mxu1  ;;  %v8415_v25 = vld [vmem:[#allocation99_spill] sm:$0xff] }
 0x3b2   : > { %v3279_v0 = vadd.f32 %v8410_v16, %v2597_v11  ;;  %v8424_v11 = vld [vmem:[#allocation57_spill] sm:$0xff] }
 0x3b3   : > { %v5193_v12 = vmax.f32 %v5161_v39, 0.0  ;;  %v4018_v34 = vadd.f32 %v7997_v19, %v3703_v60  ;;  %v8406_v19 = vld [vmem:[#allocation43_spill] sm:$0xff] }
 0x3b4   : > { %v1851_v46 = vadd.f32 %v8407_v51, %v8406_v19  ;;  %v8421_v19 = vld [vmem:[#allocation53_spill] sm:$0xff]  ;;  %v8422_v51 = vld [vmem:[#allocation127_spill] sm:$0xff] }
 0x3b5   : > { %5226 = vst.msk [vmem:[%s7807_s15 + $0x70] sm:$0xff] %vm5211_vm1, %v5193_v12  ;;  %v4700_v6 = vadd.f32 %v8004_v56, %v4018_v34  ;;  %v3970_v56 = vpop.f32.mrf.mxu3  ;;  %v4652_v1 = vpop.f32.mrf.mxu0 }
 0x3b7   : > { %v5126_v41 = vadd.f32 %v8012_v15, %v4700_v6  ;;  %v8409_v15 = vld [vmem:[#allocation44_spill] sm:$0xff] }
 0x3b8   : > { %v3648_v40 = vpop.f32.mrf.mxu2  ;;  %v2284_v47 = vadd.f32 %v8409_v15, %v1851_v46 }
 0x3b9   : > { %v5162_v43 = vadd.f32 %v7794_v23, %v5126_v41  ;;  %v3704_v38 = vadd.f32 %v3648_v40, %v3278_v48  ;;  %v5081_v2 = vpop.f32.mrf.mxu1 }
 0x3ba   : > { %v2598_v22 = vadd.f32 %v8413_v54, %v2284_v47  ;;  %v8425_v47 = vld [vmem:[#allocation102_spill] sm:$0xff] }
 0x3bb   : > { %v5194_v3 = vmax.f32 %v5162_v43, 0.0  ;;  %v4019_v17 = vadd.f32 %v3963_v26, %v3704_v38  ;;  %v8412_v26 = vld [vmem:[#allocation123_spill] sm:$0xff] }
 0x3bc   : > { %v1853_v63 = vadd.f32 %v8412_v26, %v8411_v4  ;;  %v3280_v58 = vadd.f32 %v8415_v25, %v2598_v22  ;;  %v8427_v4 = vld [vmem:[#allocation128_spill] sm:$0xff]  ;;  %v8429_v22 = vld [vmem:[#allocation61_spill] sm:$0xff] }
 0x3bd   : > { %5227 = vst.msk [vmem:[%s7807_s15 + $0x78] sm:$0xff] %vm5211_vm1, %v5194_v3  ;;  %v4701_v61 = vadd.f32 %v4645_v18, %v4019_v17  ;;  %v3973_v24 = vpop.f32.mrf.mxu3  ;;  %v4655_v32 = vpop.f32.mrf.mxu0  ;;  %v8423_v17 = vld [vmem:[#allocation55_spill] sm:$0xff] }
 0x3bf   : > { %v5127_v50 = vadd.f32 %v5071_v42, %v4701_v61  ;;  %v8414_v42 = vld [vmem:[#allocation48_spill] sm:$0xff] }
 0x3c0   : > { %v3650_v52 = vpop.f32.mrf.mxu2  ;;  %v2285_v31 = vadd.f32 %v8414_v42, %v1853_v63 }
 0x3c1   : > { %v5163_v59 = vadd.f32 %v7794_v23, %v5127_v50  ;;  %v3705_v21 = vadd.f32 %v3650_v52, %v3279_v0 }
 0x3c2   : > { %v2599_v13 = vadd.f32 %v8418_v8, %v2285_v31  ;;  %v8430_v31 = vld [vmem:[#allocation105_spill] sm:$0xff] }
 0x3c3   : > { %v5195_v62 = vmax.f32 %v5163_v59, 0.0  ;;  %v4020_v14 = vadd.f32 %v3965_v55, %v3705_v21  ;;  %v8417_v55 = vld [vmem:[#allocation125_spill] sm:$0xff]  ;;  %v8426_v21 = vld [vmem:[#allocation56_spill] sm:$0xff] }
 0x3c4   : > { %v1856_v5 = vadd.f32 %v8417_v55, %v8416_v20  ;;  %v3281_v41 = vadd.f32 %v8420_v53, %v2599_v13 }
 0x3c5   : > { %5228 = vst.msk [vmem:[%s7807_s15 + $0x80] sm:$0xff] %vm5211_vm1, %v5195_v62  ;;  %v4702_v18 = vadd.f32 %v4647_v57, %v4020_v14  ;;  %v3975_v27 = vpop.f32.mrf.mxu3  ;;  %v4657_v38 = vpop.f32.mrf.mxu0  ;;  %v8428_v62 = vld [vmem:[#allocation59_spill] sm:$0xff] }
 0x3c7   : > { %v5128_v35 = vadd.f32 %v5073_v45, %v4702_v18  ;;  %v8419_v45 = vld [vmem:[#allocation52_spill] sm:$0xff] }
 0x3c8   : > { %v3653_v37 = vpop.f32.mrf.mxu2  ;;  %v2286_v6 = vadd.f32 %v8419_v45, %v1856_v5  ;;  %v8433_v5 = vld [vmem:[#allocation64_spill] sm:$0xff] }
 0x3c9   : > { %v5164_v39 = vadd.f32 %v7794_v23, %v5128_v35  ;;  %v3706_v60 = vadd.f32 %v3653_v37, %v3280_v58  ;;  %v8435_v45 = vld [vmem:[#allocation108_spill] sm:$0xff] }
 0x3ca   : > { %v2600_v49 = vadd.f32 %v8423_v17, %v2286_v6  ;;  %v8439_v17 = vld [vmem:[#allocation69_spill] sm:$0xff] }
 0x3cb   : > { %v5196_v12 = vmax.f32 %v5164_v39, 0.0  ;;  %v4021_v34 = vadd.f32 %v3968_v30, %v3706_v60  ;;  %v1858_v30 = vadd.f32 %v8422_v51, %v8421_v19  ;;  %v8431_v39 = vld [vmem:[#allocation60_spill] sm:$0xff]  ;;  %v8432_v60 = vld [vmem:[#allocation129_spill] sm:$0xff] }
 0x3cc   : > { %v3282_v50 = vadd.f32 %v8425_v47, %v2600_v49 }
 0x3cd   : > { %5229 = vst.msk [vmem:[%s7807_s15 + $0x88] sm:$0xff] %vm5211_vm1, %v5196_v12  ;;  %v4703_v57 = vadd.f32 %v4650_v33, %v4021_v34  ;;  %v5083_v33 = vpop.f32.mrf.mxu1  ;;  %v2287_v61 = vadd.f32 %v8424_v11, %v1858_v30  ;;  %v3978_v59 = vpop.f32.mrf.mxu3  ;;  %v8438_v30 = vld [vmem:[#allocation68_spill] sm:$0xff] }
 0x3ce   : > { %v4660_v54 = vpop.f32.mrf.mxu0 }
 0x3cf   : > { %v5129_v9 = vadd.f32 %v5076_v29, %v4703_v57  ;;  %v2601_v14 = vadd.f32 %v8428_v62, %v2287_v61  ;;  %v8444_v62 = vld [vmem:[#allocation74_spill] sm:$0xff] }
 0x3d0   : > { %v3655_v48 = vpop.f32.mrf.mxu2 }
 0x3d1   : > { %v5165_v40 = vadd.f32 %v7794_v23, %v5129_v9  ;;  %v3707_v43 = vadd.f32 %v3655_v48, %v3281_v41  ;;  %v3283_v35 = vadd.f32 %v8430_v31, %v2601_v14 }
 0x3d3   : > { %v5197_v46 = vmax.f32 %v5165_v40, 0.0  ;;  %v4022_v3 = vadd.f32 %v3970_v56, %v3707_v43  ;;  %v1861_v56 = vadd.f32 %v8427_v4, %v8426_v21  ;;  %v8436_v40 = vld [vmem:[#allocation63_spill] sm:$0xff] }
 0x3d5   : > { %5230 = vst.msk [vmem:[%s7807_s15 + $0x90] sm:$0xff] %vm5211_vm1, %v5197_v46  ;;  %v4704_v29 = vadd.f32 %v4652_v1, %v4022_v3  ;;  %v2288_v18 = vadd.f32 %v8429_v22, %v1861_v56  ;;  %v3980_v34 = vpop.f32.mrf.mxu3  ;;  %v8443_v56 = vld [vmem:[#allocation72_spill] sm:$0xff] }
 0x3d6   : > { %v4662_v8 = vpop.f32.mrf.mxu0 }
 0x3d7   : > { %v5130_v15 = vadd.f32 %v5078_v28, %v4704_v29  ;;  %v5086_v28 = vpop.f32.mrf.mxu1  ;;  %v2602_v12 = vadd.f32 %v8433_v5, %v2288_v18  ;;  %v8440_v29 = vld [vmem:[#allocation109_spill] sm:$0xff] }
 0x3d8   : > { %v3658_v16 = vpop.f32.mrf.mxu2 }
 0x3d9   : > { %v5166_v0 = vadd.f32 %v7794_v23, %v5130_v15  ;;  %v3708_v52 = vadd.f32 %v3658_v16, %v3282_v50  ;;  %v3284_v6 = vadd.f32 %v8435_v45, %v2602_v12  ;;  %v8449_v12 = vld [vmem:[#allocation78_spill] sm:$0xff] }
 0x3db   : > { %v5198_v26 = vmax.f32 %v5166_v0, 0.0  ;;  %v4023_v63 = vadd.f32 %v3973_v24, %v3708_v52  ;;  %v1863_v24 = vadd.f32 %v8432_v60, %v8431_v39  ;;  %v8441_v0 = vld [vmem:[#allocation67_spill] sm:$0xff] }
 0x3dc   : > { %v8442_v52 = vld [vmem:[#allocation131_spill] sm:$0xff] }
 0x3dd   : > { %5231 = vst.msk [vmem:[%s7807_s15 + $0x98] sm:$0xff] %vm5211_vm1, %v5198_v26  ;;  %v4705_v1 = vadd.f32 %v4655_v32, %v4023_v63  ;;  %v3983_v3 = vpop.f32.mrf.mxu3 }
 0x3de   : > { %v4665_v61 = vpop.f32.mrf.mxu0 }
 0x3df   : > { %v5131_v42 = vadd.f32 %v5081_v2, %v4705_v1  ;;  %v8434_v2 = vld [vmem:[#allocation65_spill] sm:$0xff]  ;;  %v5088_v9 = vpop.f32.mrf.mxu1  ;;  %v8445_v1 = vld [vmem:[#allocation110_spill] sm:$0xff] }
 0x3e0   : > { %v3660_v25 = vpop.f32.mrf.mxu2  ;;  %v2289_v13 = vadd.f32 %v8434_v2, %v1863_v24  ;;  %v8448_v24 = vld [vmem:[#allocation76_spill] sm:$0xff] }
 0x3e1   : > { %v5167_v58 = vadd.f32 %v7794_v23, %v5131_v42  ;;  %v3709_v37 = vadd.f32 %v3660_v25, %v3283_v35  ;;  %v8446_v25 = vld [vmem:[#allocation70_spill] sm:$0xff] }
 0x3e2   : > { %v2603_v46 = vadd.f32 %v8438_v30, %v2289_v13  ;;  %v8453_v30 = vld [vmem:[#allocation82_spill] sm:$0xff] }
 0x3e3   : > { %v5199_v20 = vmax.f32 %v5167_v58, 0.0  ;;  %v4024_v55 = vadd.f32 %v3975_v27, %v3709_v37  ;;  %v8437_v27 = vld [vmem:[#allocation130_spill] sm:$0xff]  ;;  %v8447_v58 = vld [vmem:[#allocation132_spill] sm:$0xff] }
 0x3e4   : > { %v1866_v43 = vadd.f32 %v8437_v27, %v8436_v40  ;;  %v3285_v11 = vadd.f32 %v8440_v29, %v2603_v46  ;;  %v1871_v37 = vadd.f32 %v8447_v58, %v8446_v25  ;;  %v8452_v40 = vld [vmem:[#allocation81_spill] sm:$0xff]  ;;  %v8461_v25 = vld [vmem:[#allocation90_spill] sm:$0xff] }
 0x3e5   : > { %5232 = vst.msk [vmem:[%s7807_s15 + $0xa0] sm:$0xff] %vm5211_vm1, %v5199_v20  ;;  %v4706_v32 = vadd.f32 %v4657_v38, %v4024_v55  ;;  %v3985_v22 = vpop.f32.mrf.mxu3 }
 0x3e6   : > { %v2290_v49 = vadd.f32 %v8439_v17, %v1866_v43  ;;  %v4667_v35 = vpop.f32.mrf.mxu0 }
 0x3e7   : > { %v5132_v57 = vadd.f32 %v5083_v33, %v4706_v32  ;;  %v5091_v16 = vpop.f32.mrf.mxu1 }
 0x3e8   : > { %v3663_v53 = vpop.f32.mrf.mxu2  ;;  %v2604_v26 = vadd.f32 %v8443_v56, %v2290_v49  ;;  %v8458_v56 = vld [vmem:[#allocation117_spill] sm:$0xff] }
 0x3e9   : > { %v5168_v41 = vadd.f32 %v7794_v23, %v5132_v57  ;;  %v3710_v48 = vadd.f32 %v3663_v53, %v3284_v6 }
 0x3eb   : > { %v5200_v19 = vmax.f32 %v5168_v41, 0.0  ;;  %v4025_v51 = vadd.f32 %v3978_v59, %v3710_v48  ;;  %v1868_v59 = vadd.f32 %v8442_v52, %v8441_v0 }
 0x3ed   : > { %5233 = vst.msk [vmem:[%s7807_s15 + $0xa8] sm:$0xff] %vm5211_vm1, %v5200_v19  ;;  %v4707_v38 = vadd.f32 %v4660_v54, %v4025_v51  ;;  %v2291_v14 = vadd.f32 %v8444_v62, %v1868_v59  ;;  %v3988_v6 = vpop.f32.mrf.mxu3  ;;  %v8457_v59 = vld [vmem:[#allocation86_spill] sm:$0xff] }
 0x3ee   : > { %v4670_v43 = vpop.f32.mrf.mxu0 }
 0x3ef   : > { %v5133_v33 = vadd.f32 %v5086_v28, %v4707_v38  ;;  %v3286_v28 = vadd.f32 %v8445_v1, %v2604_v26  ;;  %v2605_v20 = vadd.f32 %v8448_v24, %v2291_v14  ;;  %v5093_v55 = vpop.f32.mrf.mxu1 }
 0x3f0   : > { %v3665_v15 = vpop.f32.mrf.mxu2 }
 0x3f1   : > { %v5169_v47 = vadd.f32 %v7794_v23, %v5133_v33  ;;  %v3711_v50 = vadd.f32 %v3665_v15, %v3285_v11 }
 0x3f3   : > { %v5201_v21 = vmax.f32 %v5169_v47, 0.0  ;;  %v4026_v4 = vadd.f32 %v3980_v34, %v3711_v50  ;;  %v2292_v34 = vadd.f32 %v8449_v12, %v1871_v37  ;;  %v8456_v47 = vld [vmem:[#allocation85_spill] sm:$0xff]  ;;  %v8463_v12 = vld [vmem:[#allocation84_spill] sm:$0xff] }
 0x3f5   : > { %5234 = vst.msk [vmem:[%s7807_s15 + $0xb0] sm:$0xff] %vm5211_vm1, %v5201_v21  ;;  %v4708_v63 = vadd.f32 %v4662_v8, %v4026_v4  ;;  %v8450_v8 = vld [vmem:[#allocation112_spill] sm:$0xff]  ;;  %v2606_v27 = vadd.f32 %v8452_v40, %v2292_v34  ;;  %v1881_v34 = vadd.f32 %v7761_v7, %v8463_v12 }
 0x3f6   : > { %v3287_v2 = vadd.f32 %v8450_v8, %v2605_v20  ;;  %v4672_v52 = vpop.f32.mrf.mxu0  ;;  %v6053_v40 = vld [vmem:[%s8198_s4] ss:$0 sm:$0xff] }
 0x3f7   : > { %v5134_v54 = vadd.f32 %v5088_v9, %v4708_v63  ;;  %v8451_v9 = vld [vmem:[#allocation73_spill] sm:$0xff]  ;;  %v5096_v51 = vpop.f32.mrf.mxu1 }
 0x3f8   : > { %v3668_v18 = vpop.f32.mrf.mxu2  ;;  %v1873_v53 = vadd.f32 %v7746_v10, %v8451_v9  ;;  %v8455_v10 = vld [vmem:[#allocation77_spill] sm:$0xff] }
 0x3f9   : > { %v5170_v42 = vadd.f32 %v7794_v23, %v5134_v54  ;;  %v3712_v31 = vadd.f32 %v3668_v18, %v3286_v28  ;;  %v1876_v11 = vadd.f32 %v7752_v44, %v8455_v10  ;;  %v8459_v54 = vld [vmem:[#allocation80_spill] sm:$0xff]  ;;  %v8460_v18 = vld [vmem:[#allocation89_spill] sm:$0xff] }
 0x3fa   : > { %v2293_v46 = vadd.f32 %v8453_v30, %v1873_v53  ;;  %v1878_v1 = vadd.f32 %v7758_v36, %v8459_v54  ;;  %v8466_v53 = vld [vmem:[#allocation121_spill] sm:$0xff] }
 0x3fb   : > { %v5202_v39 = vmax.f32 %v5170_v42, 0.0  ;;  %v4027_v60 = vadd.f32 %v3983_v3, %v3712_v31  ;;  %v8454_v3 = vld [vmem:[#allocation115_spill] sm:$0xff]  ;;  %v2294_v21 = vadd.f32 %v8457_v59, %v1876_v11 }
 0x3fc   : > { %v3288_v17 = vadd.f32 %v8454_v3, %v2606_v27  ;;  %v2607_v50 = vadd.f32 %v8456_v47, %v2293_v46  ;;  %v2295_v58 = vadd.f32 %v8461_v25, %v1878_v1  ;;  %v8469_v3 = vld [vmem:[#allocation95_spill] sm:$0xff] }
 0x3fd   : > { %5235 = vst.msk [vmem:[%s7807_s15 + $0xb8] sm:$0xff] %vm5211_vm1, %v5202_v39  ;;  %v4709_v5 = vadd.f32 %v4665_v61, %v4027_v60  ;;  %v2608_v42 = vadd.f32 %v8460_v18, %v2294_v21  ;;  %v8462_v39 = vld [vmem:[#allocation119_spill] sm:$0xff] }
 0x3fe   : > { %v3289_v26 = vadd.f32 %v8458_v56, %v2607_v50  ;;  %v4675_v24 = vpop.f32.mrf.mxu0 }
 0x3ff   : > { %v5135_v32 = vadd.f32 %v5091_v16, %v4709_v5  ;;  %v3990_v16 = vpop.f32.mrf.mxu3  ;;  %v5098_v63 = vpop.f32.mrf.mxu1  ;;  %v3290_v60 = vadd.f32 %v8462_v39, %v2608_v42 }
 0x400   : > { %v3670_v13 = vpop.f32.mrf.mxu2 }
 0x401   : > { %v5171_v57 = vadd.f32 %v7794_v23, %v5135_v32  ;;  %v3713_v45 = vadd.f32 %v3670_v13, %v3287_v2  ;;  %v8464_v2 = vld [vmem:[#allocation92_spill] sm:$0xff] }
 0x402   : > { %v2609_v13 = vadd.f32 %v8464_v2, %v2295_v58 }
 0x403   : > { %v5203_v41 = vmax.f32 %v5171_v57, 0.0  ;;  %v4028_v48 = vadd.f32 %v3985_v22, %v3713_v45  ;;  %v8465_v45 = vld [vmem:[#allocation93_spill] sm:$0xff] }
 0x405   : > { %5236 = vst.msk [vmem:[%s7807_s15 + $0xc0] sm:$0xff] %vm5211_vm1, %v5203_v41  ;;  %v4710_v19 = vadd.f32 %v4667_v35, %v4028_v48  ;;  %v3291_v41 = vadd.f32 %v8466_v53, %v2609_v13 }
 0x407   : > { %v5136_v38 = vadd.f32 %v5093_v55, %v4710_v19  ;;  %v3993_v35 = vpop.f32.mrf.mxu3  ;;  %v5101_v36 = vpop.f32.mrf.mxu1  ;;  %v8467_v19 = vld [vmem:[#allocation87_spill] sm:$0xff] }
 0x408   : > { %v3673_v49 = vpop.f32.mrf.mxu2 }
 0x409   : > { %v5172_v33 = vadd.f32 %v7794_v23, %v5136_v38  ;;  %v3714_v29 = vadd.f32 %v3673_v49, %v3288_v17 }
 0x40b   : > { %v5204_v61 = vmax.f32 %v5172_v33, 0.0  ;;  %v4029_v15 = vadd.f32 %v3988_v6, %v3714_v29  ;;  %v2296_v6 = vadd.f32 %v8465_v45, %v1881_v34  ;;  %v8470_v29 = vld [vmem:[#allocation96_spill] sm:$0xff] }
 0x40d   : > { %5237 = vst.msk [vmem:[%s7807_s15 + $0xc8] sm:$0xff] %vm5211_vm1, %v5204_v61  ;;  %v4711_v0 = vadd.f32 %v4670_v43, %v4029_v15  ;;  %v4677_v43 = vpop.f32.mrf.mxu0  ;;  %v2610_v17 = vadd.f32 %v8469_v3, %v2296_v6  ;;  %v8471_v61 = vld [vmem:[#allocation124_spill] sm:$0xff] }
 0x40f   : > { %v5137_v4 = vadd.f32 %v5096_v51, %v4711_v0  ;;  %v3995_v48 = vpop.f32.mrf.mxu3  ;;  %v8468_v51 = vld [vmem:[#allocation133_spill] sm:$0xff]  ;;  %v5103_v49 = vpop.f32.mrf.mxu1  ;;  %v3292_v15 = vadd.f32 %v8471_v61, %v2610_v17 }
 0x410   : > { %v3675_v62 = vpop.f32.mrf.mxu2  ;;  %v1883_v30 = vadd.f32 %v8468_v51, %v8467_v19 }
 0x411   : > { %v5173_v14 = vadd.f32 %v7794_v23, %v5137_v4  ;;  %v3715_v44 = vadd.f32 %v3675_v62, %v3289_v26  ;;  %v8472_v4 = vld [vmem:[#allocation98_spill] sm:$0xff] }
 0x412   : > { %v2297_v10 = vadd.f32 %v8470_v29, %v1883_v30 }
 0x413   : > { %v5205_v28 = vmax.f32 %v5173_v14, 0.0  ;;  %v4030_v22 = vadd.f32 %v3990_v16, %v3715_v44  ;;  %v8473_v14 = vld [vmem:[#allocation126_spill] sm:$0xff] }
 0x414   : > { %v2611_v56 = vadd.f32 %v8472_v4, %v2297_v10 }
 0x415   : > { %5238 = vst.msk [vmem:[%s7807_s15 + $0xd0] sm:$0xff] %vm5211_vm1, %v5205_v28  ;;  %v4712_v31 = vadd.f32 %v4672_v52, %v4030_v22 }
 0x416   : > { %v4680_v52 = vpop.f32.mrf.mxu0  ;;  %v3293_v44 = vadd.f32 %v8473_v14, %v2611_v56 }
 0x417   : > { %v5138_v37 = vadd.f32 %v5098_v63, %v4712_v31  ;;  %v3998_v47 = vpop.f32.mrf.mxu3 }
 0x418   : > { %v3678_v20 = vpop.f32.mrf.mxu2 }
 0x419   : > { %v5174_v55 = vadd.f32 %v7794_v23, %v5138_v37  ;;  %v3716_v5 = vadd.f32 %v3678_v20, %v3290_v60  ;;  %v5106_v26 = vpop.f32.mrf.mxu1 }
 0x41b   : > { %v5206_v32 = vmax.f32 %v5174_v55, 0.0  ;;  %v4031_v8 = vadd.f32 %v3993_v35, %v3716_v5 }
 0x41d   : > { %5239 = vst.msk [vmem:[%s7807_s15 + $0xd8] sm:$0xff] %vm5211_vm1, %v5206_v32  ;;  %v4713_v57 = vadd.f32 %v4675_v24, %v4031_v8 }
 0x41e   : > { %v4682_v31 = vpop.f32.mrf.mxu0 }
 0x41f   : > { %v5139_v9 = vadd.f32 %v5101_v36, %v4713_v57  ;;  %v4000_v22 = vpop.f32.mrf.mxu3 }
 0x420   : > { %v3680_v23 = vpop.f32.mrf.mxu2 }
 0x421   : > { %v5175_v7 = vadd.f32 %v6053_v40, %v5139_v9  ;;  %v3717_v27 = vadd.f32 %v3680_v23, %v3291_v41  ;;  %v5108_v25 = vpop.f32.mrf.mxu1 }
 0x423   : > { %v5207_v46 = vmax.f32 %v5175_v7, 0.0  ;;  %v4032_v38 = vadd.f32 %v3995_v48, %v3717_v27 }
 0x425   : > { %5240 = vst.msk [vmem:[%s7807_s15 + $0xe0] sm:$0xff] %vm5211_vm1, %v5207_v46  ;;  %v4714_v33 = vadd.f32 %v4677_v43, %v4032_v38 }
 0x427   : > { %v5140_v11 = vadd.f32 %v5103_v49, %v4714_v33 }
 0x428   : > { %v3683_v50 = vpop.f32.mrf.mxu2 }
 0x429   : > { %v5176_v16 = vadd.f32 %v6053_v40, %v5140_v11  ;;  %v3718_v0 = vadd.f32 %v3683_v50, %v3292_v15 }
 0x42b   : > { %v5208_v59 = vmax.f32 %v5176_v16, 0.0  ;;  %v4033_v21 = vadd.f32 %v3998_v47, %v3718_v0 }
 0x42d   : > { %5241 = vst.msk [vmem:[%s7807_s15 + $0xe8] sm:$0xff] %vm5211_vm1, %v5208_v59  ;;  %v4715_v63 = vadd.f32 %v4680_v52, %v4033_v21 }
 0x42f   : > { %v5141_v62 = vadd.f32 %v5106_v26, %v4715_v63 }
 0x430   : > { %v3685_v54 = vpop.f32.mrf.mxu2 }
 0x431   : > { %v5177_v1 = vadd.f32 %v6053_v40, %v5141_v62  ;;  %v3719_v28 = vadd.f32 %v3685_v54, %v3293_v44 }
 0x433   : > { %v5209_v18 = vmax.f32 %v5177_v1, 0.0  ;;  %v4034_v42 = vadd.f32 %v4000_v22, %v3719_v28 }
 0x435   : > { %5242 = vst.msk [vmem:[%s7807_s15 + $0xf0] sm:$0xff] %vm5211_vm1, %v5209_v18  ;;  %v4716_v35 = vadd.f32 %v4682_v31, %v4034_v42 }
 0x437   : > { %v5142_v58 = vadd.f32 %v5108_v25, %v4716_v35 }
 0x439   : > { %v5178_v37 = vadd.f32 %v6053_v40, %v5142_v58 }
 0x43b   : > { %v5210_v39 = vmax.f32 %v5178_v37, 0.0 }
 0x43d   : > { %5243 = vst.msk [vmem:[%s7807_s15 + $0xf8] sm:$0xff] %vm5211_vm1, %v5210_v39 }
 0x43e PF: > { %s15_s18 = sadd.s32 1, %s6060_s18  }
 0x43f   : > { %p12_p4 = scmp.ge.s32.totalorder %s15_s18, 4  }
 0x441   :  { %14 = sbr.rel (!%p12_p4) target bundleno = 1 (0x1), region = 80 }

</bundles_post_ra>
